<compile_context>
chip_gen: v7x
topology: tpu7x:2x2x1
jax: 0.10.0
libtpu: 0.0.40
codegen_flags: <defaults>
</compile_context>

<pallas_src>
import math
import jax
import jax.numpy as jnp
from jax.experimental import pallas as pl
from jax.experimental.pallas import tpu as pltpu

# ---- module hyper-parameters (from fcn_reco.py) ----
N_FEAT = 32 * 5          # n = 160
N_CLASSES = 15
NFMP_BLOCK1 = 64
NFMP_BLOCK2 = 128
INPUT_HEIGHT = 16
INPUT_WIDTH = 16
OUTPUT_HEIGHT = INPUT_HEIGHT
OUTPUT_WIDTH = INPUT_WIDTH

# Flattened padded-activation geometry (row = h*Wp + w), with a few zero slack
# rows (>= KW-1, rounded to a multiple of 8) so per-tap slices never run OOB:
#   a1 (conv2 in):  18x18 grid -> 324 rows -> alloc 328
#   a2 (conv3 in):  10x10      -> 100      -> alloc 104
#   a3 (conv4 in):  10x10      -> 100      -> alloc 104
#   a4 (blc1  in):   7x 7      ->  49      -> alloc 56


# ---------------------------- fused kernel ----------------------------

def _encoder_kernel(xc_ref, w1_ref, b1_ref, w2_ref, b2_ref, w3_ref, b3_ref,
                    w4_ref, b4_ref, wb1_ref, bb1_ref, wb2_ref, bb2_ref,
                    wt_ref, bt_ref, o_ref,
                    a1, a2, a3, a4, a5, wa, wb, wc):
    f32 = jnp.float32

    # Padding ring / slack rows of the padded activation buffers must be zero.
    a1[...] = jnp.zeros_like(a1)
    a2[...] = jnp.zeros_like(a2)
    a3[...] = jnp.zeros_like(a3)
    a4[...] = jnp.zeros_like(a4)

    # -------- conv1 (1->64, 3x3 pad 1): dense im2col matmul (K padded to 16) ----
    # xc_ref[0] is (288, 16): row j = h*18 + w of the pad-1 18-wide plane.
    for m0 in range(0, 288, 96):                      # M-chunks bound vreg pressure
        wa[pl.ds(m0, 96), :] = jnp.dot(
            xc_ref[0, pl.ds(m0, 96), :], w1_ref[...],
            preferred_element_type=f32)
    b1 = b1_ref[...]
    for h in range(16):                               # bias+ReLU, pack a1 interior
        a1[pl.ds((1 + h) * 18 + 1, 16), :] = jnp.maximum(
            wa[pl.ds(h * 18, 16), :] + b1, 0.0)

    # -------- conv2 (64->64, 3x3 pad 1): 9 per-tap whole-image matmuls ----------
    for m0 in range(0, 288, 96):
        acc = None
        for kh in range(3):
            for kw in range(3):
                t = jnp.dot(a1[pl.ds(kh * 18 + kw + m0, 96), :],
                            w2_ref[kh * 3 + kw], preferred_element_type=f32)
                acc = t if acc is None else acc + t
        wa[pl.ds(m0, 96), :] = acc                    # raw (bias/ReLU after pool)

    # -------- maxpool 2x2 fused (bias+ReLU after pool is exact) -> a2 interior --
    b2 = b2_ref[...]
    for h2 in range(8):
        r0 = (2 * h2) * 18
        r1 = (2 * h2 + 1) * 18
        p = jnp.maximum(
            jnp.maximum(wa[pl.ds(r0, 8, stride=2), :],
                        wa[pl.ds(r0 + 1, 8, stride=2), :]),
            jnp.maximum(wa[pl.ds(r1, 8, stride=2), :],
                        wa[pl.ds(r1 + 1, 8, stride=2), :]))
        a2[pl.ds((1 + h2) * 10 + 1, 8), :] = jnp.maximum(p + b2, 0.0)

    # -------- conv3 (64->128, 3x3 pad 1) ----------------------------------------
    acc = None
    for kh in range(3):
        for kw in range(3):
            t = jnp.dot(a2[pl.ds(kh * 10 + kw, 80), :],
                        w3_ref[kh * 3 + kw], preferred_element_type=f32)
            acc = t if acc is None else acc + t
    wb[...] = acc
    b3 = b3_ref[...]
    for h in range(8):
        a3[pl.ds((1 + h) * 10 + 1, 8), :] = jnp.maximum(
            wb[pl.ds(h * 10, 8), :] + b3, 0.0)

    # -------- conv4 (128->128, 3x3 pad 1) ---------------------------------------
    acc = None
    for kh in range(3):
        for kw in range(3):
            t = jnp.dot(a3[pl.ds(kh * 10 + kw, 80), :],
                        w4_ref[kh * 3 + kw], preferred_element_type=f32)
            acc = t if acc is None else acc + t
    wb[...] = acc

    # -------- maxpool 2x2 fused -> a4 interior at bl_pad offset (top=2, left=2) -
    b4 = b4_ref[...]
    for h2 in range(4):
        r0 = (2 * h2) * 10
        r1 = (2 * h2 + 1) * 10
        p = jnp.maximum(
            jnp.maximum(wb[pl.ds(r0, 4, stride=2), :],
                        wb[pl.ds(r0 + 1, 4, stride=2), :]),
            jnp.maximum(wb[pl.ds(r1, 4, stride=2), :],
                        wb[pl.ds(r1 + 1, 4, stride=2), :]))
        a4[pl.ds((2 + h2) * 7 + 2, 4), :] = jnp.maximum(p + b4, 0.0)

    # -------- bl_conv1 (128->160, 4x4 valid on the 7x7 padded map) --------------
    acc = None
    for kh in range(4):
        for kw in range(4):
            t = jnp.dot(a4[pl.ds(kh * 7 + kw, 28), :],
                        wb1_ref[kh * 4 + kw], preferred_element_type=f32)
            acc = t if acc is None else acc + t
    wc[...] = acc
    bb1 = bb1_ref[...]
    for h in range(4):                                # keep the 4 valid cols / row
        a5[pl.ds(4 * h, 4), :] = jnp.maximum(wc[pl.ds(7 * h, 4), :] + bb1, 0.0)

    # -------- bl_conv2 (1x1, 160->160) + ReLU -----------------------------------
    hid = jnp.maximum(
        jnp.dot(a5[...], wb2_ref[...], preferred_element_type=f32) + bb2_ref[...],
        0.0)                                          # (16, 160)

    # -------- upsample: ConvTranspose (4,4)/stride 4 == one lane-padded matmul --
    o_ref[0] = (jnp.dot(hid, wt_ref[...], preferred_element_type=f32)
                + bt_ref[...]).astype(o_ref.dtype)


# ---------------------------- forward pass ----------------------------

def encoder_forward(img_nchw, params):
    """img_nchw: (N, 1, 16, 16) float32 — same convention as the PyTorch module."""
    n = img_nchw.shape[0]
    p = params

    # Glue: "wide" im2col (row stride 18) of the single-channel pad-1 input.
    x = img_nchw[:, 0, :, :]                                    # (N, 16, 16)
    xp = jnp.pad(x, ((0, 0), (1, 1), (1, 3)))                   # (N, 18, 20) pad-1 + slack
    xc = jnp.stack(
        [xp[:, kh:kh + 16, kw:kw + 18].reshape(n, 16 * 18)
         for kh in range(3) for kw in range(3)], axis=-1)       # (N, 288, 9)
    xc = jnp.pad(xc, ((0, 0), (0, 0), (0, 7)))                  # K 9 -> 16 (zeros)

    # Glue: weights as per-tap (Cin, Cout) stacks / lane-padded matmuls.
    w1 = jnp.pad(p["w1"].reshape(9, NFMP_BLOCK1), ((0, 7), (0, 0)))     # (16, 64)
    w2 = p["w2"].reshape(9, NFMP_BLOCK1, NFMP_BLOCK1)
    w3 = p["w3"].reshape(9, NFMP_BLOCK1, NFMP_BLOCK2)
    w4 = p["w4"].reshape(9, NFMP_BLOCK2, NFMP_BLOCK2)
    wb1 = p["wb1"].reshape(16, NFMP_BLOCK2, N_FEAT)
    wb2 = p["wb2"].reshape(N_FEAT, N_FEAT)
    # ConvTranspose2d weight (Cin, Cout, KH, KW) -> (Cin, Cout*16), lane-pad 240->256.
    wt = jnp.pad(p["wt"].reshape(N_FEAT, N_CLASSES * 16),
                 ((0, 0), (0, 256 - N_CLASSES * 16)))
    bt = jnp.pad(jnp.repeat(p["bt"], 16),
                 (0, 256 - N_CLASSES * 16)).reshape(1, 256)

    b1 = p["b1"].reshape(1, -1); b2 = p["b2"].reshape(1, -1)
    b3 = p["b3"].reshape(1, -1); b4 = p["b4"].reshape(1, -1)
    bb1 = p["bb1"].reshape(1, -1); bb2 = p["bb2"].reshape(1, -1)

    def rep(shape):
        return pl.BlockSpec(shape, lambda i: (0,) * len(shape))

    z = pl.pallas_call(
        _encoder_kernel,
        out_shape=jax.ShapeDtypeStruct((n, 16, 256), jnp.float32),
        grid=(n,),
        in_specs=[
            pl.BlockSpec((1, 288, 16), lambda i: (i, 0, 0)),            # im2col input
            rep((16, NFMP_BLOCK1)), rep((1, NFMP_BLOCK1)),              # w1, b1
            rep((9, NFMP_BLOCK1, NFMP_BLOCK1)), rep((1, NFMP_BLOCK1)),  # w2, b2
            rep((9, NFMP_BLOCK1, NFMP_BLOCK2)), rep((1, NFMP_BLOCK2)),  # w3, b3
            rep((9, NFMP_BLOCK2, NFMP_BLOCK2)), rep((1, NFMP_BLOCK2)),  # w4, b4
            rep((16, NFMP_BLOCK2, N_FEAT)), rep((1, N_FEAT)),           # wb1, bb1
            rep((N_FEAT, N_FEAT)), rep((1, N_FEAT)),                    # wb2, bb2
            rep((N_FEAT, 256)), rep((1, 256)),                          # wt, bt
        ],
        out_specs=pl.BlockSpec((1, 16, 256), lambda i: (i, 0, 0)),
        scratch_shapes=[
            pltpu.VMEM((328, NFMP_BLOCK1), jnp.float32),   # a1: conv2 padded input
            pltpu.VMEM((104, NFMP_BLOCK1), jnp.float32),   # a2: conv3 padded input
            pltpu.VMEM((104, NFMP_BLOCK2), jnp.float32),   # a3: conv4 padded input
            pltpu.VMEM((56, NFMP_BLOCK2), jnp.float32),    # a4: bl_conv1 padded input
            pltpu.VMEM((16, N_FEAT), jnp.float32),         # a5: bl_conv2 input
            pltpu.VMEM((288, NFMP_BLOCK1), jnp.float32),   # wa: wide conv1/conv2 acc
            pltpu.VMEM((80, NFMP_BLOCK2), jnp.float32),    # wb: wide conv3/conv4 acc
            pltpu.VMEM((28, N_FEAT), jnp.float32),         # wc: wide bl_conv1 acc
        ],
        compiler_params=pltpu.CompilerParams(dimension_semantics=("parallel",)),
    )(xc, w1, b1, w2, b2, w3, b3, w4, b4, wb1, bb1, wb2, bb2, wt, bt)

    # Glue: scatter the stride-4 ConvTranspose taps and flatten in NCHW order so
    # the result matches PyTorch's x.view(-1, W*H*nClasses, 1) element order.
    z = z[:, :, :N_CLASSES * 16].reshape(n, 4, 4, N_CLASSES, 4, 4)
    z = jnp.transpose(z, (0, 3, 1, 4, 2, 5)).reshape(n, N_CLASSES, 16, 16)
    return z.reshape(n, OUTPUT_WIDTH * OUTPUT_HEIGHT * N_CLASSES, 1)


# ---------------------------- params ----------------------------

def _init_conv(key, kh, kw, cin, cout):
    kw_, kb_ = jax.random.split(key)
    bound = 1.0 / math.sqrt(kh * kw * cin)
    w = jax.random.uniform(kw_, (kh, kw, cin, cout), jnp.float32, -bound, bound)
    b = jax.random.uniform(kb_, (cout,), jnp.float32, -bound, bound)
    return w, b


def init_params(key):
    keys = jax.random.split(key, 7)
    p = {}
    p["w1"], p["b1"] = _init_conv(keys[0], 3, 3, 1, NFMP_BLOCK1)
    p["w2"], p["b2"] = _init_conv(keys[1], 3, 3, NFMP_BLOCK1, NFMP_BLOCK1)
    p["w3"], p["b3"] = _init_conv(keys[2], 3, 3, NFMP_BLOCK1, NFMP_BLOCK2)
    p["w4"], p["b4"] = _init_conv(keys[3], 3, 3, NFMP_BLOCK2, NFMP_BLOCK2)
    cur_h, cur_w = INPUT_HEIGHT // 4, INPUT_WIDTH // 4
    p["wb1"], p["bb1"] = _init_conv(keys[4], cur_h, cur_w, NFMP_BLOCK2, N_FEAT)
    p["wb2"], p["bb2"] = _init_conv(keys[5], 1, 1, N_FEAT, N_FEAT)
    # ConvTranspose2d(n, nClasses, (4,4), stride=(4,4)) — weight (Cin, Cout, KH, KW)
    kwt, kbt = jax.random.split(keys[6])
    bound = 1.0 / math.sqrt(N_FEAT * 4 * 4)
    p["wt"] = jax.random.uniform(kwt, (N_FEAT, N_CLASSES, 4, 4), jnp.float32,
                                 -bound, bound)
    p["bt"] = jax.random.uniform(kbt, (N_CLASSES,), jnp.float32, -bound, bound)
    return p


if __name__ == "__main__":
    key = jax.random.PRNGKey(0)
    kp, kx = jax.random.split(key)
    params = init_params(kp)
    img = jax.random.normal(kx, (2, 1, INPUT_HEIGHT, INPUT_WIDTH), jnp.float32)

    out = jax.jit(encoder_forward)(img, params)
    out = jax.block_until_ready(out)
    assert out.shape == (2, OUTPUT_WIDTH * OUTPUT_HEIGHT * N_CLASSES, 1), out.shape
    print("KERNEL_OK")
</pallas_src>

<mosaic_0001>
module attributes {stable_mosaic.version = 11 : i64} {
  func.func @_encoder_kernel(%arg0: i32, %arg1: memref<1x288x16xf32, #tpu.memory_space<vmem>>, %arg2: memref<16x64xf32, #tpu.memory_space<vmem>>, %arg3: memref<1x64xf32, #tpu.memory_space<vmem>>, %arg4: memref<9x64x64xf32, #tpu.memory_space<vmem>>, %arg5: memref<1x64xf32, #tpu.memory_space<vmem>>, %arg6: memref<9x64x128xf32, #tpu.memory_space<vmem>>, %arg7: memref<1x128xf32, #tpu.memory_space<vmem>>, %arg8: memref<9x128x128xf32, #tpu.memory_space<vmem>>, %arg9: memref<1x128xf32, #tpu.memory_space<vmem>>, %arg10: memref<16x128x160xf32, #tpu.memory_space<vmem>>, %arg11: memref<1x160xf32, #tpu.memory_space<vmem>>, %arg12: memref<160x160xf32, #tpu.memory_space<vmem>>, %arg13: memref<1x160xf32, #tpu.memory_space<vmem>>, %arg14: memref<160x256xf32, #tpu.memory_space<vmem>>, %arg15: memref<1x256xf32, #tpu.memory_space<vmem>>, %arg16: memref<1x16x256xf32, #tpu.memory_space<vmem>>, %arg17: memref<328x64xf32, #tpu.memory_space<vmem>>, %arg18: memref<104x64xf32, #tpu.memory_space<vmem>>, %arg19: memref<104x128xf32, #tpu.memory_space<vmem>>, %arg20: memref<56x128xf32, #tpu.memory_space<vmem>>, %arg21: memref<16x160xf32, #tpu.memory_space<vmem>>, %arg22: memref<288x64xf32, #tpu.memory_space<vmem>>, %arg23: memref<80x128xf32, #tpu.memory_space<vmem>>, %arg24: memref<28x160xf32, #tpu.memory_space<vmem>>) attributes {dimension_semantics = [#tpu.dimension_semantics<parallel>], iteration_bounds = array<i64: 2>, scalar_prefetch = 0 : i64, scratch_operands = 8 : i64, tpu.core_type = #tpu.core_type<tc>, window_params = [{transform_indices = @transform_0, window_bounds = array<i64: 1, 288, 16>}, {pipeline_mode = #tpu.pipeline_mode<synchronous>, transform_indices = @transform_1, window_bounds = array<i64: 16, 64>}, {pipeline_mode = #tpu.pipeline_mode<synchronous>, transform_indices = @transform_2, window_bounds = array<i64: 1, 64>}, {pipeline_mode = #tpu.pipeline_mode<synchronous>, transform_indices = @transform_3, window_bounds = array<i64: 9, 64, 64>}, {pipeline_mode = #tpu.pipeline_mode<synchronous>, transform_indices = @transform_4, window_bounds = array<i64: 1, 64>}, {pipeline_mode = #tpu.pipeline_mode<synchronous>, transform_indices = @transform_5, window_bounds = array<i64: 9, 64, 128>}, {pipeline_mode = #tpu.pipeline_mode<synchronous>, transform_indices = @transform_6, window_bounds = array<i64: 1, 128>}, {pipeline_mode = #tpu.pipeline_mode<synchronous>, transform_indices = @transform_7, window_bounds = array<i64: 9, 128, 128>}, {pipeline_mode = #tpu.pipeline_mode<synchronous>, transform_indices = @transform_8, window_bounds = array<i64: 1, 128>}, {pipeline_mode = #tpu.pipeline_mode<synchronous>, transform_indices = @transform_9, window_bounds = array<i64: 16, 128, 160>}, {pipeline_mode = #tpu.pipeline_mode<synchronous>, transform_indices = @transform_10, window_bounds = array<i64: 1, 160>}, {pipeline_mode = #tpu.pipeline_mode<synchronous>, transform_indices = @transform_11, window_bounds = array<i64: 160, 160>}, {pipeline_mode = #tpu.pipeline_mode<synchronous>, transform_indices = @transform_12, window_bounds = array<i64: 1, 160>}, {pipeline_mode = #tpu.pipeline_mode<synchronous>, transform_indices = @transform_13, window_bounds = array<i64: 160, 256>}, {pipeline_mode = #tpu.pipeline_mode<synchronous>, transform_indices = @transform_14, window_bounds = array<i64: 1, 256>}, {transform_indices = @transform_15, window_bounds = array<i64: 1, 16, 256>}]} {
    %cst = arith.constant 0.000000e+00 : f32
    %0 = vector.broadcast %cst : f32 to vector<328x64xf32>
    %c0 = arith.constant 0 : index
    %c0_0 = arith.constant 0 : index
    %1 = vector.load %arg17[%c0, %c0_0] : memref<328x64xf32, #tpu.memory_space<vmem>>, vector<328x64xf32>
    tpu.vector_store %arg17[%c0, %c0_0], %0 {strides = array<i32>} : memref<328x64xf32, #tpu.memory_space<vmem>>, vector<328x64xf32>,
    %cst_1 = arith.constant 0.000000e+00 : f32
    %2 = vector.broadcast %cst_1 : f32 to vector<104x64xf32>
    %c0_2 = arith.constant 0 : index
    %c0_3 = arith.constant 0 : index
    %3 = vector.load %arg18[%c0_2, %c0_3] : memref<104x64xf32, #tpu.memory_space<vmem>>, vector<104x64xf32>
    tpu.vector_store %arg18[%c0_2, %c0_3], %2 {strides = array<i32>} : memref<104x64xf32, #tpu.memory_space<vmem>>, vector<104x64xf32>,
    %cst_4 = arith.constant 0.000000e+00 : f32
    %4 = vector.broadcast %cst_4 : f32 to vector<104x128xf32>
    %c0_5 = arith.constant 0 : index
    %c0_6 = arith.constant 0 : index
    %5 = vector.load %arg19[%c0_5, %c0_6] : memref<104x128xf32, #tpu.memory_space<vmem>>, vector<104x128xf32>
    tpu.vector_store %arg19[%c0_5, %c0_6], %4 {strides = array<i32>} : memref<104x128xf32, #tpu.memory_space<vmem>>, vector<104x128xf32>,
    %cst_7 = arith.constant 0.000000e+00 : f32
    %6 = vector.broadcast %cst_7 : f32 to vector<56x128xf32>
    %c0_8 = arith.constant 0 : index
    %c0_9 = arith.constant 0 : index
    %7 = vector.load %arg20[%c0_8, %c0_9] : memref<56x128xf32, #tpu.memory_space<vmem>>, vector<56x128xf32>
    tpu.vector_store %arg20[%c0_8, %c0_9], %6 {strides = array<i32>} : memref<56x128xf32, #tpu.memory_space<vmem>>, vector<56x128xf32>,
    %c0_10 = arith.constant 0 : index
    %c0_11 = arith.constant 0 : index
    %c0_12 = arith.constant 0 : index
    %8 = vector.load %arg1[%c0_10, %c0_11, %c0_12] : memref<1x288x16xf32, #tpu.memory_space<vmem>>, vector<1x96x16xf32>
    %9 = vector.shape_cast %8 : vector<1x96x16xf32> to vector<96x16xf32>
    %c0_13 = arith.constant 0 : index
    %c0_14 = arith.constant 0 : index
    %10 = vector.load %arg2[%c0_13, %c0_14] : memref<16x64xf32, #tpu.memory_space<vmem>>, vector<16x64xf32>
    %cst_15 = arith.constant dense<0.000000e+00> : vector<96x64xf32>
    %11 = tpu.matmul %9, %10, %cst_15 {dimension_numbers = #tpu.dot_dimension_numbers<[1], [0], [0], [1], [0, 0, 1, 1], [], []>} : vector<96x16xf32>, vector<16x64xf32>, vector<96x64xf32> -> vector<96x64xf32>
    %c0_16 = arith.constant 0 : index
    %c0_17 = arith.constant 0 : index
    %12 = vector.load %arg22[%c0_16, %c0_17] : memref<288x64xf32, #tpu.memory_space<vmem>>, vector<96x64xf32>
    tpu.vector_store %arg22[%c0_16, %c0_17], %11 {strides = array<i32>} : memref<288x64xf32, #tpu.memory_space<vmem>>, vector<96x64xf32>,
    %c0_18 = arith.constant 0 : index
    %c96 = arith.constant 96 : index
    %c0_19 = arith.constant 0 : index
    %13 = vector.load %arg1[%c0_18, %c96, %c0_19] : memref<1x288x16xf32, #tpu.memory_space<vmem>>, vector<1x96x16xf32>
    %14 = vector.shape_cast %13 : vector<1x96x16xf32> to vector<96x16xf32>
    %c0_20 = arith.constant 0 : index
    %c0_21 = arith.constant 0 : index
    %15 = vector.load %arg2[%c0_20, %c0_21] : memref<16x64xf32, #tpu.memory_space<vmem>>, vector<16x64xf32>
    %cst_22 = arith.constant dense<0.000000e+00> : vector<96x64xf32>
    %16 = tpu.matmul %14, %15, %cst_22 {dimension_numbers = #tpu.dot_dimension_numbers<[1], [0], [0], [1], [0, 0, 1, 1], [], []>} : vector<96x16xf32>, vector<16x64xf32>, vector<96x64xf32> -> vector<96x64xf32>
    %c96_23 = arith.constant 96 : index
    %c0_24 = arith.constant 0 : index
    %17 = vector.load %arg22[%c96_23, %c0_24] : memref<288x64xf32, #tpu.memory_space<vmem>>, vector<96x64xf32>
    tpu.vector_store %arg22[%c96_23, %c0_24], %16 {strides = array<i32>} : memref<288x64xf32, #tpu.memory_space<vmem>>, vector<96x64xf32>,
    %c0_25 = arith.constant 0 : index
    %c192 = arith.constant 192 : index
    %c0_26 = arith.constant 0 : index
    %18 = vector.load %arg1[%c0_25, %c192, %c0_26] : memref<1x288x16xf32, #tpu.memory_space<vmem>>, vector<1x96x16xf32>
    %19 = vector.shape_cast %18 : vector<1x96x16xf32> to vector<96x16xf32>
    %c0_27 = arith.constant 0 : index
    %c0_28 = arith.constant 0 : index
    %20 = vector.load %arg2[%c0_27, %c0_28] : memref<16x64xf32, #tpu.memory_space<vmem>>, vector<16x64xf32>
    %cst_29 = arith.constant dense<0.000000e+00> : vector<96x64xf32>
    %21 = tpu.matmul %19, %20, %cst_29 {dimension_numbers = #tpu.dot_dimension_numbers<[1], [0], [0], [1], [0, 0, 1, 1], [], []>} : vector<96x16xf32>, vector<16x64xf32>, vector<96x64xf32> -> vector<96x64xf32>
    %c192_30 = arith.constant 192 : index
    %c0_31 = arith.constant 0 : index
    %22 = vector.load %arg22[%c192_30, %c0_31] : memref<288x64xf32, #tpu.memory_space<vmem>>, vector<96x64xf32>
    tpu.vector_store %arg22[%c192_30, %c0_31], %21 {strides = array<i32>} : memref<288x64xf32, #tpu.memory_space<vmem>>, vector<96x64xf32>,
    %c0_32 = arith.constant 0 : index
    %c0_33 = arith.constant 0 : index
    %23 = vector.load %arg3[%c0_32, %c0_33] : memref<1x64xf32, #tpu.memory_space<vmem>>, vector<1x64xf32>
    %c0_34 = arith.constant 0 : index
    %c0_35 = arith.constant 0 : index
    %24 = vector.load %arg22[%c0_34, %c0_35] : memref<288x64xf32, #tpu.memory_space<vmem>>, vector<16x64xf32>
    %25 = vector.broadcast %23 : vector<1x64xf32> to vector<16x64xf32>
    %26 = arith.addf %24, %25 : vector<16x64xf32>
    %cst_36 = arith.constant 0.000000e+00 : f32
    %27 = vector.broadcast %cst_36 : f32 to vector<16x64xf32>
    %28 = arith.maximumf %26, %27 : vector<16x64xf32>
    %c19 = arith.constant 19 : index
    %c0_37 = arith.constant 0 : index
    %29 = vector.load %arg17[%c19, %c0_37] : memref<328x64xf32, #tpu.memory_space<vmem>>, vector<16x64xf32>
    tpu.vector_store %arg17[%c19, %c0_37], %28 {strides = array<i32>} : memref<328x64xf32, #tpu.memory_space<vmem>>, vector<16x64xf32>,
    %c18 = arith.constant 18 : index
    %c0_38 = arith.constant 0 : index
    %30 = vector.load %arg22[%c18, %c0_38] : memref<288x64xf32, #tpu.memory_space<vmem>>, vector<16x64xf32>
    %31 = vector.broadcast %23 : vector<1x64xf32> to vector<16x64xf32>
    %32 = arith.addf %30, %31 : vector<16x64xf32>
    %cst_39 = arith.constant 0.000000e+00 : f32
    %33 = vector.broadcast %cst_39 : f32 to vector<16x64xf32>
    %34 = arith.maximumf %32, %33 : vector<16x64xf32>
    %c37 = arith.constant 37 : index
    %c0_40 = arith.constant 0 : index
    %35 = vector.load %arg17[%c37, %c0_40] : memref<328x64xf32, #tpu.memory_space<vmem>>, vector<16x64xf32>
    tpu.vector_store %arg17[%c37, %c0_40], %34 {strides = array<i32>} : memref<328x64xf32, #tpu.memory_space<vmem>>, vector<16x64xf32>,
    %c36 = arith.constant 36 : index
    %c0_41 = arith.constant 0 : index
    %36 = vector.load %arg22[%c36, %c0_41] : memref<288x64xf32, #tpu.memory_space<vmem>>, vector<16x64xf32>
    %37 = vector.broadcast %23 : vector<1x64xf32> to vector<16x64xf32>
    %38 = arith.addf %36, %37 : vector<16x64xf32>
    %cst_42 = arith.constant 0.000000e+00 : f32
    %39 = vector.broadcast %cst_42 : f32 to vector<16x64xf32>
    %40 = arith.maximumf %38, %39 : vector<16x64xf32>
    %c55 = arith.constant 55 : index
    %c0_43 = arith.constant 0 : index
    %41 = vector.load %arg17[%c55, %c0_43] : memref<328x64xf32, #tpu.memory_space<vmem>>, vector<16x64xf32>
    tpu.vector_store %arg17[%c55, %c0_43], %40 {strides = array<i32>} : memref<328x64xf32, #tpu.memory_space<vmem>>, vector<16x64xf32>,
    %c54 = arith.constant 54 : index
    %c0_44 = arith.constant 0 : index
    %42 = vector.load %arg22[%c54, %c0_44] : memref<288x64xf32, #tpu.memory_space<vmem>>, vector<16x64xf32>
    %43 = vector.broadcast %23 : vector<1x64xf32> to vector<16x64xf32>
    %44 = arith.addf %42, %43 : vector<16x64xf32>
    %cst_45 = arith.constant 0.000000e+00 : f32
    %45 = vector.broadcast %cst_45 : f32 to vector<16x64xf32>
    %46 = arith.maximumf %44, %45 : vector<16x64xf32>
    %c73 = arith.constant 73 : index
    %c0_46 = arith.constant 0 : index
    %47 = vector.load %arg17[%c73, %c0_46] : memref<328x64xf32, #tpu.memory_space<vmem>>, vector<16x64xf32>
    tpu.vector_store %arg17[%c73, %c0_46], %46 {strides = array<i32>} : memref<328x64xf32, #tpu.memory_space<vmem>>, vector<16x64xf32>,
    %c72 = arith.constant 72 : index
    %c0_47 = arith.constant 0 : index
    %48 = vector.load %arg22[%c72, %c0_47] : memref<288x64xf32, #tpu.memory_space<vmem>>, vector<16x64xf32>
    %49 = vector.broadcast %23 : vector<1x64xf32> to vector<16x64xf32>
    %50 = arith.addf %48, %49 : vector<16x64xf32>
    %cst_48 = arith.constant 0.000000e+00 : f32
    %51 = vector.broadcast %cst_48 : f32 to vector<16x64xf32>
    %52 = arith.maximumf %50, %51 : vector<16x64xf32>
    %c91 = arith.constant 91 : index
    %c0_49 = arith.constant 0 : index
    %53 = vector.load %arg17[%c91, %c0_49] : memref<328x64xf32, #tpu.memory_space<vmem>>, vector<16x64xf32>
    tpu.vector_store %arg17[%c91, %c0_49], %52 {strides = array<i32>} : memref<328x64xf32, #tpu.memory_space<vmem>>, vector<16x64xf32>,
    %c90 = arith.constant 90 : index
    %c0_50 = arith.constant 0 : index
    %54 = vector.load %arg22[%c90, %c0_50] : memref<288x64xf32, #tpu.memory_space<vmem>>, vector<16x64xf32>
    %55 = vector.broadcast %23 : vector<1x64xf32> to vector<16x64xf32>
    %56 = arith.addf %54, %55 : vector<16x64xf32>
    %cst_51 = arith.constant 0.000000e+00 : f32
    %57 = vector.broadcast %cst_51 : f32 to vector<16x64xf32>
    %58 = arith.maximumf %56, %57 : vector<16x64xf32>
    %c109 = arith.constant 109 : index
    %c0_52 = arith.constant 0 : index
    %59 = vector.load %arg17[%c109, %c0_52] : memref<328x64xf32, #tpu.memory_space<vmem>>, vector<16x64xf32>
    tpu.vector_store %arg17[%c109, %c0_52], %58 {strides = array<i32>} : memref<328x64xf32, #tpu.memory_space<vmem>>, vector<16x64xf32>,
    %c108 = arith.constant 108 : index
    %c0_53 = arith.constant 0 : index
    %60 = vector.load %arg22[%c108, %c0_53] : memref<288x64xf32, #tpu.memory_space<vmem>>, vector<16x64xf32>
    %61 = vector.broadcast %23 : vector<1x64xf32> to vector<16x64xf32>
    %62 = arith.addf %60, %61 : vector<16x64xf32>
    %cst_54 = arith.constant 0.000000e+00 : f32
    %63 = vector.broadcast %cst_54 : f32 to vector<16x64xf32>
    %64 = arith.maximumf %62, %63 : vector<16x64xf32>
    %c127 = arith.constant 127 : index
    %c0_55 = arith.constant 0 : index
    %65 = vector.load %arg17[%c127, %c0_55] : memref<328x64xf32, #tpu.memory_space<vmem>>, vector<16x64xf32>
    tpu.vector_store %arg17[%c127, %c0_55], %64 {strides = array<i32>} : memref<328x64xf32, #tpu.memory_space<vmem>>, vector<16x64xf32>,
    %c126 = arith.constant 126 : index
    %c0_56 = arith.constant 0 : index
    %66 = vector.load %arg22[%c126, %c0_56] : memref<288x64xf32, #tpu.memory_space<vmem>>, vector<16x64xf32>
    %67 = vector.broadcast %23 : vector<1x64xf32> to vector<16x64xf32>
    %68 = arith.addf %66, %67 : vector<16x64xf32>
    %cst_57 = arith.constant 0.000000e+00 : f32
    %69 = vector.broadcast %cst_57 : f32 to vector<16x64xf32>
    %70 = arith.maximumf %68, %69 : vector<16x64xf32>
    %c145 = arith.constant 145 : index
    %c0_58 = arith.constant 0 : index
    %71 = vector.load %arg17[%c145, %c0_58] : memref<328x64xf32, #tpu.memory_space<vmem>>, vector<16x64xf32>
    tpu.vector_store %arg17[%c145, %c0_58], %70 {strides = array<i32>} : memref<328x64xf32, #tpu.memory_space<vmem>>, vector<16x64xf32>,
    %c144 = arith.constant 144 : index
    %c0_59 = arith.constant 0 : index
    %72 = vector.load %arg22[%c144, %c0_59] : memref<288x64xf32, #tpu.memory_space<vmem>>, vector<16x64xf32>
    %73 = vector.broadcast %23 : vector<1x64xf32> to vector<16x64xf32>
    %74 = arith.addf %72, %73 : vector<16x64xf32>
    %cst_60 = arith.constant 0.000000e+00 : f32
    %75 = vector.broadcast %cst_60 : f32 to vector<16x64xf32>
    %76 = arith.maximumf %74, %75 : vector<16x64xf32>
    %c163 = arith.constant 163 : index
    %c0_61 = arith.constant 0 : index
    %77 = vector.load %arg17[%c163, %c0_61] : memref<328x64xf32, #tpu.memory_space<vmem>>, vector<16x64xf32>
    tpu.vector_store %arg17[%c163, %c0_61], %76 {strides = array<i32>} : memref<328x64xf32, #tpu.memory_space<vmem>>, vector<16x64xf32>,
    %c162 = arith.constant 162 : index
    %c0_62 = arith.constant 0 : index
    %78 = vector.load %arg22[%c162, %c0_62] : memref<288x64xf32, #tpu.memory_space<vmem>>, vector<16x64xf32>
    %79 = vector.broadcast %23 : vector<1x64xf32> to vector<16x64xf32>
    %80 = arith.addf %78, %79 : vector<16x64xf32>
    %cst_63 = arith.constant 0.000000e+00 : f32
    %81 = vector.broadcast %cst_63 : f32 to vector<16x64xf32>
    %82 = arith.maximumf %80, %81 : vector<16x64xf32>
    %c181 = arith.constant 181 : index
    %c0_64 = arith.constant 0 : index
    %83 = vector.load %arg17[%c181, %c0_64] : memref<328x64xf32, #tpu.memory_space<vmem>>, vector<16x64xf32>
    tpu.vector_store %arg17[%c181, %c0_64], %82 {strides = array<i32>} : memref<328x64xf32, #tpu.memory_space<vmem>>, vector<16x64xf32>,
    %c180 = arith.constant 180 : index
    %c0_65 = arith.constant 0 : index
    %84 = vector.load %arg22[%c180, %c0_65] : memref<288x64xf32, #tpu.memory_space<vmem>>, vector<16x64xf32>
    %85 = vector.broadcast %23 : vector<1x64xf32> to vector<16x64xf32>
    %86 = arith.addf %84, %85 : vector<16x64xf32>
    %cst_66 = arith.constant 0.000000e+00 : f32
    %87 = vector.broadcast %cst_66 : f32 to vector<16x64xf32>
    %88 = arith.maximumf %86, %87 : vector<16x64xf32>
    %c199 = arith.constant 199 : index
    %c0_67 = arith.constant 0 : index
    %89 = vector.load %arg17[%c199, %c0_67] : memref<328x64xf32, #tpu.memory_space<vmem>>, vector<16x64xf32>
    tpu.vector_store %arg17[%c199, %c0_67], %88 {strides = array<i32>} : memref<328x64xf32, #tpu.memory_space<vmem>>, vector<16x64xf32>,
    %c198 = arith.constant 198 : index
    %c0_68 = arith.constant 0 : index
    %90 = vector.load %arg22[%c198, %c0_68] : memref<288x64xf32, #tpu.memory_space<vmem>>, vector<16x64xf32>
    %91 = vector.broadcast %23 : vector<1x64xf32> to vector<16x64xf32>
    %92 = arith.addf %90, %91 : vector<16x64xf32>
    %cst_69 = arith.constant 0.000000e+00 : f32
    %93 = vector.broadcast %cst_69 : f32 to vector<16x64xf32>
    %94 = arith.maximumf %92, %93 : vector<16x64xf32>
    %c217 = arith.constant 217 : index
    %c0_70 = arith.constant 0 : index
    %95 = vector.load %arg17[%c217, %c0_70] : memref<328x64xf32, #tpu.memory_space<vmem>>, vector<16x64xf32>
    tpu.vector_store %arg17[%c217, %c0_70], %94 {strides = array<i32>} : memref<328x64xf32, #tpu.memory_space<vmem>>, vector<16x64xf32>,
    %c216 = arith.constant 216 : index
    %c0_71 = arith.constant 0 : index
    %96 = vector.load %arg22[%c216, %c0_71] : memref<288x64xf32, #tpu.memory_space<vmem>>, vector<16x64xf32>
    %97 = vector.broadcast %23 : vector<1x64xf32> to vector<16x64xf32>
    %98 = arith.addf %96, %97 : vector<16x64xf32>
    %cst_72 = arith.constant 0.000000e+00 : f32
    %99 = vector.broadcast %cst_72 : f32 to vector<16x64xf32>
    %100 = arith.maximumf %98, %99 : vector<16x64xf32>
    %c235 = arith.constant 235 : index
    %c0_73 = arith.constant 0 : index
    %101 = vector.load %arg17[%c235, %c0_73] : memref<328x64xf32, #tpu.memory_space<vmem>>, vector<16x64xf32>
    tpu.vector_store %arg17[%c235, %c0_73], %100 {strides = array<i32>} : memref<328x64xf32, #tpu.memory_space<vmem>>, vector<16x64xf32>,
    %c234 = arith.constant 234 : index
    %c0_74 = arith.constant 0 : index
    %102 = vector.load %arg22[%c234, %c0_74] : memref<288x64xf32, #tpu.memory_space<vmem>>, vector<16x64xf32>
    %103 = vector.broadcast %23 : vector<1x64xf32> to vector<16x64xf32>
    %104 = arith.addf %102, %103 : vector<16x64xf32>
    %cst_75 = arith.constant 0.000000e+00 : f32
    %105 = vector.broadcast %cst_75 : f32 to vector<16x64xf32>
    %106 = arith.maximumf %104, %105 : vector<16x64xf32>
    %c253 = arith.constant 253 : index
    %c0_76 = arith.constant 0 : index
    %107 = vector.load %arg17[%c253, %c0_76] : memref<328x64xf32, #tpu.memory_space<vmem>>, vector<16x64xf32>
    tpu.vector_store %arg17[%c253, %c0_76], %106 {strides = array<i32>} : memref<328x64xf32, #tpu.memory_space<vmem>>, vector<16x64xf32>,
    %c252 = arith.constant 252 : index
    %c0_77 = arith.constant 0 : index
    %108 = vector.load %arg22[%c252, %c0_77] : memref<288x64xf32, #tpu.memory_space<vmem>>, vector<16x64xf32>
    %109 = vector.broadcast %23 : vector<1x64xf32> to vector<16x64xf32>
    %110 = arith.addf %108, %109 : vector<16x64xf32>
    %cst_78 = arith.constant 0.000000e+00 : f32
    %111 = vector.broadcast %cst_78 : f32 to vector<16x64xf32>
    %112 = arith.maximumf %110, %111 : vector<16x64xf32>
    %c271 = arith.constant 271 : index
    %c0_79 = arith.constant 0 : index
    %113 = vector.load %arg17[%c271, %c0_79] : memref<328x64xf32, #tpu.memory_space<vmem>>, vector<16x64xf32>
    tpu.vector_store %arg17[%c271, %c0_79], %112 {strides = array<i32>} : memref<328x64xf32, #tpu.memory_space<vmem>>, vector<16x64xf32>,
    %c270 = arith.constant 270 : index
    %c0_80 = arith.constant 0 : index
    %114 = vector.load %arg22[%c270, %c0_80] : memref<288x64xf32, #tpu.memory_space<vmem>>, vector<16x64xf32>
    %115 = vector.broadcast %23 : vector<1x64xf32> to vector<16x64xf32>
    %116 = arith.addf %114, %115 : vector<16x64xf32>
    %cst_81 = arith.constant 0.000000e+00 : f32
    %117 = vector.broadcast %cst_81 : f32 to vector<16x64xf32>
    %118 = arith.maximumf %116, %117 : vector<16x64xf32>
    %c289 = arith.constant 289 : index
    %c0_82 = arith.constant 0 : index
    %119 = vector.load %arg17[%c289, %c0_82] : memref<328x64xf32, #tpu.memory_space<vmem>>, vector<16x64xf32>
    tpu.vector_store %arg17[%c289, %c0_82], %118 {strides = array<i32>} : memref<328x64xf32, #tpu.memory_space<vmem>>, vector<16x64xf32>,
    %c0_83 = arith.constant 0 : index
    %c0_84 = arith.constant 0 : index
    %120 = vector.load %arg17[%c0_83, %c0_84] : memref<328x64xf32, #tpu.memory_space<vmem>>, vector<96x64xf32>
    %c0_85 = arith.constant 0 : index
    %c0_86 = arith.constant 0 : index
    %c0_87 = arith.constant 0 : index
    %121 = vector.load %arg4[%c0_85, %c0_86, %c0_87] : memref<9x64x64xf32, #tpu.memory_space<vmem>>, vector<1x64x64xf32>
    %122 = vector.shape_cast %121 : vector<1x64x64xf32> to vector<64x64xf32>
    %cst_88 = arith.constant dense<0.000000e+00> : vector<96x64xf32>
    %123 = tpu.matmul %120, %122, %cst_88 {dimension_numbers = #tpu.dot_dimension_numbers<[1], [0], [0], [1], [0, 0, 1, 1], [], []>} : vector<96x64xf32>, vector<64x64xf32>, vector<96x64xf32> -> vector<96x64xf32>
    %c1 = arith.constant 1 : index
    %c0_89 = arith.constant 0 : index
    %124 = vector.load %arg17[%c1, %c0_89] : memref<328x64xf32, #tpu.memory_space<vmem>>, vector<96x64xf32>
    %c1_90 = arith.constant 1 : index
    %c0_91 = arith.constant 0 : index
    %c0_92 = arith.constant 0 : index
    %125 = vector.load %arg4[%c1_90, %c0_91, %c0_92] : memref<9x64x64xf32, #tpu.memory_space<vmem>>, vector<1x64x64xf32>
    %126 = vector.shape_cast %125 : vector<1x64x64xf32> to vector<64x64xf32>
    %cst_93 = arith.constant dense<0.000000e+00> : vector<96x64xf32>
    %127 = tpu.matmul %124, %126, %cst_93 {dimension_numbers = #tpu.dot_dimension_numbers<[1], [0], [0], [1], [0, 0, 1, 1], [], []>} : vector<96x64xf32>, vector<64x64xf32>, vector<96x64xf32> -> vector<96x64xf32>
    %128 = arith.addf %123, %127 : vector<96x64xf32>
    %c2 = arith.constant 2 : index
    %c0_94 = arith.constant 0 : index
    %129 = vector.load %arg17[%c2, %c0_94] : memref<328x64xf32, #tpu.memory_space<vmem>>, vector<96x64xf32>
    %c2_95 = arith.constant 2 : index
    %c0_96 = arith.constant 0 : index
    %c0_97 = arith.constant 0 : index
    %130 = vector.load %arg4[%c2_95, %c0_96, %c0_97] : memref<9x64x64xf32, #tpu.memory_space<vmem>>, vector<1x64x64xf32>
    %131 = vector.shape_cast %130 : vector<1x64x64xf32> to vector<64x64xf32>
    %cst_98 = arith.constant dense<0.000000e+00> : vector<96x64xf32>
    %132 = tpu.matmul %129, %131, %cst_98 {dimension_numbers = #tpu.dot_dimension_numbers<[1], [0], [0], [1], [0, 0, 1, 1], [], []>} : vector<96x64xf32>, vector<64x64xf32>, vector<96x64xf32> -> vector<96x64xf32>
    %133 = arith.addf %128, %132 : vector<96x64xf32>
    %c18_99 = arith.constant 18 : index
    %c0_100 = arith.constant 0 : index
    %134 = vector.load %arg17[%c18_99, %c0_100] : memref<328x64xf32, #tpu.memory_space<vmem>>, vector<96x64xf32>
    %c3 = arith.constant 3 : index
    %c0_101 = arith.constant 0 : index
    %c0_102 = arith.constant 0 : index
    %135 = vector.load %arg4[%c3, %c0_101, %c0_102] : memref<9x64x64xf32, #tpu.memory_space<vmem>>, vector<1x64x64xf32>
    %136 = vector.shape_cast %135 : vector<1x64x64xf32> to vector<64x64xf32>
    %cst_103 = arith.constant dense<0.000000e+00> : vector<96x64xf32>
    %137 = tpu.matmul %134, %136, %cst_103 {dimension_numbers = #tpu.dot_dimension_numbers<[1], [0], [0], [1], [0, 0, 1, 1], [], []>} : vector<96x64xf32>, vector<64x64xf32>, vector<96x64xf32> -> vector<96x64xf32>
    %138 = arith.addf %133, %137 : vector<96x64xf32>
    %c19_104 = arith.constant 19 : index
    %c0_105 = arith.constant 0 : index
    %139 = vector.load %arg17[%c19_104, %c0_105] : memref<328x64xf32, #tpu.memory_space<vmem>>, vector<96x64xf32>
    %c4 = arith.constant 4 : index
    %c0_106 = arith.constant 0 : index
    %c0_107 = arith.constant 0 : index
    %140 = vector.load %arg4[%c4, %c0_106, %c0_107] : memref<9x64x64xf32, #tpu.memory_space<vmem>>, vector<1x64x64xf32>
    %141 = vector.shape_cast %140 : vector<1x64x64xf32> to vector<64x64xf32>
    %cst_108 = arith.constant dense<0.000000e+00> : vector<96x64xf32>
    %142 = tpu.matmul %139, %141, %cst_108 {dimension_numbers = #tpu.dot_dimension_numbers<[1], [0], [0], [1], [0, 0, 1, 1], [], []>} : vector<96x64xf32>, vector<64x64xf32>, vector<96x64xf32> -> vector<96x64xf32>
    %143 = arith.addf %138, %142 : vector<96x64xf32>
    %c20 = arith.constant 20 : index
    %c0_109 = arith.constant 0 : index
    %144 = vector.load %arg17[%c20, %c0_109] : memref<328x64xf32, #tpu.memory_space<vmem>>, vector<96x64xf32>
    %c5 = arith.constant 5 : index
    %c0_110 = arith.constant 0 : index
    %c0_111 = arith.constant 0 : index
    %145 = vector.load %arg4[%c5, %c0_110, %c0_111] : memref<9x64x64xf32, #tpu.memory_space<vmem>>, vector<1x64x64xf32>
    %146 = vector.shape_cast %145 : vector<1x64x64xf32> to vector<64x64xf32>
    %cst_112 = arith.constant dense<0.000000e+00> : vector<96x64xf32>
    %147 = tpu.matmul %144, %146, %cst_112 {dimension_numbers = #tpu.dot_dimension_numbers<[1], [0], [0], [1], [0, 0, 1, 1], [], []>} : vector<96x64xf32>, vector<64x64xf32>, vector<96x64xf32> -> vector<96x64xf32>
    %148 = arith.addf %143, %147 : vector<96x64xf32>
    %c36_113 = arith.constant 36 : index
    %c0_114 = arith.constant 0 : index
    %149 = vector.load %arg17[%c36_113, %c0_114] : memref<328x64xf32, #tpu.memory_space<vmem>>, vector<96x64xf32>
    %c6 = arith.constant 6 : index
    %c0_115 = arith.constant 0 : index
    %c0_116 = arith.constant 0 : index
    %150 = vector.load %arg4[%c6, %c0_115, %c0_116] : memref<9x64x64xf32, #tpu.memory_space<vmem>>, vector<1x64x64xf32>
    %151 = vector.shape_cast %150 : vector<1x64x64xf32> to vector<64x64xf32>
    %cst_117 = arith.constant dense<0.000000e+00> : vector<96x64xf32>
    %152 = tpu.matmul %149, %151, %cst_117 {dimension_numbers = #tpu.dot_dimension_numbers<[1], [0], [0], [1], [0, 0, 1, 1], [], []>} : vector<96x64xf32>, vector<64x64xf32>, vector<96x64xf32> -> vector<96x64xf32>
    %153 = arith.addf %148, %152 : vector<96x64xf32>
    %c37_118 = arith.constant 37 : index
    %c0_119 = arith.constant 0 : index
    %154 = vector.load %arg17[%c37_118, %c0_119] : memref<328x64xf32, #tpu.memory_space<vmem>>, vector<96x64xf32>
    %c7 = arith.constant 7 : index
    %c0_120 = arith.constant 0 : index
    %c0_121 = arith.constant 0 : index
    %155 = vector.load %arg4[%c7, %c0_120, %c0_121] : memref<9x64x64xf32, #tpu.memory_space<vmem>>, vector<1x64x64xf32>
    %156 = vector.shape_cast %155 : vector<1x64x64xf32> to vector<64x64xf32>
    %cst_122 = arith.constant dense<0.000000e+00> : vector<96x64xf32>
    %157 = tpu.matmul %154, %156, %cst_122 {dimension_numbers = #tpu.dot_dimension_numbers<[1], [0], [0], [1], [0, 0, 1, 1], [], []>} : vector<96x64xf32>, vector<64x64xf32>, vector<96x64xf32> -> vector<96x64xf32>
    %158 = arith.addf %153, %157 : vector<96x64xf32>
    %c38 = arith.constant 38 : index
    %c0_123 = arith.constant 0 : index
    %159 = vector.load %arg17[%c38, %c0_123] : memref<328x64xf32, #tpu.memory_space<vmem>>, vector<96x64xf32>
    %c8 = arith.constant 8 : index
    %c0_124 = arith.constant 0 : index
    %c0_125 = arith.constant 0 : index
    %160 = vector.load %arg4[%c8, %c0_124, %c0_125] : memref<9x64x64xf32, #tpu.memory_space<vmem>>, vector<1x64x64xf32>
    %161 = vector.shape_cast %160 : vector<1x64x64xf32> to vector<64x64xf32>
    %cst_126 = arith.constant dense<0.000000e+00> : vector<96x64xf32>
    %162 = tpu.matmul %159, %161, %cst_126 {dimension_numbers = #tpu.dot_dimension_numbers<[1], [0], [0], [1], [0, 0, 1, 1], [], []>} : vector<96x64xf32>, vector<64x64xf32>, vector<96x64xf32> -> vector<96x64xf32>
    %163 = arith.addf %158, %162 : vector<96x64xf32>
    %c0_127 = arith.constant 0 : index
    %c0_128 = arith.constant 0 : index
    %164 = vector.load %arg22[%c0_127, %c0_128] : memref<288x64xf32, #tpu.memory_space<vmem>>, vector<96x64xf32>
    tpu.vector_store %arg22[%c0_127, %c0_128], %163 {strides = array<i32>} : memref<288x64xf32, #tpu.memory_space<vmem>>, vector<96x64xf32>,
    %c96_129 = arith.constant 96 : index
    %c0_130 = arith.constant 0 : index
    %165 = vector.load %arg17[%c96_129, %c0_130] : memref<328x64xf32, #tpu.memory_space<vmem>>, vector<96x64xf32>
    %c0_131 = arith.constant 0 : index
    %c0_132 = arith.constant 0 : index
    %c0_133 = arith.constant 0 : index
    %166 = vector.load %arg4[%c0_131, %c0_132, %c0_133] : memref<9x64x64xf32, #tpu.memory_space<vmem>>, vector<1x64x64xf32>
    %167 = vector.shape_cast %166 : vector<1x64x64xf32> to vector<64x64xf32>
    %cst_134 = arith.constant dense<0.000000e+00> : vector<96x64xf32>
    %168 = tpu.matmul %165, %167, %cst_134 {dimension_numbers = #tpu.dot_dimension_numbers<[1], [0], [0], [1], [0, 0, 1, 1], [], []>} : vector<96x64xf32>, vector<64x64xf32>, vector<96x64xf32> -> vector<96x64xf32>
    %c97 = arith.constant 97 : index
    %c0_135 = arith.constant 0 : index
    %169 = vector.load %arg17[%c97, %c0_135] : memref<328x64xf32, #tpu.memory_space<vmem>>, vector<96x64xf32>
    %c1_136 = arith.constant 1 : index
    %c0_137 = arith.constant 0 : index
    %c0_138 = arith.constant 0 : index
    %170 = vector.load %arg4[%c1_136, %c0_137, %c0_138] : memref<9x64x64xf32, #tpu.memory_space<vmem>>, vector<1x64x64xf32>
    %171 = vector.shape_cast %170 : vector<1x64x64xf32> to vector<64x64xf32>
    %cst_139 = arith.constant dense<0.000000e+00> : vector<96x64xf32>
    %172 = tpu.matmul %169, %171, %cst_139 {dimension_numbers = #tpu.dot_dimension_numbers<[1], [0], [0], [1], [0, 0, 1, 1], [], []>} : vector<96x64xf32>, vector<64x64xf32>, vector<96x64xf32> -> vector<96x64xf32>
    %173 = arith.addf %168, %172 : vector<96x64xf32>
    %c98 = arith.constant 98 : index
    %c0_140 = arith.constant 0 : index
    %174 = vector.load %arg17[%c98, %c0_140] : memref<328x64xf32, #tpu.memory_space<vmem>>, vector<96x64xf32>
    %c2_141 = arith.constant 2 : index
    %c0_142 = arith.constant 0 : index
    %c0_143 = arith.constant 0 : index
    %175 = vector.load %arg4[%c2_141, %c0_142, %c0_143] : memref<9x64x64xf32, #tpu.memory_space<vmem>>, vector<1x64x64xf32>
    %176 = vector.shape_cast %175 : vector<1x64x64xf32> to vector<64x64xf32>
    %cst_144 = arith.constant dense<0.000000e+00> : vector<96x64xf32>
    %177 = tpu.matmul %174, %176, %cst_144 {dimension_numbers = #tpu.dot_dimension_numbers<[1], [0], [0], [1], [0, 0, 1, 1], [], []>} : vector<96x64xf32>, vector<64x64xf32>, vector<96x64xf32> -> vector<96x64xf32>
    %178 = arith.addf %173, %177 : vector<96x64xf32>
    %c114 = arith.constant 114 : index
    %c0_145 = arith.constant 0 : index
    %179 = vector.load %arg17[%c114, %c0_145] : memref<328x64xf32, #tpu.memory_space<vmem>>, vector<96x64xf32>
    %c3_146 = arith.constant 3 : index
    %c0_147 = arith.constant 0 : index
    %c0_148 = arith.constant 0 : index
    %180 = vector.load %arg4[%c3_146, %c0_147, %c0_148] : memref<9x64x64xf32, #tpu.memory_space<vmem>>, vector<1x64x64xf32>
    %181 = vector.shape_cast %180 : vector<1x64x64xf32> to vector<64x64xf32>
    %cst_149 = arith.constant dense<0.000000e+00> : vector<96x64xf32>
    %182 = tpu.matmul %179, %181, %cst_149 {dimension_numbers = #tpu.dot_dimension_numbers<[1], [0], [0], [1], [0, 0, 1, 1], [], []>} : vector<96x64xf32>, vector<64x64xf32>, vector<96x64xf32> -> vector<96x64xf32>
    %183 = arith.addf %178, %182 : vector<96x64xf32>
    %c115 = arith.constant 115 : index
    %c0_150 = arith.constant 0 : index
    %184 = vector.load %arg17[%c115, %c0_150] : memref<328x64xf32, #tpu.memory_space<vmem>>, vector<96x64xf32>
    %c4_151 = arith.constant 4 : index
    %c0_152 = arith.constant 0 : index
    %c0_153 = arith.constant 0 : index
    %185 = vector.load %arg4[%c4_151, %c0_152, %c0_153] : memref<9x64x64xf32, #tpu.memory_space<vmem>>, vector<1x64x64xf32>
    %186 = vector.shape_cast %185 : vector<1x64x64xf32> to vector<64x64xf32>
    %cst_154 = arith.constant dense<0.000000e+00> : vector<96x64xf32>
    %187 = tpu.matmul %184, %186, %cst_154 {dimension_numbers = #tpu.dot_dimension_numbers<[1], [0], [0], [1], [0, 0, 1, 1], [], []>} : vector<96x64xf32>, vector<64x64xf32>, vector<96x64xf32> -> vector<96x64xf32>
    %188 = arith.addf %183, %187 : vector<96x64xf32>
    %c116 = arith.constant 116 : index
    %c0_155 = arith.constant 0 : index
    %189 = vector.load %arg17[%c116, %c0_155] : memref<328x64xf32, #tpu.memory_space<vmem>>, vector<96x64xf32>
    %c5_156 = arith.constant 5 : index
    %c0_157 = arith.constant 0 : index
    %c0_158 = arith.constant 0 : index
    %190 = vector.load %arg4[%c5_156, %c0_157, %c0_158] : memref<9x64x64xf32, #tpu.memory_space<vmem>>, vector<1x64x64xf32>
    %191 = vector.shape_cast %190 : vector<1x64x64xf32> to vector<64x64xf32>
    %cst_159 = arith.constant dense<0.000000e+00> : vector<96x64xf32>
    %192 = tpu.matmul %189, %191, %cst_159 {dimension_numbers = #tpu.dot_dimension_numbers<[1], [0], [0], [1], [0, 0, 1, 1], [], []>} : vector<96x64xf32>, vector<64x64xf32>, vector<96x64xf32> -> vector<96x64xf32>
    %193 = arith.addf %188, %192 : vector<96x64xf32>
    %c132 = arith.constant 132 : index
    %c0_160 = arith.constant 0 : index
    %194 = vector.load %arg17[%c132, %c0_160] : memref<328x64xf32, #tpu.memory_space<vmem>>, vector<96x64xf32>
    %c6_161 = arith.constant 6 : index
    %c0_162 = arith.constant 0 : index
    %c0_163 = arith.constant 0 : index
    %195 = vector.load %arg4[%c6_161, %c0_162, %c0_163] : memref<9x64x64xf32, #tpu.memory_space<vmem>>, vector<1x64x64xf32>
    %196 = vector.shape_cast %195 : vector<1x64x64xf32> to vector<64x64xf32>
    %cst_164 = arith.constant dense<0.000000e+00> : vector<96x64xf32>
    %197 = tpu.matmul %194, %196, %cst_164 {dimension_numbers = #tpu.dot_dimension_numbers<[1], [0], [0], [1], [0, 0, 1, 1], [], []>} : vector<96x64xf32>, vector<64x64xf32>, vector<96x64xf32> -> vector<96x64xf32>
    %198 = arith.addf %193, %197 : vector<96x64xf32>
    %c133 = arith.constant 133 : index
    %c0_165 = arith.constant 0 : index
    %199 = vector.load %arg17[%c133, %c0_165] : memref<328x64xf32, #tpu.memory_space<vmem>>, vector<96x64xf32>
    %c7_166 = arith.constant 7 : index
    %c0_167 = arith.constant 0 : index
    %c0_168 = arith.constant 0 : index
    %200 = vector.load %arg4[%c7_166, %c0_167, %c0_168] : memref<9x64x64xf32, #tpu.memory_space<vmem>>, vector<1x64x64xf32>
    %201 = vector.shape_cast %200 : vector<1x64x64xf32> to vector<64x64xf32>
    %cst_169 = arith.constant dense<0.000000e+00> : vector<96x64xf32>
    %202 = tpu.matmul %199, %201, %cst_169 {dimension_numbers = #tpu.dot_dimension_numbers<[1], [0], [0], [1], [0, 0, 1, 1], [], []>} : vector<96x64xf32>, vector<64x64xf32>, vector<96x64xf32> -> vector<96x64xf32>
    %203 = arith.addf %198, %202 : vector<96x64xf32>
    %c134 = arith.constant 134 : index
    %c0_170 = arith.constant 0 : index
    %204 = vector.load %arg17[%c134, %c0_170] : memref<328x64xf32, #tpu.memory_space<vmem>>, vector<96x64xf32>
    %c8_171 = arith.constant 8 : index
    %c0_172 = arith.constant 0 : index
    %c0_173 = arith.constant 0 : index
    %205 = vector.load %arg4[%c8_171, %c0_172, %c0_173] : memref<9x64x64xf32, #tpu.memory_space<vmem>>, vector<1x64x64xf32>
    %206 = vector.shape_cast %205 : vector<1x64x64xf32> to vector<64x64xf32>
    %cst_174 = arith.constant dense<0.000000e+00> : vector<96x64xf32>
    %207 = tpu.matmul %204, %206, %cst_174 {dimension_numbers = #tpu.dot_dimension_numbers<[1], [0], [0], [1], [0, 0, 1, 1], [], []>} : vector<96x64xf32>, vector<64x64xf32>, vector<96x64xf32> -> vector<96x64xf32>
    %208 = arith.addf %203, %207 : vector<96x64xf32>
    %c96_175 = arith.constant 96 : index
    %c0_176 = arith.constant 0 : index
    %209 = vector.load %arg22[%c96_175, %c0_176] : memref<288x64xf32, #tpu.memory_space<vmem>>, vector<96x64xf32>
    tpu.vector_store %arg22[%c96_175, %c0_176], %208 {strides = array<i32>} : memref<288x64xf32, #tpu.memory_space<vmem>>, vector<96x64xf32>,
    %c192_177 = arith.constant 192 : index
    %c0_178 = arith.constant 0 : index
    %210 = vector.load %arg17[%c192_177, %c0_178] : memref<328x64xf32, #tpu.memory_space<vmem>>, vector<96x64xf32>
    %c0_179 = arith.constant 0 : index
    %c0_180 = arith.constant 0 : index
    %c0_181 = arith.constant 0 : index
    %211 = vector.load %arg4[%c0_179, %c0_180, %c0_181] : memref<9x64x64xf32, #tpu.memory_space<vmem>>, vector<1x64x64xf32>
    %212 = vector.shape_cast %211 : vector<1x64x64xf32> to vector<64x64xf32>
    %cst_182 = arith.constant dense<0.000000e+00> : vector<96x64xf32>
    %213 = tpu.matmul %210, %212, %cst_182 {dimension_numbers = #tpu.dot_dimension_numbers<[1], [0], [0], [1], [0, 0, 1, 1], [], []>} : vector<96x64xf32>, vector<64x64xf32>, vector<96x64xf32> -> vector<96x64xf32>
    %c193 = arith.constant 193 : index
    %c0_183 = arith.constant 0 : index
    %214 = vector.load %arg17[%c193, %c0_183] : memref<328x64xf32, #tpu.memory_space<vmem>>, vector<96x64xf32>
    %c1_184 = arith.constant 1 : index
    %c0_185 = arith.constant 0 : index
    %c0_186 = arith.constant 0 : index
    %215 = vector.load %arg4[%c1_184, %c0_185, %c0_186] : memref<9x64x64xf32, #tpu.memory_space<vmem>>, vector<1x64x64xf32>
    %216 = vector.shape_cast %215 : vector<1x64x64xf32> to vector<64x64xf32>
    %cst_187 = arith.constant dense<0.000000e+00> : vector<96x64xf32>
    %217 = tpu.matmul %214, %216, %cst_187 {dimension_numbers = #tpu.dot_dimension_numbers<[1], [0], [0], [1], [0, 0, 1, 1], [], []>} : vector<96x64xf32>, vector<64x64xf32>, vector<96x64xf32> -> vector<96x64xf32>
    %218 = arith.addf %213, %217 : vector<96x64xf32>
    %c194 = arith.constant 194 : index
    %c0_188 = arith.constant 0 : index
    %219 = vector.load %arg17[%c194, %c0_188] : memref<328x64xf32, #tpu.memory_space<vmem>>, vector<96x64xf32>
    %c2_189 = arith.constant 2 : index
    %c0_190 = arith.constant 0 : index
    %c0_191 = arith.constant 0 : index
    %220 = vector.load %arg4[%c2_189, %c0_190, %c0_191] : memref<9x64x64xf32, #tpu.memory_space<vmem>>, vector<1x64x64xf32>
    %221 = vector.shape_cast %220 : vector<1x64x64xf32> to vector<64x64xf32>
    %cst_192 = arith.constant dense<0.000000e+00> : vector<96x64xf32>
    %222 = tpu.matmul %219, %221, %cst_192 {dimension_numbers = #tpu.dot_dimension_numbers<[1], [0], [0], [1], [0, 0, 1, 1], [], []>} : vector<96x64xf32>, vector<64x64xf32>, vector<96x64xf32> -> vector<96x64xf32>
    %223 = arith.addf %218, %222 : vector<96x64xf32>
    %c210 = arith.constant 210 : index
    %c0_193 = arith.constant 0 : index
    %224 = vector.load %arg17[%c210, %c0_193] : memref<328x64xf32, #tpu.memory_space<vmem>>, vector<96x64xf32>
    %c3_194 = arith.constant 3 : index
    %c0_195 = arith.constant 0 : index
    %c0_196 = arith.constant 0 : index
    %225 = vector.load %arg4[%c3_194, %c0_195, %c0_196] : memref<9x64x64xf32, #tpu.memory_space<vmem>>, vector<1x64x64xf32>
    %226 = vector.shape_cast %225 : vector<1x64x64xf32> to vector<64x64xf32>
    %cst_197 = arith.constant dense<0.000000e+00> : vector<96x64xf32>
    %227 = tpu.matmul %224, %226, %cst_197 {dimension_numbers = #tpu.dot_dimension_numbers<[1], [0], [0], [1], [0, 0, 1, 1], [], []>} : vector<96x64xf32>, vector<64x64xf32>, vector<96x64xf32> -> vector<96x64xf32>
    %228 = arith.addf %223, %227 : vector<96x64xf32>
    %c211 = arith.constant 211 : index
    %c0_198 = arith.constant 0 : index
    %229 = vector.load %arg17[%c211, %c0_198] : memref<328x64xf32, #tpu.memory_space<vmem>>, vector<96x64xf32>
    %c4_199 = arith.constant 4 : index
    %c0_200 = arith.constant 0 : index
    %c0_201 = arith.constant 0 : index
    %230 = vector.load %arg4[%c4_199, %c0_200, %c0_201] : memref<9x64x64xf32, #tpu.memory_space<vmem>>, vector<1x64x64xf32>
    %231 = vector.shape_cast %230 : vector<1x64x64xf32> to vector<64x64xf32>
    %cst_202 = arith.constant dense<0.000000e+00> : vector<96x64xf32>
    %232 = tpu.matmul %229, %231, %cst_202 {dimension_numbers = #tpu.dot_dimension_numbers<[1], [0], [0], [1], [0, 0, 1, 1], [], []>} : vector<96x64xf32>, vector<64x64xf32>, vector<96x64xf32> -> vector<96x64xf32>
    %233 = arith.addf %228, %232 : vector<96x64xf32>
    %c212 = arith.constant 212 : index
    %c0_203 = arith.constant 0 : index
    %234 = vector.load %arg17[%c212, %c0_203] : memref<328x64xf32, #tpu.memory_space<vmem>>, vector<96x64xf32>
    %c5_204 = arith.constant 5 : index
    %c0_205 = arith.constant 0 : index
    %c0_206 = arith.constant 0 : index
    %235 = vector.load %arg4[%c5_204, %c0_205, %c0_206] : memref<9x64x64xf32, #tpu.memory_space<vmem>>, vector<1x64x64xf32>
    %236 = vector.shape_cast %235 : vector<1x64x64xf32> to vector<64x64xf32>
    %cst_207 = arith.constant dense<0.000000e+00> : vector<96x64xf32>
    %237 = tpu.matmul %234, %236, %cst_207 {dimension_numbers = #tpu.dot_dimension_numbers<[1], [0], [0], [1], [0, 0, 1, 1], [], []>} : vector<96x64xf32>, vector<64x64xf32>, vector<96x64xf32> -> vector<96x64xf32>
    %238 = arith.addf %233, %237 : vector<96x64xf32>
    %c228 = arith.constant 228 : index
    %c0_208 = arith.constant 0 : index
    %239 = vector.load %arg17[%c228, %c0_208] : memref<328x64xf32, #tpu.memory_space<vmem>>, vector<96x64xf32>
    %c6_209 = arith.constant 6 : index
    %c0_210 = arith.constant 0 : index
    %c0_211 = arith.constant 0 : index
    %240 = vector.load %arg4[%c6_209, %c0_210, %c0_211] : memref<9x64x64xf32, #tpu.memory_space<vmem>>, vector<1x64x64xf32>
    %241 = vector.shape_cast %240 : vector<1x64x64xf32> to vector<64x64xf32>
    %cst_212 = arith.constant dense<0.000000e+00> : vector<96x64xf32>
    %242 = tpu.matmul %239, %241, %cst_212 {dimension_numbers = #tpu.dot_dimension_numbers<[1], [0], [0], [1], [0, 0, 1, 1], [], []>} : vector<96x64xf32>, vector<64x64xf32>, vector<96x64xf32> -> vector<96x64xf32>
    %243 = arith.addf %238, %242 : vector<96x64xf32>
    %c229 = arith.constant 229 : index
    %c0_213 = arith.constant 0 : index
    %244 = vector.load %arg17[%c229, %c0_213] : memref<328x64xf32, #tpu.memory_space<vmem>>, vector<96x64xf32>
    %c7_214 = arith.constant 7 : index
    %c0_215 = arith.constant 0 : index
    %c0_216 = arith.constant 0 : index
    %245 = vector.load %arg4[%c7_214, %c0_215, %c0_216] : memref<9x64x64xf32, #tpu.memory_space<vmem>>, vector<1x64x64xf32>
    %246 = vector.shape_cast %245 : vector<1x64x64xf32> to vector<64x64xf32>
    %cst_217 = arith.constant dense<0.000000e+00> : vector<96x64xf32>
    %247 = tpu.matmul %244, %246, %cst_217 {dimension_numbers = #tpu.dot_dimension_numbers<[1], [0], [0], [1], [0, 0, 1, 1], [], []>} : vector<96x64xf32>, vector<64x64xf32>, vector<96x64xf32> -> vector<96x64xf32>
    %248 = arith.addf %243, %247 : vector<96x64xf32>
    %c230 = arith.constant 230 : index
    %c0_218 = arith.constant 0 : index
    %249 = vector.load %arg17[%c230, %c0_218] : memref<328x64xf32, #tpu.memory_space<vmem>>, vector<96x64xf32>
    %c8_219 = arith.constant 8 : index
    %c0_220 = arith.constant 0 : index
    %c0_221 = arith.constant 0 : index
    %250 = vector.load %arg4[%c8_219, %c0_220, %c0_221] : memref<9x64x64xf32, #tpu.memory_space<vmem>>, vector<1x64x64xf32>
    %251 = vector.shape_cast %250 : vector<1x64x64xf32> to vector<64x64xf32>
    %cst_222 = arith.constant dense<0.000000e+00> : vector<96x64xf32>
    %252 = tpu.matmul %249, %251, %cst_222 {dimension_numbers = #tpu.dot_dimension_numbers<[1], [0], [0], [1], [0, 0, 1, 1], [], []>} : vector<96x64xf32>, vector<64x64xf32>, vector<96x64xf32> -> vector<96x64xf32>
    %253 = arith.addf %248, %252 : vector<96x64xf32>
    %c192_223 = arith.constant 192 : index
    %c0_224 = arith.constant 0 : index
    %254 = vector.load %arg22[%c192_223, %c0_224] : memref<288x64xf32, #tpu.memory_space<vmem>>, vector<96x64xf32>
    tpu.vector_store %arg22[%c192_223, %c0_224], %253 {strides = array<i32>} : memref<288x64xf32, #tpu.memory_space<vmem>>, vector<96x64xf32>,
    %c0_225 = arith.constant 0 : index
    %c0_226 = arith.constant 0 : index
    %255 = vector.load %arg5[%c0_225, %c0_226] : memref<1x64xf32, #tpu.memory_space<vmem>>, vector<1x64xf32>
    %c0_227 = arith.constant 0 : index
    %c0_228 = arith.constant 0 : index
    %256 = tpu.strided_load %arg22[%c0_227, %c0_228] {strides = array<i32: 2, 1>} : memref<288x64xf32, #tpu.memory_space<vmem>>, vector<8x64xf32>
    %c1_229 = arith.constant 1 : index
    %c0_230 = arith.constant 0 : index
    %257 = tpu.strided_load %arg22[%c1_229, %c0_230] {strides = array<i32: 2, 1>} : memref<288x64xf32, #tpu.memory_space<vmem>>, vector<8x64xf32>
    %258 = arith.maximumf %256, %257 : vector<8x64xf32>
    %c18_231 = arith.constant 18 : index
    %c0_232 = arith.constant 0 : index
    %259 = tpu.strided_load %arg22[%c18_231, %c0_232] {strides = array<i32: 2, 1>} : memref<288x64xf32, #tpu.memory_space<vmem>>, vector<8x64xf32>
    %c19_233 = arith.constant 19 : index
    %c0_234 = arith.constant 0 : index
    %260 = tpu.strided_load %arg22[%c19_233, %c0_234] {strides = array<i32: 2, 1>} : memref<288x64xf32, #tpu.memory_space<vmem>>, vector<8x64xf32>
    %261 = arith.maximumf %259, %260 : vector<8x64xf32>
    %262 = arith.maximumf %258, %261 : vector<8x64xf32>
    %263 = vector.broadcast %255 : vector<1x64xf32> to vector<8x64xf32>
    %264 = arith.addf %262, %263 : vector<8x64xf32>
    %cst_235 = arith.constant 0.000000e+00 : f32
    %265 = vector.broadcast %cst_235 : f32 to vector<8x64xf32>
    %266 = arith.maximumf %264, %265 : vector<8x64xf32>
    %c11 = arith.constant 11 : index
    %c0_236 = arith.constant 0 : index
    %267 = vector.load %arg18[%c11, %c0_236] : memref<104x64xf32, #tpu.memory_space<vmem>>, vector<8x64xf32>
    tpu.vector_store %arg18[%c11, %c0_236], %266 {strides = array<i32>} : memref<104x64xf32, #tpu.memory_space<vmem>>, vector<8x64xf32>,
    %c36_237 = arith.constant 36 : index
    %c0_238 = arith.constant 0 : index
    %268 = tpu.strided_load %arg22[%c36_237, %c0_238] {strides = array<i32: 2, 1>} : memref<288x64xf32, #tpu.memory_space<vmem>>, vector<8x64xf32>
    %c37_239 = arith.constant 37 : index
    %c0_240 = arith.constant 0 : index
    %269 = tpu.strided_load %arg22[%c37_239, %c0_240] {strides = array<i32: 2, 1>} : memref<288x64xf32, #tpu.memory_space<vmem>>, vector<8x64xf32>
    %270 = arith.maximumf %268, %269 : vector<8x64xf32>
    %c54_241 = arith.constant 54 : index
    %c0_242 = arith.constant 0 : index
    %271 = tpu.strided_load %arg22[%c54_241, %c0_242] {strides = array<i32: 2, 1>} : memref<288x64xf32, #tpu.memory_space<vmem>>, vector<8x64xf32>
    %c55_243 = arith.constant 55 : index
    %c0_244 = arith.constant 0 : index
    %272 = tpu.strided_load %arg22[%c55_243, %c0_244] {strides = array<i32: 2, 1>} : memref<288x64xf32, #tpu.memory_space<vmem>>, vector<8x64xf32>
    %273 = arith.maximumf %271, %272 : vector<8x64xf32>
    %274 = arith.maximumf %270, %273 : vector<8x64xf32>
    %275 = vector.broadcast %255 : vector<1x64xf32> to vector<8x64xf32>
    %276 = arith.addf %274, %275 : vector<8x64xf32>
    %cst_245 = arith.constant 0.000000e+00 : f32
    %277 = vector.broadcast %cst_245 : f32 to vector<8x64xf32>
    %278 = arith.maximumf %276, %277 : vector<8x64xf32>
    %c21 = arith.constant 21 : index
    %c0_246 = arith.constant 0 : index
    %279 = vector.load %arg18[%c21, %c0_246] : memref<104x64xf32, #tpu.memory_space<vmem>>, vector<8x64xf32>
    tpu.vector_store %arg18[%c21, %c0_246], %278 {strides = array<i32>} : memref<104x64xf32, #tpu.memory_space<vmem>>, vector<8x64xf32>,
    %c72_247 = arith.constant 72 : index
    %c0_248 = arith.constant 0 : index
    %280 = tpu.strided_load %arg22[%c72_247, %c0_248] {strides = array<i32: 2, 1>} : memref<288x64xf32, #tpu.memory_space<vmem>>, vector<8x64xf32>
    %c73_249 = arith.constant 73 : index
    %c0_250 = arith.constant 0 : index
    %281 = tpu.strided_load %arg22[%c73_249, %c0_250] {strides = array<i32: 2, 1>} : memref<288x64xf32, #tpu.memory_space<vmem>>, vector<8x64xf32>
    %282 = arith.maximumf %280, %281 : vector<8x64xf32>
    %c90_251 = arith.constant 90 : index
    %c0_252 = arith.constant 0 : index
    %283 = tpu.strided_load %arg22[%c90_251, %c0_252] {strides = array<i32: 2, 1>} : memref<288x64xf32, #tpu.memory_space<vmem>>, vector<8x64xf32>
    %c91_253 = arith.constant 91 : index
    %c0_254 = arith.constant 0 : index
    %284 = tpu.strided_load %arg22[%c91_253, %c0_254] {strides = array<i32: 2, 1>} : memref<288x64xf32, #tpu.memory_space<vmem>>, vector<8x64xf32>
    %285 = arith.maximumf %283, %284 : vector<8x64xf32>
    %286 = arith.maximumf %282, %285 : vector<8x64xf32>
    %287 = vector.broadcast %255 : vector<1x64xf32> to vector<8x64xf32>
    %288 = arith.addf %286, %287 : vector<8x64xf32>
    %cst_255 = arith.constant 0.000000e+00 : f32
    %289 = vector.broadcast %cst_255 : f32 to vector<8x64xf32>
    %290 = arith.maximumf %288, %289 : vector<8x64xf32>
    %c31 = arith.constant 31 : index
    %c0_256 = arith.constant 0 : index
    %291 = vector.load %arg18[%c31, %c0_256] : memref<104x64xf32, #tpu.memory_space<vmem>>, vector<8x64xf32>
    tpu.vector_store %arg18[%c31, %c0_256], %290 {strides = array<i32>} : memref<104x64xf32, #tpu.memory_space<vmem>>, vector<8x64xf32>,
    %c108_257 = arith.constant 108 : index
    %c0_258 = arith.constant 0 : index
    %292 = tpu.strided_load %arg22[%c108_257, %c0_258] {strides = array<i32: 2, 1>} : memref<288x64xf32, #tpu.memory_space<vmem>>, vector<8x64xf32>
    %c109_259 = arith.constant 109 : index
    %c0_260 = arith.constant 0 : index
    %293 = tpu.strided_load %arg22[%c109_259, %c0_260] {strides = array<i32: 2, 1>} : memref<288x64xf32, #tpu.memory_space<vmem>>, vector<8x64xf32>
    %294 = arith.maximumf %292, %293 : vector<8x64xf32>
    %c126_261 = arith.constant 126 : index
    %c0_262 = arith.constant 0 : index
    %295 = tpu.strided_load %arg22[%c126_261, %c0_262] {strides = array<i32: 2, 1>} : memref<288x64xf32, #tpu.memory_space<vmem>>, vector<8x64xf32>
    %c127_263 = arith.constant 127 : index
    %c0_264 = arith.constant 0 : index
    %296 = tpu.strided_load %arg22[%c127_263, %c0_264] {strides = array<i32: 2, 1>} : memref<288x64xf32, #tpu.memory_space<vmem>>, vector<8x64xf32>
    %297 = arith.maximumf %295, %296 : vector<8x64xf32>
    %298 = arith.maximumf %294, %297 : vector<8x64xf32>
    %299 = vector.broadcast %255 : vector<1x64xf32> to vector<8x64xf32>
    %300 = arith.addf %298, %299 : vector<8x64xf32>
    %cst_265 = arith.constant 0.000000e+00 : f32
    %301 = vector.broadcast %cst_265 : f32 to vector<8x64xf32>
    %302 = arith.maximumf %300, %301 : vector<8x64xf32>
    %c41 = arith.constant 41 : index
    %c0_266 = arith.constant 0 : index
    %303 = vector.load %arg18[%c41, %c0_266] : memref<104x64xf32, #tpu.memory_space<vmem>>, vector<8x64xf32>
    tpu.vector_store %arg18[%c41, %c0_266], %302 {strides = array<i32>} : memref<104x64xf32, #tpu.memory_space<vmem>>, vector<8x64xf32>,
    %c144_267 = arith.constant 144 : index
    %c0_268 = arith.constant 0 : index
    %304 = tpu.strided_load %arg22[%c144_267, %c0_268] {strides = array<i32: 2, 1>} : memref<288x64xf32, #tpu.memory_space<vmem>>, vector<8x64xf32>
    %c145_269 = arith.constant 145 : index
    %c0_270 = arith.constant 0 : index
    %305 = tpu.strided_load %arg22[%c145_269, %c0_270] {strides = array<i32: 2, 1>} : memref<288x64xf32, #tpu.memory_space<vmem>>, vector<8x64xf32>
    %306 = arith.maximumf %304, %305 : vector<8x64xf32>
    %c162_271 = arith.constant 162 : index
    %c0_272 = arith.constant 0 : index
    %307 = tpu.strided_load %arg22[%c162_271, %c0_272] {strides = array<i32: 2, 1>} : memref<288x64xf32, #tpu.memory_space<vmem>>, vector<8x64xf32>
    %c163_273 = arith.constant 163 : index
    %c0_274 = arith.constant 0 : index
    %308 = tpu.strided_load %arg22[%c163_273, %c0_274] {strides = array<i32: 2, 1>} : memref<288x64xf32, #tpu.memory_space<vmem>>, vector<8x64xf32>
    %309 = arith.maximumf %307, %308 : vector<8x64xf32>
    %310 = arith.maximumf %306, %309 : vector<8x64xf32>
    %311 = vector.broadcast %255 : vector<1x64xf32> to vector<8x64xf32>
    %312 = arith.addf %310, %311 : vector<8x64xf32>
    %cst_275 = arith.constant 0.000000e+00 : f32
    %313 = vector.broadcast %cst_275 : f32 to vector<8x64xf32>
    %314 = arith.maximumf %312, %313 : vector<8x64xf32>
    %c51 = arith.constant 51 : index
    %c0_276 = arith.constant 0 : index
    %315 = vector.load %arg18[%c51, %c0_276] : memref<104x64xf32, #tpu.memory_space<vmem>>, vector<8x64xf32>
    tpu.vector_store %arg18[%c51, %c0_276], %314 {strides = array<i32>} : memref<104x64xf32, #tpu.memory_space<vmem>>, vector<8x64xf32>,
    %c180_277 = arith.constant 180 : index
    %c0_278 = arith.constant 0 : index
    %316 = tpu.strided_load %arg22[%c180_277, %c0_278] {strides = array<i32: 2, 1>} : memref<288x64xf32, #tpu.memory_space<vmem>>, vector<8x64xf32>
    %c181_279 = arith.constant 181 : index
    %c0_280 = arith.constant 0 : index
    %317 = tpu.strided_load %arg22[%c181_279, %c0_280] {strides = array<i32: 2, 1>} : memref<288x64xf32, #tpu.memory_space<vmem>>, vector<8x64xf32>
    %318 = arith.maximumf %316, %317 : vector<8x64xf32>
    %c198_281 = arith.constant 198 : index
    %c0_282 = arith.constant 0 : index
    %319 = tpu.strided_load %arg22[%c198_281, %c0_282] {strides = array<i32: 2, 1>} : memref<288x64xf32, #tpu.memory_space<vmem>>, vector<8x64xf32>
    %c199_283 = arith.constant 199 : index
    %c0_284 = arith.constant 0 : index
    %320 = tpu.strided_load %arg22[%c199_283, %c0_284] {strides = array<i32: 2, 1>} : memref<288x64xf32, #tpu.memory_space<vmem>>, vector<8x64xf32>
    %321 = arith.maximumf %319, %320 : vector<8x64xf32>
    %322 = arith.maximumf %318, %321 : vector<8x64xf32>
    %323 = vector.broadcast %255 : vector<1x64xf32> to vector<8x64xf32>
    %324 = arith.addf %322, %323 : vector<8x64xf32>
    %cst_285 = arith.constant 0.000000e+00 : f32
    %325 = vector.broadcast %cst_285 : f32 to vector<8x64xf32>
    %326 = arith.maximumf %324, %325 : vector<8x64xf32>
    %c61 = arith.constant 61 : index
    %c0_286 = arith.constant 0 : index
    %327 = vector.load %arg18[%c61, %c0_286] : memref<104x64xf32, #tpu.memory_space<vmem>>, vector<8x64xf32>
    tpu.vector_store %arg18[%c61, %c0_286], %326 {strides = array<i32>} : memref<104x64xf32, #tpu.memory_space<vmem>>, vector<8x64xf32>,
    %c216_287 = arith.constant 216 : index
    %c0_288 = arith.constant 0 : index
    %328 = tpu.strided_load %arg22[%c216_287, %c0_288] {strides = array<i32: 2, 1>} : memref<288x64xf32, #tpu.memory_space<vmem>>, vector<8x64xf32>
    %c217_289 = arith.constant 217 : index
    %c0_290 = arith.constant 0 : index
    %329 = tpu.strided_load %arg22[%c217_289, %c0_290] {strides = array<i32: 2, 1>} : memref<288x64xf32, #tpu.memory_space<vmem>>, vector<8x64xf32>
    %330 = arith.maximumf %328, %329 : vector<8x64xf32>
    %c234_291 = arith.constant 234 : index
    %c0_292 = arith.constant 0 : index
    %331 = tpu.strided_load %arg22[%c234_291, %c0_292] {strides = array<i32: 2, 1>} : memref<288x64xf32, #tpu.memory_space<vmem>>, vector<8x64xf32>
    %c235_293 = arith.constant 235 : index
    %c0_294 = arith.constant 0 : index
    %332 = tpu.strided_load %arg22[%c235_293, %c0_294] {strides = array<i32: 2, 1>} : memref<288x64xf32, #tpu.memory_space<vmem>>, vector<8x64xf32>
    %333 = arith.maximumf %331, %332 : vector<8x64xf32>
    %334 = arith.maximumf %330, %333 : vector<8x64xf32>
    %335 = vector.broadcast %255 : vector<1x64xf32> to vector<8x64xf32>
    %336 = arith.addf %334, %335 : vector<8x64xf32>
    %cst_295 = arith.constant 0.000000e+00 : f32
    %337 = vector.broadcast %cst_295 : f32 to vector<8x64xf32>
    %338 = arith.maximumf %336, %337 : vector<8x64xf32>
    %c71 = arith.constant 71 : index
    %c0_296 = arith.constant 0 : index
    %339 = vector.load %arg18[%c71, %c0_296] : memref<104x64xf32, #tpu.memory_space<vmem>>, vector<8x64xf32>
    tpu.vector_store %arg18[%c71, %c0_296], %338 {strides = array<i32>} : memref<104x64xf32, #tpu.memory_space<vmem>>, vector<8x64xf32>,
    %c252_297 = arith.constant 252 : index
    %c0_298 = arith.constant 0 : index
    %340 = tpu.strided_load %arg22[%c252_297, %c0_298] {strides = array<i32: 2, 1>} : memref<288x64xf32, #tpu.memory_space<vmem>>, vector<8x64xf32>
    %c253_299 = arith.constant 253 : index
    %c0_300 = arith.constant 0 : index
    %341 = tpu.strided_load %arg22[%c253_299, %c0_300] {strides = array<i32: 2, 1>} : memref<288x64xf32, #tpu.memory_space<vmem>>, vector<8x64xf32>
    %342 = arith.maximumf %340, %341 : vector<8x64xf32>
    %c270_301 = arith.constant 270 : index
    %c0_302 = arith.constant 0 : index
    %343 = tpu.strided_load %arg22[%c270_301, %c0_302] {strides = array<i32: 2, 1>} : memref<288x64xf32, #tpu.memory_space<vmem>>, vector<8x64xf32>
    %c271_303 = arith.constant 271 : index
    %c0_304 = arith.constant 0 : index
    %344 = tpu.strided_load %arg22[%c271_303, %c0_304] {strides = array<i32: 2, 1>} : memref<288x64xf32, #tpu.memory_space<vmem>>, vector<8x64xf32>
    %345 = arith.maximumf %343, %344 : vector<8x64xf32>
    %346 = arith.maximumf %342, %345 : vector<8x64xf32>
    %347 = vector.broadcast %255 : vector<1x64xf32> to vector<8x64xf32>
    %348 = arith.addf %346, %347 : vector<8x64xf32>
    %cst_305 = arith.constant 0.000000e+00 : f32
    %349 = vector.broadcast %cst_305 : f32 to vector<8x64xf32>
    %350 = arith.maximumf %348, %349 : vector<8x64xf32>
    %c81 = arith.constant 81 : index
    %c0_306 = arith.constant 0 : index
    %351 = vector.load %arg18[%c81, %c0_306] : memref<104x64xf32, #tpu.memory_space<vmem>>, vector<8x64xf32>
    tpu.vector_store %arg18[%c81, %c0_306], %350 {strides = array<i32>} : memref<104x64xf32, #tpu.memory_space<vmem>>, vector<8x64xf32>,
    %c0_307 = arith.constant 0 : index
    %c0_308 = arith.constant 0 : index
    %352 = vector.load %arg18[%c0_307, %c0_308] : memref<104x64xf32, #tpu.memory_space<vmem>>, vector<80x64xf32>
    %c0_309 = arith.constant 0 : index
    %c0_310 = arith.constant 0 : index
    %c0_311 = arith.constant 0 : index
    %353 = vector.load %arg6[%c0_309, %c0_310, %c0_311] : memref<9x64x128xf32, #tpu.memory_space<vmem>>, vector<1x64x128xf32>
    %354 = vector.shape_cast %353 : vector<1x64x128xf32> to vector<64x128xf32>
    %cst_312 = arith.constant dense<0.000000e+00> : vector<80x128xf32>
    %355 = tpu.matmul %352, %354, %cst_312 {dimension_numbers = #tpu.dot_dimension_numbers<[1], [0], [0], [1], [0, 0, 1, 1], [], []>} : vector<80x64xf32>, vector<64x128xf32>, vector<80x128xf32> -> vector<80x128xf32>
    %c1_313 = arith.constant 1 : index
    %c0_314 = arith.constant 0 : index
    %356 = vector.load %arg18[%c1_313, %c0_314] : memref<104x64xf32, #tpu.memory_space<vmem>>, vector<80x64xf32>
    %c1_315 = arith.constant 1 : index
    %c0_316 = arith.constant 0 : index
    %c0_317 = arith.constant 0 : index
    %357 = vector.load %arg6[%c1_315, %c0_316, %c0_317] : memref<9x64x128xf32, #tpu.memory_space<vmem>>, vector<1x64x128xf32>
    %358 = vector.shape_cast %357 : vector<1x64x128xf32> to vector<64x128xf32>
    %cst_318 = arith.constant dense<0.000000e+00> : vector<80x128xf32>
    %359 = tpu.matmul %356, %358, %cst_318 {dimension_numbers = #tpu.dot_dimension_numbers<[1], [0], [0], [1], [0, 0, 1, 1], [], []>} : vector<80x64xf32>, vector<64x128xf32>, vector<80x128xf32> -> vector<80x128xf32>
    %360 = arith.addf %355, %359 : vector<80x128xf32>
    %c2_319 = arith.constant 2 : index
    %c0_320 = arith.constant 0 : index
    %361 = vector.load %arg18[%c2_319, %c0_320] : memref<104x64xf32, #tpu.memory_space<vmem>>, vector<80x64xf32>
    %c2_321 = arith.constant 2 : index
    %c0_322 = arith.constant 0 : index
    %c0_323 = arith.constant 0 : index
    %362 = vector.load %arg6[%c2_321, %c0_322, %c0_323] : memref<9x64x128xf32, #tpu.memory_space<vmem>>, vector<1x64x128xf32>
    %363 = vector.shape_cast %362 : vector<1x64x128xf32> to vector<64x128xf32>
    %cst_324 = arith.constant dense<0.000000e+00> : vector<80x128xf32>
    %364 = tpu.matmul %361, %363, %cst_324 {dimension_numbers = #tpu.dot_dimension_numbers<[1], [0], [0], [1], [0, 0, 1, 1], [], []>} : vector<80x64xf32>, vector<64x128xf32>, vector<80x128xf32> -> vector<80x128xf32>
    %365 = arith.addf %360, %364 : vector<80x128xf32>
    %c10 = arith.constant 10 : index
    %c0_325 = arith.constant 0 : index
    %366 = vector.load %arg18[%c10, %c0_325] : memref<104x64xf32, #tpu.memory_space<vmem>>, vector<80x64xf32>
    %c3_326 = arith.constant 3 : index
    %c0_327 = arith.constant 0 : index
    %c0_328 = arith.constant 0 : index
    %367 = vector.load %arg6[%c3_326, %c0_327, %c0_328] : memref<9x64x128xf32, #tpu.memory_space<vmem>>, vector<1x64x128xf32>
    %368 = vector.shape_cast %367 : vector<1x64x128xf32> to vector<64x128xf32>
    %cst_329 = arith.constant dense<0.000000e+00> : vector<80x128xf32>
    %369 = tpu.matmul %366, %368, %cst_329 {dimension_numbers = #tpu.dot_dimension_numbers<[1], [0], [0], [1], [0, 0, 1, 1], [], []>} : vector<80x64xf32>, vector<64x128xf32>, vector<80x128xf32> -> vector<80x128xf32>
    %370 = arith.addf %365, %369 : vector<80x128xf32>
    %c11_330 = arith.constant 11 : index
    %c0_331 = arith.constant 0 : index
    %371 = vector.load %arg18[%c11_330, %c0_331] : memref<104x64xf32, #tpu.memory_space<vmem>>, vector<80x64xf32>
    %c4_332 = arith.constant 4 : index
    %c0_333 = arith.constant 0 : index
    %c0_334 = arith.constant 0 : index
    %372 = vector.load %arg6[%c4_332, %c0_333, %c0_334] : memref<9x64x128xf32, #tpu.memory_space<vmem>>, vector<1x64x128xf32>
    %373 = vector.shape_cast %372 : vector<1x64x128xf32> to vector<64x128xf32>
    %cst_335 = arith.constant dense<0.000000e+00> : vector<80x128xf32>
    %374 = tpu.matmul %371, %373, %cst_335 {dimension_numbers = #tpu.dot_dimension_numbers<[1], [0], [0], [1], [0, 0, 1, 1], [], []>} : vector<80x64xf32>, vector<64x128xf32>, vector<80x128xf32> -> vector<80x128xf32>
    %375 = arith.addf %370, %374 : vector<80x128xf32>
    %c12 = arith.constant 12 : index
    %c0_336 = arith.constant 0 : index
    %376 = vector.load %arg18[%c12, %c0_336] : memref<104x64xf32, #tpu.memory_space<vmem>>, vector<80x64xf32>
    %c5_337 = arith.constant 5 : index
    %c0_338 = arith.constant 0 : index
    %c0_339 = arith.constant 0 : index
    %377 = vector.load %arg6[%c5_337, %c0_338, %c0_339] : memref<9x64x128xf32, #tpu.memory_space<vmem>>, vector<1x64x128xf32>
    %378 = vector.shape_cast %377 : vector<1x64x128xf32> to vector<64x128xf32>
    %cst_340 = arith.constant dense<0.000000e+00> : vector<80x128xf32>
    %379 = tpu.matmul %376, %378, %cst_340 {dimension_numbers = #tpu.dot_dimension_numbers<[1], [0], [0], [1], [0, 0, 1, 1], [], []>} : vector<80x64xf32>, vector<64x128xf32>, vector<80x128xf32> -> vector<80x128xf32>
    %380 = arith.addf %375, %379 : vector<80x128xf32>
    %c20_341 = arith.constant 20 : index
    %c0_342 = arith.constant 0 : index
    %381 = vector.load %arg18[%c20_341, %c0_342] : memref<104x64xf32, #tpu.memory_space<vmem>>, vector<80x64xf32>
    %c6_343 = arith.constant 6 : index
    %c0_344 = arith.constant 0 : index
    %c0_345 = arith.constant 0 : index
    %382 = vector.load %arg6[%c6_343, %c0_344, %c0_345] : memref<9x64x128xf32, #tpu.memory_space<vmem>>, vector<1x64x128xf32>
    %383 = vector.shape_cast %382 : vector<1x64x128xf32> to vector<64x128xf32>
    %cst_346 = arith.constant dense<0.000000e+00> : vector<80x128xf32>
    %384 = tpu.matmul %381, %383, %cst_346 {dimension_numbers = #tpu.dot_dimension_numbers<[1], [0], [0], [1], [0, 0, 1, 1], [], []>} : vector<80x64xf32>, vector<64x128xf32>, vector<80x128xf32> -> vector<80x128xf32>
    %385 = arith.addf %380, %384 : vector<80x128xf32>
    %c21_347 = arith.constant 21 : index
    %c0_348 = arith.constant 0 : index
    %386 = vector.load %arg18[%c21_347, %c0_348] : memref<104x64xf32, #tpu.memory_space<vmem>>, vector<80x64xf32>
    %c7_349 = arith.constant 7 : index
    %c0_350 = arith.constant 0 : index
    %c0_351 = arith.constant 0 : index
    %387 = vector.load %arg6[%c7_349, %c0_350, %c0_351] : memref<9x64x128xf32, #tpu.memory_space<vmem>>, vector<1x64x128xf32>
    %388 = vector.shape_cast %387 : vector<1x64x128xf32> to vector<64x128xf32>
    %cst_352 = arith.constant dense<0.000000e+00> : vector<80x128xf32>
    %389 = tpu.matmul %386, %388, %cst_352 {dimension_numbers = #tpu.dot_dimension_numbers<[1], [0], [0], [1], [0, 0, 1, 1], [], []>} : vector<80x64xf32>, vector<64x128xf32>, vector<80x128xf32> -> vector<80x128xf32>
    %390 = arith.addf %385, %389 : vector<80x128xf32>
    %c22 = arith.constant 22 : index
    %c0_353 = arith.constant 0 : index
    %391 = vector.load %arg18[%c22, %c0_353] : memref<104x64xf32, #tpu.memory_space<vmem>>, vector<80x64xf32>
    %c8_354 = arith.constant 8 : index
    %c0_355 = arith.constant 0 : index
    %c0_356 = arith.constant 0 : index
    %392 = vector.load %arg6[%c8_354, %c0_355, %c0_356] : memref<9x64x128xf32, #tpu.memory_space<vmem>>, vector<1x64x128xf32>
    %393 = vector.shape_cast %392 : vector<1x64x128xf32> to vector<64x128xf32>
    %cst_357 = arith.constant dense<0.000000e+00> : vector<80x128xf32>
    %394 = tpu.matmul %391, %393, %cst_357 {dimension_numbers = #tpu.dot_dimension_numbers<[1], [0], [0], [1], [0, 0, 1, 1], [], []>} : vector<80x64xf32>, vector<64x128xf32>, vector<80x128xf32> -> vector<80x128xf32>
    %395 = arith.addf %390, %394 : vector<80x128xf32>
    %c0_358 = arith.constant 0 : index
    %c0_359 = arith.constant 0 : index
    %396 = vector.load %arg23[%c0_358, %c0_359] : memref<80x128xf32, #tpu.memory_space<vmem>>, vector<80x128xf32>
    tpu.vector_store %arg23[%c0_358, %c0_359], %395 {strides = array<i32>} : memref<80x128xf32, #tpu.memory_space<vmem>>, vector<80x128xf32>,
    %c0_360 = arith.constant 0 : index
    %c0_361 = arith.constant 0 : index
    %397 = vector.load %arg7[%c0_360, %c0_361] : memref<1x128xf32, #tpu.memory_space<vmem>>, vector<1x128xf32>
    %c0_362 = arith.constant 0 : index
    %c0_363 = arith.constant 0 : index
    %398 = vector.load %arg23[%c0_362, %c0_363] : memref<80x128xf32, #tpu.memory_space<vmem>>, vector<8x128xf32>
    %399 = vector.broadcast %397 : vector<1x128xf32> to vector<8x128xf32>
    %400 = arith.addf %398, %399 : vector<8x128xf32>
    %cst_364 = arith.constant 0.000000e+00 : f32
    %401 = vector.broadcast %cst_364 : f32 to vector<8x128xf32>
    %402 = arith.maximumf %400, %401 : vector<8x128xf32>
    %c11_365 = arith.constant 11 : index
    %c0_366 = arith.constant 0 : index
    %403 = vector.load %arg19[%c11_365, %c0_366] : memref<104x128xf32, #tpu.memory_space<vmem>>, vector<8x128xf32>
    tpu.vector_store %arg19[%c11_365, %c0_366], %402 {strides = array<i32>} : memref<104x128xf32, #tpu.memory_space<vmem>>, vector<8x128xf32>,
    %c10_367 = arith.constant 10 : index
    %c0_368 = arith.constant 0 : index
    %404 = vector.load %arg23[%c10_367, %c0_368] : memref<80x128xf32, #tpu.memory_space<vmem>>, vector<8x128xf32>
    %405 = vector.broadcast %397 : vector<1x128xf32> to vector<8x128xf32>
    %406 = arith.addf %404, %405 : vector<8x128xf32>
    %cst_369 = arith.constant 0.000000e+00 : f32
    %407 = vector.broadcast %cst_369 : f32 to vector<8x128xf32>
    %408 = arith.maximumf %406, %407 : vector<8x128xf32>
    %c21_370 = arith.constant 21 : index
    %c0_371 = arith.constant 0 : index
    %409 = vector.load %arg19[%c21_370, %c0_371] : memref<104x128xf32, #tpu.memory_space<vmem>>, vector<8x128xf32>
    tpu.vector_store %arg19[%c21_370, %c0_371], %408 {strides = array<i32>} : memref<104x128xf32, #tpu.memory_space<vmem>>, vector<8x128xf32>,
    %c20_372 = arith.constant 20 : index
    %c0_373 = arith.constant 0 : index
    %410 = vector.load %arg23[%c20_372, %c0_373] : memref<80x128xf32, #tpu.memory_space<vmem>>, vector<8x128xf32>
    %411 = vector.broadcast %397 : vector<1x128xf32> to vector<8x128xf32>
    %412 = arith.addf %410, %411 : vector<8x128xf32>
    %cst_374 = arith.constant 0.000000e+00 : f32
    %413 = vector.broadcast %cst_374 : f32 to vector<8x128xf32>
    %414 = arith.maximumf %412, %413 : vector<8x128xf32>
    %c31_375 = arith.constant 31 : index
    %c0_376 = arith.constant 0 : index
    %415 = vector.load %arg19[%c31_375, %c0_376] : memref<104x128xf32, #tpu.memory_space<vmem>>, vector<8x128xf32>
    tpu.vector_store %arg19[%c31_375, %c0_376], %414 {strides = array<i32>} : memref<104x128xf32, #tpu.memory_space<vmem>>, vector<8x128xf32>,
    %c30 = arith.constant 30 : index
    %c0_377 = arith.constant 0 : index
    %416 = vector.load %arg23[%c30, %c0_377] : memref<80x128xf32, #tpu.memory_space<vmem>>, vector<8x128xf32>
    %417 = vector.broadcast %397 : vector<1x128xf32> to vector<8x128xf32>
    %418 = arith.addf %416, %417 : vector<8x128xf32>
    %cst_378 = arith.constant 0.000000e+00 : f32
    %419 = vector.broadcast %cst_378 : f32 to vector<8x128xf32>
    %420 = arith.maximumf %418, %419 : vector<8x128xf32>
    %c41_379 = arith.constant 41 : index
    %c0_380 = arith.constant 0 : index
    %421 = vector.load %arg19[%c41_379, %c0_380] : memref<104x128xf32, #tpu.memory_space<vmem>>, vector<8x128xf32>
    tpu.vector_store %arg19[%c41_379, %c0_380], %420 {strides = array<i32>} : memref<104x128xf32, #tpu.memory_space<vmem>>, vector<8x128xf32>,
    %c40 = arith.constant 40 : index
    %c0_381 = arith.constant 0 : index
    %422 = vector.load %arg23[%c40, %c0_381] : memref<80x128xf32, #tpu.memory_space<vmem>>, vector<8x128xf32>
    %423 = vector.broadcast %397 : vector<1x128xf32> to vector<8x128xf32>
    %424 = arith.addf %422, %423 : vector<8x128xf32>
    %cst_382 = arith.constant 0.000000e+00 : f32
    %425 = vector.broadcast %cst_382 : f32 to vector<8x128xf32>
    %426 = arith.maximumf %424, %425 : vector<8x128xf32>
    %c51_383 = arith.constant 51 : index
    %c0_384 = arith.constant 0 : index
    %427 = vector.load %arg19[%c51_383, %c0_384] : memref<104x128xf32, #tpu.memory_space<vmem>>, vector<8x128xf32>
    tpu.vector_store %arg19[%c51_383, %c0_384], %426 {strides = array<i32>} : memref<104x128xf32, #tpu.memory_space<vmem>>, vector<8x128xf32>,
    %c50 = arith.constant 50 : index
    %c0_385 = arith.constant 0 : index
    %428 = vector.load %arg23[%c50, %c0_385] : memref<80x128xf32, #tpu.memory_space<vmem>>, vector<8x128xf32>
    %429 = vector.broadcast %397 : vector<1x128xf32> to vector<8x128xf32>
    %430 = arith.addf %428, %429 : vector<8x128xf32>
    %cst_386 = arith.constant 0.000000e+00 : f32
    %431 = vector.broadcast %cst_386 : f32 to vector<8x128xf32>
    %432 = arith.maximumf %430, %431 : vector<8x128xf32>
    %c61_387 = arith.constant 61 : index
    %c0_388 = arith.constant 0 : index
    %433 = vector.load %arg19[%c61_387, %c0_388] : memref<104x128xf32, #tpu.memory_space<vmem>>, vector<8x128xf32>
    tpu.vector_store %arg19[%c61_387, %c0_388], %432 {strides = array<i32>} : memref<104x128xf32, #tpu.memory_space<vmem>>, vector<8x128xf32>,
    %c60 = arith.constant 60 : index
    %c0_389 = arith.constant 0 : index
    %434 = vector.load %arg23[%c60, %c0_389] : memref<80x128xf32, #tpu.memory_space<vmem>>, vector<8x128xf32>
    %435 = vector.broadcast %397 : vector<1x128xf32> to vector<8x128xf32>
    %436 = arith.addf %434, %435 : vector<8x128xf32>
    %cst_390 = arith.constant 0.000000e+00 : f32
    %437 = vector.broadcast %cst_390 : f32 to vector<8x128xf32>
    %438 = arith.maximumf %436, %437 : vector<8x128xf32>
    %c71_391 = arith.constant 71 : index
    %c0_392 = arith.constant 0 : index
    %439 = vector.load %arg19[%c71_391, %c0_392] : memref<104x128xf32, #tpu.memory_space<vmem>>, vector<8x128xf32>
    tpu.vector_store %arg19[%c71_391, %c0_392], %438 {strides = array<i32>} : memref<104x128xf32, #tpu.memory_space<vmem>>, vector<8x128xf32>,
    %c70 = arith.constant 70 : index
    %c0_393 = arith.constant 0 : index
    %440 = vector.load %arg23[%c70, %c0_393] : memref<80x128xf32, #tpu.memory_space<vmem>>, vector<8x128xf32>
    %441 = vector.broadcast %397 : vector<1x128xf32> to vector<8x128xf32>
    %442 = arith.addf %440, %441 : vector<8x128xf32>
    %cst_394 = arith.constant 0.000000e+00 : f32
    %443 = vector.broadcast %cst_394 : f32 to vector<8x128xf32>
    %444 = arith.maximumf %442, %443 : vector<8x128xf32>
    %c81_395 = arith.constant 81 : index
    %c0_396 = arith.constant 0 : index
    %445 = vector.load %arg19[%c81_395, %c0_396] : memref<104x128xf32, #tpu.memory_space<vmem>>, vector<8x128xf32>
    tpu.vector_store %arg19[%c81_395, %c0_396], %444 {strides = array<i32>} : memref<104x128xf32, #tpu.memory_space<vmem>>, vector<8x128xf32>,
    %c0_397 = arith.constant 0 : index
    %c0_398 = arith.constant 0 : index
    %446 = vector.load %arg19[%c0_397, %c0_398] : memref<104x128xf32, #tpu.memory_space<vmem>>, vector<80x128xf32>
    %c0_399 = arith.constant 0 : index
    %c0_400 = arith.constant 0 : index
    %c0_401 = arith.constant 0 : index
    %447 = vector.load %arg8[%c0_399, %c0_400, %c0_401] : memref<9x128x128xf32, #tpu.memory_space<vmem>>, vector<1x128x128xf32>
    %448 = vector.shape_cast %447 : vector<1x128x128xf32> to vector<128x128xf32>
    %cst_402 = arith.constant dense<0.000000e+00> : vector<80x128xf32>
    %449 = tpu.matmul %446, %448, %cst_402 {dimension_numbers = #tpu.dot_dimension_numbers<[1], [0], [0], [1], [0, 0, 1, 1], [], []>} : vector<80x128xf32>, vector<128x128xf32>, vector<80x128xf32> -> vector<80x128xf32>
    %c1_403 = arith.constant 1 : index
    %c0_404 = arith.constant 0 : index
    %450 = vector.load %arg19[%c1_403, %c0_404] : memref<104x128xf32, #tpu.memory_space<vmem>>, vector<80x128xf32>
    %c1_405 = arith.constant 1 : index
    %c0_406 = arith.constant 0 : index
    %c0_407 = arith.constant 0 : index
    %451 = vector.load %arg8[%c1_405, %c0_406, %c0_407] : memref<9x128x128xf32, #tpu.memory_space<vmem>>, vector<1x128x128xf32>
    %452 = vector.shape_cast %451 : vector<1x128x128xf32> to vector<128x128xf32>
    %cst_408 = arith.constant dense<0.000000e+00> : vector<80x128xf32>
    %453 = tpu.matmul %450, %452, %cst_408 {dimension_numbers = #tpu.dot_dimension_numbers<[1], [0], [0], [1], [0, 0, 1, 1], [], []>} : vector<80x128xf32>, vector<128x128xf32>, vector<80x128xf32> -> vector<80x128xf32>
    %454 = arith.addf %449, %453 : vector<80x128xf32>
    %c2_409 = arith.constant 2 : index
    %c0_410 = arith.constant 0 : index
    %455 = vector.load %arg19[%c2_409, %c0_410] : memref<104x128xf32, #tpu.memory_space<vmem>>, vector<80x128xf32>
    %c2_411 = arith.constant 2 : index
    %c0_412 = arith.constant 0 : index
    %c0_413 = arith.constant 0 : index
    %456 = vector.load %arg8[%c2_411, %c0_412, %c0_413] : memref<9x128x128xf32, #tpu.memory_space<vmem>>, vector<1x128x128xf32>
    %457 = vector.shape_cast %456 : vector<1x128x128xf32> to vector<128x128xf32>
    %cst_414 = arith.constant dense<0.000000e+00> : vector<80x128xf32>
    %458 = tpu.matmul %455, %457, %cst_414 {dimension_numbers = #tpu.dot_dimension_numbers<[1], [0], [0], [1], [0, 0, 1, 1], [], []>} : vector<80x128xf32>, vector<128x128xf32>, vector<80x128xf32> -> vector<80x128xf32>
    %459 = arith.addf %454, %458 : vector<80x128xf32>
    %c10_415 = arith.constant 10 : index
    %c0_416 = arith.constant 0 : index
    %460 = vector.load %arg19[%c10_415, %c0_416] : memref<104x128xf32, #tpu.memory_space<vmem>>, vector<80x128xf32>
    %c3_417 = arith.constant 3 : index
    %c0_418 = arith.constant 0 : index
    %c0_419 = arith.constant 0 : index
    %461 = vector.load %arg8[%c3_417, %c0_418, %c0_419] : memref<9x128x128xf32, #tpu.memory_space<vmem>>, vector<1x128x128xf32>
    %462 = vector.shape_cast %461 : vector<1x128x128xf32> to vector<128x128xf32>
    %cst_420 = arith.constant dense<0.000000e+00> : vector<80x128xf32>
    %463 = tpu.matmul %460, %462, %cst_420 {dimension_numbers = #tpu.dot_dimension_numbers<[1], [0], [0], [1], [0, 0, 1, 1], [], []>} : vector<80x128xf32>, vector<128x128xf32>, vector<80x128xf32> -> vector<80x128xf32>
    %464 = arith.addf %459, %463 : vector<80x128xf32>
    %c11_421 = arith.constant 11 : index
    %c0_422 = arith.constant 0 : index
    %465 = vector.load %arg19[%c11_421, %c0_422] : memref<104x128xf32, #tpu.memory_space<vmem>>, vector<80x128xf32>
    %c4_423 = arith.constant 4 : index
    %c0_424 = arith.constant 0 : index
    %c0_425 = arith.constant 0 : index
    %466 = vector.load %arg8[%c4_423, %c0_424, %c0_425] : memref<9x128x128xf32, #tpu.memory_space<vmem>>, vector<1x128x128xf32>
    %467 = vector.shape_cast %466 : vector<1x128x128xf32> to vector<128x128xf32>
    %cst_426 = arith.constant dense<0.000000e+00> : vector<80x128xf32>
    %468 = tpu.matmul %465, %467, %cst_426 {dimension_numbers = #tpu.dot_dimension_numbers<[1], [0], [0], [1], [0, 0, 1, 1], [], []>} : vector<80x128xf32>, vector<128x128xf32>, vector<80x128xf32> -> vector<80x128xf32>
    %469 = arith.addf %464, %468 : vector<80x128xf32>
    %c12_427 = arith.constant 12 : index
    %c0_428 = arith.constant 0 : index
    %470 = vector.load %arg19[%c12_427, %c0_428] : memref<104x128xf32, #tpu.memory_space<vmem>>, vector<80x128xf32>
    %c5_429 = arith.constant 5 : index
    %c0_430 = arith.constant 0 : index
    %c0_431 = arith.constant 0 : index
    %471 = vector.load %arg8[%c5_429, %c0_430, %c0_431] : memref<9x128x128xf32, #tpu.memory_space<vmem>>, vector<1x128x128xf32>
    %472 = vector.shape_cast %471 : vector<1x128x128xf32> to vector<128x128xf32>
    %cst_432 = arith.constant dense<0.000000e+00> : vector<80x128xf32>
    %473 = tpu.matmul %470, %472, %cst_432 {dimension_numbers = #tpu.dot_dimension_numbers<[1], [0], [0], [1], [0, 0, 1, 1], [], []>} : vector<80x128xf32>, vector<128x128xf32>, vector<80x128xf32> -> vector<80x128xf32>
    %474 = arith.addf %469, %473 : vector<80x128xf32>
    %c20_433 = arith.constant 20 : index
    %c0_434 = arith.constant 0 : index
    %475 = vector.load %arg19[%c20_433, %c0_434] : memref<104x128xf32, #tpu.memory_space<vmem>>, vector<80x128xf32>
    %c6_435 = arith.constant 6 : index
    %c0_436 = arith.constant 0 : index
    %c0_437 = arith.constant 0 : index
    %476 = vector.load %arg8[%c6_435, %c0_436, %c0_437] : memref<9x128x128xf32, #tpu.memory_space<vmem>>, vector<1x128x128xf32>
    %477 = vector.shape_cast %476 : vector<1x128x128xf32> to vector<128x128xf32>
    %cst_438 = arith.constant dense<0.000000e+00> : vector<80x128xf32>
    %478 = tpu.matmul %475, %477, %cst_438 {dimension_numbers = #tpu.dot_dimension_numbers<[1], [0], [0], [1], [0, 0, 1, 1], [], []>} : vector<80x128xf32>, vector<128x128xf32>, vector<80x128xf32> -> vector<80x128xf32>
    %479 = arith.addf %474, %478 : vector<80x128xf32>
    %c21_439 = arith.constant 21 : index
    %c0_440 = arith.constant 0 : index
    %480 = vector.load %arg19[%c21_439, %c0_440] : memref<104x128xf32, #tpu.memory_space<vmem>>, vector<80x128xf32>
    %c7_441 = arith.constant 7 : index
    %c0_442 = arith.constant 0 : index
    %c0_443 = arith.constant 0 : index
    %481 = vector.load %arg8[%c7_441, %c0_442, %c0_443] : memref<9x128x128xf32, #tpu.memory_space<vmem>>, vector<1x128x128xf32>
    %482 = vector.shape_cast %481 : vector<1x128x128xf32> to vector<128x128xf32>
    %cst_444 = arith.constant dense<0.000000e+00> : vector<80x128xf32>
    %483 = tpu.matmul %480, %482, %cst_444 {dimension_numbers = #tpu.dot_dimension_numbers<[1], [0], [0], [1], [0, 0, 1, 1], [], []>} : vector<80x128xf32>, vector<128x128xf32>, vector<80x128xf32> -> vector<80x128xf32>
    %484 = arith.addf %479, %483 : vector<80x128xf32>
    %c22_445 = arith.constant 22 : index
    %c0_446 = arith.constant 0 : index
    %485 = vector.load %arg19[%c22_445, %c0_446] : memref<104x128xf32, #tpu.memory_space<vmem>>, vector<80x128xf32>
    %c8_447 = arith.constant 8 : index
    %c0_448 = arith.constant 0 : index
    %c0_449 = arith.constant 0 : index
    %486 = vector.load %arg8[%c8_447, %c0_448, %c0_449] : memref<9x128x128xf32, #tpu.memory_space<vmem>>, vector<1x128x128xf32>
    %487 = vector.shape_cast %486 : vector<1x128x128xf32> to vector<128x128xf32>
    %cst_450 = arith.constant dense<0.000000e+00> : vector<80x128xf32>
    %488 = tpu.matmul %485, %487, %cst_450 {dimension_numbers = #tpu.dot_dimension_numbers<[1], [0], [0], [1], [0, 0, 1, 1], [], []>} : vector<80x128xf32>, vector<128x128xf32>, vector<80x128xf32> -> vector<80x128xf32>
    %489 = arith.addf %484, %488 : vector<80x128xf32>
    %c0_451 = arith.constant 0 : index
    %c0_452 = arith.constant 0 : index
    %490 = vector.load %arg23[%c0_451, %c0_452] : memref<80x128xf32, #tpu.memory_space<vmem>>, vector<80x128xf32>
    tpu.vector_store %arg23[%c0_451, %c0_452], %489 {strides = array<i32>} : memref<80x128xf32, #tpu.memory_space<vmem>>, vector<80x128xf32>,
    %c0_453 = arith.constant 0 : index
    %c0_454 = arith.constant 0 : index
    %491 = vector.load %arg9[%c0_453, %c0_454] : memref<1x128xf32, #tpu.memory_space<vmem>>, vector<1x128xf32>
    %c0_455 = arith.constant 0 : index
    %c0_456 = arith.constant 0 : index
    %492 = tpu.strided_load %arg23[%c0_455, %c0_456] {strides = array<i32: 2, 1>} : memref<80x128xf32, #tpu.memory_space<vmem>>, vector<4x128xf32>
    %c1_457 = arith.constant 1 : index
    %c0_458 = arith.constant 0 : index
    %493 = tpu.strided_load %arg23[%c1_457, %c0_458] {strides = array<i32: 2, 1>} : memref<80x128xf32, #tpu.memory_space<vmem>>, vector<4x128xf32>
    %494 = arith.maximumf %492, %493 : vector<4x128xf32>
    %c10_459 = arith.constant 10 : index
    %c0_460 = arith.constant 0 : index
    %495 = tpu.strided_load %arg23[%c10_459, %c0_460] {strides = array<i32: 2, 1>} : memref<80x128xf32, #tpu.memory_space<vmem>>, vector<4x128xf32>
    %c11_461 = arith.constant 11 : index
    %c0_462 = arith.constant 0 : index
    %496 = tpu.strided_load %arg23[%c11_461, %c0_462] {strides = array<i32: 2, 1>} : memref<80x128xf32, #tpu.memory_space<vmem>>, vector<4x128xf32>
    %497 = arith.maximumf %495, %496 : vector<4x128xf32>
    %498 = arith.maximumf %494, %497 : vector<4x128xf32>
    %499 = vector.broadcast %491 : vector<1x128xf32> to vector<4x128xf32>
    %500 = arith.addf %498, %499 : vector<4x128xf32>
    %cst_463 = arith.constant 0.000000e+00 : f32
    %501 = vector.broadcast %cst_463 : f32 to vector<4x128xf32>
    %502 = arith.maximumf %500, %501 : vector<4x128xf32>
    %c16 = arith.constant 16 : index
    %c0_464 = arith.constant 0 : index
    %503 = vector.load %arg20[%c16, %c0_464] : memref<56x128xf32, #tpu.memory_space<vmem>>, vector<4x128xf32>
    tpu.vector_store %arg20[%c16, %c0_464], %502 {strides = array<i32>} : memref<56x128xf32, #tpu.memory_space<vmem>>, vector<4x128xf32>,
    %c20_465 = arith.constant 20 : index
    %c0_466 = arith.constant 0 : index
    %504 = tpu.strided_load %arg23[%c20_465, %c0_466] {strides = array<i32: 2, 1>} : memref<80x128xf32, #tpu.memory_space<vmem>>, vector<4x128xf32>
    %c21_467 = arith.constant 21 : index
    %c0_468 = arith.constant 0 : index
    %505 = tpu.strided_load %arg23[%c21_467, %c0_468] {strides = array<i32: 2, 1>} : memref<80x128xf32, #tpu.memory_space<vmem>>, vector<4x128xf32>
    %506 = arith.maximumf %504, %505 : vector<4x128xf32>
    %c30_469 = arith.constant 30 : index
    %c0_470 = arith.constant 0 : index
    %507 = tpu.strided_load %arg23[%c30_469, %c0_470] {strides = array<i32: 2, 1>} : memref<80x128xf32, #tpu.memory_space<vmem>>, vector<4x128xf32>
    %c31_471 = arith.constant 31 : index
    %c0_472 = arith.constant 0 : index
    %508 = tpu.strided_load %arg23[%c31_471, %c0_472] {strides = array<i32: 2, 1>} : memref<80x128xf32, #tpu.memory_space<vmem>>, vector<4x128xf32>
    %509 = arith.maximumf %507, %508 : vector<4x128xf32>
    %510 = arith.maximumf %506, %509 : vector<4x128xf32>
    %511 = vector.broadcast %491 : vector<1x128xf32> to vector<4x128xf32>
    %512 = arith.addf %510, %511 : vector<4x128xf32>
    %cst_473 = arith.constant 0.000000e+00 : f32
    %513 = vector.broadcast %cst_473 : f32 to vector<4x128xf32>
    %514 = arith.maximumf %512, %513 : vector<4x128xf32>
    %c23 = arith.constant 23 : index
    %c0_474 = arith.constant 0 : index
    %515 = vector.load %arg20[%c23, %c0_474] : memref<56x128xf32, #tpu.memory_space<vmem>>, vector<4x128xf32>
    tpu.vector_store %arg20[%c23, %c0_474], %514 {strides = array<i32>} : memref<56x128xf32, #tpu.memory_space<vmem>>, vector<4x128xf32>,
    %c40_475 = arith.constant 40 : index
    %c0_476 = arith.constant 0 : index
    %516 = tpu.strided_load %arg23[%c40_475, %c0_476] {strides = array<i32: 2, 1>} : memref<80x128xf32, #tpu.memory_space<vmem>>, vector<4x128xf32>
    %c41_477 = arith.constant 41 : index
    %c0_478 = arith.constant 0 : index
    %517 = tpu.strided_load %arg23[%c41_477, %c0_478] {strides = array<i32: 2, 1>} : memref<80x128xf32, #tpu.memory_space<vmem>>, vector<4x128xf32>
    %518 = arith.maximumf %516, %517 : vector<4x128xf32>
    %c50_479 = arith.constant 50 : index
    %c0_480 = arith.constant 0 : index
    %519 = tpu.strided_load %arg23[%c50_479, %c0_480] {strides = array<i32: 2, 1>} : memref<80x128xf32, #tpu.memory_space<vmem>>, vector<4x128xf32>
    %c51_481 = arith.constant 51 : index
    %c0_482 = arith.constant 0 : index
    %520 = tpu.strided_load %arg23[%c51_481, %c0_482] {strides = array<i32: 2, 1>} : memref<80x128xf32, #tpu.memory_space<vmem>>, vector<4x128xf32>
    %521 = arith.maximumf %519, %520 : vector<4x128xf32>
    %522 = arith.maximumf %518, %521 : vector<4x128xf32>
    %523 = vector.broadcast %491 : vector<1x128xf32> to vector<4x128xf32>
    %524 = arith.addf %522, %523 : vector<4x128xf32>
    %cst_483 = arith.constant 0.000000e+00 : f32
    %525 = vector.broadcast %cst_483 : f32 to vector<4x128xf32>
    %526 = arith.maximumf %524, %525 : vector<4x128xf32>
    %c30_484 = arith.constant 30 : index
    %c0_485 = arith.constant 0 : index
    %527 = vector.load %arg20[%c30_484, %c0_485] : memref<56x128xf32, #tpu.memory_space<vmem>>, vector<4x128xf32>
    tpu.vector_store %arg20[%c30_484, %c0_485], %526 {strides = array<i32>} : memref<56x128xf32, #tpu.memory_space<vmem>>, vector<4x128xf32>,
    %c60_486 = arith.constant 60 : index
    %c0_487 = arith.constant 0 : index
    %528 = tpu.strided_load %arg23[%c60_486, %c0_487] {strides = array<i32: 2, 1>} : memref<80x128xf32, #tpu.memory_space<vmem>>, vector<4x128xf32>
    %c61_488 = arith.constant 61 : index
    %c0_489 = arith.constant 0 : index
    %529 = tpu.strided_load %arg23[%c61_488, %c0_489] {strides = array<i32: 2, 1>} : memref<80x128xf32, #tpu.memory_space<vmem>>, vector<4x128xf32>
    %530 = arith.maximumf %528, %529 : vector<4x128xf32>
    %c70_490 = arith.constant 70 : index
    %c0_491 = arith.constant 0 : index
    %531 = tpu.strided_load %arg23[%c70_490, %c0_491] {strides = array<i32: 2, 1>} : memref<80x128xf32, #tpu.memory_space<vmem>>, vector<4x128xf32>
    %c71_492 = arith.constant 71 : index
    %c0_493 = arith.constant 0 : index
    %532 = tpu.strided_load %arg23[%c71_492, %c0_493] {strides = array<i32: 2, 1>} : memref<80x128xf32, #tpu.memory_space<vmem>>, vector<4x128xf32>
    %533 = arith.maximumf %531, %532 : vector<4x128xf32>
    %534 = arith.maximumf %530, %533 : vector<4x128xf32>
    %535 = vector.broadcast %491 : vector<1x128xf32> to vector<4x128xf32>
    %536 = arith.addf %534, %535 : vector<4x128xf32>
    %cst_494 = arith.constant 0.000000e+00 : f32
    %537 = vector.broadcast %cst_494 : f32 to vector<4x128xf32>
    %538 = arith.maximumf %536, %537 : vector<4x128xf32>
    %c37_495 = arith.constant 37 : index
    %c0_496 = arith.constant 0 : index
    %539 = vector.load %arg20[%c37_495, %c0_496] : memref<56x128xf32, #tpu.memory_space<vmem>>, vector<4x128xf32>
    tpu.vector_store %arg20[%c37_495, %c0_496], %538 {strides = array<i32>} : memref<56x128xf32, #tpu.memory_space<vmem>>, vector<4x128xf32>,
    %c0_497 = arith.constant 0 : index
    %c0_498 = arith.constant 0 : index
    %540 = vector.load %arg20[%c0_497, %c0_498] : memref<56x128xf32, #tpu.memory_space<vmem>>, vector<28x128xf32>
    %c0_499 = arith.constant 0 : index
    %c0_500 = arith.constant 0 : index
    %c0_501 = arith.constant 0 : index
    %541 = vector.load %arg10[%c0_499, %c0_500, %c0_501] : memref<16x128x160xf32, #tpu.memory_space<vmem>>, vector<1x128x160xf32>
    %542 = vector.shape_cast %541 : vector<1x128x160xf32> to vector<128x160xf32>
    %cst_502 = arith.constant dense<0.000000e+00> : vector<28x160xf32>
    %543 = tpu.matmul %540, %542, %cst_502 {dimension_numbers = #tpu.dot_dimension_numbers<[1], [0], [0], [1], [0, 0, 1, 1], [], []>} : vector<28x128xf32>, vector<128x160xf32>, vector<28x160xf32> -> vector<28x160xf32>
    %c1_503 = arith.constant 1 : index
    %c0_504 = arith.constant 0 : index
    %544 = vector.load %arg20[%c1_503, %c0_504] : memref<56x128xf32, #tpu.memory_space<vmem>>, vector<28x128xf32>
    %c1_505 = arith.constant 1 : index
    %c0_506 = arith.constant 0 : index
    %c0_507 = arith.constant 0 : index
    %545 = vector.load %arg10[%c1_505, %c0_506, %c0_507] : memref<16x128x160xf32, #tpu.memory_space<vmem>>, vector<1x128x160xf32>
    %546 = vector.shape_cast %545 : vector<1x128x160xf32> to vector<128x160xf32>
    %cst_508 = arith.constant dense<0.000000e+00> : vector<28x160xf32>
    %547 = tpu.matmul %544, %546, %cst_508 {dimension_numbers = #tpu.dot_dimension_numbers<[1], [0], [0], [1], [0, 0, 1, 1], [], []>} : vector<28x128xf32>, vector<128x160xf32>, vector<28x160xf32> -> vector<28x160xf32>
    %548 = arith.addf %543, %547 : vector<28x160xf32>
    %c2_509 = arith.constant 2 : index
    %c0_510 = arith.constant 0 : index
    %549 = vector.load %arg20[%c2_509, %c0_510] : memref<56x128xf32, #tpu.memory_space<vmem>>, vector<28x128xf32>
    %c2_511 = arith.constant 2 : index
    %c0_512 = arith.constant 0 : index
    %c0_513 = arith.constant 0 : index
    %550 = vector.load %arg10[%c2_511, %c0_512, %c0_513] : memref<16x128x160xf32, #tpu.memory_space<vmem>>, vector<1x128x160xf32>
    %551 = vector.shape_cast %550 : vector<1x128x160xf32> to vector<128x160xf32>
    %cst_514 = arith.constant dense<0.000000e+00> : vector<28x160xf32>
    %552 = tpu.matmul %549, %551, %cst_514 {dimension_numbers = #tpu.dot_dimension_numbers<[1], [0], [0], [1], [0, 0, 1, 1], [], []>} : vector<28x128xf32>, vector<128x160xf32>, vector<28x160xf32> -> vector<28x160xf32>
    %553 = arith.addf %548, %552 : vector<28x160xf32>
    %c3_515 = arith.constant 3 : index
    %c0_516 = arith.constant 0 : index
    %554 = vector.load %arg20[%c3_515, %c0_516] : memref<56x128xf32, #tpu.memory_space<vmem>>, vector<28x128xf32>
    %c3_517 = arith.constant 3 : index
    %c0_518 = arith.constant 0 : index
    %c0_519 = arith.constant 0 : index
    %555 = vector.load %arg10[%c3_517, %c0_518, %c0_519] : memref<16x128x160xf32, #tpu.memory_space<vmem>>, vector<1x128x160xf32>
    %556 = vector.shape_cast %555 : vector<1x128x160xf32> to vector<128x160xf32>
    %cst_520 = arith.constant dense<0.000000e+00> : vector<28x160xf32>
    %557 = tpu.matmul %554, %556, %cst_520 {dimension_numbers = #tpu.dot_dimension_numbers<[1], [0], [0], [1], [0, 0, 1, 1], [], []>} : vector<28x128xf32>, vector<128x160xf32>, vector<28x160xf32> -> vector<28x160xf32>
    %558 = arith.addf %553, %557 : vector<28x160xf32>
    %c7_521 = arith.constant 7 : index
    %c0_522 = arith.constant 0 : index
    %559 = vector.load %arg20[%c7_521, %c0_522] : memref<56x128xf32, #tpu.memory_space<vmem>>, vector<28x128xf32>
    %c4_523 = arith.constant 4 : index
    %c0_524 = arith.constant 0 : index
    %c0_525 = arith.constant 0 : index
    %560 = vector.load %arg10[%c4_523, %c0_524, %c0_525] : memref<16x128x160xf32, #tpu.memory_space<vmem>>, vector<1x128x160xf32>
    %561 = vector.shape_cast %560 : vector<1x128x160xf32> to vector<128x160xf32>
    %cst_526 = arith.constant dense<0.000000e+00> : vector<28x160xf32>
    %562 = tpu.matmul %559, %561, %cst_526 {dimension_numbers = #tpu.dot_dimension_numbers<[1], [0], [0], [1], [0, 0, 1, 1], [], []>} : vector<28x128xf32>, vector<128x160xf32>, vector<28x160xf32> -> vector<28x160xf32>
    %563 = arith.addf %558, %562 : vector<28x160xf32>
    %c8_527 = arith.constant 8 : index
    %c0_528 = arith.constant 0 : index
    %564 = vector.load %arg20[%c8_527, %c0_528] : memref<56x128xf32, #tpu.memory_space<vmem>>, vector<28x128xf32>
    %c5_529 = arith.constant 5 : index
    %c0_530 = arith.constant 0 : index
    %c0_531 = arith.constant 0 : index
    %565 = vector.load %arg10[%c5_529, %c0_530, %c0_531] : memref<16x128x160xf32, #tpu.memory_space<vmem>>, vector<1x128x160xf32>
    %566 = vector.shape_cast %565 : vector<1x128x160xf32> to vector<128x160xf32>
    %cst_532 = arith.constant dense<0.000000e+00> : vector<28x160xf32>
    %567 = tpu.matmul %564, %566, %cst_532 {dimension_numbers = #tpu.dot_dimension_numbers<[1], [0], [0], [1], [0, 0, 1, 1], [], []>} : vector<28x128xf32>, vector<128x160xf32>, vector<28x160xf32> -> vector<28x160xf32>
    %568 = arith.addf %563, %567 : vector<28x160xf32>
    %c9 = arith.constant 9 : index
    %c0_533 = arith.constant 0 : index
    %569 = vector.load %arg20[%c9, %c0_533] : memref<56x128xf32, #tpu.memory_space<vmem>>, vector<28x128xf32>
    %c6_534 = arith.constant 6 : index
    %c0_535 = arith.constant 0 : index
    %c0_536 = arith.constant 0 : index
    %570 = vector.load %arg10[%c6_534, %c0_535, %c0_536] : memref<16x128x160xf32, #tpu.memory_space<vmem>>, vector<1x128x160xf32>
    %571 = vector.shape_cast %570 : vector<1x128x160xf32> to vector<128x160xf32>
    %cst_537 = arith.constant dense<0.000000e+00> : vector<28x160xf32>
    %572 = tpu.matmul %569, %571, %cst_537 {dimension_numbers = #tpu.dot_dimension_numbers<[1], [0], [0], [1], [0, 0, 1, 1], [], []>} : vector<28x128xf32>, vector<128x160xf32>, vector<28x160xf32> -> vector<28x160xf32>
    %573 = arith.addf %568, %572 : vector<28x160xf32>
    %c10_538 = arith.constant 10 : index
    %c0_539 = arith.constant 0 : index
    %574 = vector.load %arg20[%c10_538, %c0_539] : memref<56x128xf32, #tpu.memory_space<vmem>>, vector<28x128xf32>
    %c7_540 = arith.constant 7 : index
    %c0_541 = arith.constant 0 : index
    %c0_542 = arith.constant 0 : index
    %575 = vector.load %arg10[%c7_540, %c0_541, %c0_542] : memref<16x128x160xf32, #tpu.memory_space<vmem>>, vector<1x128x160xf32>
    %576 = vector.shape_cast %575 : vector<1x128x160xf32> to vector<128x160xf32>
    %cst_543 = arith.constant dense<0.000000e+00> : vector<28x160xf32>
    %577 = tpu.matmul %574, %576, %cst_543 {dimension_numbers = #tpu.dot_dimension_numbers<[1], [0], [0], [1], [0, 0, 1, 1], [], []>} : vector<28x128xf32>, vector<128x160xf32>, vector<28x160xf32> -> vector<28x160xf32>
    %578 = arith.addf %573, %577 : vector<28x160xf32>
    %c14 = arith.constant 14 : index
    %c0_544 = arith.constant 0 : index
    %579 = vector.load %arg20[%c14, %c0_544] : memref<56x128xf32, #tpu.memory_space<vmem>>, vector<28x128xf32>
    %c8_545 = arith.constant 8 : index
    %c0_546 = arith.constant 0 : index
    %c0_547 = arith.constant 0 : index
    %580 = vector.load %arg10[%c8_545, %c0_546, %c0_547] : memref<16x128x160xf32, #tpu.memory_space<vmem>>, vector<1x128x160xf32>
    %581 = vector.shape_cast %580 : vector<1x128x160xf32> to vector<128x160xf32>
    %cst_548 = arith.constant dense<0.000000e+00> : vector<28x160xf32>
    %582 = tpu.matmul %579, %581, %cst_548 {dimension_numbers = #tpu.dot_dimension_numbers<[1], [0], [0], [1], [0, 0, 1, 1], [], []>} : vector<28x128xf32>, vector<128x160xf32>, vector<28x160xf32> -> vector<28x160xf32>
    %583 = arith.addf %578, %582 : vector<28x160xf32>
    %c15 = arith.constant 15 : index
    %c0_549 = arith.constant 0 : index
    %584 = vector.load %arg20[%c15, %c0_549] : memref<56x128xf32, #tpu.memory_space<vmem>>, vector<28x128xf32>
    %c9_550 = arith.constant 9 : index
    %c0_551 = arith.constant 0 : index
    %c0_552 = arith.constant 0 : index
    %585 = vector.load %arg10[%c9_550, %c0_551, %c0_552] : memref<16x128x160xf32, #tpu.memory_space<vmem>>, vector<1x128x160xf32>
    %586 = vector.shape_cast %585 : vector<1x128x160xf32> to vector<128x160xf32>
    %cst_553 = arith.constant dense<0.000000e+00> : vector<28x160xf32>
    %587 = tpu.matmul %584, %586, %cst_553 {dimension_numbers = #tpu.dot_dimension_numbers<[1], [0], [0], [1], [0, 0, 1, 1], [], []>} : vector<28x128xf32>, vector<128x160xf32>, vector<28x160xf32> -> vector<28x160xf32>
    %588 = arith.addf %583, %587 : vector<28x160xf32>
    %c16_554 = arith.constant 16 : index
    %c0_555 = arith.constant 0 : index
    %589 = vector.load %arg20[%c16_554, %c0_555] : memref<56x128xf32, #tpu.memory_space<vmem>>, vector<28x128xf32>
    %c10_556 = arith.constant 10 : index
    %c0_557 = arith.constant 0 : index
    %c0_558 = arith.constant 0 : index
    %590 = vector.load %arg10[%c10_556, %c0_557, %c0_558] : memref<16x128x160xf32, #tpu.memory_space<vmem>>, vector<1x128x160xf32>
    %591 = vector.shape_cast %590 : vector<1x128x160xf32> to vector<128x160xf32>
    %cst_559 = arith.constant dense<0.000000e+00> : vector<28x160xf32>
    %592 = tpu.matmul %589, %591, %cst_559 {dimension_numbers = #tpu.dot_dimension_numbers<[1], [0], [0], [1], [0, 0, 1, 1], [], []>} : vector<28x128xf32>, vector<128x160xf32>, vector<28x160xf32> -> vector<28x160xf32>
    %593 = arith.addf %588, %592 : vector<28x160xf32>
    %c17 = arith.constant 17 : index
    %c0_560 = arith.constant 0 : index
    %594 = vector.load %arg20[%c17, %c0_560] : memref<56x128xf32, #tpu.memory_space<vmem>>, vector<28x128xf32>
    %c11_561 = arith.constant 11 : index
    %c0_562 = arith.constant 0 : index
    %c0_563 = arith.constant 0 : index
    %595 = vector.load %arg10[%c11_561, %c0_562, %c0_563] : memref<16x128x160xf32, #tpu.memory_space<vmem>>, vector<1x128x160xf32>
    %596 = vector.shape_cast %595 : vector<1x128x160xf32> to vector<128x160xf32>
    %cst_564 = arith.constant dense<0.000000e+00> : vector<28x160xf32>
    %597 = tpu.matmul %594, %596, %cst_564 {dimension_numbers = #tpu.dot_dimension_numbers<[1], [0], [0], [1], [0, 0, 1, 1], [], []>} : vector<28x128xf32>, vector<128x160xf32>, vector<28x160xf32> -> vector<28x160xf32>
    %598 = arith.addf %593, %597 : vector<28x160xf32>
    %c21_565 = arith.constant 21 : index
    %c0_566 = arith.constant 0 : index
    %599 = vector.load %arg20[%c21_565, %c0_566] : memref<56x128xf32, #tpu.memory_space<vmem>>, vector<28x128xf32>
    %c12_567 = arith.constant 12 : index
    %c0_568 = arith.constant 0 : index
    %c0_569 = arith.constant 0 : index
    %600 = vector.load %arg10[%c12_567, %c0_568, %c0_569] : memref<16x128x160xf32, #tpu.memory_space<vmem>>, vector<1x128x160xf32>
    %601 = vector.shape_cast %600 : vector<1x128x160xf32> to vector<128x160xf32>
    %cst_570 = arith.constant dense<0.000000e+00> : vector<28x160xf32>
    %602 = tpu.matmul %599, %601, %cst_570 {dimension_numbers = #tpu.dot_dimension_numbers<[1], [0], [0], [1], [0, 0, 1, 1], [], []>} : vector<28x128xf32>, vector<128x160xf32>, vector<28x160xf32> -> vector<28x160xf32>
    %603 = arith.addf %598, %602 : vector<28x160xf32>
    %c22_571 = arith.constant 22 : index
    %c0_572 = arith.constant 0 : index
    %604 = vector.load %arg20[%c22_571, %c0_572] : memref<56x128xf32, #tpu.memory_space<vmem>>, vector<28x128xf32>
    %c13 = arith.constant 13 : index
    %c0_573 = arith.constant 0 : index
    %c0_574 = arith.constant 0 : index
    %605 = vector.load %arg10[%c13, %c0_573, %c0_574] : memref<16x128x160xf32, #tpu.memory_space<vmem>>, vector<1x128x160xf32>
    %606 = vector.shape_cast %605 : vector<1x128x160xf32> to vector<128x160xf32>
    %cst_575 = arith.constant dense<0.000000e+00> : vector<28x160xf32>
    %607 = tpu.matmul %604, %606, %cst_575 {dimension_numbers = #tpu.dot_dimension_numbers<[1], [0], [0], [1], [0, 0, 1, 1], [], []>} : vector<28x128xf32>, vector<128x160xf32>, vector<28x160xf32> -> vector<28x160xf32>
    %608 = arith.addf %603, %607 : vector<28x160xf32>
    %c23_576 = arith.constant 23 : index
    %c0_577 = arith.constant 0 : index
    %609 = vector.load %arg20[%c23_576, %c0_577] : memref<56x128xf32, #tpu.memory_space<vmem>>, vector<28x128xf32>
    %c14_578 = arith.constant 14 : index
    %c0_579 = arith.constant 0 : index
    %c0_580 = arith.constant 0 : index
    %610 = vector.load %arg10[%c14_578, %c0_579, %c0_580] : memref<16x128x160xf32, #tpu.memory_space<vmem>>, vector<1x128x160xf32>
    %611 = vector.shape_cast %610 : vector<1x128x160xf32> to vector<128x160xf32>
    %cst_581 = arith.constant dense<0.000000e+00> : vector<28x160xf32>
    %612 = tpu.matmul %609, %611, %cst_581 {dimension_numbers = #tpu.dot_dimension_numbers<[1], [0], [0], [1], [0, 0, 1, 1], [], []>} : vector<28x128xf32>, vector<128x160xf32>, vector<28x160xf32> -> vector<28x160xf32>
    %613 = arith.addf %608, %612 : vector<28x160xf32>
    %c24 = arith.constant 24 : index
    %c0_582 = arith.constant 0 : index
    %614 = vector.load %arg20[%c24, %c0_582] : memref<56x128xf32, #tpu.memory_space<vmem>>, vector<28x128xf32>
    %c15_583 = arith.constant 15 : index
    %c0_584 = arith.constant 0 : index
    %c0_585 = arith.constant 0 : index
    %615 = vector.load %arg10[%c15_583, %c0_584, %c0_585] : memref<16x128x160xf32, #tpu.memory_space<vmem>>, vector<1x128x160xf32>
    %616 = vector.shape_cast %615 : vector<1x128x160xf32> to vector<128x160xf32>
    %cst_586 = arith.constant dense<0.000000e+00> : vector<28x160xf32>
    %617 = tpu.matmul %614, %616, %cst_586 {dimension_numbers = #tpu.dot_dimension_numbers<[1], [0], [0], [1], [0, 0, 1, 1], [], []>} : vector<28x128xf32>, vector<128x160xf32>, vector<28x160xf32> -> vector<28x160xf32>
    %618 = arith.addf %613, %617 : vector<28x160xf32>
    %c0_587 = arith.constant 0 : index
    %c0_588 = arith.constant 0 : index
    %619 = vector.load %arg24[%c0_587, %c0_588] : memref<28x160xf32, #tpu.memory_space<vmem>>, vector<28x160xf32>
    tpu.vector_store %arg24[%c0_587, %c0_588], %618 {strides = array<i32>} : memref<28x160xf32, #tpu.memory_space<vmem>>, vector<28x160xf32>,
    %c0_589 = arith.constant 0 : index
    %c0_590 = arith.constant 0 : index
    %620 = vector.load %arg11[%c0_589, %c0_590] : memref<1x160xf32, #tpu.memory_space<vmem>>, vector<1x160xf32>
    %c0_591 = arith.constant 0 : index
    %c0_592 = arith.constant 0 : index
    %621 = vector.load %arg24[%c0_591, %c0_592] : memref<28x160xf32, #tpu.memory_space<vmem>>, vector<4x160xf32>
    %622 = vector.broadcast %620 : vector<1x160xf32> to vector<4x160xf32>
    %623 = arith.addf %621, %622 : vector<4x160xf32>
    %cst_593 = arith.constant 0.000000e+00 : f32
    %624 = vector.broadcast %cst_593 : f32 to vector<4x160xf32>
    %625 = arith.maximumf %623, %624 : vector<4x160xf32>
    %c0_594 = arith.constant 0 : index
    %c0_595 = arith.constant 0 : index
    %626 = vector.load %arg21[%c0_594, %c0_595] : memref<16x160xf32, #tpu.memory_space<vmem>>, vector<4x160xf32>
    tpu.vector_store %arg21[%c0_594, %c0_595], %625 {strides = array<i32>} : memref<16x160xf32, #tpu.memory_space<vmem>>, vector<4x160xf32>,
    %c7_596 = arith.constant 7 : index
    %c0_597 = arith.constant 0 : index
    %627 = vector.load %arg24[%c7_596, %c0_597] : memref<28x160xf32, #tpu.memory_space<vmem>>, vector<4x160xf32>
    %628 = vector.broadcast %620 : vector<1x160xf32> to vector<4x160xf32>
    %629 = arith.addf %627, %628 : vector<4x160xf32>
    %cst_598 = arith.constant 0.000000e+00 : f32
    %630 = vector.broadcast %cst_598 : f32 to vector<4x160xf32>
    %631 = arith.maximumf %629, %630 : vector<4x160xf32>
    %c4_599 = arith.constant 4 : index
    %c0_600 = arith.constant 0 : index
    %632 = vector.load %arg21[%c4_599, %c0_600] : memref<16x160xf32, #tpu.memory_space<vmem>>, vector<4x160xf32>
    tpu.vector_store %arg21[%c4_599, %c0_600], %631 {strides = array<i32>} : memref<16x160xf32, #tpu.memory_space<vmem>>, vector<4x160xf32>,
    %c14_601 = arith.constant 14 : index
    %c0_602 = arith.constant 0 : index
    %633 = vector.load %arg24[%c14_601, %c0_602] : memref<28x160xf32, #tpu.memory_space<vmem>>, vector<4x160xf32>
    %634 = vector.broadcast %620 : vector<1x160xf32> to vector<4x160xf32>
    %635 = arith.addf %633, %634 : vector<4x160xf32>
    %cst_603 = arith.constant 0.000000e+00 : f32
    %636 = vector.broadcast %cst_603 : f32 to vector<4x160xf32>
    %637 = arith.maximumf %635, %636 : vector<4x160xf32>
    %c8_604 = arith.constant 8 : index
    %c0_605 = arith.constant 0 : index
    %638 = vector.load %arg21[%c8_604, %c0_605] : memref<16x160xf32, #tpu.memory_space<vmem>>, vector<4x160xf32>
    tpu.vector_store %arg21[%c8_604, %c0_605], %637 {strides = array<i32>} : memref<16x160xf32, #tpu.memory_space<vmem>>, vector<4x160xf32>,
    %c21_606 = arith.constant 21 : index
    %c0_607 = arith.constant 0 : index
    %639 = vector.load %arg24[%c21_606, %c0_607] : memref<28x160xf32, #tpu.memory_space<vmem>>, vector<4x160xf32>
    %640 = vector.broadcast %620 : vector<1x160xf32> to vector<4x160xf32>
    %641 = arith.addf %639, %640 : vector<4x160xf32>
    %cst_608 = arith.constant 0.000000e+00 : f32
    %642 = vector.broadcast %cst_608 : f32 to vector<4x160xf32>
    %643 = arith.maximumf %641, %642 : vector<4x160xf32>
    %c12_609 = arith.constant 12 : index
    %c0_610 = arith.constant 0 : index
    %644 = vector.load %arg21[%c12_609, %c0_610] : memref<16x160xf32, #tpu.memory_space<vmem>>, vector<4x160xf32>
    tpu.vector_store %arg21[%c12_609, %c0_610], %643 {strides = array<i32>} : memref<16x160xf32, #tpu.memory_space<vmem>>, vector<4x160xf32>,
    %c0_611 = arith.constant 0 : index
    %c0_612 = arith.constant 0 : index
    %645 = vector.load %arg21[%c0_611, %c0_612] : memref<16x160xf32, #tpu.memory_space<vmem>>, vector<16x160xf32>
    %c0_613 = arith.constant 0 : index
    %c0_614 = arith.constant 0 : index
    %646 = vector.load %arg12[%c0_613, %c0_614] : memref<160x160xf32, #tpu.memory_space<vmem>>, vector<160x160xf32>
    %cst_615 = arith.constant dense<0.000000e+00> : vector<16x160xf32>
    %647 = tpu.matmul %645, %646, %cst_615 {dimension_numbers = #tpu.dot_dimension_numbers<[1], [0], [0], [1], [0, 0, 1, 1], [], []>} : vector<16x160xf32>, vector<160x160xf32>, vector<16x160xf32> -> vector<16x160xf32>
    %c0_616 = arith.constant 0 : index
    %c0_617 = arith.constant 0 : index
    %648 = vector.load %arg13[%c0_616, %c0_617] : memref<1x160xf32, #tpu.memory_space<vmem>>, vector<1x160xf32>
    %649 = vector.broadcast %648 : vector<1x160xf32> to vector<16x160xf32>
    %650 = arith.addf %647, %649 : vector<16x160xf32>
    %cst_618 = arith.constant 0.000000e+00 : f32
    %651 = vector.broadcast %cst_618 : f32 to vector<16x160xf32>
    %652 = arith.maximumf %650, %651 : vector<16x160xf32>
    %c0_619 = arith.constant 0 : index
    %c0_620 = arith.constant 0 : index
    %653 = vector.load %arg14[%c0_619, %c0_620] : memref<160x256xf32, #tpu.memory_space<vmem>>, vector<160x256xf32>
    %cst_621 = arith.constant dense<0.000000e+00> : vector<16x256xf32>
    %654 = tpu.matmul %652, %653, %cst_621 {dimension_numbers = #tpu.dot_dimension_numbers<[1], [0], [0], [1], [0, 0, 1, 1], [], []>} : vector<16x160xf32>, vector<160x256xf32>, vector<16x256xf32> -> vector<16x256xf32>
    %c0_622 = arith.constant 0 : index
    %c0_623 = arith.constant 0 : index
    %655 = vector.load %arg15[%c0_622, %c0_623] : memref<1x256xf32, #tpu.memory_space<vmem>>, vector<1x256xf32>
    %656 = vector.broadcast %655 : vector<1x256xf32> to vector<16x256xf32>
    %657 = arith.addf %654, %656 : vector<16x256xf32>
    %c0_624 = arith.constant 0 : index
    %c0_625 = arith.constant 0 : index
    %c0_626 = arith.constant 0 : index
    %658 = vector.load %arg16[%c0_624, %c0_625, %c0_626] : memref<1x16x256xf32, #tpu.memory_space<vmem>>, vector<1x16x256xf32>
    %659 = vector.shape_cast %658 : vector<1x16x256xf32> to vector<16x256xf32>
    %660 = vector.shape_cast %657 : vector<16x256xf32> to vector<1x16x256xf32>
    tpu.vector_store %arg16[%c0_624, %c0_625, %c0_626], %660 {strides = array<i32>} : memref<1x16x256xf32, #tpu.memory_space<vmem>>, vector<1x16x256xf32>,
    return
  }
  func.func @transform_0(%arg0: i32) -> (i32, i32, i32) {
    %c0_i32 = arith.constant 0 : i32
    %c0_i32_0 = arith.constant 0 : i32
    %c0_i32_1 = arith.constant 0 : i32
    return %arg0, %c0_i32, %c0_i32_0 : i32, i32, i32
  }
  func.func @transform_1(%arg0: i32) -> (i32, i32) {
    %c0_i32 = arith.constant 0 : i32
    %c0_i32_0 = arith.constant 0 : i32
    %c0_i32_1 = arith.constant 0 : i32
    return %c0_i32, %c0_i32_0 : i32, i32
  }
  func.func @transform_2(%arg0: i32) -> (i32, i32) {
    %c0_i32 = arith.constant 0 : i32
    %c0_i32_0 = arith.constant 0 : i32
    %c0_i32_1 = arith.constant 0 : i32
    return %c0_i32, %c0_i32_0 : i32, i32
  }
  func.func @transform_3(%arg0: i32) -> (i32, i32, i32) {
    %c0_i32 = arith.constant 0 : i32
    %c0_i32_0 = arith.constant 0 : i32
    %c0_i32_1 = arith.constant 0 : i32
    %c0_i32_2 = arith.constant 0 : i32
    return %c0_i32, %c0_i32_0, %c0_i32_1 : i32, i32, i32
  }
  func.func @transform_4(%arg0: i32) -> (i32, i32) {
    %c0_i32 = arith.constant 0 : i32
    %c0_i32_0 = arith.constant 0 : i32
    %c0_i32_1 = arith.constant 0 : i32
    return %c0_i32, %c0_i32_0 : i32, i32
  }
  func.func @transform_5(%arg0: i32) -> (i32, i32, i32) {
    %c0_i32 = arith.constant 0 : i32
    %c0_i32_0 = arith.constant 0 : i32
    %c0_i32_1 = arith.constant 0 : i32
    %c0_i32_2 = arith.constant 0 : i32
    return %c0_i32, %c0_i32_0, %c0_i32_1 : i32, i32, i32
  }
  func.func @transform_6(%arg0: i32) -> (i32, i32) {
    %c0_i32 = arith.constant 0 : i32
    %c0_i32_0 = arith.constant 0 : i32
    %c0_i32_1 = arith.constant 0 : i32
    return %c0_i32, %c0_i32_0 : i32, i32
  }
  func.func @transform_7(%arg0: i32) -> (i32, i32, i32) {
    %c0_i32 = arith.constant 0 : i32
    %c0_i32_0 = arith.constant 0 : i32
    %c0_i32_1 = arith.constant 0 : i32
    %c0_i32_2 = arith.constant 0 : i32
    return %c0_i32, %c0_i32_0, %c0_i32_1 : i32, i32, i32
  }
  func.func @transform_8(%arg0: i32) -> (i32, i32) {
    %c0_i32 = arith.constant 0 : i32
    %c0_i32_0 = arith.constant 0 : i32
    %c0_i32_1 = arith.constant 0 : i32
    return %c0_i32, %c0_i32_0 : i32, i32
  }
  func.func @transform_9(%arg0: i32) -> (i32, i32, i32) {
    %c0_i32 = arith.constant 0 : i32
    %c0_i32_0 = arith.constant 0 : i32
    %c0_i32_1 = arith.constant 0 : i32
    %c0_i32_2 = arith.constant 0 : i32
    return %c0_i32, %c0_i32_0, %c0_i32_1 : i32, i32, i32
  }
  func.func @transform_10(%arg0: i32) -> (i32, i32) {
    %c0_i32 = arith.constant 0 : i32
    %c0_i32_0 = arith.constant 0 : i32
    %c0_i32_1 = arith.constant 0 : i32
    return %c0_i32, %c0_i32_0 : i32, i32
  }
  func.func @transform_11(%arg0: i32) -> (i32, i32) {
    %c0_i32 = arith.constant 0 : i32
    %c0_i32_0 = arith.constant 0 : i32
    %c0_i32_1 = arith.constant 0 : i32
    return %c0_i32, %c0_i32_0 : i32, i32
  }
  func.func @transform_12(%arg0: i32) -> (i32, i32) {
    %c0_i32 = arith.constant 0 : i32
    %c0_i32_0 = arith.constant 0 : i32
    %c0_i32_1 = arith.constant 0 : i32
    return %c0_i32, %c0_i32_0 : i32, i32
  }
  func.func @transform_13(%arg0: i32) -> (i32, i32) {
    %c0_i32 = arith.constant 0 : i32
    %c0_i32_0 = arith.constant 0 : i32
    %c0_i32_1 = arith.constant 0 : i32
    return %c0_i32, %c0_i32_0 : i32, i32
  }
  func.func @transform_14(%arg0: i32) -> (i32, i32) {
    %c0_i32 = arith.constant 0 : i32
    %c0_i32_0 = arith.constant 0 : i32
    %c0_i32_1 = arith.constant 0 : i32
    return %c0_i32, %c0_i32_0 : i32, i32
  }
  func.func @transform_15(%arg0: i32) -> (i32, i32, i32) {
    %c0_i32 = arith.constant 0 : i32
    %c0_i32_0 = arith.constant 0 : i32
    %c0_i32_1 = arith.constant 0 : i32
    return %arg0, %c0_i32, %c0_i32_0 : i32, i32, i32
  }
}

</mosaic_0001>

<bundles_post_ra>
// kernel: encoder_forward.1
= control target key start
LH: loop header
LB: loop body
LE: loop exit
PB: predicated region body
PF: predicated region fallthrough
CT: control target
= control target key end

     0   :  { %s18294_s18 = smov 0   ;;  %s22520_s0 = inlined_call_operand.vmem [shape: f32[2,288,16], index: 0, kind: input, shape index: {}]   ;;  %s22521_s1 = inlined_call_operand.vmem [shape: f32[16,64], index: 1, kind: input, shape index: {}]   ;;  %s22522_s2 = inlined_call_operand.vmem [shape: f32[1,64], index: 2, kind: input, shape index: {}]   ;;  %s22523_s3 = inlined_call_operand.vmem [shape: f32[9,64,64], index: 3, kind: input, shape index: {}]   ;;  %s22524_s4 = inlined_call_operand.vmem [shape: f32[1,64], index: 4, kind: input, shape index: {}]   ;;  %s22525_s5 = inlined_call_operand.vmem [shape: f32[9,64,128], index: 5, kind: input, shape index: {}]   ;;  %s22526_s6 = inlined_call_operand.vmem [shape: f32[1,128], index: 6, kind: input, shape index: {}]   ;;  %s22527_s7 = inlined_call_operand.vmem [shape: f32[9,128,128], index: 7, kind: input, shape index: {}]   ;;  %s22528_s8 = inlined_call_operand.vmem [shape: f32[1,128], index: 8, kind: input, shape index: {}]   ;;  %s22529_s9 = inlined_call_operand.vmem [shape: f32[16,128,160], index: 9, kind: input, shape index: {}]   ;;  %s22530_s10 = inlined_call_operand.vmem [shape: f32[1,160], index: 10, kind: input, shape index: {}]   ;;  %s22531_s11 = inlined_call_operand.vmem [shape: f32[160,160], index: 11, kind: input, shape index: {}]   ;;  %s22532_s12 = inlined_call_operand.vmem [shape: f32[1,160], index: 12, kind: input, shape index: {}]   ;;  %s22533_s13 = inlined_call_operand.vmem [shape: f32[160,256], index: 13, kind: input, shape index: {}]   ;;  %s22534_s14 = inlined_call_operand.vmem [shape: f32[1,256], index: 14, kind: input, shape index: {}]   ;;  %s22535_s15 = inlined_call_operand.vmem [shape: f32[2,16,256], index: 15, kind: output, shape index: {}]  }
   0x1 LB: > { %s12157_s19 = sadd.s32 4294967295, %s18211_s18   ;;  %p12161_p0 = scmp.ge.s32.totalorder %s18211_s18, 1  ;;  %s18211_s18 = sphi %s18294_s18, %s25_s18  }
   0x2   : > { %p437_p1 = scmp.lt.s32.totalorder %s18211_s18, 3 }
   0x4   : > { %p438_p2 = pnand %p12161_p0, %p437_p1 }
   0x5   : > { %v582_v0 = vld [vmem:[%s22521_s1] sm:$0xff] (!%p438_p2)  ;;  %v583_v1 = vld [vmem:[%s22521_s1 + $0x8] sm:$0xff] (!%p438_p2)  ;;  %p485_p3 = scmp.lt.s32.totalorder (!%p438_p2), %s12157_s19, 1  ;;  %vm584_vm0 = vcmask (!%p438_p2), 130048   ;;  %v12204_v34 = vld [vmem:[%s22523_s3 + $0x50] sm:$0xff] (!%p438_p2)  ;;  %vm495_vm1 = vcmask (!%p438_p2), 523264  }
   0x6   : > { %441 = sbr.rel (%p438_p2) target bundleno = 2861 (0xb2d), region = 80  ;;  %v16154_v2 = vpack.c.bf16 (!%p438_p2), %v583_v1, %v582_v0  ;;  %v12202_v31 = vld [vmem:[%s22523_s3 + $0x40] sm:$0xff] (!%p438_p2)  ;;  %v12203_v32 = vld [vmem:[%s22523_s3 + $0x48] sm:$0xff] (!%p438_p2)  ;;  %v12205_v35 = vld [vmem:[%s22523_s3 + $0x58] sm:$0xff] (!%p438_p2)  ;;  %v18213_v43 = vmov (!%p438_p2), 0.0   ;;  %vm11709_vm2 = vcmask (!%p438_p2), 261120  }
   0x7   : > { %v16166_v33 = vpack.c.bf16 (!%p438_p2), %v12203_v32, %v12202_v31  ;;  %v18384_v36 = vpack.c.bf16 (!%p438_p2), %v12205_v35, %v12204_v34  ;;  %v12206_v39 = vld [vmem:[%s22523_s3 + $0x60] sm:$0xff] (!%p438_p2)  ;;  %v12207_v40 = vld [vmem:[%s22523_s3 + $0x68] sm:$0xff] (!%p438_p2)  ;;  %496 = vst.msk [vmem:[#allocation2] sm:$0xff] (!%p438_p2), %vm495_vm1, %v18213_v43  ;;  %497 = vst.msk [vmem:[#allocation2 + $0x8] sm:$0xff] (!%p438_p2), %vm495_vm1, %v18213_v43  ;;  %vm11716_vm3 = vcmask (!%p438_p2), 257024   ;;  %vm11754_vm4 = vcmask (!%p438_p2), 1044480  }
   0x8   : > { %16155 = vmatprep.subr.bf16.mxu0 (!%p438_p2), %v16154_v2  ;;  %v18398_v41 = vpack.c.bf16 (!%p438_p2), %v12207_v40, %v12206_v39  ;;  %498 = vst.msk [vmem:[#allocation2 + $0x10] sm:$0xff] (!%p438_p2), %vm495_vm1, %v18213_v43  ;;  %499 = vst.msk [vmem:[#allocation2 + $0x18] sm:$0xff] (!%p438_p2), %vm495_vm1, %v18213_v43  ;;  %v12208_v45 = vld [vmem:[%s22523_s3 + $0x70] sm:$0xff] (!%p438_p2)  ;;  %v12209_v46 = vld [vmem:[%s22523_s3 + $0x78] sm:$0xff] (!%p438_p2)  ;;  %vm11764_vm5 = vcmask (!%p438_p2), 261124   ;;  %vm11782_vm6 = vcmask (!%p438_p2), 1041408  }
   0x9   : > { %16157 = vmatpush3.bf16.msra.mxu0 (!%p438_p2), %v16154_v2  ;;  %16167 = vmatprep.subr.bf16.mxu1 (!%p438_p2), %v16166_v33  ;;  %500 = vst.msk [vmem:[#allocation2 + $0x20] sm:$0xff] (!%p438_p2), %vm495_vm1, %v18213_v43  ;;  %501 = vst.msk [vmem:[#allocation2 + $0x28] sm:$0xff] (!%p438_p2), %vm495_vm1, %v18213_v43  ;;  %v16178_v47 = vpack.c.bf16 (!%p438_p2), %v12209_v46, %v12208_v45  ;;  %v1279_v54 = vld [vmem:[%s22523_s3] sm:$0xff] (!%p438_p2)  ;;  %v1280_v55 = vld [vmem:[%s22523_s3 + $0x8] sm:$0xff] (!%p438_p2)  ;;  %vm11809_vm7 = vcmask (!%p438_p2), 1046528  }
   0xa   : > { %16159 = vmatprep.subr.bf16.mxu0 (!%p438_p2), %v16154_v2  ;;  %16169 = vmatpush3.bf16.msra.mxu1 (!%p438_p2), %v16166_v33  ;;  %502 = vst.msk [vmem:[#allocation2 + $0x30] sm:$0xff] (!%p438_p2), %vm495_vm1, %v18213_v43  ;;  %503 = vst.msk [vmem:[#allocation2 + $0x38] sm:$0xff] (!%p438_p2), %vm495_vm1, %v18213_v43  ;;  %v18563_v56 = vpack.c.bf16 (!%p438_p2), %v1280_v55, %v1279_v54  ;;  %v1281_v57 = vld [vmem:[%s22523_s3 + $0x10] sm:$0xff] (!%p438_p2)  ;;  %v1282_v58 = vld [vmem:[%s22523_s3 + $0x18] sm:$0xff] (!%p438_p2) }
   0xb   : > { %16171 = vmatprep.subr.bf16.mxu1 (!%p438_p2), %v18384_v36  ;;  %504 = vst.msk [vmem:[#allocation2 + $0x40] sm:$0xff] (!%p438_p2), %vm495_vm1, %v18213_v43  ;;  %505 = vst.msk [vmem:[#allocation2 + $0x48] sm:$0xff] (!%p438_p2), %vm495_vm1, %v18213_v43  ;;  %v18574_v59 = vpack.c.bf16 (!%p438_p2), %v1282_v58, %v1281_v57  ;;  %v1283_v60 = vld [vmem:[%s22523_s3 + $0x20] sm:$0xff] (!%p438_p2)  ;;  %v1284_v61 = vld [vmem:[%s22523_s3 + $0x28] sm:$0xff] (!%p438_p2) }
   0xc   : > { %506 = vst.msk [vmem:[#allocation2 + $0x50] sm:$0xff] (!%p438_p2), %vm495_vm1, %v18213_v43  ;;  %507 = vst.msk [vmem:[#allocation2 + $0x58] sm:$0xff] (!%p438_p2), %vm495_vm1, %v18213_v43  ;;  %v18584_v62 = vpack.c.bf16 (!%p438_p2), %v1284_v61, %v1283_v60  ;;  %v1285_v63 = vld [vmem:[%s22523_s3 + $0x30] sm:$0xff] (!%p438_p2)  ;;  %v1286_v0 = vld [vmem:[%s22523_s3 + $0x38] sm:$0xff] (!%p438_p2) }
   0xd   : > { %s22537_s19 = smov (!%p485_p3, %s12157_s19), 1  ;;  %508 = vst.msk [vmem:[#allocation2 + $0x60] sm:$0xff] %vm495_vm1, %v18213_v43  ;;  %509 = vst.msk [vmem:[#allocation2 + $0x68] sm:$0xff] %vm495_vm1, %v18213_v43  ;;  %v18594_v1 = vpack.c.bf16 %v1286_v0, %v1285_v63 }
   0xe   : > { %s18190_s24 = smul.u32 288, %s22537_s19  ;;  %16173 = vmatpush3.bf16.msra.mxu1 %v18384_v36  ;;  %510 = vst.msk [vmem:[#allocation2 + $0x70] sm:$0xff] %vm495_vm1, %v18213_v43  ;;  %511 = vst.msk [vmem:[#allocation2 + $0x78] sm:$0xff] %vm495_vm1, %v18213_v43  ;;  %v1287_v50 = vld [vmem:[#allocation2 + $0x1] sm:$0xff]  ;;  %s13489_s23 = sshll.u32 %s22537_s19, 5 }
   0xf   : > { %512 = vst.msk [vmem:[#allocation2 + $0x80] sm:$0xff] %vm495_vm1, %v18213_v43  ;;  %513 = vst.msk [vmem:[#allocation2 + $0x88] sm:$0xff] %vm495_vm1, %v18213_v43  ;;  %16175 = vmatprep.subr.bf16.mxu1 %v18398_v41  ;;  %14550 = vmatprep.mubr.msk.f32.mxu1 %vm495_vm1, %v1287_v50  ;;  %v1288_v52 = vld [vmem:[#allocation2 + $0x9] sm:$0xff]  ;;  %s494_s25 = scalar_lea.vmem %s22535_s15, %s13489_s23 }
  0x10   : > { %s18314_s27 = scalar_lea.vmem %s22520_s0, %s18190_s24  ;;  %514 = vst.msk [vmem:[#allocation2 + $0x90] sm:$0xff] %vm495_vm1, %v18213_v43  ;;  %515 = vst.msk [vmem:[#allocation2 + $0x98] sm:$0xff] %vm495_vm1, %v18213_v43 }
  0x11   : > { %v570_v3 = vld [vmem:[%s18314_s27] sm:$0xff]  ;;  %v571_v4 = vld [vmem:[%s18314_s27 + $0x8] sm:$0xff]  ;;  %v572_v5 = vld [vmem:[%s18314_s27 + $0x10] sm:$0xff]  ;;  %516 = vst.msk [vmem:[#allocation2 + $0xa0] sm:$0xff] %vm495_vm1, %v18213_v43 }
  0x12   : > { %14472 = vmatprep.mubr.msk.f32.mxu0 %vm584_vm0, %v570_v3  ;;  %v573_v6 = vld [vmem:[%s18314_s27 + $0x18] sm:$0xff]  ;;  %v574_v7 = vld [vmem:[%s18314_s27 + $0x20] sm:$0xff]  ;;  %v575_v8 = vld [vmem:[%s18314_s27 + $0x28] sm:$0xff]  ;;  %517 = vst.msk [vmem:[#allocation2 + $0xa8] sm:$0xff] %vm495_vm1, %v18213_v43  ;;  %16177 = vmatpush3.bf16.msra.mxu1 %v18398_v41 }
  0x13   : > { %14473 = vmatmul.mubr.msk.f32.vlgmr.msra.gmra.mrb[0].mxu0 %vm584_vm0, %v571_v4  ;;  %v576_v9 = vld [vmem:[%s18314_s27 + $0x30] sm:$0xff]  ;;  %v577_v10 = vld [vmem:[%s18314_s27 + $0x38] sm:$0xff]  ;;  %v578_v11 = vld [vmem:[%s18314_s27 + $0x40] sm:$0xff]  ;;  %518 = vst.msk [vmem:[#allocation2 + $0xb0] sm:$0xff] %vm495_vm1, %v18213_v43  ;;  %16179 = vmatprep.subr.bf16.mxu1 %v16178_v47 }
  0x14   : > { %14475 = vmatprep.mubr.msk.f32.mxu0 %vm584_vm0, %v572_v5  ;;  %16161 = vmatpush3.bf16.msra.mxu0 %v16154_v2  ;;  %v579_v12 = vld [vmem:[%s18314_s27 + $0x48] sm:$0xff]  ;;  %v580_v13 = vld [vmem:[%s18314_s27 + $0x50] sm:$0xff]  ;;  %v581_v14 = vld [vmem:[%s18314_s27 + $0x58] sm:$0xff]  ;;  %519 = vst.msk [vmem:[#allocation2 + $0xb8] sm:$0xff] %vm495_vm1, %v18213_v43 }
  0x15   : > { %16163 = vmatprep.subr.bf16.mxu0 %v16154_v2  ;;  %v758_v15 = vld [vmem:[%s18314_s27 + $0x60] sm:$0xff]  ;;  %v759_v16 = vld [vmem:[%s18314_s27 + $0x68] sm:$0xff]  ;;  %v760_v17 = vld [vmem:[%s18314_s27 + $0x70] sm:$0xff]  ;;  %520 = vst.msk [vmem:[#allocation2 + $0xc0] sm:$0xff] %vm495_vm1, %v18213_v43 }
  0x16   : > { %v761_v18 = vld [vmem:[%s18314_s27 + $0x78] sm:$0xff]  ;;  %v762_v19 = vld [vmem:[%s18314_s27 + $0x80] sm:$0xff]  ;;  %v763_v20 = vld [vmem:[%s18314_s27 + $0x88] sm:$0xff]  ;;  %521 = vst.msk [vmem:[#allocation2 + $0xc8] sm:$0xff] %vm495_vm1, %v18213_v43  ;;  %16181 = vmatpush3.bf16.msra.mxu1 %v16178_v47 }
  0x17   : > { %14476 = vmatmul.mubr.msk.f32.gmra.mrb[2].mxu0 %vm584_vm0, %v573_v6  ;;  %v764_v21 = vld [vmem:[%s18314_s27 + $0x90] sm:$0xff]  ;;  %v765_v22 = vld [vmem:[%s18314_s27 + $0x98] sm:$0xff]  ;;  %v766_v23 = vld [vmem:[%s18314_s27 + $0xa0] sm:$0xff]  ;;  %522 = vst.msk [vmem:[#allocation2 + $0xd0] sm:$0xff] %vm495_vm1, %v18213_v43  ;;  %16183 = vmatprep.subr.bf16.mxu1 %v18563_v56 }
  0x18   : > { %14478 = vmatprep.mubr.msk.f32.mxu0 %vm584_vm0, %v574_v7  ;;  %v767_v24 = vld [vmem:[%s18314_s27 + $0xa8] sm:$0xff]  ;;  %v768_v25 = vld [vmem:[%s18314_s27 + $0xb0] sm:$0xff]  ;;  %v769_v26 = vld [vmem:[%s18314_s27 + $0xb8] sm:$0xff]  ;;  %523 = vst.msk [vmem:[#allocation2 + $0xd8] sm:$0xff] %vm495_vm1, %v18213_v43 }
  0x19   : > { %v945_v27 = vld [vmem:[%s18314_s27 + $0xc0] sm:$0xff]  ;;  %v946_v28 = vld [vmem:[%s18314_s27 + $0xc8] sm:$0xff]  ;;  %v947_v29 = vld [vmem:[%s18314_s27 + $0xd0] sm:$0xff]  ;;  %524 = vst.msk [vmem:[#allocation2 + $0xe0] sm:$0xff] %vm495_vm1, %v18213_v43  ;;  %14551 = vmatmul.mubr.msk.f32.vlgmr.msra.gmra.mrb[0].mxu1 %vm495_vm1, %v1288_v52 }
  0x1a   : > { %v948_v30 = vld [vmem:[%s18314_s27 + $0xd8] sm:$0xff]  ;;  %v949_v37 = vld [vmem:[%s18314_s27 + $0xe0] sm:$0xff]  ;;  %v950_v38 = vld [vmem:[%s18314_s27 + $0xe8] sm:$0xff]  ;;  %525 = vst.msk [vmem:[#allocation2 + $0xe8] sm:$0xff] %vm495_vm1, %v18213_v43  ;;  %16185 = vmatpush3.bf16.msra.mxu1 %v18563_v56 }
  0x1b   : > { %14479 = vmatmul.mubr.msk.f32.gmra.mrb[4].mxu0 %vm584_vm0, %v575_v8  ;;  %v18402_v42 = vld [vmem:[%s18314_s27 + $0xf0] sm:$0xff]  ;;  %526 = vst.msk [vmem:[#allocation2 + $0xf0] sm:$0xff] %vm495_vm1, %v18213_v43  ;;  %527 = vst.msk [vmem:[#allocation2 + $0xf8] sm:$0xff] %vm495_vm1, %v18213_v43  ;;  %v952_v44 = vld [vmem:[%s18314_s27 + $0xf8] sm:$0xff]  ;;  %16187 = vmatprep.subr.bf16.mxu1 %v18574_v59 }
  0x1c   : > { %14481 = vmatprep.mubr.msk.f32.mxu0 %vm584_vm0, %v576_v9  ;;  %528 = vst.msk [vmem:[#allocation2 + $0x100] sm:$0xff] %vm495_vm1, %v18213_v43  ;;  %529 = vst.msk [vmem:[#allocation2 + $0x108] sm:$0xff] %vm495_vm1, %v18213_v43  ;;  %v953_v48 = vld [vmem:[%s18314_s27 + $0x100] sm:$0xff]  ;;  %v954_v49 = vld [vmem:[%s18314_s27 + $0x108] sm:$0xff] }
  0x1d   : > { %530 = vst.msk [vmem:[#allocation2 + $0x110] sm:$0xff] %vm495_vm1, %v18213_v43  ;;  %531 = vst.msk [vmem:[#allocation2 + $0x118] sm:$0xff] %vm495_vm1, %v18213_v43  ;;  %v955_v51 = vld [vmem:[%s18314_s27 + $0x110] sm:$0xff]  ;;  %v956_v53 = vld [vmem:[%s18314_s27 + $0x118] sm:$0xff] }
  0x1e   : > { %532 = vst.msk [vmem:[#allocation2 + $0x120] sm:$0xff] %vm495_vm1, %v18213_v43  ;;  %533 = vst.msk [vmem:[#allocation2 + $0x128] sm:$0xff] %vm495_vm1, %v18213_v43  ;;  %16189 = vmatpush3.bf16.msra.mxu1 %v18574_v59  ;;  %v12235_v3 = vld [vmem:[%s22523_s3 + $0x88] sm:$0xff]  ;;  %v18613_v9 = vld [vmem:[%s22522_s2] ss:$0 sm:$0xff] }
  0x1f   : > { %14482 = vmatmul.mubr.msk.f32.gmra.mrb[6].mxu0 %vm584_vm0, %v577_v10  ;;  %534 = vst.msk [vmem:[#allocation2 + $0x130] sm:$0xff] %vm495_vm1, %v18213_v43  ;;  %535 = vst.msk [vmem:[#allocation2 + $0x138] sm:$0xff] %vm495_vm1, %v18213_v43  ;;  %16191 = vmatprep.subr.bf16.mxu1 %v18584_v62 }
  0x20   : > { %14484 = vmatprep.mubr.msk.f32.mxu0 %vm584_vm0, %v578_v11  ;;  %536 = vst.msk [vmem:[#allocation2 + $0x140] sm:$0xff] %vm495_vm1, %v18213_v43  ;;  %537 = vst.msk [vmem:[#allocation3] sm:$0xff] %vm495_vm1, %v18213_v43 }
  0x21   : > { %538 = vst.msk [vmem:[#allocation3 + $0x8] sm:$0xff] %vm495_vm1, %v18213_v43  ;;  %539 = vst.msk [vmem:[#allocation3 + $0x10] sm:$0xff] %vm495_vm1, %v18213_v43 }
  0x22   : > { %540 = vst.msk [vmem:[#allocation3 + $0x18] sm:$0xff] %vm495_vm1, %v18213_v43  ;;  %541 = vst.msk [vmem:[#allocation3 + $0x20] sm:$0xff] %vm495_vm1, %v18213_v43  ;;  %16193 = vmatpush3.bf16.msra.mxu1 %v18584_v62 }
  0x23   : > { %14485 = vmatmul.mubr.msk.f32.gmra.mrb[8].mxu0 %vm584_vm0, %v579_v12  ;;  %542 = vst.msk [vmem:[#allocation3 + $0x28] sm:$0xff] %vm495_vm1, %v18213_v43  ;;  %543 = vst.msk [vmem:[#allocation3 + $0x30] sm:$0xff] %vm495_vm1, %v18213_v43  ;;  %16195 = vmatprep.subr.bf16.mxu1 %v18594_v1 }
  0x24   : > { %14487 = vmatprep.mubr.msk.f32.mxu0 %vm584_vm0, %v580_v13  ;;  %544 = vst.msk [vmem:[#allocation3 + $0x38] sm:$0xff] %vm495_vm1, %v18213_v43  ;;  %545 = vst.msk [vmem:[#allocation3 + $0x40] sm:$0xff] %vm495_vm1, %v18213_v43 }
  0x25   : > { %546 = vst.msk [vmem:[#allocation3 + $0x48] sm:$0xff] %vm495_vm1, %v18213_v43  ;;  %547 = vst.msk [vmem:[#allocation3 + $0x50] sm:$0xff] %vm495_vm1, %v18213_v43 }
  0x26   : > { %548 = vst.msk [vmem:[#allocation3 + $0x58] sm:$0xff] %vm495_vm1, %v18213_v43  ;;  %549 = vst.msk [vmem:[#allocation3 + $0x60] sm:$0xff] %vm495_vm1, %v18213_v43  ;;  %16197 = vmatpush3.bf16.msra.mxu1 %v18594_v1 }
  0x27   : > { %14488 = vmatmul.mubr.msk.f32.gmra.mrb[10].mxu0 %vm584_vm0, %v581_v14  ;;  %550 = vst [vmem:[#allocation4] sm:$0xff] %v18213_v43  ;;  %551 = vst [vmem:[#allocation4 + $0x8] sm:$0xff] %v18213_v43 }
  0x28   : > { %14494 = vmatprep.mubr.msk.f32.mxu0 %vm584_vm0, %v758_v15  ;;  %552 = vst [vmem:[#allocation4 + $0x10] sm:$0xff] %v18213_v43  ;;  %553 = vst [vmem:[#allocation4 + $0x18] sm:$0xff] %v18213_v43 }
  0x29   : > { %554 = vst [vmem:[#allocation4 + $0x20] sm:$0xff] %v18213_v43  ;;  %555 = vst [vmem:[#allocation4 + $0x28] sm:$0xff] %v18213_v43 }
  0x2a   : > { %556 = vst [vmem:[#allocation4 + $0x30] sm:$0xff] %v18213_v43  ;;  %557 = vst [vmem:[#allocation4 + $0x38] sm:$0xff] %v18213_v43 }
  0x2b   : > { %14495 = vmatmul.mubr.msk.f32.vlgmr.msra.gmra.mrb[12].mxu0 %vm584_vm0, %v759_v16  ;;  %558 = vst [vmem:[#allocation4 + $0x40] sm:$0xff] %v18213_v43  ;;  %559 = vst [vmem:[#allocation4 + $0x48] sm:$0xff] %v18213_v43 }
  0x2c   : > { %14497 = vmatprep.mubr.msk.f32.mxu0 %vm584_vm0, %v760_v17  ;;  %16165 = vmatpush3.bf16.msra.mxu0 %v16154_v2  ;;  %560 = vst [vmem:[#allocation4 + $0x50] sm:$0xff] %v18213_v43  ;;  %561 = vst [vmem:[#allocation4 + $0x58] sm:$0xff] %v18213_v43  ;;  %v12234_v2 = vld [vmem:[%s22523_s3 + $0x80] sm:$0xff] }
  0x2d   : > { %16311 = vmatprep.subr.bf16.mxu0 %v16166_v33  ;;  %562 = vst [vmem:[#allocation4 + $0x60] sm:$0xff] %v18213_v43  ;;  %563 = vst [vmem:[#allocation5] sm:$0xff] %v18213_v43  ;;  %v18604_v4 = vpack.c.bf16 %v12235_v3, %v12234_v2 }
  0x2e   : > { %564 = vst [vmem:[#allocation5 + $0x8] sm:$0xff] %v18213_v43  ;;  %565 = vst [vmem:[#allocation5 + $0x10] sm:$0xff] %v18213_v43 }
  0x2f   : > { %14498 = vmatmul.mubr.msk.f32.gmra.mrb[14].mxu0 %vm584_vm0, %v761_v18  ;;  %566 = vst [vmem:[#allocation5 + $0x18] sm:$0xff] %v18213_v43  ;;  %567 = vst [vmem:[#allocation5 + $0x20] sm:$0xff] %v18213_v43  ;;  %16199 = vmatprep.subr.bf16.mxu1 %v18604_v4 }
  0x30   : > { %14500 = vmatprep.mubr.msk.f32.mxu0 %vm584_vm0, %v762_v19  ;;  %568 = vst [vmem:[#allocation5 + $0x28] sm:$0xff] %v18213_v43  ;;  %569 = vst [vmem:[#allocation5 + $0x30] sm:$0xff] %v18213_v43 }
  0x33   : > { %14501 = vmatmul.mubr.msk.f32.gmra.mrb[16].mxu0 %vm584_vm0, %v763_v20 }
  0x34   : > { %14503 = vmatprep.mubr.msk.f32.mxu0 %vm584_vm0, %v764_v21 }
  0x37   : > { %14504 = vmatmul.mubr.msk.f32.gmra.mrb[18].mxu0 %vm584_vm0, %v765_v22 }
  0x38   : > { %14506 = vmatprep.mubr.msk.f32.mxu0 %vm584_vm0, %v766_v23 }
  0x3b   : > { %14507 = vmatmul.mubr.msk.f32.gmra.mrb[20].mxu0 %vm584_vm0, %v767_v24 }
  0x3c   : > { %14509 = vmatprep.mubr.msk.f32.mxu0 %vm584_vm0, %v768_v25 }
  0x3f   : > { %14510 = vmatmul.mubr.msk.f32.gmra.mrb[22].mxu0 %vm584_vm0, %v769_v26 }
  0x40   : > { %14516 = vmatprep.mubr.msk.f32.mxu0 %vm584_vm0, %v945_v27 }
  0x43   : > { %14517 = vmatmul.mubr.msk.f32.vlgmr.msra.gmra.mrb[24].mxu0 %vm584_vm0, %v946_v28 }
  0x44   : > { %14519 = vmatprep.mubr.msk.f32.mxu0 %vm584_vm0, %v947_v29  ;;  %16313 = vmatpush3.bf16.msra.mxu0 %v16166_v33 }
  0x45   : > { %16315 = vmatprep.subr.bf16.mxu0 %v18384_v36 }
  0x47   : > { %14520 = vmatmul.mubr.msk.f32.gmra.mrb[26].mxu0 %vm584_vm0, %v948_v30 }
  0x48   : > { %14522 = vmatprep.mubr.msk.f32.mxu0 %vm584_vm0, %v949_v37  ;;  %16317 = vmatpush3.bf16.msra.mxu0 %v18384_v36 }
  0x49   : > { %16319 = vmatprep.subr.bf16.mxu0 %v18398_v41 }
  0x4b   : > { %14523 = vmatmul.mubr.msk.f32.gmra.mrb[28].mxu0 %vm584_vm0, %v950_v38 }
  0x4c   : > { %14525 = vmatprep.mubr.msk.f32.mxu0 %vm584_vm0, %v18402_v42  ;;  %16321 = vmatpush3.bf16.msra.mxu0 %v18398_v41 }
  0x4d   : > { %16323 = vmatprep.subr.bf16.mxu0 %v16178_v47 }
  0x4f   : > { %14526 = vmatmul.mubr.msk.f32.gmra.mrb[30].mxu0 %vm584_vm0, %v952_v44 }
  0x50   : > { %14528 = vmatprep.mubr.msk.f32.mxu0 %vm584_vm0, %v953_v48  ;;  %16325 = vmatpush3.bf16.msra.mxu0 %v16178_v47 }
  0x51   : > { %16327 = vmatprep.subr.bf16.mxu0 %v18563_v56 }
  0x53   : > { %14529 = vmatmul.mubr.msk.f32.gmra.mrb[32].mxu0 %vm584_vm0, %v954_v49 }
  0x54   : > { %14531 = vmatprep.mubr.msk.f32.mxu0 %vm584_vm0, %v955_v51 }
  0x57   : > { %14532 = vmatmul.mubr.msk.f32.gmra.mrb[34].mxu0 %vm584_vm0, %v956_v53 }
  0xe6   : > { %v14474_v5 = vpop.f32.mrb[0].mxu0 }
  0xe7   : > { %747 = vst.msk [vmem:[#allocation7 + $0x8] sm:$0xff] %vm495_vm1, %v14474_v5  ;;  %v687_v6 = vpop.f32.mrb[1].mxu0 }
  0xe8   : > { %746 = vst.msk [vmem:[#allocation7] sm:$0xff] %vm495_vm1, %v687_v6 }
  0xea   : > { %v14477_v7 = vpop.f32.mrb[2].mxu0 }
  0xeb   : > { %749 = vst.msk [vmem:[#allocation7 + $0x18] sm:$0xff] %vm495_vm1, %v14477_v7  ;;  %v697_v8 = vpop.f32.mrb[3].mxu0 }
  0xec   : > { %748 = vst.msk [vmem:[#allocation7 + $0x10] sm:$0xff] %vm495_vm1, %v697_v8 }
  0xee   : > { %v1134_v10 = vld [vmem:[#allocation7 + $0x8] sm:$0xff]  ;;  %v14480_v11 = vpop.f32.mrb[4].mxu0 }
  0xef   : > { %v1142_v12 = vadd.f32 %v18613_v9, %v1134_v10  ;;  %v1133_v13 = vld [vmem:[#allocation7] sm:$0xff]  ;;  %751 = vst.msk [vmem:[#allocation7 + $0x28] sm:$0xff] %vm495_vm1, %v14480_v11  ;;  %v707_v14 = vpop.f32.mrb[5].mxu0 }
  0xf0   : > { %v1141_v15 = vadd.f32 %v18613_v9, %v1133_v13  ;;  %750 = vst.msk [vmem:[#allocation7 + $0x20] sm:$0xff] %vm495_vm1, %v707_v14 }
  0xf1   : > { %v1144_v16 = vmax.f32 %v1142_v12, 0.0 }
  0xf2   : > { %v1143_v17 = vmax.f32 %v1141_v15, 0.0  ;;  %v14483_v18 = vpop.f32.mrb[6].mxu0 }
  0xf3   : > { %v1147_v19 = vld [vmem:[#allocation7 + $0x12] sm:$0xff]  ;;  %753 = vst.msk [vmem:[#allocation7 + $0x38] sm:$0xff] %vm495_vm1, %v14483_v18  ;;  %v717_v20 = vpop.f32.mrb[7].mxu0  ;;  %1146 = vst.msk [vmem:[#allocation2 + $0x1b] sm:$0xff] %vm495_vm1, %v1144_v16 }
  0xf4   : > { %v1149_v21 = vadd.f32 %v18613_v9, %v1147_v19  ;;  %752 = vst.msk [vmem:[#allocation7 + $0x30] sm:$0xff] %vm495_vm1, %v717_v20  ;;  %1145 = vst.msk [vmem:[#allocation2 + $0x13] sm:$0xff] %vm495_vm1, %v1143_v17  ;;  %v1267_v17 = vld [vmem:[#allocation2] sm:$0xff] }
  0xf6   : > { %v1151_v22 = vmax.f32 %v1149_v21, 0.0  ;;  %v14486_v23 = vpop.f32.mrb[8].mxu0 }
  0xf7   : > { %v1148_v24 = vld [vmem:[#allocation7 + $0x1a] sm:$0xff]  ;;  %v1155_v25 = vld [vmem:[#allocation7 + $0x24] sm:$0xff]  ;;  %755 = vst.msk [vmem:[#allocation7 + $0x48] sm:$0xff] %vm495_vm1, %v14486_v23  ;;  %v727_v26 = vpop.f32.mrb[9].mxu0 }
  0xf8   : > { %v1150_v27 = vadd.f32 %v18613_v9, %v1148_v24  ;;  %v1157_v28 = vadd.f32 %v18613_v9, %v1155_v25  ;;  %754 = vst.msk [vmem:[#allocation7 + $0x40] sm:$0xff] %vm495_vm1, %v727_v26  ;;  %1153 = vst.msk [vmem:[#allocation2 + $0x25] sm:$0xff] %vm495_vm1, %v1151_v22  ;;  %v12236_v22 = vld [vmem:[%s22523_s3 + $0x90] sm:$0xff]  ;;  %v12237_v23 = vld [vmem:[%s22523_s3 + $0x98] sm:$0xff] }
  0xfa   : > { %v1152_v29 = vmax.f32 %v1150_v27, 0.0  ;;  %v1159_v30 = vmax.f32 %v1157_v28, 0.0  ;;  %v14489_v31 = vpop.f32.mrb[10].mxu0 }
  0xfb   : > { %v1156_v32 = vld [vmem:[#allocation7 + $0x2c] sm:$0xff]  ;;  %v1163_v33 = vld [vmem:[#allocation7 + $0x36] sm:$0xff]  ;;  %757 = vst.msk [vmem:[#allocation7 + $0x58] sm:$0xff] %vm495_vm1, %v14489_v31  ;;  %v737_v34 = vpop.f32.mrb[11].mxu0  ;;  %v1289_v35 = vld [vmem:[#allocation2 + $0x11] sm:$0xff] }
  0xfc   : > { %v1158_v36 = vadd.f32 %v18613_v9, %v1156_v32  ;;  %v1165_v37 = vadd.f32 %v18613_v9, %v1163_v33  ;;  %1154 = vst.msk [vmem:[#allocation2 + $0x2d] sm:$0xff] %vm495_vm1, %v1152_v29  ;;  %1161 = vst.msk [vmem:[#allocation2 + $0x37] sm:$0xff] %vm495_vm1, %v1159_v30  ;;  %14553 = vmatprep.mubr.msk.f32.mxu1 %vm495_vm1, %v1289_v35  ;;  %v1290_v38 = vld [vmem:[#allocation2 + $0x19] sm:$0xff]  ;;  %v1268_v30 = vld [vmem:[#allocation2 + $0x8] sm:$0xff]  ;;  %v18682_v35 = vpack.c.bf16 %v12237_v23, %v12236_v22 }
  0xfd   : > { %756 = vst.msk [vmem:[#allocation7 + $0x50] sm:$0xff] %vm495_vm1, %v737_v34  ;;  %14554 = vmatmul.mubr.msk.f32.gmra.mrb[2].mxu1 %vm495_vm1, %v1290_v38 }
  0xfe   : > { %v1160_v39 = vmax.f32 %v1158_v36, 0.0  ;;  %v1167_v40 = vmax.f32 %v1165_v37, 0.0  ;;  %v1171_v41 = vld [vmem:[#allocation7 + $0x48] sm:$0xff]  ;;  %v14496_v42 = vpop.f32.mrb[12].mxu0  ;;  %v12238_v36 = vld [vmem:[%s22523_s3 + $0xa0] sm:$0xff]  ;;  %v12239_v37 = vld [vmem:[%s22523_s3 + $0xa8] sm:$0xff] }
  0xff   : > { %v1173_v43 = vadd.f32 %v18613_v9, %v1171_v41  ;;  %v1164_v44 = vld [vmem:[#allocation7 + $0x3e] sm:$0xff]  ;;  %934 = vst.msk [vmem:[#allocation7 + $0x68] sm:$0xff] %vm495_vm1, %v14496_v42  ;;  %v874_v45 = vpop.f32.mrb[13].mxu0  ;;  %v1291_v46 = vld [vmem:[#allocation2 + $0x21] sm:$0xff] }
 0x100   : > { %v1166_v47 = vadd.f32 %v18613_v9, %v1164_v44  ;;  %1162 = vst.msk [vmem:[#allocation2 + $0x3f] sm:$0xff] %vm495_vm1, %v1160_v39  ;;  %1169 = vst.msk [vmem:[#allocation2 + $0x49] sm:$0xff] %vm495_vm1, %v1167_v40  ;;  %14556 = vmatprep.mubr.msk.f32.mxu1 %vm495_vm1, %v1291_v46  ;;  %v1269_v44 = vld [vmem:[#allocation2 + $0x10] sm:$0xff] }
 0x101   : > { %933 = vst.msk [vmem:[#allocation7 + $0x60] sm:$0xff] %vm495_vm1, %v874_v45  ;;  %v1175_v48 = vmax.f32 %v1173_v43, 0.0 }
 0x102   : > { %v1168_v49 = vmax.f32 %v1166_v47, 0.0  ;;  %v14499_v50 = vpop.f32.mrb[14].mxu0  ;;  %v1270_v47 = vld [vmem:[#allocation2 + $0x18] sm:$0xff] }
 0x103   : > { %1177 = vst.msk [vmem:[#allocation2 + $0x5b] sm:$0xff] %vm495_vm1, %v1175_v48  ;;  %936 = vst.msk [vmem:[#allocation7 + $0x78] sm:$0xff] %vm495_vm1, %v14499_v50  ;;  %v884_v52 = vpop.f32.mrb[15].mxu0  ;;  %v1292_v53 = vld [vmem:[#allocation2 + $0x29] sm:$0xff]  ;;  %v1293_v54 = vld [vmem:[#allocation2 + $0x31] sm:$0xff]  ;;  %v18702_v48 = vpack.c.bf16 %v12239_v37, %v12238_v36 }
 0x104   : > { %v1172_v51 = vld [vmem:[#allocation7 + $0x50] sm:$0xff]  ;;  %1170 = vst.msk [vmem:[#allocation2 + $0x51] sm:$0xff] %vm495_vm1, %v1168_v49  ;;  %935 = vst.msk [vmem:[#allocation7 + $0x70] sm:$0xff] %vm495_vm1, %v884_v52  ;;  %14557 = vmatmul.mubr.msk.f32.gmra.mrb[4].mxu1 %vm495_vm1, %v1292_v53 }
 0x105   : > { %v1174_v55 = vadd.f32 %v18613_v9, %v1172_v51  ;;  %14559 = vmatprep.mubr.msk.f32.mxu1 %vm495_vm1, %v1293_v54  ;;  %v12258_v37 = vld [vmem:[%s22523_s3 + $0xe0] sm:$0xff] }
 0x106   : > { %v14502_v58 = vpop.f32.mrb[16].mxu0 }
 0x107   : > { %v1176_v57 = vmax.f32 %v1174_v55, 0.0  ;;  %v1294_v63 = vld [vmem:[#allocation2 + $0x39] sm:$0xff]  ;;  %938 = vst.msk [vmem:[#allocation7 + $0x88] sm:$0xff] %vm495_vm1, %v14502_v58  ;;  %v894_v0 = vpop.f32.mrb[17].mxu0  ;;  %v1295_v5 = vld [vmem:[#allocation2 + $0x41] sm:$0xff]  ;;  %v1296_v8 = vld [vmem:[#allocation2 + $0x49] sm:$0xff] }
 0x108   : > { %v1179_v60 = vld [vmem:[#allocation7 + $0x5a] sm:$0xff]  ;;  %v1180_v61 = vld [vmem:[#allocation7 + $0x62] sm:$0xff]  ;;  %14560 = vmatmul.mubr.msk.f32.gmra.mrb[6].mxu1 %vm495_vm1, %v1294_v63  ;;  %937 = vst.msk [vmem:[#allocation7 + $0x80] sm:$0xff] %vm495_vm1, %v894_v0  ;;  %v1271_v55 = vld [vmem:[#allocation2 + $0x20] sm:$0xff] }
 0x109   : > { %1178 = vst.msk [vmem:[#allocation2 + $0x63] sm:$0xff] %vm495_vm1, %v1176_v57  ;;  %v1181_v2 = vadd.f32 %v18613_v9, %v1179_v60  ;;  %v1182_v3 = vadd.f32 %v18613_v9, %v1180_v61  ;;  %14562 = vmatprep.mubr.msk.f32.mxu1 %vm495_vm1, %v1295_v5  ;;  %v12240_v57 = vld [vmem:[%s22523_s3 + $0xb0] sm:$0xff]  ;;  %v1272_v61 = vld [vmem:[#allocation2 + $0x28] sm:$0xff] }
 0x10a   : > { %v14505_v10 = vpop.f32.mrb[18].mxu0  ;;  %v1298_v21 = vld [vmem:[#allocation2 + $0x59] sm:$0xff] }
 0x10b   : > { %v1183_v6 = vmax.f32 %v1181_v2, 0.0  ;;  %v1184_v7 = vmax.f32 %v1182_v3, 0.0  ;;  %v1187_v11 = vld [vmem:[#allocation7 + $0x6c] sm:$0xff]  ;;  %v1188_v12 = vld [vmem:[#allocation7 + $0x74] sm:$0xff]  ;;  %940 = vst.msk [vmem:[#allocation7 + $0x98] sm:$0xff] %vm495_vm1, %v14505_v10  ;;  %v1297_v13 = vld [vmem:[#allocation2 + $0x51] sm:$0xff] }
 0x10c   : > { %v904_v14 = vpop.f32.mrb[19].mxu0  ;;  %v1189_v15 = vadd.f32 %v18613_v9, %v1187_v11  ;;  %v1190_v16 = vadd.f32 %v18613_v9, %v1188_v12  ;;  %14563 = vmatmul.mubr.msk.f32.gmra.mrb[8].mxu1 %vm495_vm1, %v1296_v8  ;;  %v12254_v8 = vld [vmem:[%s22523_s3 + $0xc0] sm:$0xff]  ;;  %v12255_v10 = vld [vmem:[%s22523_s3 + $0xc8] sm:$0xff] }
 0x10d   : > { %1185 = vst.msk [vmem:[#allocation2 + $0x6d] sm:$0xff] %vm495_vm1, %v1183_v6  ;;  %1186 = vst.msk [vmem:[#allocation2 + $0x75] sm:$0xff] %vm495_vm1, %v1184_v7  ;;  %14565 = vmatprep.mubr.msk.f32.mxu1 %vm495_vm1, %v1297_v13  ;;  %v1273_v7 = vld [vmem:[#allocation2 + $0x30] sm:$0xff] }
 0x10e   : > { %939 = vst.msk [vmem:[#allocation7 + $0x90] sm:$0xff] %vm495_vm1, %v904_v14  ;;  %v1191_v18 = vmax.f32 %v1189_v15, 0.0  ;;  %v1192_v19 = vmax.f32 %v1190_v16, 0.0  ;;  %v14508_v20 = vpop.f32.mrb[20].mxu0  ;;  %v1274_v14 = vld [vmem:[#allocation2 + $0x38] sm:$0xff]  ;;  %v18742_v16 = vpack.c.bf16 %v12255_v10, %v12254_v8  ;;  %v18855_v8 = vld [vmem:[#allocation2 + $0x4a] sm:$0xff] }
 0x10f   : > { %v1195_v24 = vld [vmem:[#allocation7 + $0x7e] sm:$0xff]  ;;  %v1196_v25 = vld [vmem:[#allocation7 + $0x86] sm:$0xff]  ;;  %942 = vst.msk [vmem:[#allocation7 + $0xa8] sm:$0xff] %vm495_vm1, %v14508_v20  ;;  %v914_v27 = vpop.f32.mrb[21].mxu0 }
 0x110   : > { %v3020_v26 = vld [vmem:[#allocation2 + $0x61] sm:$0xff]  ;;  %1193 = vst.msk [vmem:[#allocation2 + $0x7f] sm:$0xff] %vm495_vm1, %v1191_v18  ;;  %1194 = vst.msk [vmem:[#allocation2 + $0x87] sm:$0xff] %vm495_vm1, %v1192_v19  ;;  %v1197_v28 = vadd.f32 %v18613_v9, %v1195_v24  ;;  %v1198_v29 = vadd.f32 %v18613_v9, %v1196_v25  ;;  %14566 = vmatmul.mubr.msk.f32.gmra.mrb[10].mxu1 %vm495_vm1, %v1298_v21  ;;  %v18862_v10 = vld [vmem:[#allocation2 + $0x52] sm:$0xff] }
 0x111   : > { %14856 = vmatprep.mubr.msk.f32.mxu0 %vm495_vm1, %v3020_v26  ;;  %941 = vst.msk [vmem:[#allocation7 + $0xa0] sm:$0xff] %vm495_vm1, %v914_v27  ;;  %14584 = vmatprep.mubr.msk.f32.mxu1 %vm495_vm1, %v1267_v17  ;;  %v1275_v17 = vld [vmem:[#allocation2 + $0x40] sm:$0xff]  ;;  %v1276_v24 = vld [vmem:[#allocation2 + $0x48] sm:$0xff] }
 0x112   : > { %v1199_v31 = vmax.f32 %v1197_v28, 0.0  ;;  %v1200_v32 = vmax.f32 %v1198_v29, 0.0  ;;  %v1204_v33 = vld [vmem:[#allocation7 + $0x98] sm:$0xff]  ;;  %v14511_v34 = vpop.f32.mrb[22].mxu0  ;;  %v12256_v29 = vld [vmem:[%s22523_s3 + $0xd0] sm:$0xff] }
 0x113   : > { %v1206_v38 = vadd.f32 %v18613_v9, %v1204_v33  ;;  %944 = vst.msk [vmem:[#allocation7 + $0xb8] sm:$0xff] %vm495_vm1, %v14511_v34  ;;  %v924_v40 = vpop.f32.mrb[23].mxu0  ;;  %v1630_v28 = vld [vmem:[#allocation2 + $0x2] sm:$0xff]  ;;  %v1631_v33 = vld [vmem:[#allocation2 + $0xa] sm:$0xff] }
 0x114   : > { %v3021_v41 = vld [vmem:[#allocation2 + $0x69] sm:$0xff]  ;;  %v3022_v42 = vld [vmem:[#allocation2 + $0x71] sm:$0xff]  ;;  %1201 = vst.msk [vmem:[#allocation2 + $0x91] sm:$0xff] %vm495_vm1, %v1199_v31  ;;  %1202 = vst.msk [vmem:[#allocation2 + $0x99] sm:$0xff] %vm495_vm1, %v1200_v32  ;;  %14585 = vmatmul.mubr.msk.f32.vlgmr.msra.gmra.mrb[0].mxu1 %vm495_vm1, %v1268_v30 }
 0x115   : > { %v1203_v39 = vld [vmem:[#allocation7 + $0x90] sm:$0xff]  ;;  %943 = vst.msk [vmem:[#allocation7 + $0xb0] sm:$0xff] %vm495_vm1, %v924_v40  ;;  %14857 = vmatmul.mubr.msk.f32.vlgmr.msra.gmra.mrb[36].mxu0 %vm495_vm1, %v3021_v41  ;;  %v1208_v45 = vmax.f32 %v1206_v38, 0.0  ;;  %16201 = vmatpush3.bf16.msra.mxu1 %v18604_v4  ;;  %v1278_v30 = vld [vmem:[#allocation2 + $0x58] sm:$0xff]  ;;  %v3001_v34 = vld [vmem:[#allocation2 + $0x68] sm:$0xff] }
 0x116   : > { %v1205_v43 = vadd.f32 %v18613_v9, %v1203_v39  ;;  %14587 = vmatprep.mubr.msk.f32.mxu1 %vm495_vm1, %v1269_v44  ;;  %14859 = vmatprep.mubr.msk.f32.mxu0 %vm495_vm1, %v3022_v42  ;;  %v14518_v49 = vpop.f32.mrb[24].mxu0  ;;  %v12257_v32 = vld [vmem:[%s22523_s3 + $0xd8] sm:$0xff]  ;;  %v3002_v38 = vld [vmem:[#allocation2 + $0x70] sm:$0xff]  ;;  %v12259_v39 = vld [vmem:[%s22523_s3 + $0xe8] sm:$0xff] }
 0x117   : > { %16203 = vmatprep.subr.bf16.mxu1 %v18682_v35  ;;  %1210 = vst.msk [vmem:[#allocation2 + $0xab] sm:$0xff] %vm495_vm1, %v1208_v45  ;;  %v3023_v51 = vld [vmem:[#allocation2 + $0x79] sm:$0xff]  ;;  %v3024_v52 = vld [vmem:[#allocation2 + $0x81] sm:$0xff]  ;;  %16329 = vmatpush3.bf16.msra.mxu0 %v18563_v56  ;;  %1121 = vst.msk [vmem:[#allocation7 + $0xc8] sm:$0xff] %vm495_vm1, %v14518_v49  ;;  %v1061_v53 = vpop.f32.mrb[25].mxu0  ;;  %v18776_v36 = vpack.c.bf16 %v12257_v32, %v12256_v29 }
 0x118   : > { %v1207_v46 = vmax.f32 %v1205_v43, 0.0  ;;  %v1211_v50 = vld [vmem:[#allocation7 + $0xa2] sm:$0xff]  ;;  %14588 = vmatmul.mubr.msk.f32.gmra.mrb[2].mxu1 %vm495_vm1, %v1270_v47  ;;  %1120 = vst.msk [vmem:[#allocation7 + $0xc0] sm:$0xff] %vm495_vm1, %v1061_v53  ;;  %v3025_v58 = vld [vmem:[#allocation2 + $0x89] sm:$0xff]  ;;  %16331 = vmatprep.subr.bf16.mxu0 %v18574_v59  ;;  %v18797_v49 = vld [vmem:[#allocation2 + $0x1a] sm:$0xff] }
 0x119   : > { %v1213_v54 = vadd.f32 %v18613_v9, %v1211_v50  ;;  %14860 = vmatmul.mubr.msk.f32.gmra.mrb[38].mxu0 %vm495_vm1, %v3023_v51  ;;  %v12241_v56 = vld [vmem:[%s22523_s3 + $0xb8] sm:$0xff]  ;;  %14590 = vmatprep.mubr.msk.f32.mxu1 %vm495_vm1, %v1271_v55  ;;  %v3004_v50 = vld [vmem:[#allocation2 + $0x80] sm:$0xff]  ;;  %v12260_v53 = vld [vmem:[%s22523_s3 + $0xf0] sm:$0xff] }
 0x11a   : > { %1209 = vst.msk [vmem:[#allocation2 + $0xa3] sm:$0xff] %vm495_vm1, %v1207_v46  ;;  %16205 = vmatpush3.bf16.msra.mxu1 %v18682_v35  ;;  %14862 = vmatprep.mubr.msk.f32.mxu0 %vm495_vm1, %v3024_v52  ;;  %v18723_v3 = vpack.c.bf16 %v12241_v56, %v12240_v57  ;;  %v14521_v20 = vpop.f32.mrb[26].mxu0  ;;  %v18786_v41 = vld [vmem:[#allocation2 + $0x12] sm:$0xff]  ;;  %v18795_v46 = vpack.c.bf16 %v12259_v39, %v12258_v37  ;;  %v18803_v52 = vld [vmem:[#allocation2 + $0x22] sm:$0xff]  ;;  %v18818_v57 = vld [vmem:[#allocation2 + $0x2a] sm:$0xff] }
 0x11b   : > { %v1215_v60 = vmax.f32 %v1213_v54, 0.0  ;;  %16207 = vmatprep.subr.bf16.mxu1 %v18702_v48  ;;  %v3026_v2 = vld [vmem:[#allocation2 + $0x91] sm:$0xff]  ;;  %v3027_v11 = vld [vmem:[#allocation2 + $0x99] sm:$0xff]  ;;  %16333 = vmatpush3.bf16.msra.mxu0 %v18574_v59  ;;  %1123 = vst.msk [vmem:[#allocation7 + $0xd8] sm:$0xff] %vm495_vm1, %v14521_v20  ;;  %v1071_v23 = vpop.f32.mrb[27].mxu0  ;;  %v12279_v20 = vld [vmem:[%s22523_s3 + $0x128] sm:$0xff] }
 0x11c   : > { %v1212_v63 = vld [vmem:[#allocation7 + $0xaa] sm:$0xff]  ;;  %v1219_v0 = vld [vmem:[#allocation7 + $0xb4] sm:$0xff]  ;;  %14591 = vmatmul.mubr.msk.f32.gmra.mrb[4].mxu1 %vm495_vm1, %v1272_v61  ;;  %16335 = vmatprep.subr.bf16.mxu0 %v18584_v62  ;;  %1122 = vst.msk [vmem:[#allocation7 + $0xd0] sm:$0xff] %vm495_vm1, %v1071_v23  ;;  %v3006_v55 = vld [vmem:[#allocation2 + $0x90] sm:$0xff] }
 0x11d   : > { %1217 = vst.msk [vmem:[#allocation2 + $0xb5] sm:$0xff] %vm495_vm1, %v1215_v60  ;;  %v1214_v5 = vadd.f32 %v18613_v9, %v1212_v63  ;;  %v1221_v6 = vadd.f32 %v18613_v9, %v1219_v0  ;;  %14863 = vmatmul.mubr.msk.f32.gmra.mrb[40].mxu0 %vm495_vm1, %v3025_v58  ;;  %14593 = vmatprep.mubr.msk.f32.mxu1 %vm495_vm1, %v1273_v7  ;;  %v3003_v44 = vld [vmem:[#allocation2 + $0x78] sm:$0xff]  ;;  %v12274_v60 = vld [vmem:[%s22523_s3 + $0x100] sm:$0xff]  ;;  %v12275_v61 = vld [vmem:[%s22523_s3 + $0x108] sm:$0xff] }
 0x11e   : > { %14865 = vmatprep.mubr.msk.f32.mxu0 %vm495_vm1, %v3026_v2  ;;  %16209 = vmatpush3.bf16.msra.mxu1 %v18702_v48  ;;  %v12261_v54 = vld [vmem:[%s22523_s3 + $0xf8] sm:$0xff] }
 0x11f   : > { %v1216_v12 = vmax.f32 %v1214_v5, 0.0  ;;  %v1223_v13 = vmax.f32 %v1221_v6, 0.0  ;;  %16211 = vmatprep.subr.bf16.mxu1 %v18723_v3  ;;  %v1220_v18 = vld [vmem:[#allocation7 + $0xbc] sm:$0xff]  ;;  %v1227_v19 = vld [vmem:[#allocation7 + $0xc6] sm:$0xff]  ;;  %16337 = vmatpush3.bf16.msra.mxu0 %v18584_v62  ;;  %v18821_v56 = vpack.c.bf16 %v12261_v54, %v12260_v53  ;;  %v18843_v5 = vpack.c.bf16 %v12275_v61, %v12274_v60  ;;  %v18848_v6 = vld [vmem:[#allocation2 + $0x42] sm:$0xff] }
 0x120   : > { %14594 = vmatmul.mubr.msk.f32.gmra.mrb[6].mxu1 %vm495_vm1, %v1274_v14  ;;  %v1222_v21 = vadd.f32 %v18613_v9, %v1220_v18  ;;  %v1229_v22 = vadd.f32 %v18613_v9, %v1227_v19  ;;  %16339 = vmatprep.subr.bf16.mxu0 %v18594_v1  ;;  %v1277_v62 = vld [vmem:[#allocation2 + $0x50] sm:$0xff]  ;;  %v3007_v63 = vld [vmem:[#allocation2 + $0x98] sm:$0xff]  ;;  %v18880_v14 = vld [vmem:[#allocation2 + $0x62] sm:$0xff] }
 0x121   : > { %v3028_v15 = vld [vmem:[#allocation2 + $0xa1] sm:$0xff]  ;;  %1218 = vst.msk [vmem:[#allocation2 + $0xbd] sm:$0xff] %vm495_vm1, %v1216_v12  ;;  %1225 = vst.msk [vmem:[#allocation2 + $0xc7] sm:$0xff] %vm495_vm1, %v1223_v13  ;;  %14866 = vmatmul.mubr.msk.f32.gmra.mrb[42].mxu0 %vm495_vm1, %v3027_v11  ;;  %14596 = vmatprep.mubr.msk.f32.mxu1 %vm495_vm1, %v1275_v17  ;;  %v3029_v59 = vld [vmem:[#allocation2 + $0xa9] sm:$0xff] }
 0x122   : > { %14868 = vmatprep.mubr.msk.f32.mxu0 %vm495_vm1, %v3028_v15  ;;  %16213 = vmatpush3.bf16.msra.mxu1 %v18723_v3  ;;  %v1224_v26 = vmax.f32 %v1222_v21, 0.0  ;;  %v1231_v27 = vmax.f32 %v1229_v22, 0.0  ;;  %v1235_v40 = vld [vmem:[#allocation7 + $0xd8] sm:$0xff]  ;;  %v18826_v58 = vld [vmem:[#allocation2 + $0x32] sm:$0xff]  ;;  %v3008_v0 = vld [vmem:[#allocation2 + $0xa0] sm:$0xff]  ;;  %v14524_v15 = vpop.f32.mrb[28].mxu0 }
 0x123   : > { %16215 = vmatprep.subr.bf16.mxu1 %v18742_v16  ;;  %16341 = vmatpush3.bf16.msra.mxu0 %v18594_v1  ;;  %v3000_v1 = vld [vmem:[#allocation2 + $0x60] sm:$0xff]  ;;  %v1237_v42 = vadd.f32 %v18613_v9, %v1235_v40  ;;  %v12276_v12 = vld [vmem:[%s22523_s3 + $0x110] sm:$0xff]  ;;  %v12277_v13 = vld [vmem:[%s22523_s3 + $0x118] sm:$0xff]  ;;  %1125 = vst.msk [vmem:[#allocation7 + $0xe8] sm:$0xff] %vm495_vm1, %v14524_v15 }
 0x124   : > { %v3030_v25 = vld [vmem:[#allocation2 + $0xb1] sm:$0xff]  ;;  %14597 = vmatmul.mubr.msk.f32.gmra.mrb[8].mxu1 %vm495_vm1, %v1276_v24  ;;  %1226 = vst.msk [vmem:[#allocation2 + $0xcf] sm:$0xff] %vm495_vm1, %v1224_v26  ;;  %1233 = vst.msk [vmem:[#allocation2 + $0xd9] sm:$0xff] %vm495_vm1, %v1231_v27  ;;  %16343 = vmatprep.subr.bf16.mxu0 %v18604_v4  ;;  %v1228_v43 = vld [vmem:[#allocation7 + $0xce] sm:$0xff]  ;;  %v18888_v17 = vpack.c.bf16 %v12277_v13, %v12276_v12 }
 0x125   : > { %14869 = vmatmul.mubr.msk.f32.gmra.mrb[44].mxu0 %vm495_vm1, %v3029_v59  ;;  %14599 = vmatprep.mubr.msk.f32.mxu1 %vm495_vm1, %v1277_v62  ;;  %v1230_v45 = vadd.f32 %v18613_v9, %v1228_v43  ;;  %v1239_v47 = vmax.f32 %v1237_v42, 0.0  ;;  %v18839_v2 = vld [vmem:[#allocation2 + $0x3a] sm:$0xff]  ;;  %v3010_v7 = vld [vmem:[#allocation2 + $0xb0] sm:$0xff]  ;;  %v1081_v59 = vpop.f32.mrb[29].mxu0  ;;  %v18963_v39 = vld [vmem:[#allocation2 + $0xa2] sm:$0xff] }
 0x126   : > { %14871 = vmatprep.mubr.msk.f32.mxu0 %vm495_vm1, %v3030_v25  ;;  %v18868_v11 = vld [vmem:[#allocation2 + $0x5a] sm:$0xff]  ;;  %v18891_v18 = vld [vmem:[#allocation2 + $0x72] sm:$0xff]  ;;  %1124 = vst.msk [vmem:[#allocation7 + $0xe0] sm:$0xff] %vm495_vm1, %v1081_v59  ;;  %v14527_v22 = vpop.f32.mrb[30].mxu0  ;;  %v18915_v25 = vld [vmem:[#allocation2 + $0x82] sm:$0xff] }
 0x127   : > { %v1232_v51 = vmax.f32 %v1230_v45, 0.0  ;;  %1241 = vst.msk [vmem:[#allocation2 + $0xeb] sm:$0xff] %vm495_vm1, %v1239_v47  ;;  %v12278_v19 = vld [vmem:[%s22523_s3 + $0x120] sm:$0xff]  ;;  %1127 = vst.msk [vmem:[#allocation7 + $0xf8] sm:$0xff] %vm495_vm1, %v14527_v22  ;;  %v1091_v24 = vpop.f32.mrb[31].mxu0  ;;  %v12280_v62 = vld [vmem:[%s22523_s3 + $0x130] sm:$0xff] }
 0x128   : > { %v3031_v31 = vld [vmem:[#allocation2 + $0xb9] sm:$0xff]  ;;  %14600 = vmatmul.mubr.msk.f32.gmra.mrb[10].mxu1 %vm495_vm1, %v1278_v30  ;;  %v18912_v23 = vpack.c.bf16 %v12279_v20, %v12278_v19  ;;  %1126 = vst.msk [vmem:[#allocation7 + $0xf0] sm:$0xff] %vm495_vm1, %v1091_v24  ;;  %v14530_v27 = vpop.f32.mrb[32].mxu0  ;;  %v12296_v60 = vld [vmem:[%s22523_s3 + $0x150] sm:$0xff]  ;;  %v2024_v15 = vld [vmem:[#allocation2 + $0x43] sm:$0xff] }
 0x129   : > { %14872 = vmatmul.mubr.msk.f32.gmra.mrb[46].mxu0 %vm495_vm1, %v3031_v31  ;;  %14618 = vmatprep.mubr.msk.f32.mxu1 %vm495_vm1, %v1630_v28  ;;  %1234 = vst.msk [vmem:[#allocation2 + $0xe1] sm:$0xff] %vm495_vm1, %v1232_v51  ;;  %v18907_v21 = vld [vmem:[#allocation2 + $0x7a] sm:$0xff]  ;;  %v18937_v28 = vld [vmem:[#allocation2 + $0x92] sm:$0xff]  ;;  %1129 = vst.msk [vmem:[#allocation7 + $0x108] sm:$0xff] %vm495_vm1, %v14530_v27  ;;  %v1101_v30 = vpop.f32.mrb[33].mxu0 }
 0x12a   : > { %14890 = vmatprep.mubr.msk.f32.mxu0 %vm495_vm1, %v3000_v1  ;;  %v12281_v26 = vld [vmem:[%s22523_s3 + $0x138] sm:$0xff]  ;;  %1128 = vst.msk [vmem:[#allocation7 + $0x100] sm:$0xff] %vm495_vm1, %v1101_v30  ;;  %v12294_v1 = vld [vmem:[%s22523_s3 + $0x140] sm:$0xff]  ;;  %v12300_v13 = vld [vmem:[%s22523_s3 + $0x170] sm:$0xff] }
 0x12b   : > { %v18941_v31 = vpack.c.bf16 %v12281_v26, %v12280_v62  ;;  %v12297_v61 = vld [vmem:[%s22523_s3 + $0x158] sm:$0xff]  ;;  %v12314_v59 = vld [vmem:[%s22523_s3 + $0x180] sm:$0xff]  ;;  %v2025_v19 = vld [vmem:[#allocation2 + $0x4b] sm:$0xff] }
 0x12c   : > { %14619 = vmatmul.mubr.msk.f32.vlgmr.msra.gmra.mrb[0].mxu1 %vm495_vm1, %v1631_v33  ;;  %v12295_v33 = vld [vmem:[%s22523_s3 + $0x148] sm:$0xff]  ;;  %v2022_v12 = vld [vmem:[#allocation2 + $0x33] sm:$0xff]  ;;  %v2027_v22 = vld [vmem:[#allocation2 + $0x5b] sm:$0xff] }
 0x12d   : > { %14891 = vmatmul.mubr.msk.f32.vlgmr.msra.gmra.mrb[36].mxu0 %vm495_vm1, %v3001_v34  ;;  %16217 = vmatpush3.bf16.msra.mxu1 %v18742_v16  ;;  %v1236_v29 = vld [vmem:[#allocation7 + $0xe0] sm:$0xff]  ;;  %v18959_v34 = vld [vmem:[#allocation2 + $0x9a] sm:$0xff]  ;;  %v18968_v43 = vpack.c.bf16 %v12295_v33, %v12294_v1  ;;  %v2028_v24 = vld [vmem:[#allocation2 + $0x63] sm:$0xff] }
 0x12e   : > { %14621 = vmatprep.mubr.msk.f32.mxu1 %vm495_vm1, %v18786_v41  ;;  %14893 = vmatprep.mubr.msk.f32.mxu0 %vm495_vm1, %v3002_v38  ;;  %v1238_v32 = vadd.f32 %v18613_v9, %v1236_v29  ;;  %v14533_v38 = vpop.f32.mrb[34].mxu0  ;;  %v12316_v62 = vld [vmem:[%s22523_s3 + $0x190] sm:$0xff]  ;;  %v12317_v26 = vld [vmem:[%s22523_s3 + $0x198] sm:$0xff]  ;;  %v19116_v1 = vld [vmem:[#allocation2 + $0x24] sm:$0xff] }
 0x12f   : > { %16219 = vmatprep.subr.bf16.mxu1 %v18776_v36  ;;  %16345 = vmatpush3.bf16.msra.mxu0 %v18604_v4  ;;  %v3005_v4 = vld [vmem:[#allocation2 + $0x88] sm:$0xff]  ;;  %v1243_v40 = vld [vmem:[#allocation7 + $0xea] sm:$0xff]  ;;  %1131 = vst.msk [vmem:[#allocation7 + $0x118] sm:$0xff] %vm495_vm1, %v14533_v38  ;;  %v1111_v42 = vpop.f32.mrb[35].mxu0  ;;  %v19106_v29 = vpack.c.bf16 %v12317_v26, %v12316_v62 }
 0x130   : > { %14622 = vmatmul.mubr.msk.f32.gmra.mrb[2].mxu1 %vm495_vm1, %v18797_v49  ;;  %16347 = vmatprep.subr.bf16.mxu0 %v18682_v35  ;;  %v1240_v37 = vmax.f32 %v1238_v32, 0.0  ;;  %1130 = vst.msk [vmem:[#allocation7 + $0x110] sm:$0xff] %vm495_vm1, %v1111_v42  ;;  %v3748_v27 = vld [vmem:[#allocation2 + $0x73] sm:$0xff]  ;;  %v3749_v30 = vld [vmem:[#allocation2 + $0x7b] sm:$0xff]  ;;  %v12319_v32 = vld [vmem:[%s22523_s3 + $0x1a8] sm:$0xff] }
 0x131   : > { %14894 = vmatmul.mubr.msk.f32.gmra.mrb[38].mxu0 %vm495_vm1, %v3003_v44  ;;  %14624 = vmatprep.mubr.msk.f32.mxu1 %vm495_vm1, %v18803_v52  ;;  %v1245_v44 = vadd.f32 %v18613_v9, %v1243_v40  ;;  %v1251_v51 = vld [vmem:[#allocation7 + $0xfc] sm:$0xff]  ;;  %v3750_v33 = vld [vmem:[#allocation2 + $0x83] sm:$0xff]  ;;  %v2216_v40 = vld [vmem:[#allocation2 + $0x34] sm:$0xff] }
 0x132   : > { %16221 = vmatpush3.bf16.msra.mxu1 %v18776_v36  ;;  %14896 = vmatprep.mubr.msk.f32.mxu0 %vm495_vm1, %v3004_v50  ;;  %1242 = vst.msk [vmem:[#allocation2 + $0xf3] sm:$0xff] %vm495_vm1, %v1240_v37  ;;  %v18986_v50 = vld [vmem:[#allocation2 + $0xb2] sm:$0xff]  ;;  %v1253_v53 = vadd.f32 %v18613_v9, %v1251_v51  ;;  %v12358_v26 = vld [vmem:[%s22523_s3 + $0x220] sm:$0xff] }
 0x133   : > { %16223 = vmatprep.subr.bf16.mxu1 %v18795_v46  ;;  %16349 = vmatpush3.bf16.msra.mxu0 %v18682_v35  ;;  %v3009_v35 = vld [vmem:[#allocation2 + $0xa8] sm:$0xff]  ;;  %v1247_v47 = vmax.f32 %v1245_v44, 0.0  ;;  %v12321_v42 = vld [vmem:[%s22523_s3 + $0x1b8] sm:$0xff] }
 0x134   : > { %14625 = vmatmul.mubr.msk.f32.gmra.mrb[4].mxu1 %vm495_vm1, %v18818_v57  ;;  %16351 = vmatprep.subr.bf16.mxu0 %v18702_v48  ;;  %v19125_v38 = vld [vmem:[#allocation2 + $0x2c] sm:$0xff]  ;;  %v3753_v44 = vld [vmem:[#allocation2 + $0x9b] sm:$0xff] }
 0x135   : > { %14897 = vmatmul.mubr.msk.f32.gmra.mrb[40].mxu0 %vm495_vm1, %v3005_v4  ;;  %14627 = vmatprep.mubr.msk.f32.mxu1 %vm495_vm1, %v18826_v58  ;;  %1249 = vst.msk [vmem:[#allocation2 + $0xfd] sm:$0xff] %vm495_vm1, %v1247_v47  ;;  %v1255_v4 = vmax.f32 %v1253_v53, 0.0  ;;  %v2218_v47 = vld [vmem:[#allocation2 + $0x44] sm:$0xff]  ;;  %v2219_v53 = vld [vmem:[#allocation2 + $0x4c] sm:$0xff] }
 0x136   : > { %14899 = vmatprep.mubr.msk.f32.mxu0 %vm495_vm1, %v3006_v55  ;;  %16225 = vmatpush3.bf16.msra.mxu1 %v18795_v46  ;;  %v3755_v51 = vld [vmem:[#allocation2 + $0xab] sm:$0xff] }
 0x137   : > { %16227 = vmatprep.subr.bf16.mxu1 %v18821_v56  ;;  %16353 = vmatpush3.bf16.msra.mxu0 %v18702_v48  ;;  %v3011_v48 = vld [vmem:[#allocation2 + $0xb8] sm:$0xff]  ;;  %1257 = vst.msk [vmem:[#allocation2 + $0x10f] sm:$0xff] %vm495_vm1, %v1255_v4  ;;  %v2601_v62 = vld [vmem:[#allocation2 + $0x2d] sm:$0xff] }
 0x138   : > { %14628 = vmatmul.mubr.msk.f32.gmra.mrb[6].mxu1 %vm495_vm1, %v18839_v2  ;;  %16355 = vmatprep.subr.bf16.mxu0 %v18723_v3  ;;  %v3757_v4 = vld [vmem:[#allocation2 + $0xbb] sm:$0xff] }
 0x139   : > { %14900 = vmatmul.mubr.msk.f32.gmra.mrb[42].mxu0 %vm495_vm1, %v3007_v63  ;;  %14630 = vmatprep.mubr.msk.f32.mxu1 %vm495_vm1, %v18848_v6 }
 0x13a   : > { %14902 = vmatprep.mubr.msk.f32.mxu0 %vm495_vm1, %v3008_v0  ;;  %16229 = vmatpush3.bf16.msra.mxu1 %v18821_v56  ;;  %v2018_v0 = vld [vmem:[#allocation2 + $0x13] sm:$0xff] }
 0x13b   : > { %16231 = vmatprep.subr.bf16.mxu1 %v18843_v5  ;;  %16357 = vmatpush3.bf16.msra.mxu0 %v18723_v3  ;;  %v18886_v3 = vld [vmem:[#allocation2 + $0x6a] sm:$0xff] }
 0x13c   : > { %14631 = vmatmul.mubr.msk.f32.gmra.mrb[8].mxu1 %vm495_vm1, %v18855_v8  ;;  %16359 = vmatprep.subr.bf16.mxu0 %v18742_v16 }
 0x13d   : > { %14903 = vmatmul.mubr.msk.f32.gmra.mrb[44].mxu0 %vm495_vm1, %v3009_v35  ;;  %14633 = vmatprep.mubr.msk.f32.mxu1 %vm495_vm1, %v18862_v10  ;;  %v19023_v35 = vpack.c.bf16 %v12297_v61, %v12296_v60  ;;  %v3759_v60 = vld [vmem:[#allocation2 + $0xcb] sm:$0xff] }
 0x13e   : > { %14905 = vmatprep.mubr.msk.f32.mxu0 %vm495_vm1, %v3010_v7  ;;  %v2019_v7 = vld [vmem:[#allocation2 + $0x1b] sm:$0xff]  ;;  %v2223_v61 = vld [vmem:[#allocation2 + $0x6c] sm:$0xff] }
 0x140   : > { %14634 = vmatmul.mubr.msk.f32.gmra.mrb[10].mxu1 %vm495_vm1, %v18868_v11 }
 0x141   : > { %14906 = vmatmul.mubr.msk.f32.gmra.mrb[46].mxu0 %vm495_vm1, %v3011_v48  ;;  %14652 = vmatprep.mubr.msk.f32.mxu1 %vm495_vm1, %v18786_v41  ;;  %v1244_v41 = vld [vmem:[#allocation7 + $0xf2] sm:$0xff] }
 0x142   : > { %14924 = vmatprep.mubr.msk.f32.mxu0 %vm495_vm1, %v18880_v14  ;;  %v1246_v45 = vadd.f32 %v18613_v9, %v1244_v41  ;;  %v12320_v41 = vld [vmem:[%s22523_s3 + $0x1b0] sm:$0xff] }
 0x144   : > { %14653 = vmatmul.mubr.msk.f32.vlgmr.msra.gmra.mrb[0].mxu1 %vm495_vm1, %v18797_v49  ;;  %v1248_v49 = vmax.f32 %v1246_v45, 0.0  ;;  %v2217_v45 = vld [vmem:[#allocation2 + $0x3c] sm:$0xff] }
 0x145   : > { %14925 = vmatmul.mubr.msk.f32.vlgmr.msra.gmra.mrb[36].mxu0 %vm495_vm1, %v18886_v3  ;;  %16233 = vmatpush3.bf16.msra.mxu1 %v18843_v5 }
 0x146   : > { %14655 = vmatprep.mubr.msk.f32.mxu1 %vm495_vm1, %v18803_v52  ;;  %14927 = vmatprep.mubr.msk.f32.mxu0 %vm495_vm1, %v18891_v18  ;;  %v1252_v52 = vld [vmem:[#allocation7 + $0x104] sm:$0xff]  ;;  %1250 = vst.msk [vmem:[#allocation2 + $0x105] sm:$0xff] %vm495_vm1, %v1248_v49  ;;  %v12334_v49 = vld [vmem:[%s22523_s3 + $0x1c0] sm:$0xff] }
 0x147   : > { %16235 = vmatprep.subr.bf16.mxu1 %v18888_v17  ;;  %16361 = vmatpush3.bf16.msra.mxu0 %v18742_v16  ;;  %v18932_v16 = vld [vmem:[#allocation2 + $0x8a] sm:$0xff]  ;;  %v1254_v54 = vadd.f32 %v18613_v9, %v1252_v52  ;;  %v3756_v52 = vld [vmem:[#allocation2 + $0xb3] sm:$0xff] }
 0x148   : > { %14656 = vmatmul.mubr.msk.f32.gmra.mrb[2].mxu1 %vm495_vm1, %v18818_v57  ;;  %16363 = vmatprep.subr.bf16.mxu0 %v18776_v36  ;;  %v1259_v57 = vld [vmem:[#allocation7 + $0x10e] sm:$0xff] }
 0x149   : > { %14928 = vmatmul.mubr.msk.f32.gmra.mrb[38].mxu0 %vm495_vm1, %v18907_v21  ;;  %14658 = vmatprep.mubr.msk.f32.mxu1 %vm495_vm1, %v18826_v58  ;;  %v1256_v55 = vmax.f32 %v1254_v54, 0.0  ;;  %v1260_v58 = vld [vmem:[#allocation7 + $0x116] sm:$0xff]  ;;  %v1261_v63 = vadd.f32 %v18613_v9, %v1259_v57  ;;  %v2221_v57 = vld [vmem:[#allocation2 + $0x5c] sm:$0xff] }
 0x14a   : > { %16237 = vmatpush3.bf16.msra.mxu1 %v18888_v17  ;;  %14930 = vmatprep.mubr.msk.f32.mxu0 %vm495_vm1, %v18915_v25 }
 0x14b   : > { %16239 = vmatprep.subr.bf16.mxu1 %v18912_v23  ;;  %16365 = vmatpush3.bf16.msra.mxu0 %v18776_v36  ;;  %v18982_v36 = vld [vmem:[#allocation2 + $0xaa] sm:$0xff]  ;;  %1258 = vst.msk [vmem:[#allocation2 + $0x117] sm:$0xff] %vm495_vm1, %v1256_v55 }
 0x14c   : > { %14659 = vmatmul.mubr.msk.f32.gmra.mrb[4].mxu1 %vm495_vm1, %v18839_v2  ;;  %16367 = vmatprep.subr.bf16.mxu0 %v18795_v46  ;;  %v1263_v2 = vmax.f32 %v1261_v63, 0.0  ;;  %v3758_v55 = vld [vmem:[#allocation2 + $0xc3] sm:$0xff]  ;;  %v12336_v63 = vld [vmem:[%s22523_s3 + $0x1d0] sm:$0xff] }
 0x14d   : > { %14931 = vmatmul.mubr.msk.f32.gmra.mrb[40].mxu0 %vm495_vm1, %v18932_v16  ;;  %14661 = vmatprep.mubr.msk.f32.mxu1 %vm495_vm1, %v18848_v6 }
 0x14e   : > { %14933 = vmatprep.mubr.msk.f32.mxu0 %vm495_vm1, %v18937_v28  ;;  %16241 = vmatpush3.bf16.msra.mxu1 %v18912_v23  ;;  %1265 = vst.msk [vmem:[#allocation2 + $0x121] sm:$0xff] %vm495_vm1, %v1263_v2 }
 0x14f   : > { %16243 = vmatprep.subr.bf16.mxu1 %v18941_v31  ;;  %16369 = vmatpush3.bf16.msra.mxu0 %v18795_v46  ;;  %v19002_v46 = vld [vmem:[#allocation2 + $0xba] sm:$0xff] }
 0x150   : > { %14662 = vmatmul.mubr.msk.f32.gmra.mrb[6].mxu1 %vm495_vm1, %v18855_v8  ;;  %16371 = vmatprep.subr.bf16.mxu0 %v18821_v56  ;;  %v12299_v8 = vld [vmem:[%s22523_s3 + $0x168] sm:$0xff] }
 0x151   : > { %14934 = vmatmul.mubr.msk.f32.gmra.mrb[42].mxu0 %vm495_vm1, %v18959_v34  ;;  %14664 = vmatprep.mubr.msk.f32.mxu1 %vm495_vm1, %v18862_v10  ;;  %v2020_v10 = vld [vmem:[#allocation2 + $0x23] sm:$0xff] }
 0x152   : > { %14936 = vmatprep.mubr.msk.f32.mxu0 %vm495_vm1, %v18963_v39  ;;  %16245 = vmatpush3.bf16.msra.mxu1 %v18941_v31 }
 0x153   : > { %16247 = vmatprep.subr.bf16.mxu1 %v18968_v43  ;;  %16373 = vmatpush3.bf16.msra.mxu0 %v18821_v56  ;;  %v1262_v56 = vadd.f32 %v18613_v9, %v1260_v58  ;;  %v12298_v9 = vld [vmem:[%s22523_s3 + $0x160] sm:$0xff] }
 0x154   : > { %14665 = vmatmul.mubr.msk.f32.gmra.mrb[8].mxu1 %vm495_vm1, %v18868_v11  ;;  %16375 = vmatprep.subr.bf16.mxu0 %v18843_v5  ;;  %v19041_v48 = vpack.c.bf16 %v12299_v8, %v12298_v9  ;;  %v2021_v11 = vld [vmem:[#allocation2 + $0x2b] sm:$0xff] }
 0x155   : > { %14937 = vmatmul.mubr.msk.f32.gmra.mrb[44].mxu0 %vm495_vm1, %v18982_v36  ;;  %14667 = vmatprep.mubr.msk.f32.mxu1 %vm495_vm1, %v18880_v14  ;;  %v1264_v6 = vmax.f32 %v1262_v56, 0.0  ;;  %v12301_v14 = vld [vmem:[%s22523_s3 + $0x178] sm:$0xff]  ;;  %v2222_v58 = vld [vmem:[#allocation2 + $0x64] sm:$0xff]  ;;  %v3944_v8 = vld [vmem:[#allocation2 + $0x8c] sm:$0xff] }
 0x156   : > { %14939 = vmatprep.mubr.msk.f32.mxu0 %vm495_vm1, %v18986_v50  ;;  %v12337_v56 = vld [vmem:[%s22523_s3 + $0x1d8] sm:$0xff]  ;;  %v3943_v9 = vld [vmem:[#allocation2 + $0x84] sm:$0xff] }
 0x157   : > { %1266 = vst.msk [vmem:[#allocation2 + $0x129] sm:$0xff] %vm495_vm1, %v1264_v6  ;;  %v19185_v2 = vpack.c.bf16 %v12337_v56, %v12336_v63  ;;  %v3942_v6 = vld [vmem:[#allocation2 + $0x7c] sm:$0xff]  ;;  %v4331_v63 = vld [vmem:[#allocation2 + $0xa5] sm:$0xff] }
 0x158   : > { %14668 = vmatmul.mubr.msk.f32.gmra.mrb[10].mxu1 %vm495_vm1, %v18886_v3  ;;  %v19059_v3 = vpack.c.bf16 %v12301_v14, %v12300_v13  ;;  %v3946_v13 = vld [vmem:[#allocation2 + $0x9c] sm:$0xff]  ;;  %v3947_v14 = vld [vmem:[#allocation2 + $0xa4] sm:$0xff] }
 0x159   : > { %14940 = vmatmul.mubr.msk.f32.gmra.mrb[46].mxu0 %vm495_vm1, %v19002_v46  ;;  %14686 = vmatprep.mubr.msk.f32.mxu1 %vm495_vm1, %v2018_v0  ;;  %v3941_v0 = vld [vmem:[#allocation2 + $0x74] sm:$0xff]  ;;  %v2798_v56 = vld [vmem:[#allocation2 + $0x46] sm:$0xff] }
 0x15a   : > { %14958 = vmatprep.mubr.msk.f32.mxu0 %vm495_vm1, %v18891_v18  ;;  %v12315_v18 = vld [vmem:[%s22523_s3 + $0x188] sm:$0xff] }
 0x15b   : > { %v19077_v20 = vpack.c.bf16 %v12315_v18, %v12314_v59  ;;  %v3948_v59 = vld [vmem:[#allocation2 + $0xac] sm:$0xff]  ;;  %v3949_v18 = vld [vmem:[#allocation2 + $0xb4] sm:$0xff] }
 0x15c   : > { %14687 = vmatmul.mubr.msk.f32.vlgmr.msra.gmra.mrb[0].mxu1 %vm495_vm1, %v2019_v7  ;;  %v12339_v7 = vld [vmem:[%s22523_s3 + $0x1e8] sm:$0xff] }
 0x15d   : > { %14959 = vmatmul.mubr.msk.f32.vlgmr.msra.gmra.mrb[36].mxu0 %vm495_vm1, %v18907_v21  ;;  %16249 = vmatpush3.bf16.msra.mxu1 %v18968_v43  ;;  %v2026_v21 = vld [vmem:[#allocation2 + $0x53] sm:$0xff] }
 0x15e   : > { %14689 = vmatprep.mubr.msk.f32.mxu1 %vm495_vm1, %v2020_v10  ;;  %14961 = vmatprep.mubr.msk.f32.mxu0 %vm495_vm1, %v18915_v25  ;;  %v3566_v25 = vld [vmem:[#allocation2 + $0xca] sm:$0xff] }
 0x15f   : > { %16251 = vmatprep.subr.bf16.mxu1 %v19023_v35  ;;  %16377 = vmatpush3.bf16.msra.mxu0 %v18843_v5  ;;  %v2023_v5 = vld [vmem:[#allocation2 + $0x3b] sm:$0xff] }
 0x160   : > { %14690 = vmatmul.mubr.msk.f32.gmra.mrb[2].mxu1 %vm495_vm1, %v2021_v11  ;;  %16379 = vmatprep.subr.bf16.mxu0 %v18888_v17  ;;  %v12340_v11 = vld [vmem:[%s22523_s3 + $0x1f0] sm:$0xff] }
 0x161   : > { %14962 = vmatmul.mubr.msk.f32.gmra.mrb[38].mxu0 %vm495_vm1, %v18932_v16  ;;  %14692 = vmatprep.mubr.msk.f32.mxu1 %vm495_vm1, %v2022_v12  ;;  %v2212_v16 = vld [vmem:[#allocation2 + $0x14] sm:$0xff] }
 0x162   : > { %16253 = vmatpush3.bf16.msra.mxu1 %v19023_v35  ;;  %14964 = vmatprep.mubr.msk.f32.mxu0 %vm495_vm1, %v18937_v28  ;;  %v2213_v28 = vld [vmem:[#allocation2 + $0x1c] sm:$0xff] }
 0x163   : > { %16255 = vmatprep.subr.bf16.mxu1 %v19041_v48  ;;  %16381 = vmatpush3.bf16.msra.mxu0 %v18888_v17  ;;  %v3565_v17 = vld [vmem:[#allocation2 + $0xc2] sm:$0xff]  ;;  %v12341_v12 = vld [vmem:[%s22523_s3 + $0x1f8] sm:$0xff] }
 0x164   : > { %14693 = vmatmul.mubr.msk.f32.gmra.mrb[4].mxu1 %vm495_vm1, %v2023_v5  ;;  %16383 = vmatprep.subr.bf16.mxu0 %v18912_v23  ;;  %v19216_v5 = vpack.c.bf16 %v12341_v12, %v12340_v11  ;;  %v4334_v11 = vld [vmem:[#allocation2 + $0xbd] sm:$0xff]  ;;  %v4335_v12 = vld [vmem:[#allocation2 + $0xc5] sm:$0xff] }
 0x165   : > { %14965 = vmatmul.mubr.msk.f32.gmra.mrb[40].mxu0 %vm495_vm1, %v18959_v34  ;;  %14695 = vmatprep.mubr.msk.f32.mxu1 %vm495_vm1, %v2024_v15  ;;  %v3751_v34 = vld [vmem:[#allocation2 + $0x8b] sm:$0xff] }
 0x166   : > { %14967 = vmatprep.mubr.msk.f32.mxu0 %vm495_vm1, %v18963_v39  ;;  %16257 = vmatpush3.bf16.msra.mxu1 %v19041_v48  ;;  %v3752_v39 = vld [vmem:[#allocation2 + $0x93] sm:$0xff]  ;;  %v12355_v15 = vld [vmem:[%s22523_s3 + $0x208] sm:$0xff] }
 0x167   : > { %16259 = vmatprep.subr.bf16.mxu1 %v19059_v3  ;;  %16385 = vmatpush3.bf16.msra.mxu0 %v18912_v23  ;;  %v2029_v23 = vld [vmem:[#allocation2 + $0x6b] sm:$0xff] }
 0x168   : > { %14696 = vmatmul.mubr.msk.f32.gmra.mrb[6].mxu1 %vm495_vm1, %v2025_v19  ;;  %16387 = vmatprep.subr.bf16.mxu0 %v18941_v31 }
 0x169   : > { %14968 = vmatmul.mubr.msk.f32.gmra.mrb[42].mxu0 %vm495_vm1, %v18982_v36  ;;  %14698 = vmatprep.mubr.msk.f32.mxu1 %vm495_vm1, %v2026_v21  ;;  %v19142_v36 = vpack.c.bf16 %v12321_v42, %v12320_v41  ;;  %v3951_v21 = vld [vmem:[#allocation2 + $0xc4] sm:$0xff]  ;;  %v19310_v42 = vld [vmem:[#allocation2 + $0xd4] sm:$0xff] }
 0x16a   : > { %14970 = vmatprep.mubr.msk.f32.mxu0 %vm495_vm1, %v18986_v50  ;;  %16261 = vmatpush3.bf16.msra.mxu1 %v19059_v3  ;;  %v12335_v50 = vld [vmem:[%s22523_s3 + $0x1c8] sm:$0xff] }
 0x16b   : > { %16263 = vmatprep.subr.bf16.mxu1 %v19077_v20  ;;  %16389 = vmatpush3.bf16.msra.mxu0 %v18941_v31  ;;  %v12318_v31 = vld [vmem:[%s22523_s3 + $0x1a0] sm:$0xff]  ;;  %v19158_v54 = vpack.c.bf16 %v12335_v50, %v12334_v49  ;;  %v12549_v49 = vld [vmem:[%s22523_s3 + $0x58] sm:$0xff] }
 0x16c   : > { %14699 = vmatmul.mubr.msk.f32.gmra.mrb[8].mxu1 %vm495_vm1, %v2027_v22  ;;  %16391 = vmatprep.subr.bf16.mxu0 %v18968_v43  ;;  %v19123_v37 = vpack.c.bf16 %v12319_v32, %v12318_v31  ;;  %v12356_v22 = vld [vmem:[%s22523_s3 + $0x210] sm:$0xff]  ;;  %v12361_v32 = vld [vmem:[%s22523_s3 + $0x238] sm:$0xff]  ;;  %v2608_v41 = vld [vmem:[#allocation2 + $0x65] sm:$0xff] }
 0x16d   : > { %14971 = vmatmul.mubr.msk.f32.gmra.mrb[44].mxu0 %vm495_vm1, %v19002_v46  ;;  %14701 = vmatprep.mubr.msk.f32.mxu1 %vm495_vm1, %v2028_v24  ;;  %v2220_v46 = vld [vmem:[#allocation2 + $0x54] sm:$0xff]  ;;  %v2794_v50 = vld [vmem:[#allocation2 + $0x26] sm:$0xff] }
 0x16e   : > { %14973 = vmatprep.mubr.msk.f32.mxu0 %vm495_vm1, %v3565_v17  ;;  %v3952_v17 = vld [vmem:[#allocation2 + $0xcc] sm:$0xff]  ;;  %v12357_v24 = vld [vmem:[%s22523_s3 + $0x218] sm:$0xff] }
 0x16f   : > { %v12360_v31 = vld [vmem:[%s22523_s3 + $0x230] sm:$0xff] }
 0x170   : > { %14702 = vmatmul.mubr.msk.f32.gmra.mrb[10].mxu1 %vm495_vm1, %v2029_v23  ;;  %v19258_v23 = vpack.c.bf16 %v12357_v24, %v12356_v22  ;;  %v4520_v22 = vld [vmem:[#allocation2 + $0x86] sm:$0xff] }
 0x171   : > { %14974 = vmatmul.mubr.msk.f32.gmra.mrb[46].mxu0 %vm495_vm1, %v3566_v25  ;;  %14720 = vmatprep.mubr.msk.f32.mxu1 %vm495_vm1, %v2212_v16  ;;  %v2600_v25 = vld [vmem:[#allocation2 + $0x25] sm:$0xff] }
 0x172   : > { %14992 = vmatprep.mubr.msk.f32.mxu0 %vm495_vm1, %v3748_v27  ;;  %v12359_v16 = vld [vmem:[%s22523_s3 + $0x228] sm:$0xff]  ;;  %v2602_v27 = vld [vmem:[#allocation2 + $0x35] sm:$0xff] }
 0x173   : > { %v4745_v24 = vld [vmem:[#allocation2 + $0xc1] sm:$0xff] }
 0x174   : > { %14721 = vmatmul.mubr.msk.f32.vlgmr.msra.gmra.mrb[0].mxu1 %vm495_vm1, %v2213_v28  ;;  %v19272_v28 = vpack.c.bf16 %v12359_v16, %v12358_v26  ;;  %v4522_v26 = vld [vmem:[#allocation2 + $0x96] sm:$0xff]  ;;  %v4741_v16 = vld [vmem:[%s22523_s3 + $0x20] sm:$0xff] }
 0x175   : > { %14993 = vmatmul.mubr.msk.f32.vlgmr.msra.gmra.mrb[36].mxu0 %vm495_vm1, %v3749_v30  ;;  %16265 = vmatpush3.bf16.msra.mxu1 %v19077_v20  ;;  %v2604_v30 = vld [vmem:[#allocation2 + $0x45] sm:$0xff] }
 0x176   : > { %14723 = vmatprep.mubr.msk.f32.mxu1 %vm495_vm1, %v19116_v1  ;;  %14995 = vmatprep.mubr.msk.f32.mxu0 %vm495_vm1, %v3750_v33  ;;  %v19288_v33 = vpack.c.bf16 %v12361_v32, %v12360_v31  ;;  %v4524_v31 = vld [vmem:[#allocation2 + $0xa6] sm:$0xff] }
 0x177   : > { %16267 = vmatprep.subr.bf16.mxu1 %v19106_v29  ;;  %16393 = vmatpush3.bf16.msra.mxu0 %v18968_v43  ;;  %v3754_v43 = vld [vmem:[#allocation2 + $0xa3] sm:$0xff] }
 0x178   : > { %14724 = vmatmul.mubr.msk.f32.gmra.mrb[2].mxu1 %vm495_vm1, %v19125_v38  ;;  %16395 = vmatprep.subr.bf16.mxu0 %v19023_v35 }
 0x179   : > { %14996 = vmatmul.mubr.msk.f32.gmra.mrb[38].mxu0 %vm495_vm1, %v3751_v34  ;;  %14726 = vmatprep.mubr.msk.f32.mxu1 %vm495_vm1, %v2216_v40  ;;  %v2606_v34 = vld [vmem:[#allocation2 + $0x55] sm:$0xff] }
 0x17a   : > { %16269 = vmatpush3.bf16.msra.mxu1 %v19106_v29  ;;  %14998 = vmatprep.mubr.msk.f32.mxu0 %vm495_vm1, %v3752_v39  ;;  %v2607_v39 = vld [vmem:[#allocation2 + $0x5d] sm:$0xff] }
 0x17b   : > { %16271 = vmatprep.subr.bf16.mxu1 %v19123_v37  ;;  %16397 = vmatpush3.bf16.msra.mxu0 %v19023_v35  ;;  %v12338_v35 = vld [vmem:[%s22523_s3 + $0x1e0] sm:$0xff] }
 0x17c   : > { %14727 = vmatmul.mubr.msk.f32.gmra.mrb[4].mxu1 %vm495_vm1, %v2217_v45  ;;  %16399 = vmatprep.subr.bf16.mxu0 %v19041_v48  ;;  %v19200_v10 = vpack.c.bf16 %v12339_v7, %v12338_v35  ;;  %v4333_v35 = vld [vmem:[#allocation2 + $0xb5] sm:$0xff] }
 0x17d   : > { %14999 = vmatmul.mubr.msk.f32.gmra.mrb[40].mxu0 %vm495_vm1, %v3753_v44  ;;  %14729 = vmatprep.mubr.msk.f32.mxu1 %vm495_vm1, %v2218_v47  ;;  %v2609_v44 = vld [vmem:[#allocation2 + $0x6d] sm:$0xff] }
 0x17e   : > { %15001 = vmatprep.mubr.msk.f32.mxu0 %vm495_vm1, %v3754_v43  ;;  %16273 = vmatpush3.bf16.msra.mxu1 %v19123_v37  ;;  %v2610_v43 = vld [vmem:[#allocation2 + $0x75] sm:$0xff] }
 0x17f   : > { %16275 = vmatprep.subr.bf16.mxu1 %v19142_v36  ;;  %16401 = vmatpush3.bf16.msra.mxu0 %v19041_v48  ;;  %v3945_v48 = vld [vmem:[#allocation2 + $0x94] sm:$0xff] }
 0x180   : > { %14730 = vmatmul.mubr.msk.f32.gmra.mrb[6].mxu1 %vm495_vm1, %v2219_v53  ;;  %16403 = vmatprep.subr.bf16.mxu0 %v19059_v3  ;;  %v2799_v7 = vld [vmem:[#allocation2 + $0x4e] sm:$0xff] }
 0x181   : > { %15002 = vmatmul.mubr.msk.f32.gmra.mrb[42].mxu0 %vm495_vm1, %v3755_v51  ;;  %14732 = vmatprep.mubr.msk.f32.mxu1 %vm495_vm1, %v2220_v46  ;;  %v4327_v51 = vld [vmem:[#allocation2 + $0x85] sm:$0xff] }
 0x182   : > { %15004 = vmatprep.mubr.msk.f32.mxu0 %vm495_vm1, %v3756_v52  ;;  %16277 = vmatpush3.bf16.msra.mxu1 %v19142_v36  ;;  %v2795_v52 = vld [vmem:[#allocation2 + $0x2e] sm:$0xff] }
 0x183   : > { %16279 = vmatprep.subr.bf16.mxu1 %v19158_v54  ;;  %16405 = vmatpush3.bf16.msra.mxu0 %v19059_v3  ;;  %v12354_v3 = vld [vmem:[%s22523_s3 + $0x200] sm:$0xff] }
 0x184   : > { %14733 = vmatmul.mubr.msk.f32.gmra.mrb[8].mxu1 %vm495_vm1, %v2221_v57  ;;  %16407 = vmatprep.subr.bf16.mxu0 %v19077_v20  ;;  %v19232_v19 = vpack.c.bf16 %v12355_v15, %v12354_v3  ;;  %v4336_v3 = vld [vmem:[#allocation2 + $0xcd] sm:$0xff]  ;;  %v4337_v15 = vld [vmem:[#allocation2 + $0xd5] sm:$0xff] }
 0x185   : > { %15005 = vmatmul.mubr.msk.f32.gmra.mrb[44].mxu0 %vm495_vm1, %v3757_v4  ;;  %14735 = vmatprep.mubr.msk.f32.mxu1 %vm495_vm1, %v2222_v58  ;;  %v12551_v4 = vld [vmem:[%s22523_s3 + $0x68] sm:$0xff] }
 0x186   : > { %15007 = vmatprep.mubr.msk.f32.mxu0 %vm495_vm1, %v3758_v55  ;;  %v2796_v55 = vld [vmem:[#allocation2 + $0x36] sm:$0xff] }
 0x188   : > { %14736 = vmatmul.mubr.msk.f32.gmra.mrb[10].mxu1 %vm495_vm1, %v2223_v61 }
 0x189   : > { %15008 = vmatmul.mubr.msk.f32.gmra.mrb[46].mxu0 %vm495_vm1, %v3759_v60  ;;  %14754 = vmatprep.mubr.msk.f32.mxu1 %vm495_vm1, %v19116_v1  ;;  %v2605_v1 = vld [vmem:[#allocation2 + $0x4d] sm:$0xff] }
 0x18a   : > { %15026 = vmatprep.mubr.msk.f32.mxu0 %vm495_vm1, %v3941_v0 }
 0x18c   : > { %14755 = vmatmul.mubr.msk.f32.vlgmr.msra.gmra.mrb[0].mxu1 %vm495_vm1, %v19125_v38  ;;  %v12547_v38 = vld [vmem:[%s22523_s3 + $0x48] sm:$0xff] }
 0x18d   : > { %15027 = vmatmul.mubr.msk.f32.vlgmr.msra.gmra.mrb[36].mxu0 %vm495_vm1, %v3942_v6  ;;  %16281 = vmatpush3.bf16.msra.mxu1 %v19158_v54 }
 0x18e   : > { %14757 = vmatprep.mubr.msk.f32.mxu1 %vm495_vm1, %v2216_v40  ;;  %15029 = vmatprep.mubr.msk.f32.mxu0 %vm495_vm1, %v3943_v9 }
 0x18f   : > { %16283 = vmatprep.subr.bf16.mxu1 %v19185_v2  ;;  %16409 = vmatpush3.bf16.msra.mxu0 %v19077_v20  ;;  %v3950_v20 = vld [vmem:[#allocation2 + $0xbc] sm:$0xff] }
 0x190   : > { %14758 = vmatmul.mubr.msk.f32.gmra.mrb[2].mxu1 %vm495_vm1, %v2217_v45  ;;  %16411 = vmatprep.subr.bf16.mxu0 %v19106_v29  ;;  %v19318_v45 = vld [vmem:[#allocation2 + $0xdc] sm:$0xff] }
 0x191   : > { %15030 = vmatmul.mubr.msk.f32.gmra.mrb[38].mxu0 %vm495_vm1, %v3944_v8  ;;  %14760 = vmatprep.mubr.msk.f32.mxu1 %vm495_vm1, %v2218_v47  ;;  %v12548_v47 = vld [vmem:[%s22523_s3 + $0x50] sm:$0xff] }
 0x192   : > { %16285 = vmatpush3.bf16.msra.mxu1 %v19185_v2  ;;  %15032 = vmatprep.mubr.msk.f32.mxu0 %vm495_vm1, %v3945_v48 }
 0x193   : > { %16287 = vmatprep.subr.bf16.mxu1 %v19200_v10  ;;  %16413 = vmatpush3.bf16.msra.mxu0 %v19106_v29  ;;  %v2603_v29 = vld [vmem:[#allocation2 + $0x3d] sm:$0xff] }
 0x194   : > { %14761 = vmatmul.mubr.msk.f32.gmra.mrb[4].mxu1 %vm495_vm1, %v2219_v53  ;;  %16415 = vmatprep.subr.bf16.mxu0 %v19123_v37  ;;  %v16458_v53 = vpack.c.bf16 %v12549_v49, %v12548_v47  ;;  %v4752_v47 = vld [vmem:[#allocation2 + $0xf9] sm:$0xff] }
 0x195   : > { %15033 = vmatmul.mubr.msk.f32.gmra.mrb[40].mxu0 %vm495_vm1, %v3946_v13  ;;  %14763 = vmatprep.mubr.msk.f32.mxu1 %vm495_vm1, %v2220_v46  ;;  %v12550_v46 = vld [vmem:[%s22523_s3 + $0x60] sm:$0xff] }
 0x196   : > { %15035 = vmatprep.mubr.msk.f32.mxu0 %vm495_vm1, %v3947_v14  ;;  %16289 = vmatpush3.bf16.msra.mxu1 %v19200_v10  ;;  %v16462_v60 = vpack.c.bf16 %v12551_v4, %v12550_v46  ;;  %v4755_v46 = vld [vmem:[#allocation2 + $0x111] sm:$0xff]  ;;  %v4531_v4 = vld [vmem:[#allocation2 + $0xde] sm:$0xff] }
 0x197   : > { %16291 = vmatprep.subr.bf16.mxu1 %v19216_v5  ;;  %16417 = vmatpush3.bf16.msra.mxu0 %v19123_v37  ;;  %v12546_v37 = vld [vmem:[%s22523_s3 + $0x40] sm:$0xff] }
 0x198   : > { %14764 = vmatmul.mubr.msk.f32.gmra.mrb[6].mxu1 %vm495_vm1, %v2221_v57  ;;  %16419 = vmatprep.subr.bf16.mxu0 %v19142_v36  ;;  %v16454_v40 = vpack.c.bf16 %v12547_v38, %v12546_v37  ;;  %v4329_v57 = vld [vmem:[#allocation2 + $0x95] sm:$0xff]  ;;  %v4750_v38 = vld [vmem:[#allocation2 + $0xe9] sm:$0xff] }
 0x199   : > { %15036 = vmatmul.mubr.msk.f32.gmra.mrb[42].mxu0 %vm495_vm1, %v3948_v59  ;;  %14766 = vmatprep.mubr.msk.f32.mxu1 %vm495_vm1, %v2222_v58  ;;  %v4330_v58 = vld [vmem:[#allocation2 + $0x9d] sm:$0xff]  ;;  %v4525_v37 = vld [vmem:[#allocation2 + $0xae] sm:$0xff] }
 0x19a   : > { %15038 = vmatprep.mubr.msk.f32.mxu0 %vm495_vm1, %v3949_v18  ;;  %16293 = vmatpush3.bf16.msra.mxu1 %v19216_v5 }
 0x19b   : > { %16295 = vmatprep.subr.bf16.mxu1 %v19232_v19  ;;  %16421 = vmatpush3.bf16.msra.mxu0 %v19142_v36  ;;  %v2611_v36 = vld [vmem:[#allocation2 + $0x7d] sm:$0xff] }
 0x19c   : > { %14767 = vmatmul.mubr.msk.f32.gmra.mrb[8].mxu1 %vm495_vm1, %v2223_v61  ;;  %16423 = vmatprep.subr.bf16.mxu0 %v19158_v54  ;;  %v2797_v61 = vld [vmem:[#allocation2 + $0x3e] sm:$0xff] }
 0x19d   : > { %15039 = vmatmul.mubr.msk.f32.gmra.mrb[44].mxu0 %vm495_vm1, %v3950_v20  ;;  %14769 = vmatprep.mubr.msk.f32.mxu1 %vm495_vm1, %v3941_v0  ;;  %v12552_v0 = vld [vmem:[%s22523_s3 + $0x70] sm:$0xff] }
 0x19e   : > { %15041 = vmatprep.mubr.msk.f32.mxu0 %vm495_vm1, %v3951_v21 }
 0x1a0   : > { %14770 = vmatmul.mubr.msk.f32.gmra.mrb[10].mxu1 %vm495_vm1, %v3942_v6  ;;  %v4332_v6 = vld [vmem:[#allocation2 + $0xad] sm:$0xff] }
 0x1a1   : > { %15042 = vmatmul.mubr.msk.f32.gmra.mrb[46].mxu0 %vm495_vm1, %v3952_v17  ;;  %14788 = vmatprep.mubr.msk.f32.mxu1 %vm495_vm1, %v2600_v25 }
 0x1a2   : > { %15060 = vmatprep.mubr.msk.f32.mxu0 %vm495_vm1, %v3943_v9 }
 0x1a4   : > { %14789 = vmatmul.mubr.msk.f32.vlgmr.msra.gmra.mrb[0].mxu1 %vm495_vm1, %v2601_v62  ;;  %v4746_v62 = vld [vmem:[#allocation2 + $0xc9] sm:$0xff] }
 0x1a5   : > { %15061 = vmatmul.mubr.msk.f32.vlgmr.msra.gmra.mrb[36].mxu0 %vm495_vm1, %v3944_v8  ;;  %16297 = vmatpush3.bf16.msra.mxu1 %v19232_v19  ;;  %v2800_v8 = vld [vmem:[#allocation2 + $0x56] sm:$0xff] }
 0x1a6   : > { %14791 = vmatprep.mubr.msk.f32.mxu1 %vm495_vm1, %v2602_v27  ;;  %15063 = vmatprep.mubr.msk.f32.mxu0 %vm495_vm1, %v3945_v48  ;;  %v4738_v48 = vld [vmem:[%s22523_s3 + $0x8] sm:$0xff] }
 0x1a7   : > { %16299 = vmatprep.subr.bf16.mxu1 %v19258_v23  ;;  %16425 = vmatpush3.bf16.msra.mxu0 %v19158_v54  ;;  %v4328_v54 = vld [vmem:[#allocation2 + $0x8d] sm:$0xff] }
 0x1a8   : > { %14792 = vmatmul.mubr.msk.f32.gmra.mrb[2].mxu1 %vm495_vm1, %v2603_v29  ;;  %16427 = vmatprep.subr.bf16.mxu0 %v19185_v2  ;;  %v4742_v27 = vld [vmem:[%s22523_s3 + $0x28] sm:$0xff]  ;;  %v4523_v29 = vld [vmem:[#allocation2 + $0x9e] sm:$0xff] }
 0x1a9   : > { %15064 = vmatmul.mubr.msk.f32.gmra.mrb[38].mxu0 %vm495_vm1, %v3946_v13  ;;  %14794 = vmatprep.mubr.msk.f32.mxu1 %vm495_vm1, %v2604_v30  ;;  %v2801_v13 = vld [vmem:[#allocation2 + $0x5e] sm:$0xff]  ;;  %v16478_v32 = vpack.c.bf16 %v4742_v27, %v4741_v16  ;;  %v12604_v16 = vld [vmem:[%s22523_s3 + $0xf0] sm:$0xff] }
 0x1aa   : > { %16301 = vmatpush3.bf16.msra.mxu1 %v19258_v23  ;;  %15066 = vmatprep.mubr.msk.f32.mxu0 %vm495_vm1, %v3947_v14  ;;  %v4748_v30 = vld [vmem:[#allocation2 + $0xd9] sm:$0xff] }
 0x1ab   : > { %16303 = vmatprep.subr.bf16.mxu1 %v19272_v28  ;;  %16429 = vmatpush3.bf16.msra.mxu0 %v19185_v2  ;;  %v12553_v2 = vld [vmem:[%s22523_s3 + $0x78] sm:$0xff] }
 0x1ac   : > { %14795 = vmatmul.mubr.msk.f32.gmra.mrb[4].mxu1 %vm495_vm1, %v2605_v1  ;;  %16431 = vmatprep.subr.bf16.mxu0 %v19200_v10  ;;  %v16466_v9 = vpack.c.bf16 %v12553_v2, %v12552_v0  ;;  %v4749_v1 = vld [vmem:[#allocation2 + $0xe1] sm:$0xff]  ;;  %v4727_v2 = vld [vmem:[#allocation2 + $0xd0] sm:$0xff]  ;;  %v12605_v27 = vld [vmem:[%s22523_s3 + $0xf8] sm:$0xff] }
 0x1ad   : > { %15067 = vmatmul.mubr.msk.f32.gmra.mrb[40].mxu0 %vm495_vm1, %v3948_v59  ;;  %14797 = vmatprep.mubr.msk.f32.mxu1 %vm495_vm1, %v2606_v34  ;;  %v2803_v59 = vld [vmem:[#allocation2 + $0x6e] sm:$0xff]  ;;  %v4744_v34 = vld [vmem:[%s22523_s3 + $0x38] sm:$0xff] }
 0x1ae   : > { %15069 = vmatprep.mubr.msk.f32.mxu0 %vm495_vm1, %v3949_v18  ;;  %16305 = vmatpush3.bf16.msra.mxu1 %v19272_v28  ;;  %v2804_v18 = vld [vmem:[#allocation2 + $0x76] sm:$0xff]  ;;  %v12583_v0 = vld [vmem:[%s22523_s3 + $0xa8] sm:$0xff] }
 0x1af   : > { %16307 = vmatprep.subr.bf16.mxu1 %v19288_v33  ;;  %16433 = vmatpush3.bf16.msra.mxu0 %v19200_v10  ;;  %v4737_v10 = vld [vmem:[%s22523_s3] sm:$0xff] }
 0x1b0   : > { %14798 = vmatmul.mubr.msk.f32.gmra.mrb[6].mxu1 %vm495_vm1, %v2607_v39  ;;  %16435 = vmatprep.subr.bf16.mxu0 %v19216_v5  ;;  %v16470_v14 = vpack.c.bf16 %v4738_v48, %v4737_v10  ;;  %v4526_v39 = vld [vmem:[#allocation2 + $0xb6] sm:$0xff]  ;;  %v4730_v48 = vld [vmem:[#allocation2 + $0xe8] sm:$0xff] }
 0x1b1   : > { %15070 = vmatmul.mubr.msk.f32.gmra.mrb[42].mxu0 %vm495_vm1, %v3950_v20  ;;  %14800 = vmatprep.mubr.msk.f32.mxu1 %vm495_vm1, %v2608_v41  ;;  %v2805_v20 = vld [vmem:[#allocation2 + $0x7e] sm:$0xff]  ;;  %v4751_v41 = vld [vmem:[#allocation2 + $0xf1] sm:$0xff] }
 0x1b2   : > { %15072 = vmatprep.mubr.msk.f32.mxu0 %vm495_vm1, %v3951_v21  ;;  %16309 = vmatpush3.bf16.msra.mxu1 %v19288_v33  ;;  %v4739_v21 = vld [vmem:[%s22523_s3 + $0x10] sm:$0xff] }
 0x1b3   : > { %16455 = vmatprep.subr.bf16.mxu1 %v16454_v40  ;;  %16437 = vmatpush3.bf16.msra.mxu0 %v19216_v5  ;;  %v2802_v5 = vld [vmem:[#allocation2 + $0x66] sm:$0xff] }
 0x1b4   : > { %14801 = vmatmul.mubr.msk.f32.gmra.mrb[8].mxu1 %vm495_vm1, %v2609_v44  ;;  %16439 = vmatprep.subr.bf16.mxu0 %v19232_v19  ;;  %v12578_v44 = vld [vmem:[%s22523_s3 + $0x80] sm:$0xff] }
 0x1b5   : > { %15073 = vmatmul.mubr.msk.f32.gmra.mrb[44].mxu0 %vm495_vm1, %v3952_v17  ;;  %14803 = vmatprep.mubr.msk.f32.mxu1 %vm495_vm1, %v2610_v43  ;;  %v4740_v17 = vld [vmem:[%s22523_s3 + $0x18] sm:$0xff]  ;;  %v12579_v43 = vld [vmem:[%s22523_s3 + $0x88] sm:$0xff] }
 0x1b6   : > { %15075 = vmatprep.mubr.msk.f32.mxu0 %vm495_vm1, %v19310_v42  ;;  %v16474_v25 = vpack.c.bf16 %v4740_v17, %v4739_v21  ;;  %v16486_v49 = vpack.c.bf16 %v12579_v43, %v12578_v44  ;;  %v5087_v21 = vld [vmem:[#allocation2 + $0xc2] sm:$0xff]  ;;  %v12621_v44 = vld [vmem:[%s22523_s3 + $0x118] sm:$0xff] }
 0x1b8   : > { %14804 = vmatmul.mubr.msk.f32.gmra.mrb[10].mxu1 %vm495_vm1, %v2611_v36  ;;  %v4527_v36 = vld [vmem:[#allocation2 + $0xbe] sm:$0xff] }
 0x1b9   : > { %15076 = vmatmul.mubr.msk.f32.gmra.mrb[46].mxu0 %vm495_vm1, %v19318_v45  ;;  %14822 = vmatprep.mubr.msk.f32.mxu1 %vm495_vm1, %v2794_v50  ;;  %v4528_v50 = vld [vmem:[#allocation2 + $0xc6] sm:$0xff] }
 0x1ba   : > { %15094 = vmatprep.mubr.msk.f32.mxu0 %vm495_vm1, %v4327_v51  ;;  %v4753_v51 = vld [vmem:[#allocation2 + $0x101] sm:$0xff] }
 0x1bc   : > { %14823 = vmatmul.mubr.msk.f32.vlgmr.msra.gmra.mrb[0].mxu1 %vm495_vm1, %v2795_v52  ;;  %v4529_v52 = vld [vmem:[#allocation2 + $0xce] sm:$0xff] }
 0x1bd   : > { %15095 = vmatmul.mubr.msk.f32.vlgmr.msra.gmra.mrb[36].mxu0 %vm495_vm1, %v4328_v54  ;;  %16457 = vmatpush3.bf16.msra.mxu1 %v16454_v40  ;;  %v4530_v54 = vld [vmem:[#allocation2 + $0xd6] sm:$0xff] }
 0x1be   : > { %14825 = vmatprep.mubr.msk.f32.mxu1 %vm495_vm1, %v2796_v55  ;;  %15097 = vmatprep.mubr.msk.f32.mxu0 %vm495_vm1, %v4329_v57  ;;  %v4756_v55 = vld [vmem:[#allocation2 + $0x119] sm:$0xff]  ;;  %v12580_v57 = vld [vmem:[%s22523_s3 + $0x90] sm:$0xff] }
 0x1bf   : > { %16459 = vmatprep.subr.bf16.mxu1 %v16458_v53  ;;  %16441 = vmatpush3.bf16.msra.mxu0 %v19232_v19  ;;  %v4338_v19 = vld [vmem:[#allocation2 + $0xdd] sm:$0xff] }
 0x1c0   : > { %14826 = vmatmul.mubr.msk.f32.gmra.mrb[2].mxu1 %vm495_vm1, %v2797_v61  ;;  %16443 = vmatprep.subr.bf16.mxu0 %v19258_v23 }
 0x1c1   : > { %15098 = vmatmul.mubr.msk.f32.gmra.mrb[38].mxu0 %vm495_vm1, %v4330_v58  ;;  %14828 = vmatprep.mubr.msk.f32.mxu1 %vm495_vm1, %v2798_v56  ;;  %v12581_v58 = vld [vmem:[%s22523_s3 + $0x98] sm:$0xff]  ;;  %v12582_v56 = vld [vmem:[%s22523_s3 + $0xa0] sm:$0xff] }
 0x1c2   : > { %16461 = vmatpush3.bf16.msra.mxu1 %v16458_v53  ;;  %15100 = vmatprep.mubr.msk.f32.mxu0 %vm495_vm1, %v4331_v63  ;;  %v4754_v53 = vld [vmem:[#allocation2 + $0x109] sm:$0xff]  ;;  %v16490_v61 = vpack.c.bf16 %v12581_v58, %v12580_v57  ;;  %v12641_v58 = vld [vmem:[%s22523_s3 + $0x158] sm:$0xff] }
 0x1c3   : > { %16463 = vmatprep.subr.bf16.mxu1 %v16462_v60  ;;  %16445 = vmatpush3.bf16.msra.mxu0 %v19258_v23  ;;  %v4521_v23 = vld [vmem:[#allocation2 + $0x8e] sm:$0xff] }
 0x1c4   : > { %14829 = vmatmul.mubr.msk.f32.gmra.mrb[4].mxu1 %vm495_vm1, %v2799_v7  ;;  %16447 = vmatprep.subr.bf16.mxu0 %v19272_v28  ;;  %v4726_v63 = vld [vmem:[#allocation2 + $0xc8] sm:$0xff]  ;;  %v12584_v7 = vld [vmem:[%s22523_s3 + $0xb0] sm:$0xff] }
 0x1c5   : > { %15101 = vmatmul.mubr.msk.f32.gmra.mrb[40].mxu0 %vm495_vm1, %v4332_v6  ;;  %14831 = vmatprep.mubr.msk.f32.mxu1 %vm495_vm1, %v2800_v8  ;;  %v16494_v6 = vpack.c.bf16 %v12583_v0, %v12582_v56  ;;  %v4729_v8 = vld [vmem:[#allocation2 + $0xe0] sm:$0xff]  ;;  %v12640_v57 = vld [vmem:[%s22523_s3 + $0x150] sm:$0xff] }
 0x1c6   : > { %15103 = vmatprep.mubr.msk.f32.mxu0 %vm495_vm1, %v4333_v35  ;;  %16465 = vmatpush3.bf16.msra.mxu1 %v16462_v60  ;;  %v4725_v60 = vld [vmem:[#allocation2 + $0xc0] sm:$0xff]  ;;  %v4728_v35 = vld [vmem:[#allocation2 + $0xd8] sm:$0xff]  ;;  %v12721_v56 = vld [vmem:[%s22525_s5 + $0x50] sm:$0xff]  ;;  %v16538_v0 = vpack.c.bf16 %v12641_v58, %v12640_v57 }
 0x1c7   : > { %16467 = vmatprep.subr.bf16.mxu1 %v16466_v9  ;;  %16449 = vmatpush3.bf16.msra.mxu0 %v19272_v28  ;;  %v4747_v28 = vld [vmem:[#allocation2 + $0xd1] sm:$0xff] }
 0x1c8   : > { %14832 = vmatmul.mubr.msk.f32.gmra.mrb[6].mxu1 %vm495_vm1, %v2801_v13  ;;  %16451 = vmatprep.subr.bf16.mxu0 %v19288_v33  ;;  %v4731_v13 = vld [vmem:[#allocation2 + $0xf0] sm:$0xff] }
 0x1c9   : > { %15104 = vmatmul.mubr.msk.f32.gmra.mrb[42].mxu0 %vm495_vm1, %v4334_v11  ;;  %14834 = vmatprep.mubr.msk.f32.mxu1 %vm495_vm1, %v2802_v5  ;;  %v12598_v11 = vld [vmem:[%s22523_s3 + $0xc0] sm:$0xff]  ;;  %v4732_v5 = vld [vmem:[#allocation2 + $0xf8] sm:$0xff]  ;;  %v12684_v58 = vld [vmem:[%s22523_s3 + $0x1f0] sm:$0xff] }
 0x1ca   : > { %15106 = vmatprep.mubr.msk.f32.mxu0 %vm495_vm1, %v4335_v12  ;;  %16469 = vmatpush3.bf16.msra.mxu1 %v16466_v9  ;;  %v12585_v9 = vld [vmem:[%s22523_s3 + $0xb8] sm:$0xff]  ;;  %v12599_v12 = vld [vmem:[%s22523_s3 + $0xc8] sm:$0xff] }
 0x1cb   : > { %16471 = vmatprep.subr.bf16.mxu1 %v16470_v14  ;;  %16453 = vmatpush3.bf16.msra.mxu0 %v19288_v33  ;;  %v4743_v33 = vld [vmem:[%s22523_s3 + $0x30] sm:$0xff]  ;;  %v16498_v10 = vpack.c.bf16 %v12585_v9, %v12584_v7  ;;  %v12642_v7 = vld [vmem:[%s22523_s3 + $0x160] sm:$0xff]  ;;  %v12643_v9 = vld [vmem:[%s22523_s3 + $0x168] sm:$0xff] }
 0x1cc   : > { %14835 = vmatmul.mubr.msk.f32.gmra.mrb[8].mxu1 %vm495_vm1, %v2803_v59  ;;  %v16482_v40 = vpack.c.bf16 %v4744_v34, %v4743_v33  ;;  %v4735_v59 = vld [vmem:[#allocation2 + $0x110] sm:$0xff]  ;;  %v5094_v34 = vld [vmem:[#allocation2 + $0xfa] sm:$0xff] }
 0x1cd   : > { %15107 = vmatmul.mubr.msk.f32.gmra.mrb[44].mxu0 %vm495_vm1, %v4336_v3  ;;  %14837 = vmatprep.mubr.msk.f32.mxu1 %vm495_vm1, %v2804_v18  ;;  %v4733_v3 = vld [vmem:[#allocation2 + $0x100] sm:$0xff]  ;;  %v4736_v18 = vld [vmem:[#allocation2 + $0x118] sm:$0xff] }
 0x1ce   : > { %15109 = vmatprep.mubr.msk.f32.mxu0 %vm495_vm1, %v4337_v15  ;;  %v4734_v15 = vld [vmem:[#allocation2 + $0x108] sm:$0xff] }
 0x1d0   : > { %14838 = vmatmul.mubr.msk.f32.gmra.mrb[10].mxu1 %vm495_vm1, %v2805_v20  ;;  %v12601_v20 = vld [vmem:[%s22523_s3 + $0xd8] sm:$0xff] }
 0x1d1   : > { %15110 = vmatmul.mubr.msk.f32.gmra.mrb[46].mxu0 %vm495_vm1, %v4338_v19  ;;  %15162 = vmatprep.mubr.msk.f32.mxu1 %vm495_vm1, %v4745_v24  ;;  %v12600_v19 = vld [vmem:[%s22523_s3 + $0xd0] sm:$0xff]  ;;  %v12602_v24 = vld [vmem:[%s22523_s3 + $0xe0] sm:$0xff] }
 0x1d2   : > { %15128 = vmatprep.mubr.msk.f32.mxu0 %vm495_vm1, %v4520_v22  ;;  %v16506_v17 = vpack.c.bf16 %v12601_v20, %v12600_v19  ;;  %v5088_v22 = vld [vmem:[#allocation2 + $0xca] sm:$0xff]  ;;  %v12726_v19 = vld [vmem:[%s22525_s5 + $0x78] sm:$0xff] }
 0x1d3   : > { %v5478_v20 = vld [vmem:[#allocation2 + $0xfb] sm:$0xff] }
 0x1d4   : > { %15163 = vmatmul.mubr.msk.f32.vlgmr.msra.gmra.mrb[12].mxu1 %vm495_vm1, %v4746_v62 }
 0x1d5   : > { %15129 = vmatmul.mubr.msk.f32.vlgmr.msra.gmra.mrb[36].mxu0 %vm495_vm1, %v4521_v23  ;;  %16473 = vmatpush3.bf16.msra.mxu1 %v16470_v14  ;;  %v16502_v14 = vpack.c.bf16 %v12599_v12, %v12598_v11  ;;  %v5089_v23 = vld [vmem:[#allocation2 + $0xd2] sm:$0xff] }
 0x1d6   : > { %15131 = vmatprep.mubr.msk.f32.mxu0 %vm495_vm1, %v4522_v26  ;;  %15165 = vmatprep.mubr.msk.f32.mxu1 %vm495_vm1, %v4747_v28  ;;  %v5090_v26 = vld [vmem:[#allocation2 + $0xda] sm:$0xff]  ;;  %v5091_v28 = vld [vmem:[#allocation2 + $0xe2] sm:$0xff]  ;;  %v5476_v11 = vld [vmem:[#allocation2 + $0xeb] sm:$0xff] }
 0x1d7   : > { %16475 = vmatprep.subr.bf16.mxu1 %v16474_v25  ;;  %v12644_v12 = vld [vmem:[%s22523_s3 + $0x170] sm:$0xff] }
 0x1d8   : > { %15166 = vmatmul.mubr.msk.f32.gmra.mrb[14].mxu1 %vm495_vm1, %v4748_v30  ;;  %v5092_v30 = vld [vmem:[#allocation2 + $0xea] sm:$0xff] }
 0x1d9   : > { %15132 = vmatmul.mubr.msk.f32.gmra.mrb[38].mxu0 %vm495_vm1, %v4523_v29  ;;  %15168 = vmatprep.mubr.msk.f32.mxu1 %vm495_vm1, %v4749_v1  ;;  %v16514_v29 = vpack.c.bf16 %v12605_v27, %v12604_v16  ;;  %v5093_v1 = vld [vmem:[#allocation2 + $0xf2] sm:$0xff]  ;;  %v5482_v16 = vld [vmem:[#allocation2 + $0x11b] sm:$0xff]  ;;  %v5483_v27 = vld [vmem:[#allocation2 + $0x123] sm:$0xff] }
 0x1da   : > { %15134 = vmatprep.mubr.msk.f32.mxu0 %vm495_vm1, %v4524_v31  ;;  %16477 = vmatpush3.bf16.msra.mxu1 %v16474_v25  ;;  %v12603_v25 = vld [vmem:[%s22523_s3 + $0xe8] sm:$0xff]  ;;  %v12618_v31 = vld [vmem:[%s22523_s3 + $0x100] sm:$0xff] }
 0x1db   : > { %16479 = vmatprep.subr.bf16.mxu1 %v16478_v32  ;;  %v16510_v62 = vpack.c.bf16 %v12603_v25, %v12602_v24  ;;  %v5479_v24 = vld [vmem:[#allocation2 + $0x103] sm:$0xff] }
 0x1dc   : > { %15169 = vmatmul.mubr.msk.f32.gmra.mrb[16].mxu1 %vm495_vm1, %v4750_v38  ;;  %v5096_v38 = vld [vmem:[#allocation2 + $0x10a] sm:$0xff] }
 0x1dd   : > { %15135 = vmatmul.mubr.msk.f32.gmra.mrb[40].mxu0 %vm495_vm1, %v4525_v37  ;;  %15171 = vmatprep.mubr.msk.f32.mxu1 %vm495_vm1, %v4751_v41  ;;  %v5095_v37 = vld [vmem:[#allocation2 + $0x102] sm:$0xff]  ;;  %v12620_v41 = vld [vmem:[%s22523_s3 + $0x110] sm:$0xff] }
 0x1de   : > { %15137 = vmatprep.mubr.msk.f32.mxu0 %vm495_vm1, %v4526_v39  ;;  %16481 = vmatpush3.bf16.msra.mxu1 %v16478_v32  ;;  %v12619_v32 = vld [vmem:[%s22523_s3 + $0x108] sm:$0xff]  ;;  %v5097_v39 = vld [vmem:[#allocation2 + $0x112] sm:$0xff]  ;;  %v16522_v43 = vpack.c.bf16 %v12621_v44, %v12620_v41  ;;  %v12678_v41 = vld [vmem:[%s22523_s3 + $0x1c0] sm:$0xff] }
 0x1df   : > { %16483 = vmatprep.subr.bf16.mxu1 %v16482_v40  ;;  %v16518_v33 = vpack.c.bf16 %v12619_v32, %v12618_v31  ;;  %v12662_v32 = vld [vmem:[%s22523_s3 + $0x1a0] sm:$0xff]  ;;  %v12679_v44 = vld [vmem:[%s22523_s3 + $0x1c8] sm:$0xff] }
 0x1e0   : > { %15172 = vmatmul.mubr.msk.f32.gmra.mrb[18].mxu1 %vm495_vm1, %v4752_v47  ;;  %v12623_v47 = vld [vmem:[%s22523_s3 + $0x128] sm:$0xff] }
 0x1e1   : > { %15138 = vmatmul.mubr.msk.f32.gmra.mrb[42].mxu0 %vm495_vm1, %v4527_v36  ;;  %15174 = vmatprep.mubr.msk.f32.mxu1 %vm495_vm1, %v4753_v51  ;;  %v12622_v36 = vld [vmem:[%s22523_s3 + $0x120] sm:$0xff]  ;;  %v12625_v51 = vld [vmem:[%s22523_s3 + $0x138] sm:$0xff] }
 0x1e2   : > { %15140 = vmatprep.mubr.msk.f32.mxu0 %vm495_vm1, %v4528_v50  ;;  %16485 = vmatpush3.bf16.msra.mxu1 %v16482_v40  ;;  %v5098_v40 = vld [vmem:[#allocation2 + $0x11a] sm:$0xff]  ;;  %v12624_v50 = vld [vmem:[%s22523_s3 + $0x130] sm:$0xff] }
 0x1e3   : > { %16487 = vmatprep.subr.bf16.mxu1 %v16486_v49 }
 0x1e4   : > { %15175 = vmatmul.mubr.msk.f32.gmra.mrb[20].mxu1 %vm495_vm1, %v4754_v53  ;;  %v12638_v53 = vld [vmem:[%s22523_s3 + $0x140] sm:$0xff] }
 0x1e5   : > { %15141 = vmatmul.mubr.msk.f32.gmra.mrb[44].mxu0 %vm495_vm1, %v4529_v52  ;;  %15177 = vmatprep.mubr.msk.f32.mxu1 %vm495_vm1, %v4755_v46  ;;  %v16530_v52 = vpack.c.bf16 %v12625_v51, %v12624_v50  ;;  %v5675_v50 = vld [vmem:[#allocation2 + $0x11c] sm:$0xff]  ;;  %v5676_v51 = vld [vmem:[#allocation2 + $0x124] sm:$0xff] }
 0x1e6   : > { %15143 = vmatprep.mubr.msk.f32.mxu0 %vm495_vm1, %v4530_v54  ;;  %v12639_v54 = vld [vmem:[%s22523_s3 + $0x148] sm:$0xff] }
 0x1e7   : > { %v16534_v46 = vpack.c.bf16 %v12639_v54, %v12638_v53  ;;  %v12680_v53 = vld [vmem:[%s22523_s3 + $0x1d0] sm:$0xff]  ;;  %v12681_v54 = vld [vmem:[%s22523_s3 + $0x1d8] sm:$0xff] }
 0x1e8   : > { %15178 = vmatmul.mubr.msk.f32.gmra.mrb[22].mxu1 %vm495_vm1, %v4756_v55  ;;  %v5291_v55 = vld [vmem:[#allocation2 + $0x12a] sm:$0xff] }
 0x1e9   : > { %15144 = vmatmul.mubr.msk.f32.gmra.mrb[46].mxu0 %vm495_vm1, %v4531_v4  ;;  %15196 = vmatprep.mubr.msk.f32.mxu1 %vm495_vm1, %v4725_v60  ;;  %v5290_v4 = vld [vmem:[#allocation2 + $0x122] sm:$0xff]  ;;  %v5473_v60 = vld [vmem:[#allocation2 + $0xd3] sm:$0xff] }
 0x1ec   : > { %15197 = vmatmul.mubr.msk.f32.vlgmr.msra.gmra.mrb[12].mxu1 %vm495_vm1, %v4726_v63  ;;  %v12720_v63 = vld [vmem:[%s22525_s5 + $0x48] sm:$0xff] }
 0x1ed   : > { %16489 = vmatpush3.bf16.msra.mxu1 %v16486_v49  ;;  %15199 = vmatprep.mubr.msk.f32.mxu1 %vm495_vm1, %v4727_v2  ;;  %v16526_v49 = vpack.c.bf16 %v12623_v47, %v12622_v36  ;;  %v16566_v36 = vpack.c.bf16 %v12679_v44, %v12678_v41  ;;  %v5673_v47 = vld [vmem:[#allocation2 + $0x10c] sm:$0xff] }
 0x1ee   : > { %16491 = vmatprep.subr.bf16.mxu1 %v16490_v61 }
 0x1f0   : > { %15200 = vmatmul.mubr.msk.f32.gmra.mrb[14].mxu1 %vm495_vm1, %v4728_v35  ;;  %v5474_v35 = vld [vmem:[#allocation2 + $0xdb] sm:$0xff] }
 0x1f1   : > { %15202 = vmatprep.mubr.msk.f32.mxu1 %vm495_vm1, %v4729_v8  ;;  %16493 = vmatpush3.bf16.msra.mxu1 %v16490_v61  ;;  %v12719_v61 = vld [vmem:[%s22525_s5 + $0x40] sm:$0xff] }
 0x1f2   : > { %16495 = vmatprep.subr.bf16.mxu1 %v16494_v6  ;;  %v16598_v2 = vpack.c.bf16 %v12720_v63, %v12719_v61  ;;  %v12698_v63 = vld [vmem:[%s22523_s3 + $0x200] sm:$0xff] }
 0x1f4   : > { %15203 = vmatmul.mubr.msk.f32.gmra.mrb[16].mxu1 %vm495_vm1, %v4730_v48  ;;  %16599 = vmatprep.subr.bf16.mxu0 %v16598_v2  ;;  %v16542_v48 = vpack.c.bf16 %v12643_v9, %v12642_v7  ;;  %v12701_v7 = vld [vmem:[%s22523_s3 + $0x218] sm:$0xff]  ;;  %v6052_v9 = vld [vmem:[#allocation2 + $0xe5] sm:$0xff] }
 0x1f5   : > { %15205 = vmatprep.mubr.msk.f32.mxu1 %vm495_vm1, %v4731_v13  ;;  %16497 = vmatpush3.bf16.msra.mxu1 %v16494_v6  ;;  %v12722_v6 = vld [vmem:[%s22525_s5 + $0x58] sm:$0xff] }
 0x1f6   : > { %16499 = vmatprep.subr.bf16.mxu1 %v16498_v10  ;;  %v16602_v8 = vpack.c.bf16 %v12722_v6, %v12721_v56  ;;  %16601 = vmatpush3.bf16.msra.mxu0 %v16598_v2  ;;  %v12645_v13 = vld [vmem:[%s22523_s3 + $0x178] sm:$0xff]  ;;  %v12699_v56 = vld [vmem:[%s22523_s3 + $0x208] sm:$0xff] }
 0x1f7   : > { %v5869_v2 = vld [vmem:[#allocation2 + $0x134] sm:$0xff]  ;;  %v5870_v6 = vld [vmem:[#allocation2 + $0x13c] sm:$0xff] }
 0x1f8   : > { %15206 = vmatmul.mubr.msk.f32.gmra.mrb[18].mxu1 %vm495_vm1, %v4732_v5  ;;  %16603 = vmatprep.subr.bf16.mxu0 %v16602_v8  ;;  %v12723_v5 = vld [vmem:[%s22525_s5 + $0x60] sm:$0xff] }
 0x1f9   : > { %15208 = vmatprep.mubr.msk.f32.mxu1 %vm495_vm1, %v4733_v3  ;;  %16501 = vmatpush3.bf16.msra.mxu1 %v16498_v10  ;;  %v5475_v10 = vld [vmem:[#allocation2 + $0xe3] sm:$0xff] }
 0x1fa   : > { %16503 = vmatprep.subr.bf16.mxu1 %v16502_v14  ;;  %v12724_v3 = vld [vmem:[%s22525_s5 + $0x68] sm:$0xff]  ;;  %16605 = vmatpush3.bf16.msra.mxu0 %v16602_v8 }
 0x1fc   : > { %15209 = vmatmul.mubr.msk.f32.gmra.mrb[20].mxu1 %vm495_vm1, %v4734_v15  ;;  %v16546_v15 = vpack.c.bf16 %v12645_v13, %v12644_v12  ;;  %v6054_v12 = vld [vmem:[#allocation2 + $0xf5] sm:$0xff] }
 0x1fd   : > { %15211 = vmatprep.mubr.msk.f32.mxu1 %vm495_vm1, %v4735_v59  ;;  %v16606_v59 = vpack.c.bf16 %v12724_v3, %v12723_v5  ;;  %v12704_v5 = vld [vmem:[%s22523_s3 + $0x230] sm:$0xff]  ;;  %v12705_v3 = vld [vmem:[%s22523_s3 + $0x238] sm:$0xff] }
 0x1ff   : > { %16607 = vmatprep.subr.bf16.mxu0 %v16606_v59 }
 0x200   : > { %15212 = vmatmul.mubr.msk.f32.gmra.mrb[22].mxu1 %vm495_vm1, %v4736_v18  ;;  %v12725_v18 = vld [vmem:[%s22525_s5 + $0x70] sm:$0xff]  ;;  %16609 = vmatpush3.bf16.msra.mxu0 %v16606_v59  ;;  %v16594_v59 = vpack.c.bf16 %v12705_v3, %v12704_v5 }
 0x201   : > { %15230 = vmatprep.mubr.msk.f32.mxu1 %vm495_vm1, %v5087_v21  ;;  %v12658_v21 = vld [vmem:[%s22523_s3 + $0x180] sm:$0xff] }
 0x204   : > { %15231 = vmatmul.mubr.msk.f32.vlgmr.msra.gmra.mrb[12].mxu1 %vm495_vm1, %v5088_v22  ;;  %v16610_v22 = vpack.c.bf16 %v12726_v19, %v12725_v18  ;;  %v6057_v18 = vld [vmem:[#allocation2 + $0x10d] sm:$0xff]  ;;  %v6058_v19 = vld [vmem:[#allocation2 + $0x115] sm:$0xff] }
 0x205   : > { %16505 = vmatpush3.bf16.msra.mxu1 %v16502_v14  ;;  %15233 = vmatprep.mubr.msk.f32.mxu1 %vm495_vm1, %v5089_v23  ;;  %v5477_v14 = vld [vmem:[#allocation2 + $0xf3] sm:$0xff] }
 0x206   : > { %16507 = vmatprep.subr.bf16.mxu1 %v16506_v17  ;;  %16611 = vmatprep.subr.bf16.mxu0 %v16610_v22 }
 0x207   : > { %16613 = vmatpush3.bf16.msra.mxu0 %v16610_v22  ;;  %v6061_v22 = vld [vmem:[#allocation2 + $0x12d] sm:$0xff] }
 0x208   : > { %15234 = vmatmul.mubr.msk.f32.gmra.mrb[14].mxu1 %vm495_vm1, %v5090_v26 }
 0x209   : > { %15236 = vmatprep.mubr.msk.f32.mxu1 %vm495_vm1, %v5091_v28  ;;  %16509 = vmatpush3.bf16.msra.mxu1 %v16506_v17  ;;  %v12659_v17 = vld [vmem:[%s22523_s3 + $0x188] sm:$0xff] }
 0x20a   : > { %16511 = vmatprep.subr.bf16.mxu1 %v16510_v62  ;;  %v16550_v25 = vpack.c.bf16 %v12659_v17, %v12658_v21  ;;  %v6060_v21 = vld [vmem:[#allocation2 + $0x125] sm:$0xff]  ;;  %v6062_v17 = vld [vmem:[#allocation2 + $0x135] sm:$0xff] }
 0x20c   : > { %15237 = vmatmul.mubr.msk.f32.gmra.mrb[16].mxu1 %vm495_vm1, %v5092_v30 }
 0x20d   : > { %15239 = vmatprep.mubr.msk.f32.mxu1 %vm495_vm1, %v5093_v1  ;;  %16513 = vmatpush3.bf16.msra.mxu1 %v16510_v62  ;;  %v5481_v62 = vld [vmem:[#allocation2 + $0x113] sm:$0xff] }
 0x20e   : > { %16515 = vmatprep.subr.bf16.mxu1 %v16514_v29 }
 0x210   : > { %15240 = vmatmul.mubr.msk.f32.gmra.mrb[18].mxu1 %vm495_vm1, %v5094_v34 }
 0x211   : > { %15242 = vmatprep.mubr.msk.f32.mxu1 %vm495_vm1, %v5095_v37  ;;  %16517 = vmatpush3.bf16.msra.mxu1 %v16514_v29  ;;  %v12660_v29 = vld [vmem:[%s22523_s3 + $0x190] sm:$0xff] }
 0x212   : > { %16519 = vmatprep.subr.bf16.mxu1 %v16518_v33 }
 0x214   : > { %15243 = vmatmul.mubr.msk.f32.gmra.mrb[20].mxu1 %vm495_vm1, %v5096_v38 }
 0x215   : > { %15245 = vmatprep.mubr.msk.f32.mxu1 %vm495_vm1, %v5097_v39 }
 0x218   : > { %15246 = vmatmul.mubr.msk.f32.gmra.mrb[22].mxu1 %vm495_vm1, %v5098_v40 }
 0x219   : > { %15264 = vmatprep.mubr.msk.f32.mxu1 %vm495_vm1, %v5089_v23  ;;  %v5480_v23 = vld [vmem:[#allocation2 + $0x10b] sm:$0xff] }
 0x21c   : > { %15265 = vmatmul.mubr.msk.f32.vlgmr.msra.gmra.mrb[12].mxu1 %vm495_vm1, %v5090_v26  ;;  %v6586_v26 = vld [vmem:[#allocation3 + $0x1] sm:$0xff] }
 0x21d   : > { %16521 = vmatpush3.bf16.msra.mxu1 %v16518_v33  ;;  %15267 = vmatprep.mubr.msk.f32.mxu1 %vm495_vm1, %v5091_v28  ;;  %v5484_v28 = vld [vmem:[#allocation2 + $0x12b] sm:$0xff] }
 0x21e   : > { %16523 = vmatprep.subr.bf16.mxu1 %v16522_v43  ;;  %15468 = vmatprep.mubr.msk.f32.mxu0 %vm495_vm1, %v6586_v26  ;;  %v5668_v33 = vld [vmem:[#allocation2 + $0xe4] sm:$0xff] }
 0x220   : > { %15268 = vmatmul.mubr.msk.f32.gmra.mrb[14].mxu1 %vm495_vm1, %v5092_v30  ;;  %v12661_v30 = vld [vmem:[%s22523_s3 + $0x198] sm:$0xff] }
 0x221   : > { %15270 = vmatprep.mubr.msk.f32.mxu1 %vm495_vm1, %v5093_v1  ;;  %16525 = vmatpush3.bf16.msra.mxu1 %v16522_v43  ;;  %v16554_v31 = vpack.c.bf16 %v12661_v30, %v12660_v29  ;;  %v12663_v1 = vld [vmem:[%s22523_s3 + $0x1a8] sm:$0xff]  ;;  %v6248_v30 = vld [vmem:[#allocation2 + $0xfe] sm:$0xff] }
 0x222   : > { %16527 = vmatprep.subr.bf16.mxu1 %v16526_v49  ;;  %v5672_v43 = vld [vmem:[#allocation2 + $0x104] sm:$0xff] }
 0x224   : > { %15271 = vmatmul.mubr.msk.f32.gmra.mrb[16].mxu1 %vm495_vm1, %v5094_v34  ;;  %v16558_v34 = vpack.c.bf16 %v12663_v1, %v12662_v32  ;;  %v6249_v32 = vld [vmem:[#allocation2 + $0x106] sm:$0xff] }
 0x225   : > { %15273 = vmatprep.mubr.msk.f32.mxu1 %vm495_vm1, %v5095_v37  ;;  %16529 = vmatpush3.bf16.msra.mxu1 %v16526_v49  ;;  %v5669_v37 = vld [vmem:[#allocation2 + $0xec] sm:$0xff]  ;;  %v5674_v49 = vld [vmem:[#allocation2 + $0x114] sm:$0xff] }
 0x226   : > { %16531 = vmatprep.subr.bf16.mxu1 %v16530_v52 }
 0x228   : > { %15274 = vmatmul.mubr.msk.f32.gmra.mrb[18].mxu1 %vm495_vm1, %v5096_v38  ;;  %v12665_v38 = vld [vmem:[%s22523_s3 + $0x1b8] sm:$0xff] }
 0x229   : > { %15276 = vmatprep.mubr.msk.f32.mxu1 %vm495_vm1, %v5097_v39  ;;  %16533 = vmatpush3.bf16.msra.mxu1 %v16530_v52  ;;  %v5670_v39 = vld [vmem:[#allocation2 + $0xf4] sm:$0xff]  ;;  %v5677_v52 = vld [vmem:[#allocation2 + $0x12c] sm:$0xff] }
 0x22a   : > { %16535 = vmatprep.subr.bf16.mxu1 %v16534_v46 }
 0x22c   : > { %15277 = vmatmul.mubr.msk.f32.gmra.mrb[20].mxu1 %vm495_vm1, %v5098_v40  ;;  %v5671_v40 = vld [vmem:[#allocation2 + $0xfc] sm:$0xff] }
 0x22d   : > { %15279 = vmatprep.mubr.msk.f32.mxu1 %vm495_vm1, %v5290_v4  ;;  %v12682_v4 = vld [vmem:[%s22523_s3 + $0x1e0] sm:$0xff] }
 0x230   : > { %15280 = vmatmul.mubr.msk.f32.gmra.mrb[22].mxu1 %vm495_vm1, %v5291_v55  ;;  %v12683_v55 = vld [vmem:[%s22523_s3 + $0x1e8] sm:$0xff] }
 0x231   : > { %15298 = vmatprep.mubr.msk.f32.mxu1 %vm495_vm1, %v5473_v60  ;;  %v16574_v57 = vpack.c.bf16 %v12683_v55, %v12682_v4  ;;  %v12685_v60 = vld [vmem:[%s22523_s3 + $0x1f8] sm:$0xff] }
 0x232   : > { %v16578_v61 = vpack.c.bf16 %v12685_v60, %v12684_v58  ;;  %v6256_v4 = vld [vmem:[#allocation2 + $0x13e] sm:$0xff] }
 0x234   : > { %15299 = vmatmul.mubr.msk.f32.vlgmr.msra.gmra.mrb[12].mxu1 %vm495_vm1, %v5474_v35  ;;  %v12700_v35 = vld [vmem:[%s22523_s3 + $0x210] sm:$0xff] }
 0x235   : > { %16537 = vmatpush3.bf16.msra.mxu1 %v16534_v46  ;;  %15301 = vmatprep.mubr.msk.f32.mxu1 %vm495_vm1, %v5475_v10  ;;  %v16570_v46 = vpack.c.bf16 %v12681_v54, %v12680_v53  ;;  %v16586_v8 = vpack.c.bf16 %v12701_v7, %v12700_v35  ;;  %v6053_v10 = vld [vmem:[#allocation2 + $0xed] sm:$0xff] }
 0x236   : > { %16539 = vmatprep.subr.bf16.mxu1 %v16538_v0  ;;  %v6254_v53 = vld [vmem:[#allocation2 + $0x12e] sm:$0xff] }
 0x238   : > { %15302 = vmatmul.mubr.msk.f32.gmra.mrb[14].mxu1 %vm495_vm1, %v5476_v11  ;;  %v12703_v11 = vld [vmem:[%s22523_s3 + $0x228] sm:$0xff] }
 0x239   : > { %15304 = vmatprep.mubr.msk.f32.mxu1 %vm495_vm1, %v5477_v14  ;;  %16541 = vmatpush3.bf16.msra.mxu1 %v16538_v0  ;;  %v16582_v0 = vpack.c.bf16 %v12699_v56, %v12698_v63  ;;  %v6055_v14 = vld [vmem:[#allocation2 + $0xfd] sm:$0xff] }
 0x23a   : > { %16543 = vmatprep.subr.bf16.mxu1 %v16542_v48 }
 0x23c   : > { %15305 = vmatmul.mubr.msk.f32.gmra.mrb[16].mxu1 %vm495_vm1, %v5478_v20  ;;  %v6059_v20 = vld [vmem:[#allocation2 + $0x11d] sm:$0xff] }
 0x23d   : > { %15307 = vmatprep.mubr.msk.f32.mxu1 %vm495_vm1, %v5479_v24  ;;  %16545 = vmatpush3.bf16.msra.mxu1 %v16542_v48  ;;  %v12702_v48 = vld [vmem:[%s22523_s3 + $0x220] sm:$0xff] }
 0x23e   : > { %16547 = vmatprep.subr.bf16.mxu1 %v16546_v15  ;;  %v16590_v13 = vpack.c.bf16 %v12703_v11, %v12702_v48  ;;  %v6063_v24 = vld [vmem:[#allocation2 + $0x13d] sm:$0xff] }
 0x240   : > { %15308 = vmatmul.mubr.msk.f32.gmra.mrb[18].mxu1 %vm495_vm1, %v5480_v23 }
 0x241   : > { %15310 = vmatprep.mubr.msk.f32.mxu1 %vm495_vm1, %v5481_v62  ;;  %16549 = vmatpush3.bf16.msra.mxu1 %v16546_v15  ;;  %v6056_v15 = vld [vmem:[#allocation2 + $0x105] sm:$0xff] }
 0x242   : > { %16551 = vmatprep.subr.bf16.mxu1 %v16550_v25  ;;  %v6245_v62 = vld [vmem:[#allocation2 + $0xe6] sm:$0xff] }
 0x244   : > { %15311 = vmatmul.mubr.msk.f32.gmra.mrb[20].mxu1 %vm495_vm1, %v5482_v16  ;;  %v6246_v16 = vld [vmem:[#allocation2 + $0xee] sm:$0xff] }
 0x245   : > { %15313 = vmatprep.mubr.msk.f32.mxu1 %vm495_vm1, %v5483_v27 }
 0x248   : > { %15314 = vmatmul.mubr.msk.f32.gmra.mrb[22].mxu1 %vm495_vm1, %v5484_v28  ;;  %v6247_v28 = vld [vmem:[#allocation2 + $0xf6] sm:$0xff] }
 0x249   : > { %15332 = vmatprep.mubr.msk.f32.mxu1 %vm495_vm1, %v19310_v42  ;;  %v12664_v42 = vld [vmem:[%s22523_s3 + $0x1b0] sm:$0xff] }
 0x24c   : > { %15333 = vmatmul.mubr.msk.f32.vlgmr.msra.gmra.mrb[12].mxu1 %vm495_vm1, %v19318_v45  ;;  %v16562_v45 = vpack.c.bf16 %v12665_v38, %v12664_v42 }
 0x24d   : > { %16553 = vmatpush3.bf16.msra.mxu1 %v16550_v25  ;;  %15335 = vmatprep.mubr.msk.f32.mxu1 %vm495_vm1, %v5668_v33 }
 0x24e   : > { %16555 = vmatprep.subr.bf16.mxu1 %v16554_v31 }
 0x250   : > { %15336 = vmatmul.mubr.msk.f32.gmra.mrb[14].mxu1 %vm495_vm1, %v5669_v37 }
 0x251   : > { %15338 = vmatprep.mubr.msk.f32.mxu1 %vm495_vm1, %v5670_v39  ;;  %16557 = vmatpush3.bf16.msra.mxu1 %v16554_v31 }
 0x252   : > { %16559 = vmatprep.subr.bf16.mxu1 %v16558_v34 }
 0x254   : > { %15339 = vmatmul.mubr.msk.f32.gmra.mrb[16].mxu1 %vm495_vm1, %v5671_v40 }
 0x255   : > { %15341 = vmatprep.mubr.msk.f32.mxu1 %vm495_vm1, %v5672_v43  ;;  %16561 = vmatpush3.bf16.msra.mxu1 %v16558_v34 }
 0x256   : > { %16563 = vmatprep.subr.bf16.mxu1 %v16562_v45 }
 0x258   : > { %15342 = vmatmul.mubr.msk.f32.gmra.mrb[18].mxu1 %vm495_vm1, %v5673_v47 }
 0x259   : > { %15344 = vmatprep.mubr.msk.f32.mxu1 %vm495_vm1, %v5674_v49  ;;  %16565 = vmatpush3.bf16.msra.mxu1 %v16562_v45  ;;  %v6252_v45 = vld [vmem:[#allocation2 + $0x11e] sm:$0xff] }
 0x25a   : > { %16567 = vmatprep.subr.bf16.mxu1 %v16566_v36 }
 0x25c   : > { %15345 = vmatmul.mubr.msk.f32.gmra.mrb[20].mxu1 %vm495_vm1, %v5675_v50 }
 0x25d   : > { %15347 = vmatprep.mubr.msk.f32.mxu1 %vm495_vm1, %v5676_v51 }
 0x260   : > { %15348 = vmatmul.mubr.msk.f32.gmra.mrb[22].mxu1 %vm495_vm1, %v5677_v52 }
 0x261   : > { %15366 = vmatprep.mubr.msk.f32.mxu1 %vm495_vm1, %v5668_v33  ;;  %v6250_v33 = vld [vmem:[#allocation2 + $0x10e] sm:$0xff] }
 0x264   : > { %15367 = vmatmul.mubr.msk.f32.vlgmr.msra.gmra.mrb[12].mxu1 %vm495_vm1, %v5669_v37  ;;  %v6251_v37 = vld [vmem:[#allocation2 + $0x116] sm:$0xff] }
 0x265   : > { %16569 = vmatpush3.bf16.msra.mxu1 %v16566_v36  ;;  %15369 = vmatprep.mubr.msk.f32.mxu1 %vm495_vm1, %v5670_v39 }
 0x266   : > { %16571 = vmatprep.subr.bf16.mxu1 %v16570_v46 }
 0x268   : > { %15370 = vmatmul.mubr.msk.f32.gmra.mrb[14].mxu1 %vm495_vm1, %v5671_v40 }
 0x269   : > { %15372 = vmatprep.mubr.msk.f32.mxu1 %vm495_vm1, %v5672_v43  ;;  %16573 = vmatpush3.bf16.msra.mxu1 %v16570_v46  ;;  %v6253_v43 = vld [vmem:[#allocation2 + $0x126] sm:$0xff] }
 0x26a   : > { %16575 = vmatprep.subr.bf16.mxu1 %v16574_v57 }
 0x26c   : > { %15373 = vmatmul.mubr.msk.f32.gmra.mrb[16].mxu1 %vm495_vm1, %v5673_v47 }
 0x26d   : > { %15375 = vmatprep.mubr.msk.f32.mxu1 %vm495_vm1, %v5674_v49  ;;  %16577 = vmatpush3.bf16.msra.mxu1 %v16574_v57  ;;  %v19723_v49 = vld [vmem:[%s22524_s4] ss:$0 sm:$0xff] }
 0x26e   : > { %16579 = vmatprep.subr.bf16.mxu1 %v16578_v61 }
 0x270   : > { %15376 = vmatmul.mubr.msk.f32.gmra.mrb[18].mxu1 %vm495_vm1, %v5675_v50  ;;  %v6255_v50 = vld [vmem:[#allocation2 + $0x136] sm:$0xff] }
 0x271   : > { %15378 = vmatprep.mubr.msk.f32.mxu1 %vm495_vm1, %v5676_v51  ;;  %16581 = vmatpush3.bf16.msra.mxu1 %v16578_v61 }
 0x272   : > { %16583 = vmatprep.subr.bf16.mxu1 %v16582_v0 }
 0x274   : > { %15379 = vmatmul.mubr.msk.f32.gmra.mrb[20].mxu1 %vm495_vm1, %v5677_v52 }
 0x275   : > { %15381 = vmatprep.mubr.msk.f32.mxu1 %vm495_vm1, %v5869_v2 }
 0x278   : > { %15382 = vmatmul.mubr.msk.f32.gmra.mrb[22].mxu1 %vm495_vm1, %v5870_v6  ;;  %v18200_v6 = vld [vmem:[#allocation4] sm:$0xff] }
 0x279   : > { %15400 = vmatprep.mubr.msk.f32.mxu1 %vm495_vm1, %v6052_v9 }
 0x27c   : > { %15401 = vmatmul.mubr.msk.f32.vlgmr.msra.gmra.mrb[12].mxu1 %vm495_vm1, %v6053_v10 }
 0x27d   : > { %16585 = vmatpush3.bf16.msra.mxu1 %v16582_v0  ;;  %15403 = vmatprep.mubr.msk.f32.mxu1 %vm495_vm1, %v6054_v12 }
 0x27e   : > { %16587 = vmatprep.subr.bf16.mxu1 %v16586_v8 }
 0x280   : > { %15404 = vmatmul.mubr.msk.f32.gmra.mrb[14].mxu1 %vm495_vm1, %v6055_v14 }
 0x281   : > { %15406 = vmatprep.mubr.msk.f32.mxu1 %vm495_vm1, %v6056_v15  ;;  %16589 = vmatpush3.bf16.msra.mxu1 %v16586_v8 }
 0x282   : > { %16591 = vmatprep.subr.bf16.mxu1 %v16590_v13 }
 0x284   : > { %15407 = vmatmul.mubr.msk.f32.gmra.mrb[16].mxu1 %vm495_vm1, %v6057_v18 }
 0x285   : > { %15409 = vmatprep.mubr.msk.f32.mxu1 %vm495_vm1, %v6058_v19  ;;  %16593 = vmatpush3.bf16.msra.mxu1 %v16590_v13 }
 0x286   : > { %16595 = vmatprep.subr.bf16.mxu1 %v16594_v59 }
 0x288   : > { %15410 = vmatmul.mubr.msk.f32.gmra.mrb[18].mxu1 %vm495_vm1, %v6059_v20 }
 0x289   : > { %15412 = vmatprep.mubr.msk.f32.mxu1 %vm495_vm1, %v6060_v21  ;;  %16597 = vmatpush3.bf16.msra.mxu1 %v16594_v59 }
 0x28c   : > { %15413 = vmatmul.mubr.msk.f32.gmra.mrb[20].mxu1 %vm495_vm1, %v6061_v22 }
 0x28d   : > { %15415 = vmatprep.mubr.msk.f32.mxu1 %vm495_vm1, %v6062_v17 }
 0x28f   : > { %v14824_v25 = vpop.f32.mrb[0].mxu1 }
 0x290   : > { %2989 = vst.msk [vmem:[#allocation7 + $0x8] sm:$0xff] %vm495_vm1, %v14824_v25  ;;  %v2917_v23 = vpop.f32.mrb[1].mxu1  ;;  %15416 = vmatmul.mubr.msk.f32.gmra.mrb[22].mxu1 %vm495_vm1, %v6063_v24 }
 0x291   : > { %2988 = vst.msk [vmem:[#allocation7] sm:$0xff] %vm495_vm1, %v2917_v23  ;;  %15434 = vmatprep.mubr.msk.f32.mxu1 %vm495_vm1, %v6245_v62 }
 0x293   : > { %v14827_v26 = vpop.f32.mrb[2].mxu1 }
 0x294   : > { %2991 = vst.msk [vmem:[#allocation7 + $0x18] sm:$0xff] %vm495_vm1, %v14827_v26  ;;  %v2927_v27 = vpop.f32.mrb[3].mxu1  ;;  %15435 = vmatmul.mubr.msk.f32.vlgmr.msra.gmra.mrb[12].mxu1 %vm495_vm1, %v6246_v16 }
 0x295   : > { %2990 = vst.msk [vmem:[#allocation7 + $0x10] sm:$0xff] %vm495_vm1, %v2927_v27  ;;  %15437 = vmatprep.mubr.msk.f32.mxu1 %vm495_vm1, %v6247_v28 }
 0x297   : > { %v14830_v29 = vpop.f32.mrb[4].mxu1 }
 0x298   : > { %2993 = vst.msk [vmem:[#allocation7 + $0x28] sm:$0xff] %vm495_vm1, %v14830_v29  ;;  %v2937_v31 = vpop.f32.mrb[5].mxu1  ;;  %15438 = vmatmul.mubr.msk.f32.gmra.mrb[14].mxu1 %vm495_vm1, %v6248_v30  ;;  %v6451_v42 = vld [vmem:[#allocation7] ss:$2 sm:$0xff]  ;;  %v6453_v38 = vld [vmem:[#allocation7 + $0x1] ss:$2 sm:$0xff] }
 0x299   : > { %2992 = vst.msk [vmem:[#allocation7 + $0x20] sm:$0xff] %vm495_vm1, %v2937_v31  ;;  %15440 = vmatprep.mubr.msk.f32.mxu1 %vm495_vm1, %v6249_v32  ;;  %v6454_v36 = vmax.f32 %v6451_v42, %v6453_v38 }
 0x29b   : > { %v14833_v1 = vpop.f32.mrb[6].mxu1 }
 0x29c   : > { %2995 = vst.msk [vmem:[#allocation7 + $0x38] sm:$0xff] %vm495_vm1, %v14833_v1  ;;  %v2947_v34 = vpop.f32.mrb[7].mxu1  ;;  %15441 = vmatmul.mubr.msk.f32.gmra.mrb[16].mxu1 %vm495_vm1, %v6250_v33 }
 0x29d   : > { %2994 = vst.msk [vmem:[#allocation7 + $0x30] sm:$0xff] %vm495_vm1, %v2947_v34  ;;  %15443 = vmatprep.mubr.msk.f32.mxu1 %vm495_vm1, %v6251_v37 }
 0x29f   : > { %v14836_v39 = vpop.f32.mrb[8].mxu1 }
 0x2a0   : > { %v6456_v40 = vld [vmem:[#allocation7 + $0x12] ss:$2 sm:$0xff]  ;;  %v6458_v41 = vld [vmem:[#allocation7 + $0x13] ss:$2 sm:$0xff]  ;;  %2997 = vst.msk [vmem:[#allocation7 + $0x48] sm:$0xff] %vm495_vm1, %v14836_v39  ;;  %v2957_v44 = vpop.f32.mrb[9].mxu1  ;;  %15444 = vmatmul.mubr.msk.f32.gmra.mrb[18].mxu1 %vm495_vm1, %v6252_v45 }
 0x2a1   : > { %v6459_v47 = vmax.f32 %v6456_v40, %v6458_v41  ;;  %2996 = vst.msk [vmem:[#allocation7 + $0x40] sm:$0xff] %vm495_vm1, %v2957_v44  ;;  %15446 = vmatprep.mubr.msk.f32.mxu1 %vm495_vm1, %v6253_v43 }
 0x2a3   : > { %v6460_v51 = vmax.f32 %v6454_v36, %v6459_v47  ;;  %v14839_v52 = vpop.f32.mrb[10].mxu1 }
 0x2a4   : > { %2999 = vst.msk [vmem:[#allocation7 + $0x58] sm:$0xff] %vm495_vm1, %v14839_v52  ;;  %v2967_v54 = vpop.f32.mrb[11].mxu1  ;;  %15447 = vmatmul.mubr.msk.f32.gmra.mrb[20].mxu1 %vm495_vm1, %v6254_v53  ;;  %v6471_v55 = vld [vmem:[#allocation7 + $0x24] ss:$2 sm:$0xff]  ;;  %v6473_v57 = vld [vmem:[#allocation7 + $0x25] ss:$2 sm:$0xff] }
 0x2a5   : > { %v6467_v46 = vadd.f32 %v19723_v49, %v6460_v51  ;;  %2998 = vst.msk [vmem:[#allocation7 + $0x50] sm:$0xff] %vm495_vm1, %v2967_v54  ;;  %15449 = vmatprep.mubr.msk.f32.mxu1 %vm495_vm1, %v6255_v50  ;;  %v6474_v0 = vmax.f32 %v6471_v55, %v6473_v57  ;;  %v6578_v50 = vld [vmem:[%s22525_s5] sm:$0xff]  ;;  %v6579_v51 = vld [vmem:[%s22525_s5 + $0x8] sm:$0xff]  ;;  %v6580_v52 = vld [vmem:[%s22525_s5 + $0x10] sm:$0xff] }
 0x2a6   : > { %v16614_v53 = vpack.c.bf16 %v6579_v51, %v6578_v50  ;;  %v6581_v54 = vld [vmem:[%s22525_s5 + $0x18] sm:$0xff]  ;;  %v6583_v55 = vld [vmem:[%s22525_s5 + $0x28] sm:$0xff] }
 0x2a7   : > { %v6468_v58 = vmax.f32 %v6467_v46, 0.0  ;;  %v16618_v46 = vpack.c.bf16 %v6581_v54, %v6580_v52  ;;  %v12754_v54 = vld [vmem:[%s22525_s5 + $0xb8] sm:$0xff] }
 0x2a8   : > { %v15130_v60 = vpop.f32.mrb[36].mxu0  ;;  %v6476_v61 = vld [vmem:[#allocation7 + $0x36] ss:$2 sm:$0xff]  ;;  %v6478_v63 = vld [vmem:[#allocation7 + $0x37] ss:$2 sm:$0xff]  ;;  %15450 = vmatmul.mubr.msk.f32.gmra.mrb[22].mxu1 %vm495_vm1, %v6256_v4  ;;  %16615 = vmatprep.subr.bf16.mxu0 %v16614_v53 }
 0x2a9   : > { %4714 = vst.msk [vmem:[#allocation7 + $0x68] sm:$0xff] %vm495_vm1, %v15130_v60  ;;  %v4642_v56 = vpop.f32.mrb[37].mxu0  ;;  %6469 = vst.msk [vmem:[#allocation3 + $0xb] sm:$0xff] %vm495_vm1, %v6468_v58  ;;  %v6479_v2 = vmax.f32 %v6476_v61, %v6478_v63  ;;  %9933 = vmatprep.mubr.f32.mxu1 %v18200_v6  ;;  %v6582_v4 = vld [vmem:[%s22525_s5 + $0x20] sm:$0xff]  ;;  %v6584_v58 = vld [vmem:[%s22525_s5 + $0x30] sm:$0xff] }
 0x2aa   : > { %4713 = vst.msk [vmem:[#allocation7 + $0x60] sm:$0xff] %vm495_vm1, %v4642_v56  ;;  %v16622_v57 = vpack.c.bf16 %v6583_v55, %v6582_v4  ;;  %v6585_v60 = vld [vmem:[%s22525_s5 + $0x38] sm:$0xff]  ;;  %v12747_v63 = vld [vmem:[%s22525_s5 + $0x80] sm:$0xff]  ;;  %v12748_v56 = vld [vmem:[%s22525_s5 + $0x88] sm:$0xff] }
 0x2ab   : > { %v6480_v35 = vmax.f32 %v6474_v0, %v6479_v2  ;;  %v16626_v61 = vpack.c.bf16 %v6585_v60, %v6584_v58  ;;  %v19788_v0 = vpack.c.bf16 %v12748_v56, %v12747_v63  ;;  %v12766_v58 = vld [vmem:[%s22525_s5 + $0xc8] sm:$0xff] }
 0x2ac   : > { %v15133_v7 = vpop.f32.mrb[38].mxu0  ;;  %v6485_v10 = vld [vmem:[#allocation7 + $0x48] ss:$2 sm:$0xff]  ;;  %v6487_v48 = vld [vmem:[#allocation7 + $0x49] ss:$2 sm:$0xff] }
 0x2ad   : > { %4716 = vst.msk [vmem:[#allocation7 + $0x78] sm:$0xff] %vm495_vm1, %v15133_v7  ;;  %v4652_v9 = vpop.f32.mrb[39].mxu0  ;;  %v6481_v8 = vadd.f32 %v19723_v49, %v6480_v35  ;;  %v6488_v15 = vmax.f32 %v6485_v10, %v6487_v48 }
 0x2ae   : > { %4715 = vst.msk [vmem:[#allocation7 + $0x70] sm:$0xff] %vm495_vm1, %v4652_v9 }
 0x2af   : > { %v6482_v11 = vmax.f32 %v6481_v8, 0.0 }
 0x2b0   : > { %v15136_v12 = vpop.f32.mrb[40].mxu0  ;;  %v6587_v3 = vld [vmem:[#allocation3 + $0x9] sm:$0xff] }
 0x2b1   : > { %v6490_v13 = vld [vmem:[#allocation7 + $0x5a] ss:$2 sm:$0xff]  ;;  %v6492_v14 = vld [vmem:[#allocation7 + $0x5b] ss:$2 sm:$0xff]  ;;  %4718 = vst.msk [vmem:[#allocation7 + $0x88] sm:$0xff] %vm495_vm1, %v15136_v12  ;;  %v4662_v5 = vpop.f32.mrb[41].mxu0  ;;  %15469 = vmatmul.mubr.msk.f32.vlgmr.msra.gmra.mrb[48].mxu0 %vm495_vm1, %v6587_v3 }
 0x2b2   : > { %6483 = vst.msk [vmem:[#allocation3 + $0x15] sm:$0xff] %vm495_vm1, %v6482_v11  ;;  %v6493_v59 = vmax.f32 %v6490_v13, %v6492_v14  ;;  %4717 = vst.msk [vmem:[#allocation7 + $0x80] sm:$0xff] %vm495_vm1, %v4662_v5  ;;  %16617 = vmatpush3.bf16.msra.mxu0 %v16614_v53  ;;  %v12753_v53 = vld [vmem:[%s22525_s5 + $0xb0] sm:$0xff] }
 0x2b3   : > { %16619 = vmatprep.subr.bf16.mxu0 %v16618_v46  ;;  %v16642_v4 = vpack.c.bf16 %v12754_v54, %v12753_v53 }
 0x2b4   : > { %v6494_v18 = vmax.f32 %v6488_v15, %v6493_v59  ;;  %v15139_v19 = vpop.f32.mrb[42].mxu0 }
 0x2b5   : > { %4720 = vst.msk [vmem:[#allocation7 + $0x98] sm:$0xff] %vm495_vm1, %v15139_v19  ;;  %v4672_v20 = vpop.f32.mrb[43].mxu0  ;;  %v6499_v17 = vld [vmem:[#allocation7 + $0x6c] ss:$2 sm:$0xff]  ;;  %v6501_v22 = vld [vmem:[#allocation7 + $0x6d] ss:$2 sm:$0xff] }
 0x2b6   : > { %v6495_v21 = vadd.f32 %v19723_v49, %v6494_v18  ;;  %4719 = vst.msk [vmem:[#allocation7 + $0x90] sm:$0xff] %vm495_vm1, %v4672_v20  ;;  %v6502_v27 = vmax.f32 %v6499_v17, %v6501_v22  ;;  %16621 = vmatpush3.bf16.msra.mxu0 %v16618_v46 }
 0x2b7   : > { %16623 = vmatprep.subr.bf16.mxu0 %v16622_v57 }
 0x2b8   : > { %v6496_v24 = vmax.f32 %v6495_v21, 0.0  ;;  %v15142_v25 = vpop.f32.mrb[44].mxu0 }
 0x2b9   : > { %v6504_v23 = vld [vmem:[#allocation7 + $0x7e] ss:$2 sm:$0xff]  ;;  %v6506_v62 = vld [vmem:[#allocation7 + $0x7f] ss:$2 sm:$0xff]  ;;  %4722 = vst.msk [vmem:[#allocation7 + $0xa8] sm:$0xff] %vm495_vm1, %v15142_v25  ;;  %v4682_v26 = vpop.f32.mrb[45].mxu0 }
 0x2ba   : > { %v6588_v16 = vld [vmem:[#allocation3 + $0x11] sm:$0xff]  ;;  %6497 = vst.msk [vmem:[#allocation3 + $0x1f] sm:$0xff] %vm495_vm1, %v6496_v24  ;;  %v6507_v28 = vmax.f32 %v6504_v23, %v6506_v62  ;;  %4721 = vst.msk [vmem:[#allocation7 + $0xa0] sm:$0xff] %vm495_vm1, %v4682_v26  ;;  %16625 = vmatpush3.bf16.msra.mxu0 %v16622_v57 }
 0x2bb   : > { %15471 = vmatprep.mubr.msk.f32.mxu0 %vm495_vm1, %v6588_v16  ;;  %16627 = vmatprep.subr.bf16.mxu0 %v16626_v61  ;;  %v6570_v50 = vld [vmem:[#allocation3 + $0x10] sm:$0xff]  ;;  %v12765_v57 = vld [vmem:[%s22525_s5 + $0xc0] sm:$0xff] }
 0x2bc   : > { %v6508_v29 = vmax.f32 %v6502_v27, %v6507_v28  ;;  %v15145_v30 = vpop.f32.mrb[46].mxu0 }
 0x2bd   : > { %4724 = vst.msk [vmem:[#allocation7 + $0xb8] sm:$0xff] %vm495_vm1, %v15145_v30  ;;  %v4692_v31 = vpop.f32.mrb[47].mxu0  ;;  %v6513_v37 = vld [vmem:[#allocation7 + $0x90] ss:$2 sm:$0xff]  ;;  %v6515_v42 = vld [vmem:[#allocation7 + $0x91] ss:$2 sm:$0xff] }
 0x2be   : > { %v6509_v32 = vadd.f32 %v19723_v49, %v6508_v29  ;;  %4723 = vst.msk [vmem:[#allocation7 + $0xb0] sm:$0xff] %vm495_vm1, %v4692_v31  ;;  %v6516_v45 = vmax.f32 %v6513_v37, %v6515_v42  ;;  %16629 = vmatpush3.bf16.msra.mxu0 %v16626_v61  ;;  %v16646_v61 = vpack.c.bf16 %v12766_v58, %v12765_v57  ;;  %v12821_v57 = vld [vmem:[%s22525_s5 + $0x190] sm:$0xff]  ;;  %v12822_v58 = vld [vmem:[%s22525_s5 + $0x198] sm:$0xff] }
 0x2bf   : > { %16631 = vmatprep.subr.bf16.mxu0 %v19788_v0 }
 0x2c0   : > { %v6510_v1 = vmax.f32 %v6509_v32, 0.0 }
 0x2c1   : > { %v6589_v33 = vld [vmem:[#allocation3 + $0x19] sm:$0xff]  ;;  %v6590_v34 = vld [vmem:[#allocation3 + $0x21] sm:$0xff] }
 0x2c2   : > { %6511 = vst.msk [vmem:[#allocation3 + $0x29] sm:$0xff] %vm495_vm1, %v6510_v1  ;;  %15472 = vmatmul.mubr.msk.f32.gmra.mrb[50].mxu0 %vm495_vm1, %v6589_v33  ;;  %v6571_v52 = vld [vmem:[#allocation3 + $0x18] sm:$0xff]  ;;  %v6572_v46 = vld [vmem:[#allocation3 + $0x20] sm:$0xff] }
 0x2c3   : > { %15474 = vmatprep.mubr.msk.f32.mxu0 %vm495_vm1, %v6590_v34 }
 0x2c5   : > { %v6518_v38 = vld [vmem:[#allocation7 + $0xa2] ss:$2 sm:$0xff]  ;;  %v6520_v39 = vld [vmem:[#allocation7 + $0xa3] ss:$2 sm:$0xff] }
 0x2c6   : > { %v6521_v40 = vmax.f32 %v6518_v38, %v6520_v39 }
 0x2c8   : > { %v6522_v41 = vmax.f32 %v6516_v45, %v6521_v40  ;;  %v6568_v40 = vld [vmem:[#allocation3] sm:$0xff] }
 0x2c9   : > { %v6591_v44 = vld [vmem:[#allocation3 + $0x29] sm:$0xff] }
 0x2ca   : > { %v6523_v43 = vadd.f32 %v19723_v49, %v6522_v41  ;;  %15475 = vmatmul.mubr.msk.f32.gmra.mrb[52].mxu0 %vm495_vm1, %v6591_v44  ;;  %v12749_v41 = vld [vmem:[%s22525_s5 + $0x90] sm:$0xff]  ;;  %v12750_v44 = vld [vmem:[%s22525_s5 + $0x98] sm:$0xff] }
 0x2cb   : > { %v6573_v55 = vld [vmem:[#allocation3 + $0x28] sm:$0xff] }
 0x2cc   : > { %v6524_v36 = vmax.f32 %v6523_v43, 0.0  ;;  %v6569_v43 = vld [vmem:[#allocation3 + $0x8] sm:$0xff] }
 0x2ce   : > { %6525 = vst.msk [vmem:[#allocation3 + $0x33] sm:$0xff] %vm495_vm1, %v6524_v36  ;;  %v12751_v36 = vld [vmem:[%s22525_s5 + $0xa0] sm:$0xff] }
 0x2d5   : > { %v6592_v47 = vld [vmem:[#allocation3 + $0x31] sm:$0xff] }
 0x2d6   : > { %15477 = vmatprep.mubr.msk.f32.mxu0 %vm495_vm1, %v6592_v47  ;;  %v12752_v47 = vld [vmem:[%s22525_s5 + $0xa8] sm:$0xff]  ;;  %v6574_v60 = vld [vmem:[#allocation3 + $0x30] sm:$0xff] }
 0x2d7   : > { %v16638_v51 = vpack.c.bf16 %v12752_v47, %v12751_v36  ;;  %v7247_v36 = vld [vmem:[#allocation3 + $0x2b] sm:$0xff] }
 0x367   : > { %v15436_v2 = vpop.f32.mrb[12].mxu1 }
 0x368   : > { %6439 = vst.msk [vmem:[#allocation7 + $0xc8] sm:$0xff] %vm495_vm1, %v15436_v2  ;;  %v6367_v6 = vpop.f32.mrb[13].mxu1 }
 0x369   : > { %6438 = vst.msk [vmem:[#allocation7 + $0xc0] sm:$0xff] %vm495_vm1, %v6367_v6  ;;  %v12767_v6 = vld [vmem:[%s22525_s5 + $0xd0] sm:$0xff] }
 0x36b   : > { %v15439_v35 = vpop.f32.mrb[14].mxu1 }
 0x36c   : > { %6441 = vst.msk [vmem:[#allocation7 + $0xd8] sm:$0xff] %vm495_vm1, %v15439_v35  ;;  %v6377_v7 = vpop.f32.mrb[15].mxu1  ;;  %v12768_v35 = vld [vmem:[%s22525_s5 + $0xd8] sm:$0xff] }
 0x36d   : > { %6440 = vst.msk [vmem:[#allocation7 + $0xd0] sm:$0xff] %vm495_vm1, %v6377_v7  ;;  %v16650_v7 = vpack.c.bf16 %v12768_v35, %v12767_v6  ;;  %v7420_v35 = vld [vmem:[#allocation3 + $0x24] sm:$0xff] }
 0x36f   : > { %v15442_v9 = vpop.f32.mrb[16].mxu1 }
 0x370   : > { %6443 = vst.msk [vmem:[#allocation7 + $0xe8] sm:$0xff] %vm495_vm1, %v15442_v9  ;;  %v6387_v8 = vpop.f32.mrb[17].mxu1  ;;  %v6527_v10 = vld [vmem:[#allocation7 + $0xb4] ss:$2 sm:$0xff]  ;;  %v6529_v48 = vld [vmem:[#allocation7 + $0xb5] ss:$2 sm:$0xff] }
 0x371   : > { %6442 = vst.msk [vmem:[#allocation7 + $0xe0] sm:$0xff] %vm495_vm1, %v6387_v8  ;;  %v6530_v5 = vmax.f32 %v6527_v10, %v6529_v48  ;;  %v6896_v9 = vld [vmem:[#allocation3 + $0xa] sm:$0xff]  ;;  %v12769_v8 = vld [vmem:[%s22525_s5 + $0xe0] sm:$0xff]  ;;  %v12770_v10 = vld [vmem:[%s22525_s5 + $0xe8] sm:$0xff] }
 0x372   : > { %v6897_v48 = vld [vmem:[#allocation3 + $0x12] sm:$0xff] }
 0x373   : > { %v15445_v11 = vpop.f32.mrb[18].mxu1 }
 0x374   : > { %v6532_v12 = vld [vmem:[#allocation7 + $0xc6] ss:$2 sm:$0xff]  ;;  %v6534_v13 = vld [vmem:[#allocation7 + $0xc7] ss:$2 sm:$0xff]  ;;  %6445 = vst.msk [vmem:[#allocation7 + $0xf8] sm:$0xff] %vm495_vm1, %v15445_v11  ;;  %v6397_v14 = vpop.f32.mrb[19].mxu1  ;;  %v16654_v11 = vpack.c.bf16 %v12770_v10, %v12769_v8 }
 0x375   : > { %v6535_v3 = vmax.f32 %v6532_v12, %v6534_v13  ;;  %6444 = vst.msk [vmem:[#allocation7 + $0xf0] sm:$0xff] %vm495_vm1, %v6397_v14  ;;  %v6898_v12 = vld [vmem:[#allocation3 + $0x1a] sm:$0xff]  ;;  %v12771_v13 = vld [vmem:[%s22525_s5 + $0xf0] sm:$0xff]  ;;  %v12772_v14 = vld [vmem:[%s22525_s5 + $0xf8] sm:$0xff] }
 0x376   : > { %v7421_v8 = vld [vmem:[#allocation3 + $0x2c] sm:$0xff] }
 0x377   : > { %v6536_v15 = vmax.f32 %v6530_v5, %v6535_v3  ;;  %v15448_v59 = vpop.f32.mrb[20].mxu1  ;;  %v6899_v5 = vld [vmem:[#allocation3 + $0x22] sm:$0xff]  ;;  %v16658_v3 = vpack.c.bf16 %v12772_v14, %v12771_v13 }
 0x378   : > { %6447 = vst.msk [vmem:[#allocation7 + $0x108] sm:$0xff] %vm495_vm1, %v15448_v59  ;;  %v6407_v18 = vpop.f32.mrb[21].mxu1  ;;  %v6541_v20 = vld [vmem:[#allocation7 + $0xd8] ss:$2 sm:$0xff]  ;;  %v6543_v21 = vld [vmem:[#allocation7 + $0xd9] ss:$2 sm:$0xff] }
 0x379   : > { %v6537_v19 = vadd.f32 %v19723_v49, %v6536_v15  ;;  %6446 = vst.msk [vmem:[#allocation7 + $0x100] sm:$0xff] %vm495_vm1, %v6407_v18  ;;  %v6544_v62 = vmax.f32 %v6541_v20, %v6543_v21  ;;  %v6900_v15 = vld [vmem:[#allocation3 + $0x2a] sm:$0xff]  ;;  %v12783_v59 = vld [vmem:[%s22525_s5 + $0x100] sm:$0xff]  ;;  %v12784_v18 = vld [vmem:[%s22525_s5 + $0x108] sm:$0xff] }
 0x37a   : > { %v16662_v20 = vpack.c.bf16 %v12784_v18, %v12783_v59  ;;  %v12839_v59 = vld [vmem:[%s22525_s5 + $0x1d0] sm:$0xff]  ;;  %v12840_v18 = vld [vmem:[%s22525_s5 + $0x1d8] sm:$0xff] }
 0x37b   : > { %v6538_v17 = vmax.f32 %v6537_v19, 0.0  ;;  %v15451_v22 = vpop.f32.mrb[22].mxu1  ;;  %v6901_v19 = vld [vmem:[#allocation3 + $0x32] sm:$0xff] }
 0x37c   : > { %v6546_v24 = vld [vmem:[#allocation7 + $0xea] ss:$2 sm:$0xff]  ;;  %v6548_v25 = vld [vmem:[#allocation7 + $0xeb] ss:$2 sm:$0xff]  ;;  %6449 = vst.msk [vmem:[#allocation7 + $0x118] sm:$0xff] %vm495_vm1, %v15451_v22  ;;  %v6417_v23 = vpop.f32.mrb[23].mxu1 }
 0x37d   : > { %6539 = vst.msk [vmem:[#allocation3 + $0x3d] sm:$0xff] %vm495_vm1, %v6538_v17  ;;  %v6549_v26 = vmax.f32 %v6546_v24, %v6548_v25  ;;  %6448 = vst.msk [vmem:[#allocation7 + $0x110] sm:$0xff] %vm495_vm1, %v6417_v23  ;;  %v12785_v24 = vld [vmem:[%s22525_s5 + $0x110] sm:$0xff]  ;;  %v12786_v25 = vld [vmem:[%s22525_s5 + $0x118] sm:$0xff] }
 0x37e   : > { %v16666_v23 = vpack.c.bf16 %v12786_v25, %v12785_v24  ;;  %v12844_v24 = vld [vmem:[%s22525_s5 + $0x1f8] sm:$0xff] }
 0x37f   : > { %v6550_v16 = vmax.f32 %v6544_v62, %v6549_v26  ;;  %v12787_v62 = vld [vmem:[%s22525_s5 + $0x120] sm:$0xff]  ;;  %v12788_v26 = vld [vmem:[%s22525_s5 + $0x128] sm:$0xff] }
 0x380   : > { %v6555_v28 = vld [vmem:[#allocation7 + $0xfc] ss:$2 sm:$0xff]  ;;  %v6557_v29 = vld [vmem:[#allocation7 + $0xfd] ss:$2 sm:$0xff] }
 0x381   : > { %v6551_v27 = vadd.f32 %v19723_v49, %v6550_v16  ;;  %v6558_v33 = vmax.f32 %v6555_v28, %v6557_v29  ;;  %v16670_v16 = vpack.c.bf16 %v12788_v26, %v12787_v62  ;;  %v12790_v28 = vld [vmem:[%s22525_s5 + $0x138] sm:$0xff]  ;;  %v12856_v62 = vld [vmem:[%s22525_s5 + $0x208] sm:$0xff] }
 0x383   : > { %v6552_v30 = vmax.f32 %v6551_v27, 0.0  ;;  %v12789_v27 = vld [vmem:[%s22525_s5 + $0x130] sm:$0xff] }
 0x384   : > { %v6560_v31 = vld [vmem:[#allocation7 + $0x10e] ss:$2 sm:$0xff]  ;;  %v6562_v32 = vld [vmem:[#allocation7 + $0x10f] ss:$2 sm:$0xff]  ;;  %v16674_v29 = vpack.c.bf16 %v12790_v28, %v12789_v27  ;;  %v12857_v27 = vld [vmem:[%s22525_s5 + $0x210] sm:$0xff] }
 0x385   : > { %v6593_v1 = vld [vmem:[#allocation3 + $0x39] sm:$0xff]  ;;  %6553 = vst.msk [vmem:[#allocation3 + $0x47] sm:$0xff] %vm495_vm1, %v6552_v30  ;;  %v6563_v34 = vmax.f32 %v6560_v31, %v6562_v32  ;;  %v12858_v28 = vld [vmem:[%s22525_s5 + $0x218] sm:$0xff] }
 0x386   : > { %15478 = vmatmul.mubr.msk.f32.gmra.mrb[54].mxu0 %vm495_vm1, %v6593_v1  ;;  %v6575_v63 = vld [vmem:[#allocation3 + $0x38] sm:$0xff]  ;;  %v12802_v31 = vld [vmem:[%s22525_s5 + $0x148] sm:$0xff] }
 0x387   : > { %v6564_v37 = vmax.f32 %v6558_v33, %v6563_v34  ;;  %v6902_v21 = vld [vmem:[#allocation3 + $0x3a] sm:$0xff]  ;;  %v12803_v33 = vld [vmem:[%s22525_s5 + $0x150] sm:$0xff]  ;;  %v12804_v34 = vld [vmem:[%s22525_s5 + $0x158] sm:$0xff] }
 0x388   : > { %v12801_v30 = vld [vmem:[%s22525_s5 + $0x140] sm:$0xff] }
 0x389   : > { %v6565_v42 = vadd.f32 %v19723_v49, %v6564_v37  ;;  %v16634_v49 = vpack.c.bf16 %v12750_v44, %v12749_v41  ;;  %v16678_v32 = vpack.c.bf16 %v12802_v31, %v12801_v30  ;;  %v7243_v37 = vld [vmem:[#allocation3 + $0xb] sm:$0xff]  ;;  %v7246_v44 = vld [vmem:[#allocation3 + $0x23] sm:$0xff]  ;;  %v7249_v53 = vld [vmem:[#allocation3 + $0x3b] sm:$0xff]  ;;  %v16730_v30 = vpack.c.bf16 %v12858_v28, %v12857_v27 }
 0x38a   : > { %v7423_v13 = vld [vmem:[#allocation3 + $0x3c] sm:$0xff] }
 0x38b   : > { %v6566_v38 = vmax.f32 %v6565_v42, 0.0  ;;  %v16682_v42 = vpack.c.bf16 %v12804_v34, %v12803_v33  ;;  %v7766_v31 = vld [vmem:[#allocation3 + $0x1d] sm:$0xff]  ;;  %v7767_v33 = vld [vmem:[#allocation3 + $0x25] sm:$0xff] }
 0x38c   : > { %v6594_v39 = vld [vmem:[#allocation3 + $0x41] sm:$0xff]  ;;  %v6595_v45 = vld [vmem:[#allocation3 + $0x49] sm:$0xff] }
 0x38d   : > { %6567 = vst.msk [vmem:[#allocation3 + $0x51] sm:$0xff] %vm495_vm1, %v6566_v38  ;;  %15480 = vmatprep.mubr.msk.f32.mxu0 %vm495_vm1, %v6594_v39  ;;  %v6576_v56 = vld [vmem:[#allocation3 + $0x40] sm:$0xff]  ;;  %v6577_v2 = vld [vmem:[#allocation3 + $0x48] sm:$0xff]  ;;  %v7244_v38 = vld [vmem:[#allocation3 + $0x13] sm:$0xff] }
 0x38e   : > { %15481 = vmatmul.mubr.msk.f32.gmra.mrb[56].mxu0 %vm495_vm1, %v6595_v45  ;;  %v6903_v17 = vld [vmem:[#allocation3 + $0x42] sm:$0xff]  ;;  %v12805_v39 = vld [vmem:[%s22525_s5 + $0x160] sm:$0xff] }
 0x38f   : > { %15499 = vmatprep.mubr.msk.f32.mxu0 %vm495_vm1, %v6568_v40  ;;  %v12806_v45 = vld [vmem:[%s22525_s5 + $0x168] sm:$0xff] }
 0x390   : > { %v7245_v40 = vld [vmem:[#allocation3 + $0x1b] sm:$0xff]  ;;  %v16686_v41 = vpack.c.bf16 %v12806_v45, %v12805_v39 }
 0x391   : > { %v7769_v39 = vld [vmem:[#allocation3 + $0x35] sm:$0xff] }
 0x392   : > { %15500 = vmatmul.mubr.msk.f32.vlgmr.msra.gmra.mrb[48].mxu0 %vm495_vm1, %v6569_v43  ;;  %v12808_v43 = vld [vmem:[%s22525_s5 + $0x178] sm:$0xff] }
 0x393   : > { %16633 = vmatpush3.bf16.msra.mxu0 %v19788_v0  ;;  %15502 = vmatprep.mubr.msk.f32.mxu0 %vm495_vm1, %v6570_v50  ;;  %v6895_v0 = vld [vmem:[#allocation3 + $0x2] sm:$0xff]  ;;  %v7248_v50 = vld [vmem:[#allocation3 + $0x33] sm:$0xff] }
 0x394   : > { %16635 = vmatprep.subr.bf16.mxu0 %v16634_v49  ;;  %v6904_v22 = vld [vmem:[#allocation3 + $0x4a] sm:$0xff]  ;;  %v7078_v1 = vld [vmem:[#allocation3 + $0x52] sm:$0xff] }
 0x396   : > { %15503 = vmatmul.mubr.msk.f32.gmra.mrb[50].mxu0 %vm495_vm1, %v6571_v52  ;;  %v12820_v52 = vld [vmem:[%s22525_s5 + $0x188] sm:$0xff] }
 0x397   : > { %15505 = vmatprep.mubr.msk.f32.mxu0 %vm495_vm1, %v6572_v46  ;;  %16637 = vmatpush3.bf16.msra.mxu0 %v16634_v49  ;;  %v12807_v49 = vld [vmem:[%s22525_s5 + $0x170] sm:$0xff] }
 0x398   : > { %16639 = vmatprep.subr.bf16.mxu0 %v16638_v51  ;;  %v16690_v47 = vpack.c.bf16 %v12808_v43, %v12807_v49  ;;  %v7250_v46 = vld [vmem:[#allocation3 + $0x43] sm:$0xff] }
 0x399   : > { %v7771_v49 = vld [vmem:[#allocation3 + $0x45] sm:$0xff] }
 0x39a   : > { %15506 = vmatmul.mubr.msk.f32.gmra.mrb[52].mxu0 %vm495_vm1, %v6573_v55  ;;  %v7252_v55 = vld [vmem:[#allocation3 + $0x53] sm:$0xff] }
 0x39b   : > { %15508 = vmatprep.mubr.msk.f32.mxu0 %vm495_vm1, %v6574_v60  ;;  %16641 = vmatpush3.bf16.msra.mxu0 %v16638_v51  ;;  %v12819_v51 = vld [vmem:[%s22525_s5 + $0x180] sm:$0xff]  ;;  %v7417_v60 = vld [vmem:[#allocation3 + $0xc] sm:$0xff] }
 0x39c   : > { %16643 = vmatprep.subr.bf16.mxu0 %v16642_v4  ;;  %v16694_v54 = vpack.c.bf16 %v12820_v52, %v12819_v51  ;;  %v12876_v51 = vld [vmem:[%s22527_s7 + $0x90] sm:$0xff]  ;;  %v12877_v52 = vld [vmem:[%s22527_s7 + $0x98] sm:$0xff] }
 0x39e   : > { %15509 = vmatmul.mubr.msk.f32.gmra.mrb[54].mxu0 %vm495_vm1, %v6575_v63  ;;  %v7418_v63 = vld [vmem:[#allocation3 + $0x14] sm:$0xff] }
 0x39f   : > { %15511 = vmatprep.mubr.msk.f32.mxu0 %vm495_vm1, %v6576_v56  ;;  %16645 = vmatpush3.bf16.msra.mxu0 %v16642_v4  ;;  %v7251_v4 = vld [vmem:[#allocation3 + $0x4b] sm:$0xff]  ;;  %v12823_v56 = vld [vmem:[%s22525_s5 + $0x1a0] sm:$0xff] }
 0x3a0   : > { %16647 = vmatprep.subr.bf16.mxu0 %v16646_v61 }
 0x3a2   : > { %15512 = vmatmul.mubr.msk.f32.gmra.mrb[56].mxu0 %vm495_vm1, %v6577_v2  ;;  %v7419_v2 = vld [vmem:[#allocation3 + $0x1c] sm:$0xff] }
 0x3a3   : > { %15530 = vmatprep.mubr.msk.f32.mxu0 %vm495_vm1, %v6895_v0  ;;  %v12824_v0 = vld [vmem:[%s22525_s5 + $0x1a8] sm:$0xff] }
 0x3a4   : > { %v16702_v6 = vpack.c.bf16 %v12824_v0, %v12823_v56  ;;  %v7945_v56 = vld [vmem:[#allocation3 + $0x46] sm:$0xff]  ;;  %v7946_v0 = vld [vmem:[#allocation3 + $0x4e] sm:$0xff] }
 0x3a6   : > { %15531 = vmatmul.mubr.msk.f32.vlgmr.msra.gmra.mrb[48].mxu0 %vm495_vm1, %v6896_v9 }
 0x3a7   : > { %16649 = vmatpush3.bf16.msra.mxu0 %v16646_v61  ;;  %15533 = vmatprep.mubr.msk.f32.mxu0 %vm495_vm1, %v6897_v48  ;;  %v16698_v61 = vpack.c.bf16 %v12822_v58, %v12821_v57  ;;  %v7941_v57 = vld [vmem:[#allocation3 + $0x26] sm:$0xff] }
 0x3a8   : > { %16651 = vmatprep.subr.bf16.mxu0 %v16650_v7 }
 0x3aa   : > { %15534 = vmatmul.mubr.msk.f32.gmra.mrb[50].mxu0 %vm495_vm1, %v6898_v12 }
 0x3ab   : > { %15536 = vmatprep.mubr.msk.f32.mxu0 %vm495_vm1, %v6899_v5  ;;  %16653 = vmatpush3.bf16.msra.mxu0 %v16650_v7  ;;  %v12825_v7 = vld [vmem:[%s22525_s5 + $0x1b0] sm:$0xff] }
 0x3ac   : > { %16655 = vmatprep.subr.bf16.mxu0 %v16654_v11 }
 0x3ae   : > { %15537 = vmatmul.mubr.msk.f32.gmra.mrb[52].mxu0 %vm495_vm1, %v6900_v15 }
 0x3af   : > { %15539 = vmatprep.mubr.msk.f32.mxu0 %vm495_vm1, %v6901_v19  ;;  %16657 = vmatpush3.bf16.msra.mxu0 %v16654_v11  ;;  %v12837_v11 = vld [vmem:[%s22525_s5 + $0x1c0] sm:$0xff] }
 0x3b0   : > { %16659 = vmatprep.subr.bf16.mxu0 %v16658_v3 }
 0x3b2   : > { %15540 = vmatmul.mubr.msk.f32.gmra.mrb[54].mxu0 %vm495_vm1, %v6902_v21 }
 0x3b3   : > { %15542 = vmatprep.mubr.msk.f32.mxu0 %vm495_vm1, %v6903_v17  ;;  %16661 = vmatpush3.bf16.msra.mxu0 %v16658_v3  ;;  %v7425_v3 = vld [vmem:[#allocation3 + $0x4c] sm:$0xff] }
 0x3b4   : > { %16663 = vmatprep.subr.bf16.mxu0 %v16662_v20 }
 0x3b6   : > { %15543 = vmatmul.mubr.msk.f32.gmra.mrb[56].mxu0 %vm495_vm1, %v6904_v22 }
 0x3b7   : > { %15561 = vmatprep.mubr.msk.f32.mxu0 %vm495_vm1, %v6896_v9  ;;  %v12826_v9 = vld [vmem:[%s22525_s5 + $0x1b8] sm:$0xff] }
 0x3b8   : > { %v16706_v10 = vpack.c.bf16 %v12826_v9, %v12825_v7  ;;  %v12881_v7 = vld [vmem:[%s22527_s7 + $0xb8] sm:$0xff] }
 0x3ba   : > { %15562 = vmatmul.mubr.msk.f32.vlgmr.msra.gmra.mrb[48].mxu0 %vm495_vm1, %v6897_v48  ;;  %v7422_v48 = vld [vmem:[#allocation3 + $0x34] sm:$0xff] }
 0x3bb   : > { %16665 = vmatpush3.bf16.msra.mxu0 %v16662_v20  ;;  %15564 = vmatprep.mubr.msk.f32.mxu0 %vm495_vm1, %v6898_v12  ;;  %v12838_v12 = vld [vmem:[%s22525_s5 + $0x1c8] sm:$0xff]  ;;  %v12841_v20 = vld [vmem:[%s22525_s5 + $0x1e0] sm:$0xff] }
 0x3bc   : > { %16667 = vmatprep.subr.bf16.mxu0 %v16666_v23  ;;  %v16710_v14 = vpack.c.bf16 %v12838_v12, %v12837_v11  ;;  %v12884_v11 = vld [vmem:[%s22527_s7 + $0xd0] sm:$0xff]  ;;  %v12885_v12 = vld [vmem:[%s22527_s7 + $0xd8] sm:$0xff] }
 0x3be   : > { %15565 = vmatmul.mubr.msk.f32.gmra.mrb[50].mxu0 %vm495_vm1, %v6899_v5  ;;  %v7424_v5 = vld [vmem:[#allocation3 + $0x44] sm:$0xff] }
 0x3bf   : > { %15567 = vmatprep.mubr.msk.f32.mxu0 %vm495_vm1, %v6900_v15  ;;  %16669 = vmatpush3.bf16.msra.mxu0 %v16666_v23  ;;  %v7426_v15 = vld [vmem:[#allocation3 + $0x54] sm:$0xff] }
 0x3c0   : > { %16671 = vmatprep.subr.bf16.mxu0 %v16670_v16  ;;  %v12855_v23 = vld [vmem:[%s22525_s5 + $0x200] sm:$0xff] }
 0x3c1   : > { %v16726_v26 = vpack.c.bf16 %v12856_v62, %v12855_v23 }
 0x3c2   : > { %15568 = vmatmul.mubr.msk.f32.gmra.mrb[52].mxu0 %vm495_vm1, %v6901_v19  ;;  %v16714_v19 = vpack.c.bf16 %v12840_v18, %v12839_v59  ;;  %v12889_v59 = vld [vmem:[%s22527_s7 + $0xf8] sm:$0xff] }
 0x3c3   : > { %15570 = vmatprep.mubr.msk.f32.mxu0 %vm495_vm1, %v6902_v21  ;;  %16673 = vmatpush3.bf16.msra.mxu0 %v16670_v16  ;;  %v12842_v21 = vld [vmem:[%s22525_s5 + $0x1e8] sm:$0xff]  ;;  %v8188_v18 = vld [vmem:[#allocation4 + $0x1] sm:$0xff] }
 0x3c4   : > { %16675 = vmatprep.subr.bf16.mxu0 %v16674_v29  ;;  %v7600_v16 = vld [vmem:[#allocation3 + $0x5c] sm:$0xff] }
 0x3c6   : > { %15571 = vmatmul.mubr.msk.f32.gmra.mrb[54].mxu0 %vm495_vm1, %v6903_v17  ;;  %v16718_v17 = vpack.c.bf16 %v12842_v21, %v12841_v20  ;;  %v8172_v20 = vld [vmem:[%s22527_s7] sm:$0xff]  ;;  %v8173_v21 = vld [vmem:[%s22527_s7 + $0x8] sm:$0xff] }
 0x3c7   : > { %15573 = vmatprep.mubr.msk.f32.mxu0 %vm495_vm1, %v6904_v22  ;;  %16677 = vmatpush3.bf16.msra.mxu0 %v16674_v29  ;;  %v12843_v22 = vld [vmem:[%s22525_s5 + $0x1f0] sm:$0xff]  ;;  %v7765_v29 = vld [vmem:[#allocation3 + $0x15] sm:$0xff] }
 0x3c8   : > { %16679 = vmatprep.subr.bf16.mxu0 %v16678_v32  ;;  %v16722_v25 = vpack.c.bf16 %v12844_v24, %v12843_v22  ;;  %v20112_v22 = vld [vmem:[%s22526_s6] ss:$0 sm:$0xff] }
 0x3ca   : > { %15574 = vmatmul.mubr.msk.f32.gmra.mrb[56].mxu0 %vm495_vm1, %v7078_v1  ;;  %v12860_v1 = vld [vmem:[%s22525_s5 + $0x228] sm:$0xff] }
 0x3cb   : > { %15592 = vmatprep.mubr.msk.f32.mxu0 %vm495_vm1, %v7243_v37  ;;  %v7768_v37 = vld [vmem:[#allocation3 + $0x2d] sm:$0xff] }
 0x3ce   : > { %15593 = vmatmul.mubr.msk.f32.vlgmr.msra.gmra.mrb[48].mxu0 %vm495_vm1, %v7244_v38  ;;  %v12862_v38 = vld [vmem:[%s22525_s5 + $0x238] sm:$0xff] }
 0x3cf   : > { %16681 = vmatpush3.bf16.msra.mxu0 %v16678_v32  ;;  %15595 = vmatprep.mubr.msk.f32.mxu0 %vm495_vm1, %v7245_v40  ;;  %v12859_v32 = vld [vmem:[%s22525_s5 + $0x220] sm:$0xff] }
 0x3d0   : > { %16683 = vmatprep.subr.bf16.mxu0 %v16682_v42  ;;  %v16734_v34 = vpack.c.bf16 %v12860_v1, %v12859_v32  ;;  %v7770_v40 = vld [vmem:[#allocation3 + $0x3d] sm:$0xff] }
 0x3d2   : > { %15596 = vmatmul.mubr.msk.f32.gmra.mrb[50].mxu0 %vm495_vm1, %v7246_v44  ;;  %v12875_v44 = vld [vmem:[%s22527_s7 + $0x88] sm:$0xff] }
 0x3d3   : > { %15598 = vmatprep.mubr.msk.f32.mxu0 %vm495_vm1, %v7247_v36  ;;  %16685 = vmatpush3.bf16.msra.mxu0 %v16682_v42  ;;  %v12861_v42 = vld [vmem:[%s22525_s5 + $0x230] sm:$0xff] }
 0x3d4   : > { %16687 = vmatprep.subr.bf16.mxu0 %v16686_v41  ;;  %v16738_v45 = vpack.c.bf16 %v12862_v38, %v12861_v42  ;;  %v7772_v36 = vld [vmem:[#allocation3 + $0x4d] sm:$0xff] }
 0x3d6   : > { %15599 = vmatmul.mubr.msk.f32.gmra.mrb[52].mxu0 %vm495_vm1, %v7248_v50  ;;  %v7774_v50 = vld [vmem:[#allocation3 + $0x5d] sm:$0xff] }
 0x3d7   : > { %15601 = vmatprep.mubr.msk.f32.mxu0 %vm495_vm1, %v7249_v53  ;;  %16689 = vmatpush3.bf16.msra.mxu0 %v16686_v41  ;;  %v12874_v41 = vld [vmem:[%s22527_s7 + $0x80] sm:$0xff] }
 0x3d8   : > { %16691 = vmatprep.subr.bf16.mxu0 %v16690_v47  ;;  %v16742_v43 = vpack.c.bf16 %v12875_v44, %v12874_v41  ;;  %v7939_v53 = vld [vmem:[#allocation3 + $0x16] sm:$0xff] }
 0x3da   : > { %15602 = vmatmul.mubr.msk.f32.gmra.mrb[54].mxu0 %vm495_vm1, %v7250_v46  ;;  %v7940_v46 = vld [vmem:[#allocation3 + $0x1e] sm:$0xff] }
 0x3db   : > { %15604 = vmatprep.mubr.msk.f32.mxu0 %vm495_vm1, %v7251_v4  ;;  %16693 = vmatpush3.bf16.msra.mxu0 %v16690_v47  ;;  %v7773_v47 = vld [vmem:[#allocation3 + $0x55] sm:$0xff] }
 0x3dc   : > { %16695 = vmatprep.subr.bf16.mxu0 %v16694_v54  ;;  %v12878_v4 = vld [vmem:[%s22527_s7 + $0xa0] sm:$0xff] }
 0x3de   : > { %15605 = vmatmul.mubr.msk.f32.gmra.mrb[56].mxu0 %vm495_vm1, %v7252_v55  ;;  %v12879_v55 = vld [vmem:[%s22527_s7 + $0xa8] sm:$0xff] }
 0x3df   : > { %15623 = vmatprep.mubr.msk.f32.mxu0 %vm495_vm1, %v7417_v60  ;;  %v16750_v58 = vpack.c.bf16 %v12879_v55, %v12878_v4  ;;  %v7942_v60 = vld [vmem:[#allocation3 + $0x2e] sm:$0xff] }
 0x3e2   : > { %15624 = vmatmul.mubr.msk.f32.vlgmr.msra.gmra.mrb[48].mxu0 %vm495_vm1, %v7418_v63 }
 0x3e3   : > { %16697 = vmatpush3.bf16.msra.mxu0 %v16694_v54  ;;  %15626 = vmatprep.mubr.msk.f32.mxu0 %vm495_vm1, %v7419_v2  ;;  %v16746_v54 = vpack.c.bf16 %v12877_v52, %v12876_v51  ;;  %v8178_v51 = vld [vmem:[%s22527_s7 + $0x30] sm:$0xff]  ;;  %v8179_v52 = vld [vmem:[%s22527_s7 + $0x38] sm:$0xff] }
 0x3e4   : > { %16699 = vmatprep.subr.bf16.mxu0 %v16698_v61 }
 0x3e6   : > { %15627 = vmatmul.mubr.msk.f32.gmra.mrb[50].mxu0 %vm495_vm1, %v7420_v35 }
 0x3e7   : > { %15629 = vmatprep.mubr.msk.f32.mxu0 %vm495_vm1, %v7421_v8  ;;  %16701 = vmatpush3.bf16.msra.mxu0 %v16698_v61  ;;  %v7943_v61 = vld [vmem:[#allocation3 + $0x36] sm:$0xff] }
 0x3e8   : > { %16703 = vmatprep.subr.bf16.mxu0 %v16702_v6 }
 0x3ea   : > { %15630 = vmatmul.mubr.msk.f32.gmra.mrb[52].mxu0 %vm495_vm1, %v7422_v48 }
 0x3eb   : > { %15632 = vmatprep.mubr.msk.f32.mxu0 %vm495_vm1, %v7423_v13  ;;  %16705 = vmatpush3.bf16.msra.mxu0 %v16702_v6  ;;  %v7948_v6 = vld [vmem:[#allocation3 + $0x5e] sm:$0xff] }
 0x3ec   : > { %16707 = vmatprep.subr.bf16.mxu0 %v16706_v10 }
 0x3ee   : > { %15633 = vmatmul.mubr.msk.f32.gmra.mrb[54].mxu0 %vm495_vm1, %v7424_v5 }
 0x3ef   : > { %15635 = vmatprep.mubr.msk.f32.mxu0 %vm495_vm1, %v7425_v3  ;;  %16709 = vmatpush3.bf16.msra.mxu0 %v16706_v10  ;;  %v12883_v10 = vld [vmem:[%s22527_s7 + $0xc8] sm:$0xff] }
 0x3f0   : > { %16711 = vmatprep.subr.bf16.mxu0 %v16710_v14 }
 0x3f2   : > { %15636 = vmatmul.mubr.msk.f32.gmra.mrb[56].mxu0 %vm495_vm1, %v7426_v15 }
 0x3f3   : > { %15654 = vmatprep.mubr.msk.f32.mxu0 %vm495_vm1, %v7418_v63  ;;  %v7944_v63 = vld [vmem:[#allocation3 + $0x3e] sm:$0xff] }
 0x3f6   : > { %15655 = vmatmul.mubr.msk.f32.vlgmr.msra.gmra.mrb[48].mxu0 %vm495_vm1, %v7419_v2  ;;  %v7947_v2 = vld [vmem:[#allocation3 + $0x56] sm:$0xff] }
 0x3f7   : > { %16713 = vmatpush3.bf16.msra.mxu0 %v16710_v14  ;;  %15657 = vmatprep.mubr.msk.f32.mxu0 %vm495_vm1, %v7420_v35  ;;  %v12880_v35 = vld [vmem:[%s22527_s7 + $0xb0] sm:$0xff]  ;;  %v12886_v14 = vld [vmem:[%s22527_s7 + $0xe0] sm:$0xff] }
 0x3f8   : > { %16715 = vmatprep.subr.bf16.mxu0 %v16714_v19  ;;  %v16754_v9 = vpack.c.bf16 %v12881_v7, %v12880_v35  ;;  %v8182_v7 = vld [vmem:[%s22527_s7 + $0x50] sm:$0xff] }
 0x3fa   : > { %15658 = vmatmul.mubr.msk.f32.gmra.mrb[50].mxu0 %vm495_vm1, %v7421_v8  ;;  %v12882_v8 = vld [vmem:[%s22527_s7 + $0xc0] sm:$0xff] }
 0x3fb   : > { %15660 = vmatprep.mubr.msk.f32.mxu0 %vm495_vm1, %v7422_v48  ;;  %16717 = vmatpush3.bf16.msra.mxu0 %v16714_v19  ;;  %v16758_v48 = vpack.c.bf16 %v12883_v10, %v12882_v8 }
 0x3fc   : > { %16719 = vmatprep.subr.bf16.mxu0 %v16718_v17 }
 0x3fe   : > { %15661 = vmatmul.mubr.msk.f32.gmra.mrb[52].mxu0 %vm495_vm1, %v7423_v13  ;;  %v16762_v13 = vpack.c.bf16 %v12885_v12, %v12884_v11  ;;  %v8184_v12 = vld [vmem:[%s22527_s7 + $0x60] sm:$0xff] }
 0x3ff   : > { %15663 = vmatprep.mubr.msk.f32.mxu0 %vm495_vm1, %v7424_v5  ;;  %16721 = vmatpush3.bf16.msra.mxu0 %v16718_v17  ;;  %v12887_v5 = vld [vmem:[%s22527_s7 + $0xe8] sm:$0xff]  ;;  %v16774_v17 = vpack.c.bf16 %v8173_v21, %v8172_v20  ;;  %v12890_v21 = vld [vmem:[%s22527_s7 + $0x100] sm:$0xff] }
 0x400   : > { %16723 = vmatprep.subr.bf16.mxu0 %v16722_v25 }
 0x402   : > { %15664 = vmatmul.mubr.msk.f32.gmra.mrb[54].mxu0 %vm495_vm1, %v7425_v3  ;;  %v16766_v3 = vpack.c.bf16 %v12887_v5, %v12886_v14 }
 0x403   : > { %15666 = vmatprep.mubr.msk.f32.mxu0 %vm495_vm1, %v7426_v15  ;;  %16725 = vmatpush3.bf16.msra.mxu0 %v16722_v25  ;;  %v12888_v15 = vld [vmem:[%s22527_s7 + $0xf0] sm:$0xff] }
 0x404   : > { %16727 = vmatprep.subr.bf16.mxu0 %v16726_v26  ;;  %v16770_v19 = vpack.c.bf16 %v12889_v59, %v12888_v15  ;;  %v8186_v15 = vld [vmem:[%s22527_s7 + $0x70] sm:$0xff]  ;;  %v8187_v59 = vld [vmem:[%s22527_s7 + $0x78] sm:$0xff] }
 0x405   : > { %v16802_v20 = vpack.c.bf16 %v8187_v59, %v8186_v15  ;;  %v12914_v59 = vld [vmem:[%s22527_s7 + $0x1c0] sm:$0xff] }
 0x406   : > { %15667 = vmatmul.mubr.msk.f32.gmra.mrb[56].mxu0 %vm495_vm1, %v7600_v16 }
 0x407   : > { %15685 = vmatprep.mubr.msk.f32.mxu0 %vm495_vm1, %v7765_v29 }
 0x40a   : > { %15686 = vmatmul.mubr.msk.f32.vlgmr.msra.gmra.mrb[48].mxu0 %vm495_vm1, %v7766_v31  ;;  %v8175_v31 = vld [vmem:[%s22527_s7 + $0x18] sm:$0xff] }
 0x40b   : > { %16729 = vmatpush3.bf16.msra.mxu0 %v16726_v26  ;;  %15688 = vmatprep.mubr.msk.f32.mxu0 %vm495_vm1, %v7767_v33 }
 0x40c   : > { %16731 = vmatprep.subr.bf16.mxu0 %v16730_v30 }
 0x40e   : > { %15689 = vmatmul.mubr.msk.f32.gmra.mrb[50].mxu0 %vm495_vm1, %v7768_v37  ;;  %v8177_v37 = vld [vmem:[%s22527_s7 + $0x28] sm:$0xff] }
 0x40f   : > { %15691 = vmatprep.mubr.msk.f32.mxu0 %vm495_vm1, %v7769_v39  ;;  %16733 = vmatpush3.bf16.msra.mxu0 %v16730_v30  ;;  %v8174_v30 = vld [vmem:[%s22527_s7 + $0x10] sm:$0xff] }
 0x410   : > { %16735 = vmatprep.subr.bf16.mxu0 %v16734_v34  ;;  %v16778_v33 = vpack.c.bf16 %v8175_v31, %v8174_v30  ;;  %v12895_v30 = vld [vmem:[%s22527_s7 + $0x128] sm:$0xff] }
 0x412   : > { %15692 = vmatmul.mubr.msk.f32.gmra.mrb[52].mxu0 %vm495_vm1, %v7770_v40 }
 0x413   : > { %15694 = vmatprep.mubr.msk.f32.mxu0 %vm495_vm1, %v7771_v49  ;;  %16737 = vmatpush3.bf16.msra.mxu0 %v16734_v34  ;;  %v8176_v34 = vld [vmem:[%s22527_s7 + $0x20] sm:$0xff] }
 0x414   : > { %16739 = vmatprep.subr.bf16.mxu0 %v16738_v45 }
 0x416   : > { %15695 = vmatmul.mubr.msk.f32.gmra.mrb[54].mxu0 %vm495_vm1, %v7772_v36  ;;  %v16782_v36 = vpack.c.bf16 %v8177_v37, %v8176_v34  ;;  %v12896_v34 = vld [vmem:[%s22527_s7 + $0x130] sm:$0xff]  ;;  %v12897_v37 = vld [vmem:[%s22527_s7 + $0x138] sm:$0xff] }
 0x417   : > { %15697 = vmatprep.mubr.msk.f32.mxu0 %vm495_vm1, %v7773_v47  ;;  %16741 = vmatpush3.bf16.msra.mxu0 %v16738_v45 }
 0x418   : > { %16743 = vmatprep.subr.bf16.mxu0 %v16742_v43 }
 0x41a   : > { %15698 = vmatmul.mubr.msk.f32.gmra.mrb[56].mxu0 %vm495_vm1, %v7774_v50 }
 0x41b   : > { %15716 = vmatprep.mubr.msk.f32.mxu0 %vm495_vm1, %v7939_v53 }
 0x41e   : > { %15717 = vmatmul.mubr.msk.f32.vlgmr.msra.gmra.mrb[48].mxu0 %vm495_vm1, %v7940_v46  ;;  %v16786_v46 = vpack.c.bf16 %v8179_v52, %v8178_v51 }
 0x41f   : > { %15719 = vmatprep.mubr.msk.f32.mxu0 %vm495_vm1, %v7941_v57  ;;  %16745 = vmatpush3.bf16.msra.mxu0 %v16742_v43  ;;  %v8180_v57 = vld [vmem:[%s22527_s7 + $0x40] sm:$0xff] }
 0x420   : > { %16747 = vmatprep.subr.bf16.mxu0 %v16746_v54 }
 0x422   : > { %15720 = vmatmul.mubr.msk.f32.gmra.mrb[50].mxu0 %vm495_vm1, %v7942_v60 }
 0x423   : > { %15722 = vmatprep.mubr.msk.f32.mxu0 %vm495_vm1, %v7943_v61  ;;  %16749 = vmatpush3.bf16.msra.mxu0 %v16746_v54 }
 0x424   : > { %16751 = vmatprep.subr.bf16.mxu0 %v16750_v58 }
 0x426   : > { %15723 = vmatmul.mubr.msk.f32.gmra.mrb[52].mxu0 %vm495_vm1, %v7944_v63 }
 0x427   : > { %15725 = vmatprep.mubr.msk.f32.mxu0 %vm495_vm1, %v7945_v56  ;;  %16753 = vmatpush3.bf16.msra.mxu0 %v16750_v58  ;;  %v8181_v58 = vld [vmem:[%s22527_s7 + $0x48] sm:$0xff] }
 0x428   : > { %16755 = vmatprep.subr.bf16.mxu0 %v16754_v9 }
 0x42a   : > { %15726 = vmatmul.mubr.msk.f32.gmra.mrb[54].mxu0 %vm495_vm1, %v7946_v0  ;;  %v16790_v0 = vpack.c.bf16 %v8181_v58, %v8180_v57  ;;  %v12904_v58 = vld [vmem:[%s22527_s7 + $0x170] sm:$0xff] }
 0x42b   : > { %15728 = vmatprep.mubr.msk.f32.mxu0 %vm495_vm1, %v7947_v2  ;;  %16757 = vmatpush3.bf16.msra.mxu0 %v16754_v9  ;;  %v8183_v9 = vld [vmem:[%s22527_s7 + $0x58] sm:$0xff] }
 0x42c   : > { %16759 = vmatprep.subr.bf16.mxu0 %v16758_v48  ;;  %v16794_v11 = vpack.c.bf16 %v8183_v9, %v8182_v7 }
 0x42e   : > { %15729 = vmatmul.mubr.msk.f32.gmra.mrb[56].mxu0 %vm495_vm1, %v7948_v6 }
 0x42f   : > { %16761 = vmatpush3.bf16.msra.mxu0 %v16758_v48  ;;  %15763 = vmatprep.mubr.f32.mxu0 %v8188_v18 }
 0x430   : > { %16763 = vmatprep.subr.bf16.mxu0 %v16762_v13 }
 0x433   : > { %16765 = vmatpush3.bf16.msra.mxu0 %v16762_v13  ;;  %v8185_v13 = vld [vmem:[%s22527_s7 + $0x68] sm:$0xff] }
 0x434   : > { %16767 = vmatprep.subr.bf16.mxu0 %v16766_v3 }
 0x437   : > { %16769 = vmatpush3.bf16.msra.mxu0 %v16766_v3  ;;  %v16798_v3 = vpack.c.bf16 %v8185_v13, %v8184_v12  ;;  %v12912_v13 = vld [vmem:[%s22527_s7 + $0x1b0] sm:$0xff] }
 0x438   : > { %16771 = vmatprep.subr.bf16.mxu0 %v16770_v19 }
 0x43b   : > { %16773 = vmatpush3.bf16.msra.mxu0 %v16770_v19 }
 0x43c   : > { %16775 = vmatprep.subr.bf16.mxu0 %v16774_v17 }
 0x4f1   : > { %v15718_v24 = vpop.f32.mrb[48].mxu0 }
 0x4f2   : > { %8114 = vst [vmem:[#allocation8 + $0x8] sm:$0xff] %v15718_v24  ;;  %v8054_v25 = vpop.f32.mrb[49].mxu0 }
 0x4f3   : > { %v20115_v23 = vadd.f32 %v20112_v22, %v8054_v25  ;;  %v12892_v25 = vld [vmem:[%s22527_s7 + $0x110] sm:$0xff] }
 0x4f5   : > { %v8132_v62 = vmax.f32 %v20115_v23, 0.0  ;;  %v15721_v26 = vpop.f32.mrb[50].mxu0  ;;  %v12939_v23 = vld [vmem:[%s22527_s7 + $0x288] sm:$0xff] }
 0x4f6   : > { %8116 = vst [vmem:[#allocation8 + $0x18] sm:$0xff] %v15721_v26  ;;  %v8064_v16 = vpop.f32.mrb[51].mxu0  ;;  %v12893_v26 = vld [vmem:[%s22527_s7 + $0x118] sm:$0xff] }
 0x4f7   : > { %8133 = vst [vmem:[#allocation4 + $0xb] sm:$0xff] %v8132_v62  ;;  %8115 = vst [vmem:[#allocation8 + $0x10] sm:$0xff] %v8064_v16  ;;  %v16810_v16 = vpack.c.bf16 %v12893_v26, %v12892_v25 }
 0x4f9   : > { %v15724_v27 = vpop.f32.mrb[52].mxu0 }
 0x4fa   : > { %v20121_v28 = vadd.f32 %v15724_v27, %v20112_v22  ;;  %v8074_v29 = vpop.f32.mrb[53].mxu0 }
 0x4fb   : > { %8117 = vst [vmem:[#allocation8 + $0x20] sm:$0xff] %v8074_v29  ;;  %v12894_v29 = vld [vmem:[%s22527_s7 + $0x120] sm:$0xff] }
 0x4fc   : > { %v8148_v32 = vmax.f32 %v20121_v28, 0.0 }
 0x4fd   : > { %v15727_v1 = vpop.f32.mrb[54].mxu0 }
 0x4fe   : > { %v8134_v42 = vld [vmem:[#allocation8 + $0xa] sm:$0xff]  ;;  %v8138_v38 = vld [vmem:[#allocation8 + $0x14] sm:$0xff]  ;;  %8149 = vst [vmem:[#allocation4 + $0x33] sm:$0xff] %v8148_v32  ;;  %8120 = vst [vmem:[#allocation8 + $0x38] sm:$0xff] %v15727_v1  ;;  %v8084_v39 = vpop.f32.mrb[55].mxu0  ;;  %v16814_v1 = vpack.c.bf16 %v12895_v30, %v12894_v29 }
 0x4ff   : > { %v8189_v45 = vld [vmem:[#allocation4 + $0x9] sm:$0xff]  ;;  %v20139_v40 = vadd.f32 %v20112_v22, %v8134_v42  ;;  %v8139_v41 = vadd.f32 %v20112_v22, %v8138_v38  ;;  %8119 = vst [vmem:[#allocation8 + $0x30] sm:$0xff] %v8084_v39  ;;  %v16818_v38 = vpack.c.bf16 %v12897_v37, %v12896_v34  ;;  %v12919_v29 = vld [vmem:[%s22527_s7 + $0x1e8] sm:$0xff] }
 0x500   : > { %15764 = vmatmul.mubr.f32.vlgmr.msra.gmra.mrb[58].mxu0 %v8189_v45  ;;  %v8163_v27 = vld [vmem:[#allocation4 + $0x8] sm:$0xff]  ;;  %v12898_v45 = vld [vmem:[%s22527_s7 + $0x140] sm:$0xff]  ;;  %v12923_v37 = vld [vmem:[%s22527_s7 + $0x208] sm:$0xff] }
 0x501   : > { %16777 = vmatpush3.bf16.msra.mxu0 %v16774_v17  ;;  %v8136_v44 = vmax.f32 %v20139_v40, 0.0  ;;  %v8140_v49 = vmax.f32 %v8139_v41, 0.0  ;;  %v15730_v43 = vpop.f32.mrb[56].mxu0  ;;  %v12891_v17 = vld [vmem:[%s22527_s7 + $0x108] sm:$0xff]  ;;  %v8446_v9 = vld [vmem:[#allocation4 + $0xa] sm:$0xff] }
 0x502   : > { %16779 = vmatprep.subr.bf16.mxu0 %v16778_v33  ;;  %v8142_v47 = vld [vmem:[#allocation8 + $0x1e] sm:$0xff]  ;;  %8122 = vst [vmem:[#allocation8 + $0x48] sm:$0xff] %v15730_v43  ;;  %v8094_v50 = vpop.f32.mrb[57].mxu0  ;;  %v16806_v24 = vpack.c.bf16 %v12891_v17, %v12890_v21  ;;  %v12922_v34 = vld [vmem:[%s22527_s7 + $0x200] sm:$0xff] }
 0x503   : > { %8137 = vst [vmem:[#allocation4 + $0x15] sm:$0xff] %v8136_v44  ;;  %8141 = vst [vmem:[#allocation4 + $0x1f] sm:$0xff] %v8140_v49  ;;  %v8143_v53 = vadd.f32 %v20112_v22, %v8142_v47  ;;  %v12899_v41 = vld [vmem:[%s22527_s7 + $0x148] sm:$0xff]  ;;  %v12900_v47 = vld [vmem:[%s22527_s7 + $0x150] sm:$0xff] }
 0x504   : > { %8121 = vst [vmem:[#allocation8 + $0x40] sm:$0xff] %v8094_v50  ;;  %v16822_v43 = vpack.c.bf16 %v12899_v41, %v12898_v45  ;;  %v12901_v50 = vld [vmem:[%s22527_s7 + $0x158] sm:$0xff]  ;;  %v12916_v17 = vld [vmem:[%s22527_s7 + $0x1d0] sm:$0xff]  ;;  %v12926_v41 = vld [vmem:[%s22527_s7 + $0x220] sm:$0xff] }
 0x505   : > { %16781 = vmatpush3.bf16.msra.mxu0 %v16778_v33  ;;  %v8144_v54 = vmax.f32 %v8143_v53, 0.0  ;;  %v8194_v14 = vld [vmem:[#allocation4 + $0x31] sm:$0xff]  ;;  %v16826_v52 = vpack.c.bf16 %v12901_v50, %v12900_v47  ;;  %v8445_v53 = vld [vmem:[#allocation4 + $0x2] sm:$0xff] }
 0x506   : > { %16783 = vmatprep.subr.bf16.mxu0 %v16782_v36  ;;  %v8150_v4 = vld [vmem:[#allocation8 + $0x32] sm:$0xff]  ;;  %v12929_v47 = vld [vmem:[%s22527_s7 + $0x238] sm:$0xff] }
 0x507   : > { %8145 = vst [vmem:[#allocation4 + $0x29] sm:$0xff] %v8144_v54  ;;  %v20153_v55 = vadd.f32 %v20112_v22, %v8150_v4  ;;  %v12903_v4 = vld [vmem:[%s22527_s7 + $0x168] sm:$0xff] }
 0x508   : > { %v12987_v40 = vld [vmem:[%s22527_s7 + $0x408] sm:$0xff] }
 0x509   : > { %16785 = vmatpush3.bf16.msra.mxu0 %v16782_v36  ;;  %v8152_v60 = vmax.f32 %v20153_v55, 0.0  ;;  %v9214_v55 = vld [vmem:[#allocation4 + $0x5d] sm:$0xff] }
 0x50a   : > { %16787 = vmatprep.subr.bf16.mxu0 %v16786_v46  ;;  %v8190_v56 = vld [vmem:[#allocation4 + $0x11] sm:$0xff]  ;;  %v8191_v35 = vld [vmem:[#allocation4 + $0x19] sm:$0xff]  ;;  %v8192_v8 = vld [vmem:[#allocation4 + $0x21] sm:$0xff] }
 0x50b   : > { %v8154_v61 = vld [vmem:[#allocation8 + $0x3c] sm:$0xff]  ;;  %v8158_v63 = vld [vmem:[#allocation8 + $0x46] sm:$0xff]  ;;  %8153 = vst [vmem:[#allocation4 + $0x3d] sm:$0xff] %v8152_v60  ;;  %15766 = vmatprep.mubr.f32.mxu0 %v8190_v56  ;;  %v8164_v31 = vld [vmem:[#allocation4 + $0x10] sm:$0xff] }
 0x50c   : > { %v8155_v2 = vadd.f32 %v20112_v22, %v8154_v61  ;;  %v8159_v6 = vadd.f32 %v20112_v22, %v8158_v63  ;;  %15767 = vmatmul.mubr.f32.gmra.mrb[60].mxu0 %v8191_v35  ;;  %v20190_v22 = vld [vmem:[#allocation4] sm:$0xff]  ;;  %v8165_v33 = vld [vmem:[#allocation4 + $0x18] sm:$0xff]  ;;  %v12905_v61 = vld [vmem:[%s22527_s7 + $0x178] sm:$0xff] }
 0x50d   : > { %15769 = vmatprep.mubr.f32.mxu0 %v8192_v8  ;;  %16789 = vmatpush3.bf16.msra.mxu0 %v16786_v46  ;;  %v8166_v42 = vld [vmem:[#allocation4 + $0x20] sm:$0xff]  ;;  %v12902_v46 = vld [vmem:[%s22527_s7 + $0x160] sm:$0xff]  ;;  %v16834_v63 = vpack.c.bf16 %v12905_v61, %v12904_v58  ;;  %v12909_v35 = vld [vmem:[%s22527_s7 + $0x198] sm:$0xff] }
 0x50e   : > { %v8156_v10 = vmax.f32 %v8155_v2, 0.0  ;;  %v8160_v48 = vmax.f32 %v8159_v6, 0.0  ;;  %16791 = vmatprep.subr.bf16.mxu0 %v16790_v0  ;;  %v8167_v39 = vld [vmem:[#allocation4 + $0x28] sm:$0xff]  ;;  %v8168_v49 = vld [vmem:[#allocation4 + $0x30] sm:$0xff]  ;;  %v16830_v57 = vpack.c.bf16 %v12903_v4, %v12902_v46  ;;  %v12908_v6 = vld [vmem:[%s22527_s7 + $0x190] sm:$0xff] }
 0x50f   : > { %v12906_v56 = vld [vmem:[%s22527_s7 + $0x180] sm:$0xff]  ;;  %v16842_v7 = vpack.c.bf16 %v12909_v35, %v12908_v6  ;;  %v8448_v12 = vld [vmem:[#allocation4 + $0x1a] sm:$0xff]  ;;  %v12933_v46 = vld [vmem:[%s22527_s7 + $0x258] sm:$0xff] }
 0x510   : > { %8157 = vst [vmem:[#allocation4 + $0x47] sm:$0xff] %v8156_v10  ;;  %8161 = vst [vmem:[#allocation4 + $0x51] sm:$0xff] %v8160_v48  ;;  %15770 = vmatmul.mubr.f32.gmra.mrb[62].mxu0 %v8144_v54  ;;  %v12910_v8 = vld [vmem:[%s22527_s7 + $0x1a0] sm:$0xff]  ;;  %v12911_v10 = vld [vmem:[%s22527_s7 + $0x1a8] sm:$0xff] }
 0x511   : > { %15772 = vmatprep.mubr.f32.mxu0 %v8194_v14  ;;  %16793 = vmatpush3.bf16.msra.mxu0 %v16790_v0  ;;  %v12907_v0 = vld [vmem:[%s22527_s7 + $0x188] sm:$0xff]  ;;  %v12913_v14 = vld [vmem:[%s22527_s7 + $0x1b8] sm:$0xff]  ;;  %v12934_v58 = vld [vmem:[%s22527_s7 + $0x260] sm:$0xff] }
 0x512   : > { %v8195_v5 = vld [vmem:[#allocation4 + $0x39] sm:$0xff]  ;;  %16795 = vmatprep.subr.bf16.mxu0 %v16794_v11  ;;  %v16838_v2 = vpack.c.bf16 %v12907_v0, %v12906_v56  ;;  %v8450_v15 = vld [vmem:[#allocation4 + $0x2a] sm:$0xff] }
 0x513   : > { %v8169_v36 = vld [vmem:[#allocation4 + $0x38] sm:$0xff]  ;;  %v12936_v56 = vld [vmem:[%s22527_s7 + $0x270] sm:$0xff]  ;;  %v12937_v0 = vld [vmem:[%s22527_s7 + $0x278] sm:$0xff] }
 0x514   : > { %15773 = vmatmul.mubr.f32.gmra.mrb[64].mxu0 %v8195_v5  ;;  %v8447_v48 = vld [vmem:[#allocation4 + $0x12] sm:$0xff]  ;;  %v8449_v5 = vld [vmem:[#allocation4 + $0x22] sm:$0xff]  ;;  %v8452_v21 = vld [vmem:[#allocation4 + $0x3a] sm:$0xff] }
 0x515   : > { %16797 = vmatpush3.bf16.msra.mxu0 %v16794_v11  ;;  %v16846_v11 = vpack.c.bf16 %v12911_v10, %v12910_v8  ;;  %v12935_v61 = vld [vmem:[%s22527_s7 + $0x268] sm:$0xff]  ;;  %v12938_v6 = vld [vmem:[%s22527_s7 + $0x280] sm:$0xff]  ;;  %v12940_v35 = vld [vmem:[%s22527_s7 + $0x290] sm:$0xff] }
 0x516   : > { %16799 = vmatprep.subr.bf16.mxu0 %v16798_v3  ;;  %v8750_v8 = vld [vmem:[#allocation4 + $0x13] sm:$0xff] }
 0x517   : > { %v8196_v18 = vld [vmem:[#allocation4 + $0x41] sm:$0xff]  ;;  %v8197_v19 = vld [vmem:[#allocation4 + $0x49] sm:$0xff] }
 0x518   : > { %15775 = vmatprep.mubr.f32.mxu0 %v8196_v18  ;;  %v8170_v51 = vld [vmem:[#allocation4 + $0x40] sm:$0xff]  ;;  %v8171_v54 = vld [vmem:[#allocation4 + $0x48] sm:$0xff]  ;;  %v12915_v18 = vld [vmem:[%s22527_s7 + $0x1c8] sm:$0xff] }
 0x519   : > { %15776 = vmatmul.mubr.f32.gmra.mrb[66].mxu0 %v8197_v19  ;;  %v8451_v19 = vld [vmem:[#allocation4 + $0x32] sm:$0xff]  ;;  %v8453_v25 = vld [vmem:[#allocation4 + $0x42] sm:$0xff] }
 0x51a   : > { %16801 = vmatpush3.bf16.msra.mxu0 %v16798_v3  ;;  %15810 = vmatprep.mubr.f32.mxu0 %v20190_v22  ;;  %v16850_v3 = vpack.c.bf16 %v12913_v14, %v12912_v13  ;;  %v12942_v10 = vld [vmem:[%s22527_s7 + $0x2a0] sm:$0xff]  ;;  %v8752_v13 = vld [vmem:[#allocation4 + $0x23] sm:$0xff] }
 0x51b   : > { %16803 = vmatprep.subr.bf16.mxu0 %v16802_v20  ;;  %v12944_v14 = vld [vmem:[%s22527_s7 + $0x2b0] sm:$0xff] }
 0x51e   : > { %16805 = vmatpush3.bf16.msra.mxu0 %v16802_v20  ;;  %v16854_v20 = vpack.c.bf16 %v12915_v18, %v12914_v59  ;;  %v12946_v59 = vld [vmem:[%s22527_s7 + $0x2c0] sm:$0xff]  ;;  %v12947_v18 = vld [vmem:[%s22527_s7 + $0x2c8] sm:$0xff] }
 0x51f   : > { %16807 = vmatprep.subr.bf16.mxu0 %v16806_v24 }
 0x521   : > { %15811 = vmatmul.mubr.f32.vlgmr.msra.gmra.mrb[58].mxu0 %v8163_v27  ;;  %v12918_v27 = vld [vmem:[%s22527_s7 + $0x1e0] sm:$0xff] }
 0x522   : > { %15813 = vmatprep.mubr.f32.mxu0 %v8164_v31  ;;  %16809 = vmatpush3.bf16.msra.mxu0 %v16806_v24  ;;  %v12917_v24 = vld [vmem:[%s22527_s7 + $0x1d8] sm:$0xff]  ;;  %v16862_v30 = vpack.c.bf16 %v12919_v29, %v12918_v27  ;;  %v12920_v31 = vld [vmem:[%s22527_s7 + $0x1f0] sm:$0xff]  ;;  %v13036_v29 = vld [vmem:[%s22529_s9 + $0x208] sm:$0xff] }
 0x523   : > { %16811 = vmatprep.subr.bf16.mxu0 %v16810_v16  ;;  %v16858_v26 = vpack.c.bf16 %v12917_v24, %v12916_v17  ;;  %v12948_v17 = vld [vmem:[%s22527_s7 + $0x2d0] sm:$0xff]  ;;  %v12949_v24 = vld [vmem:[%s22527_s7 + $0x2d8] sm:$0xff] }
 0x524   : > { %v16922_v28 = vpack.c.bf16 %v12949_v24, %v12948_v17  ;;  %v8901_v27 = vld [vmem:[#allocation4 + $0xc] sm:$0xff]  ;;  %v12960_v17 = vld [vmem:[%s22527_s7 + $0x330] sm:$0xff] }
 0x525   : > { %15814 = vmatmul.mubr.f32.gmra.mrb[60].mxu0 %v8165_v33  ;;  %v12961_v24 = vld [vmem:[%s22527_s7 + $0x338] sm:$0xff] }
 0x526   : > { %15816 = vmatprep.mubr.f32.mxu0 %v8166_v42  ;;  %16813 = vmatpush3.bf16.msra.mxu0 %v16810_v16  ;;  %v8454_v16 = vld [vmem:[#allocation4 + $0x4a] sm:$0xff]  ;;  %v16870_v42 = vpack.c.bf16 %v12923_v37, %v12922_v34 }
 0x527   : > { %16815 = vmatprep.subr.bf16.mxu0 %v16814_v1 }
 0x529   : > { %15817 = vmatmul.mubr.f32.gmra.mrb[62].mxu0 %v8167_v39  ;;  %v12925_v39 = vld [vmem:[%s22527_s7 + $0x218] sm:$0xff] }
 0x52a   : > { %15819 = vmatprep.mubr.f32.mxu0 %v8168_v49  ;;  %16817 = vmatpush3.bf16.msra.mxu0 %v16814_v1  ;;  %v12921_v1 = vld [vmem:[%s22527_s7 + $0x1f8] sm:$0xff]  ;;  %v12927_v49 = vld [vmem:[%s22527_s7 + $0x228] sm:$0xff] }
 0x52b   : > { %16819 = vmatprep.subr.bf16.mxu0 %v16818_v38  ;;  %v16866_v33 = vpack.c.bf16 %v12921_v1, %v12920_v31  ;;  %v13035_v1 = vld [vmem:[%s22529_s9 + $0x200] sm:$0xff] }
 0x52d   : > { %15820 = vmatmul.mubr.f32.gmra.mrb[64].mxu0 %v8169_v36  ;;  %v12928_v36 = vld [vmem:[%s22527_s7 + $0x230] sm:$0xff] }
 0x52e   : > { %15822 = vmatprep.mubr.f32.mxu0 %v8170_v51  ;;  %16821 = vmatpush3.bf16.msra.mxu0 %v16818_v38  ;;  %v12924_v38 = vld [vmem:[%s22527_s7 + $0x210] sm:$0xff]  ;;  %v16882_v50 = vpack.c.bf16 %v12929_v47, %v12928_v36  ;;  %v12930_v51 = vld [vmem:[%s22527_s7 + $0x240] sm:$0xff]  ;;  %v13044_v47 = vld [vmem:[%s22529_s9 + $0x248] sm:$0xff] }
 0x52f   : > { %16823 = vmatprep.subr.bf16.mxu0 %v16822_v43  ;;  %v16874_v45 = vpack.c.bf16 %v12925_v39, %v12924_v38  ;;  %v12952_v38 = vld [vmem:[%s22527_s7 + $0x2f0] sm:$0xff]  ;;  %v12953_v39 = vld [vmem:[%s22527_s7 + $0x2f8] sm:$0xff] }
 0x531   : > { %15823 = vmatmul.mubr.f32.gmra.mrb[66].mxu0 %v8171_v54  ;;  %v12932_v54 = vld [vmem:[%s22527_s7 + $0x250] sm:$0xff] }
 0x532   : > { %16825 = vmatpush3.bf16.msra.mxu0 %v16822_v43  ;;  %15857 = vmatprep.mubr.f32.mxu0 %v8445_v53  ;;  %v16878_v43 = vpack.c.bf16 %v12927_v49, %v12926_v41  ;;  %v16890_v4 = vpack.c.bf16 %v12933_v46, %v12932_v54  ;;  %v13039_v49 = vld [vmem:[%s22529_s9 + $0x220] sm:$0xff]  ;;  %v12955_v46 = vld [vmem:[%s22527_s7 + $0x308] sm:$0xff] }
 0x533   : > { %16827 = vmatprep.subr.bf16.mxu0 %v16826_v52  ;;  %v12954_v54 = vld [vmem:[%s22527_s7 + $0x300] sm:$0xff] }
 0x536   : > { %16829 = vmatpush3.bf16.msra.mxu0 %v16826_v52  ;;  %v12931_v52 = vld [vmem:[%s22527_s7 + $0x248] sm:$0xff] }
 0x537   : > { %16831 = vmatprep.subr.bf16.mxu0 %v16830_v57  ;;  %v16886_v53 = vpack.c.bf16 %v12931_v52, %v12930_v51  ;;  %v16930_v51 = vpack.c.bf16 %v12953_v39, %v12952_v38  ;;  %v12966_v38 = vld [vmem:[%s22527_s7 + $0x360] sm:$0xff]  ;;  %v12967_v39 = vld [vmem:[%s22527_s7 + $0x368] sm:$0xff] }
 0x53a   : > { %16833 = vmatpush3.bf16.msra.mxu0 %v16830_v57  ;;  %v8606_v57 = vld [vmem:[#allocation4 + $0x52] sm:$0xff] }
 0x53b   : > { %16835 = vmatprep.subr.bf16.mxu0 %v16834_v63 }
 0x53e   : > { %16837 = vmatpush3.bf16.msra.mxu0 %v16834_v63  ;;  %v16894_v63 = vpack.c.bf16 %v12935_v61, %v12934_v58  ;;  %v13048_v58 = vld [vmem:[%s22529_s9 + $0x268] sm:$0xff]  ;;  %v13050_v61 = vld [vmem:[%s22529_s9 + $0x278] sm:$0xff] }
 0x53f   : > { %16839 = vmatprep.subr.bf16.mxu0 %v16838_v2 }
 0x541   : > { %15858 = vmatmul.mubr.f32.vlgmr.msra.gmra.mrb[58].mxu0 %v8446_v9 }
 0x542   : > { %15860 = vmatprep.mubr.f32.mxu0 %v8447_v48  ;;  %16841 = vmatpush3.bf16.msra.mxu0 %v16838_v2  ;;  %v16898_v2 = vpack.c.bf16 %v12937_v0, %v12936_v56  ;;  %v13047_v56 = vld [vmem:[%s22529_s9 + $0x260] sm:$0xff]  ;;  %v13049_v0 = vld [vmem:[%s22529_s9 + $0x270] sm:$0xff] }
 0x543   : > { %16843 = vmatprep.subr.bf16.mxu0 %v16842_v7 }
 0x545   : > { %15861 = vmatmul.mubr.f32.gmra.mrb[60].mxu0 %v8448_v12 }
 0x546   : > { %15863 = vmatprep.mubr.f32.mxu0 %v8449_v5  ;;  %16845 = vmatpush3.bf16.msra.mxu0 %v16842_v7  ;;  %v12941_v7 = vld [vmem:[%s22527_s7 + $0x298] sm:$0xff] }
 0x547   : > { %16847 = vmatprep.subr.bf16.mxu0 %v16846_v11 }
 0x549   : > { %15864 = vmatmul.mubr.f32.gmra.mrb[62].mxu0 %v8450_v15 }
 0x54a   : > { %15866 = vmatprep.mubr.f32.mxu0 %v8451_v19  ;;  %16849 = vmatpush3.bf16.msra.mxu0 %v16846_v11  ;;  %v8751_v11 = vld [vmem:[#allocation4 + $0x1b] sm:$0xff] }
 0x54b   : > { %16851 = vmatprep.subr.bf16.mxu0 %v16850_v3 }
 0x54d   : > { %15867 = vmatmul.mubr.f32.gmra.mrb[64].mxu0 %v8452_v21 }
 0x54e   : > { %15869 = vmatprep.mubr.f32.mxu0 %v8453_v25  ;;  %16853 = vmatpush3.bf16.msra.mxu0 %v16850_v3  ;;  %v8753_v3 = vld [vmem:[#allocation4 + $0x2b] sm:$0xff] }
 0x54f   : > { %16855 = vmatprep.subr.bf16.mxu0 %v16854_v20 }
 0x551   : > { %15870 = vmatmul.mubr.f32.gmra.mrb[66].mxu0 %v8454_v16 }
 0x552   : > { %16857 = vmatpush3.bf16.msra.mxu0 %v16854_v20  ;;  %15904 = vmatprep.mubr.f32.mxu0 %v8446_v9  ;;  %v16906_v9 = vpack.c.bf16 %v12941_v7, %v12940_v35  ;;  %v16918_v20 = vpack.c.bf16 %v12947_v18, %v12946_v59  ;;  %v13054_v35 = vld [vmem:[%s22529_s9 + $0x298] sm:$0xff]  ;;  %v17108_v7 = vpack.c.bf16 %v13049_v0, %v13047_v56  ;;  %v13055_v59 = vld [vmem:[%s22529_s9 + $0x2a0] sm:$0xff]  ;;  %v13057_v18 = vld [vmem:[%s22529_s9 + $0x2b0] sm:$0xff] }
 0x553   : > { %16859 = vmatprep.subr.bf16.mxu0 %v16858_v26  ;;  %v12979_v56 = vld [vmem:[%s22527_s7 + $0x3c8] sm:$0xff] }
 0x556   : > { %16861 = vmatpush3.bf16.msra.mxu0 %v16858_v26  ;;  %v12950_v26 = vld [vmem:[%s22527_s7 + $0x2e0] sm:$0xff] }
 0x557   : > { %16863 = vmatprep.subr.bf16.mxu0 %v16862_v30 }
 0x55a   : > { %16865 = vmatpush3.bf16.msra.mxu0 %v16862_v30  ;;  %v13038_v30 = vld [vmem:[%s22529_s9 + $0x218] sm:$0xff] }
 0x55b   : > { %16867 = vmatprep.subr.bf16.mxu0 %v16866_v33  ;;  %v17094_v31 = vpack.c.bf16 %v13038_v30, %v13036_v29  ;;  %v8907_v29 = vld [vmem:[#allocation4 + $0x3c] sm:$0xff] }
 0x55d   : > { %17095 = vmatprep.subr.bf16.mxu1 %v17094_v31  ;;  %v8908_v31 = vld [vmem:[#allocation4 + $0x44] sm:$0xff] }
 0x55e   : > { %16869 = vmatpush3.bf16.msra.mxu0 %v16866_v33  ;;  %v13037_v33 = vld [vmem:[%s22529_s9 + $0x210] sm:$0xff] }
 0x55f   : > { %16871 = vmatprep.subr.bf16.mxu0 %v16870_v42  ;;  %v17096_v37 = vpack.c.bf16 %v13037_v33, %v13035_v1  ;;  %v12964_v1 = vld [vmem:[%s22527_s7 + $0x350] sm:$0xff]  ;;  %v12965_v33 = vld [vmem:[%s22527_s7 + $0x358] sm:$0xff] }
 0x561   : > { %15905 = vmatmul.mubr.f32.vlgmr.msra.gmra.mrb[58].mxu0 %v8447_v48  ;;  %v12943_v48 = vld [vmem:[%s22527_s7 + $0x2a8] sm:$0xff]  ;;  %17097 = vmatpush1.bf16.msra.mxu1 %v17096_v37  ;;  %v16954_v37 = vpack.c.bf16 %v12965_v33, %v12964_v1 }
 0x562   : > { %15907 = vmatprep.mubr.f32.mxu0 %v8448_v12  ;;  %16873 = vmatpush3.bf16.msra.mxu0 %v16870_v42  ;;  %v16910_v12 = vpack.c.bf16 %v12943_v48, %v12942_v10  ;;  %v13040_v42 = vld [vmem:[%s22529_s9 + $0x228] sm:$0xff] }
 0x563   : > { %16875 = vmatprep.subr.bf16.mxu0 %v16874_v45  ;;  %v8902_v10 = vld [vmem:[#allocation4 + $0x14] sm:$0xff] }
 0x564   : > { %v12999_v1 = vld [vmem:[%s22527_s7 + $0x468] sm:$0xff] }
 0x565   : > { %15908 = vmatmul.mubr.f32.gmra.mrb[60].mxu0 %v8449_v5  ;;  %v12945_v5 = vld [vmem:[%s22527_s7 + $0x2b8] sm:$0xff]  ;;  %v9357_v33 = vld [vmem:[#allocation4 + $0x16] sm:$0xff] }
 0x566   : > { %15910 = vmatprep.mubr.f32.mxu0 %v8450_v15  ;;  %16877 = vmatpush3.bf16.msra.mxu0 %v16874_v45  ;;  %v16914_v15 = vpack.c.bf16 %v12945_v5, %v12944_v14  ;;  %v13042_v45 = vld [vmem:[%s22529_s9 + $0x238] sm:$0xff]  ;;  %v13056_v14 = vld [vmem:[%s22529_s9 + $0x2a8] sm:$0xff] }
 0x567   : > { %16879 = vmatprep.subr.bf16.mxu0 %v16878_v43  ;;  %v17098_v41 = vpack.c.bf16 %v13042_v45, %v13040_v42  ;;  %v13058_v5 = vld [vmem:[%s22529_s9 + $0x2b8] sm:$0xff]  ;;  %v8910_v42 = vld [vmem:[#allocation4 + $0x54] sm:$0xff]  ;;  %v16958_v45 = vpack.c.bf16 %v12967_v39, %v12966_v38 }
 0x568   : > { %v13004_v39 = vld [vmem:[%s22529_s9 + $0x108] sm:$0xff] }
 0x569   : > { %15911 = vmatmul.mubr.f32.gmra.mrb[62].mxu0 %v8451_v19  ;;  %v8755_v19 = vld [vmem:[#allocation4 + $0x3b] sm:$0xff]  ;;  %17099 = vmatprep.subr.bf16.mxu1 %v17098_v41 }
 0x56a   : > { %15913 = vmatprep.mubr.f32.mxu0 %v8452_v21  ;;  %16881 = vmatpush3.bf16.msra.mxu0 %v16878_v43  ;;  %v8756_v21 = vld [vmem:[#allocation4 + $0x43] sm:$0xff] }
 0x56b   : > { %16883 = vmatprep.subr.bf16.mxu0 %v16882_v50  ;;  %v13041_v43 = vld [vmem:[%s22529_s9 + $0x230] sm:$0xff] }
 0x56c   : > { %v17100_v36 = vpack.c.bf16 %v13041_v43, %v13039_v49  ;;  %v12968_v41 = vld [vmem:[%s22527_s7 + $0x370] sm:$0xff]  ;;  %v12969_v49 = vld [vmem:[%s22527_s7 + $0x378] sm:$0xff] }
 0x56d   : > { %15914 = vmatmul.mubr.f32.gmra.mrb[64].mxu0 %v8453_v25  ;;  %v8757_v25 = vld [vmem:[#allocation4 + $0x4b] sm:$0xff]  ;;  %v16962_v43 = vpack.c.bf16 %v12969_v49, %v12968_v41 }
 0x56e   : > { %15916 = vmatprep.mubr.f32.mxu0 %v8454_v16  ;;  %16885 = vmatpush3.bf16.msra.mxu0 %v16882_v50  ;;  %v12951_v16 = vld [vmem:[%s22527_s7 + $0x2e8] sm:$0xff]  ;;  %v13046_v50 = vld [vmem:[%s22529_s9 + $0x258] sm:$0xff]  ;;  %v13003_v49 = vld [vmem:[%s22529_s9 + $0x100] sm:$0xff] }
 0x56f   : > { %16887 = vmatprep.subr.bf16.mxu0 %v16886_v53  ;;  %v16926_v34 = vpack.c.bf16 %v12951_v16, %v12950_v26  ;;  %v17102_v52 = vpack.c.bf16 %v13046_v50, %v13044_v47  ;;  %17101 = vmatpush1.bf16.msra.mxu1 %v17100_v36  ;;  %v8906_v26 = vld [vmem:[#allocation4 + $0x34] sm:$0xff] }
 0x570   : > { %v12962_v16 = vld [vmem:[%s22527_s7 + $0x340] sm:$0xff]  ;;  %v12971_v47 = vld [vmem:[%s22527_s7 + $0x388] sm:$0xff] }
 0x571   : > { %15917 = vmatmul.mubr.f32.gmra.mrb[66].mxu0 %v8606_v57  ;;  %17103 = vmatprep.subr.bf16.mxu1 %v17102_v52  ;;  %v12970_v36 = vld [vmem:[%s22527_s7 + $0x380] sm:$0xff]  ;;  %v12973_v52 = vld [vmem:[%s22527_s7 + $0x398] sm:$0xff] }
 0x572   : > { %16889 = vmatpush3.bf16.msra.mxu0 %v16886_v53  ;;  %15951 = vmatprep.mubr.f32.mxu0 %v8132_v62  ;;  %v16902_v62 = vpack.c.bf16 %v12939_v23, %v12938_v6  ;;  %v13043_v53 = vld [vmem:[%s22529_s9 + $0x240] sm:$0xff]  ;;  %v12956_v6 = vld [vmem:[%s22527_s7 + $0x310] sm:$0xff]  ;;  %v12957_v23 = vld [vmem:[%s22527_s7 + $0x318] sm:$0xff]  ;;  %v16966_v50 = vpack.c.bf16 %v12971_v47, %v12970_v36 }
 0x573   : > { %16891 = vmatprep.subr.bf16.mxu0 %v16890_v4  ;;  %v16938_v48 = vpack.c.bf16 %v12957_v23, %v12956_v6  ;;  %v12981_v6 = vld [vmem:[%s22527_s7 + $0x3d8] sm:$0xff]  ;;  %v9062_v23 = vld [vmem:[#allocation4 + $0x5c] sm:$0xff] }
 0x574   : > { %v13008_v36 = vld [vmem:[%s22529_s9 + $0x128] sm:$0xff]  ;;  %v13010_v47 = vld [vmem:[%s22529_s9 + $0x138] sm:$0xff] }
 0x576   : > { %16893 = vmatpush3.bf16.msra.mxu0 %v16890_v4  ;;  %v13045_v4 = vld [vmem:[%s22529_s9 + $0x250] sm:$0xff] }
 0x577   : > { %16895 = vmatprep.subr.bf16.mxu0 %v16894_v63  ;;  %v17104_v57 = vpack.c.bf16 %v13045_v4, %v13043_v53 }
 0x579   : > { %17105 = vmatpush1.bf16.msra.mxu1 %v17104_v57  ;;  %v12976_v57 = vld [vmem:[%s22527_s7 + $0x3b0] sm:$0xff] }
 0x57a   : > { %16897 = vmatpush3.bf16.msra.mxu0 %v16894_v63  ;;  %v17106_v63 = vpack.c.bf16 %v13050_v61, %v13048_v58  ;;  %v12977_v58 = vld [vmem:[%s22527_s7 + $0x3b8] sm:$0xff] }
 0x57b   : > { %16899 = vmatprep.subr.bf16.mxu0 %v16898_v2  ;;  %v16978_v61 = vpack.c.bf16 %v12977_v58, %v12976_v57  ;;  %v9359_v57 = vld [vmem:[#allocation4 + $0x26] sm:$0xff] }
 0x57c   : > { %17107 = vmatprep.subr.bf16.mxu1 %v17106_v63  ;;  %v12978_v63 = vld [vmem:[%s22527_s7 + $0x3c0] sm:$0xff] }
 0x57d   : > { %17109 = vmatpush1.bf16.msra.mxu1 %v17108_v7  ;;  %v16982_v0 = vpack.c.bf16 %v12979_v56, %v12978_v63  ;;  %v12983_v7 = vld [vmem:[%s22527_s7 + $0x3e8] sm:$0xff]  ;;  %v13011_v63 = vld [vmem:[%s22529_s9 + $0x140] sm:$0xff]  ;;  %v13013_v56 = vld [vmem:[%s22529_s9 + $0x150] sm:$0xff] }
 0x57e   : > { %16901 = vmatpush3.bf16.msra.mxu0 %v16898_v2  ;;  %v16934_v2 = vpack.c.bf16 %v12955_v46, %v12954_v54  ;;  %v12974_v54 = vld [vmem:[%s22527_s7 + $0x3a0] sm:$0xff]  ;;  %v12975_v46 = vld [vmem:[%s22527_s7 + $0x3a8] sm:$0xff] }
 0x57f   : > { %16903 = vmatprep.subr.bf16.mxu0 %v16902_v62  ;;  %v16974_v4 = vpack.c.bf16 %v12975_v46, %v12974_v54  ;;  %v9358_v54 = vld [vmem:[#allocation4 + $0x1e] sm:$0xff] }
 0x580   : > { %v13012_v46 = vld [vmem:[%s22529_s9 + $0x148] sm:$0xff] }
 0x581   : > { %15952 = vmatmul.mubr.f32.vlgmr.msra.gmra.mrb[58].mxu0 %v8750_v8  ;;  %v13053_v8 = vld [vmem:[%s22529_s9 + $0x290] sm:$0xff] }
 0x582   : > { %15954 = vmatprep.mubr.f32.mxu0 %v8751_v11  ;;  %16905 = vmatpush3.bf16.msra.mxu0 %v16902_v62  ;;  %v13052_v62 = vld [vmem:[%s22529_s9 + $0x288] sm:$0xff]  ;;  %v12958_v11 = vld [vmem:[%s22527_s7 + $0x320] sm:$0xff] }
 0x583   : > { %16907 = vmatprep.subr.bf16.mxu0 %v16906_v9 }
 0x585   : > { %15955 = vmatmul.mubr.f32.gmra.mrb[60].mxu0 %v8752_v13  ;;  %v12959_v13 = vld [vmem:[%s22527_s7 + $0x328] sm:$0xff] }
 0x586   : > { %15957 = vmatprep.mubr.f32.mxu0 %v8753_v3  ;;  %16909 = vmatpush3.bf16.msra.mxu0 %v16906_v9  ;;  %v13051_v9 = vld [vmem:[%s22529_s9 + $0x280] sm:$0xff]  ;;  %v20467_v3 = vld [vmem:[#allocation4 + $0x1c] sm:$0xff] }
 0x587   : > { %16911 = vmatprep.subr.bf16.mxu0 %v16910_v12 }
 0x589   : > { %15958 = vmatmul.mubr.f32.gmra.mrb[62].mxu0 %v8148_v32  ;;  %v8758_v32 = vld [vmem:[#allocation4 + $0x53] sm:$0xff] }
 0x58a   : > { %15960 = vmatprep.mubr.f32.mxu0 %v8755_v19  ;;  %16913 = vmatpush3.bf16.msra.mxu0 %v16910_v12  ;;  %v17110_v12 = vpack.c.bf16 %v13054_v35, %v13052_v62  ;;  %v16942_v19 = vpack.c.bf16 %v12959_v13, %v12958_v11  ;;  %v12982_v35 = vld [vmem:[%s22527_s7 + $0x3e0] sm:$0xff]  ;;  %v12989_v13 = vld [vmem:[%s22527_s7 + $0x418] sm:$0xff] }
 0x58b   : > { %16915 = vmatprep.subr.bf16.mxu0 %v16914_v15  ;;  %v12986_v11 = vld [vmem:[%s22527_s7 + $0x400] sm:$0xff] }
 0x58c   : > { %17111 = vmatprep.subr.bf16.mxu1 %v17110_v12  ;;  %v12988_v12 = vld [vmem:[%s22527_s7 + $0x410] sm:$0xff] }
 0x58d   : > { %15961 = vmatmul.mubr.f32.gmra.mrb[64].mxu0 %v8756_v21  ;;  %v8904_v21 = vld [vmem:[#allocation4 + $0x24] sm:$0xff] }
 0x58e   : > { %15963 = vmatprep.mubr.f32.mxu0 %v8757_v25  ;;  %16917 = vmatpush3.bf16.msra.mxu0 %v16914_v15  ;;  %v17112_v15 = vpack.c.bf16 %v13053_v8, %v13051_v9  ;;  %v8905_v25 = vld [vmem:[#allocation4 + $0x2c] sm:$0xff]  ;;  %v16990_v9 = vpack.c.bf16 %v12983_v7, %v12982_v35  ;;  %v12984_v8 = vld [vmem:[%s22527_s7 + $0x3f0] sm:$0xff] }
 0x58f   : > { %16919 = vmatprep.subr.bf16.mxu0 %v16918_v20  ;;  %v13015_v7 = vld [vmem:[%s22529_s9 + $0x160] sm:$0xff] }
 0x590   : > { %17113 = vmatpush1.bf16.msra.mxu1 %v17112_v15  ;;  %v12991_v15 = vld [vmem:[%s22527_s7 + $0x428] sm:$0xff] }
 0x591   : > { %15964 = vmatmul.mubr.f32.gmra.mrb[66].mxu0 %v8758_v32  ;;  %v16946_v32 = vpack.c.bf16 %v12961_v24, %v12960_v17  ;;  %v9209_v17 = vld [vmem:[#allocation4 + $0x35] sm:$0xff] }
 0x592   : > { %16921 = vmatpush3.bf16.msra.mxu0 %v16918_v20  ;;  %15998 = vmatprep.mubr.f32.mxu0 %v8901_v27  ;;  %v17114_v20 = vpack.c.bf16 %v13058_v5, %v13056_v14  ;;  %v12963_v27 = vld [vmem:[%s22527_s7 + $0x348] sm:$0xff]  ;;  %v17002_v14 = vpack.c.bf16 %v12989_v13, %v12988_v12  ;;  %v13019_v12 = vld [vmem:[%s22529_s9 + $0x180] sm:$0xff]  ;;  %v13021_v13 = vld [vmem:[%s22529_s9 + $0x190] sm:$0xff] }
 0x593   : > { %16923 = vmatprep.subr.bf16.mxu0 %v16922_v28  ;;  %v16950_v30 = vpack.c.bf16 %v12963_v27, %v12962_v16  ;;  %v9206_v5 = vld [vmem:[#allocation4 + $0x1d] sm:$0xff]  ;;  %v9212_v16 = vld [vmem:[#allocation4 + $0x4d] sm:$0xff] }
 0x594   : > { %17115 = vmatprep.subr.bf16.mxu1 %v17114_v20  ;;  %v12992_v20 = vld [vmem:[%s22527_s7 + $0x430] sm:$0xff] }
 0x595   : > { %v12996_v27 = vld [vmem:[%s22527_s7 + $0x450] sm:$0xff] }
 0x596   : > { %16925 = vmatpush3.bf16.msra.mxu0 %v16922_v28  ;;  %v17116_v28 = vpack.c.bf16 %v13057_v18, %v13055_v59  ;;  %v9207_v59 = vld [vmem:[#allocation4 + $0x25] sm:$0xff] }
 0x597   : > { %16927 = vmatprep.subr.bf16.mxu0 %v16926_v34 }
 0x598   : > { %17117 = vmatpush1.bf16.msra.mxu1 %v17116_v28  ;;  %v12995_v28 = vld [vmem:[%s22527_s7 + $0x448] sm:$0xff] }
 0x59a   : > { %16929 = vmatpush3.bf16.msra.mxu0 %v16926_v34  ;;  %v8909_v34 = vld [vmem:[#allocation4 + $0x4c] sm:$0xff] }
 0x59b   : > { %16931 = vmatprep.subr.bf16.mxu0 %v16930_v51 }
 0x59e   : > { %16933 = vmatpush3.bf16.msra.mxu0 %v16930_v51  ;;  %v12972_v51 = vld [vmem:[%s22527_s7 + $0x390] sm:$0xff] }
 0x59f   : > { %16935 = vmatprep.subr.bf16.mxu0 %v16934_v2  ;;  %v16970_v53 = vpack.c.bf16 %v12973_v52, %v12972_v51  ;;  %v17034_v51 = vpack.c.bf16 %v13010_v47, %v13008_v36  ;;  %v13007_v52 = vld [vmem:[%s22529_s9 + $0x120] sm:$0xff]  ;;  %v13068_v36 = vld [vmem:[%s22529_s9 + $0x308] sm:$0xff]  ;;  %v13070_v47 = vld [vmem:[%s22529_s9 + $0x318] sm:$0xff] }
 0x5a1   : > { %15999 = vmatmul.mubr.f32.vlgmr.msra.gmra.mrb[58].mxu0 %v8902_v10 }
 0x5a2   : > { %16001 = vmatprep.mubr.f32.mxu0 %v20467_v3  ;;  %16937 = vmatpush3.bf16.msra.mxu0 %v16934_v2  ;;  %v12980_v2 = vld [vmem:[%s22527_s7 + $0x3d0] sm:$0xff] }
 0x5a3   : > { %16939 = vmatprep.subr.bf16.mxu0 %v16938_v48  ;;  %v16986_v62 = vpack.c.bf16 %v12981_v6, %v12980_v2  ;;  %v13016_v2 = vld [vmem:[%s22529_s9 + $0x168] sm:$0xff]  ;;  %v13018_v6 = vld [vmem:[%s22529_s9 + $0x178] sm:$0xff] }
 0x5a4   : > { %v17042_v35 = vpack.c.bf16 %v13018_v6, %v13016_v2  ;;  %v13072_v2 = vld [vmem:[%s22529_s9 + $0x328] sm:$0xff]  ;;  %v13074_v6 = vld [vmem:[%s22529_s9 + $0x338] sm:$0xff] }
 0x5a5   : > { %16002 = vmatmul.mubr.f32.gmra.mrb[60].mxu0 %v8904_v21 }
 0x5a6   : > { %16004 = vmatprep.mubr.f32.mxu0 %v8905_v25  ;;  %16941 = vmatpush3.bf16.msra.mxu0 %v16938_v48 }
 0x5a7   : > { %16943 = vmatprep.subr.bf16.mxu0 %v16942_v19 }
 0x5a9   : > { %16005 = vmatmul.mubr.f32.gmra.mrb[62].mxu0 %v8906_v26 }
 0x5aa   : > { %16007 = vmatprep.mubr.f32.mxu0 %v8907_v29  ;;  %16945 = vmatpush3.bf16.msra.mxu0 %v16942_v19  ;;  %v9208_v19 = vld [vmem:[#allocation4 + $0x2d] sm:$0xff] }
 0x5ab   : > { %16947 = vmatprep.subr.bf16.mxu0 %v16946_v32 }
 0x5ad   : > { %16008 = vmatmul.mubr.f32.gmra.mrb[64].mxu0 %v8908_v31 }
 0x5ae   : > { %16010 = vmatprep.mubr.f32.mxu0 %v8909_v34  ;;  %16949 = vmatpush3.bf16.msra.mxu0 %v16946_v32  ;;  %v9211_v32 = vld [vmem:[#allocation4 + $0x45] sm:$0xff] }
 0x5af   : > { %16951 = vmatprep.subr.bf16.mxu0 %v16950_v30 }
 0x5b1   : > { %16011 = vmatmul.mubr.f32.gmra.mrb[66].mxu0 %v8910_v42 }
 0x5b2   : > { %16953 = vmatpush3.bf16.msra.mxu0 %v16950_v30  ;;  %16045 = vmatprep.mubr.f32.mxu0 %v8902_v10  ;;  %v12985_v10 = vld [vmem:[%s22527_s7 + $0x3f8] sm:$0xff]  ;;  %v9213_v30 = vld [vmem:[#allocation4 + $0x55] sm:$0xff] }
 0x5b3   : > { %16955 = vmatprep.subr.bf16.mxu0 %v16954_v37  ;;  %v16994_v48 = vpack.c.bf16 %v12985_v10, %v12984_v8  ;;  %v9362_v8 = vld [vmem:[#allocation4 + $0x3e] sm:$0xff] }
 0x5b4   : > { %v13020_v10 = vld [vmem:[%s22529_s9 + $0x188] sm:$0xff] }
 0x5b6   : > { %16957 = vmatpush3.bf16.msra.mxu0 %v16954_v37  ;;  %v13000_v37 = vld [vmem:[%s22527_s7 + $0x470] sm:$0xff] }
 0x5b7   : > { %16959 = vmatprep.subr.bf16.mxu0 %v16958_v45 }
 0x5ba   : > { %16961 = vmatpush3.bf16.msra.mxu0 %v16958_v45  ;;  %v13006_v45 = vld [vmem:[%s22529_s9 + $0x118] sm:$0xff] }
 0x5bb   : > { %16963 = vmatprep.subr.bf16.mxu0 %v16962_v43  ;;  %v17030_v41 = vpack.c.bf16 %v13006_v45, %v13004_v39 }
 0x5be   : > { %16965 = vmatpush3.bf16.msra.mxu0 %v16962_v43  ;;  %v13005_v43 = vld [vmem:[%s22529_s9 + $0x110] sm:$0xff] }
 0x5bf   : > { %16967 = vmatprep.subr.bf16.mxu0 %v16966_v50 }
 0x5c1   : > { %16046 = vmatmul.mubr.f32.vlgmr.msra.gmra.mrb[58].mxu0 %v20467_v3  ;;  %v12990_v3 = vld [vmem:[%s22527_s7 + $0x420] sm:$0xff] }
 0x5c2   : > { %16048 = vmatprep.mubr.f32.mxu0 %v8904_v21  ;;  %16969 = vmatpush3.bf16.msra.mxu0 %v16966_v50  ;;  %v17006_v18 = vpack.c.bf16 %v12991_v15, %v12990_v3  ;;  %v12993_v21 = vld [vmem:[%s22527_s7 + $0x438] sm:$0xff]  ;;  %v17032_v50 = vpack.c.bf16 %v13005_v43, %v13003_v49  ;;  %v9365_v15 = vld [vmem:[#allocation4 + $0x56] sm:$0xff]  ;;  %v13033_v49 = vld [vmem:[%s22529_s9 + $0x1f0] sm:$0xff] }
 0x5c3   : > { %16971 = vmatprep.subr.bf16.mxu0 %v16970_v53  ;;  %v17010_v24 = vpack.c.bf16 %v12993_v21, %v12992_v20  ;;  %v13026_v3 = vld [vmem:[%s22529_s9 + $0x1b8] sm:$0xff]  ;;  %v13023_v20 = vld [vmem:[%s22529_s9 + $0x1a0] sm:$0xff]  ;;  %v13025_v21 = vld [vmem:[%s22529_s9 + $0x1b0] sm:$0xff] }
 0x5c5   : > { %16049 = vmatmul.mubr.f32.gmra.mrb[60].mxu0 %v8905_v25  ;;  %v12994_v25 = vld [vmem:[%s22527_s7 + $0x440] sm:$0xff] }
 0x5c6   : > { %16051 = vmatprep.mubr.f32.mxu0 %v8906_v26  ;;  %16973 = vmatpush3.bf16.msra.mxu0 %v16970_v53  ;;  %v17014_v26 = vpack.c.bf16 %v12995_v28, %v12994_v25  ;;  %v13009_v53 = vld [vmem:[%s22529_s9 + $0x130] sm:$0xff]  ;;  %v13062_v25 = vld [vmem:[%s22529_s9 + $0x2d8] sm:$0xff]  ;;  %v13028_v28 = vld [vmem:[%s22529_s9 + $0x1c8] sm:$0xff] }
 0x5c7   : > { %16975 = vmatprep.subr.bf16.mxu0 %v16974_v4  ;;  %v17036_v58 = vpack.c.bf16 %v13009_v53, %v13007_v52  ;;  %v9588_v52 = vld [vmem:[%s22529_s9 + $0x18] sm:$0xff] }
 0x5c8   : > { %v9832_v53 = vld [vmem:[#allocation5 + $0x2] sm:$0xff] }
 0x5c9   : > { %16052 = vmatmul.mubr.f32.gmra.mrb[62].mxu0 %v8907_v29  ;;  %v12997_v29 = vld [vmem:[%s22527_s7 + $0x458] sm:$0xff] }
 0x5ca   : > { %16054 = vmatprep.mubr.f32.mxu0 %v8908_v31  ;;  %16977 = vmatpush3.bf16.msra.mxu0 %v16974_v4  ;;  %v12998_v31 = vld [vmem:[%s22527_s7 + $0x460] sm:$0xff]  ;;  %v13014_v4 = vld [vmem:[%s22529_s9 + $0x158] sm:$0xff] }
 0x5cb   : > { %16979 = vmatprep.subr.bf16.mxu0 %v16978_v61 }
 0x5cd   : > { %16055 = vmatmul.mubr.f32.gmra.mrb[64].mxu0 %v8909_v34  ;;  %v17022_v34 = vpack.c.bf16 %v12999_v1, %v12998_v31  ;;  %v13064_v31 = vld [vmem:[%s22529_s9 + $0x2e8] sm:$0xff]  ;;  %v13066_v1 = vld [vmem:[%s22529_s9 + $0x2f8] sm:$0xff] }
 0x5ce   : > { %16057 = vmatprep.mubr.f32.mxu0 %v8910_v42  ;;  %16981 = vmatpush3.bf16.msra.mxu0 %v16978_v61  ;;  %v13001_v42 = vld [vmem:[%s22527_s7 + $0x478] sm:$0xff]  ;;  %v17038_v61 = vpack.c.bf16 %v13014_v4, %v13012_v46  ;;  %v13069_v4 = vld [vmem:[%s22529_s9 + $0x310] sm:$0xff] }
 0x5cf   : > { %16983 = vmatprep.subr.bf16.mxu0 %v16982_v0  ;;  %v17026_v38 = vpack.c.bf16 %v13001_v42, %v13000_v37  ;;  %v13034_v37 = vld [vmem:[%s22529_s9 + $0x1f8] sm:$0xff]  ;;  %v13063_v42 = vld [vmem:[%s22529_s9 + $0x2e0] sm:$0xff] }
 0x5d1   : > { %16058 = vmatmul.mubr.f32.gmra.mrb[66].mxu0 %v9062_v23  ;;  %v9361_v23 = vld [vmem:[#allocation4 + $0x36] sm:$0xff] }
 0x5d2   : > { %16985 = vmatpush3.bf16.msra.mxu0 %v16982_v0  ;;  %16092 = vmatprep.mubr.f32.mxu0 %v8136_v44  ;;  %v16998_v44 = vpack.c.bf16 %v12987_v40, %v12986_v11  ;;  %v9360_v0 = vld [vmem:[#allocation4 + $0x2e] sm:$0xff]  ;;  %v9363_v11 = vld [vmem:[#allocation4 + $0x46] sm:$0xff] }
 0x5d3   : > { %16987 = vmatprep.subr.bf16.mxu0 %v16986_v62 }
 0x5d6   : > { %16989 = vmatpush3.bf16.msra.mxu0 %v16986_v62  ;;  %v17040_v62 = vpack.c.bf16 %v13013_v56, %v13011_v63  ;;  %v9587_v63 = vld [vmem:[%s22529_s9 + $0x10] sm:$0xff] }
 0x5d7   : > { %16991 = vmatprep.subr.bf16.mxu0 %v16990_v9 }
 0x5da   : > { %16993 = vmatpush3.bf16.msra.mxu0 %v16990_v9  ;;  %v13017_v9 = vld [vmem:[%s22529_s9 + $0x170] sm:$0xff] }
 0x5db   : > { %16995 = vmatprep.subr.bf16.mxu0 %v16994_v48  ;;  %v17044_v40 = vpack.c.bf16 %v13017_v9, %v13015_v7  ;;  %v13071_v7 = vld [vmem:[%s22529_s9 + $0x320] sm:$0xff]  ;;  %v13073_v9 = vld [vmem:[%s22529_s9 + $0x330] sm:$0xff] }
 0x5de   : > { %16997 = vmatpush3.bf16.msra.mxu0 %v16994_v48  ;;  %v13022_v48 = vld [vmem:[%s22529_s9 + $0x198] sm:$0xff] }
 0x5df   : > { %16999 = vmatprep.subr.bf16.mxu0 %v16998_v44 }
 0x5e1   : > { %16093 = vmatmul.mubr.f32.vlgmr.msra.gmra.mrb[58].mxu0 %v9206_v5  ;;  %v13024_v5 = vld [vmem:[%s22529_s9 + $0x1a8] sm:$0xff] }
 0x5e2   : > { %16095 = vmatprep.mubr.f32.mxu0 %v9207_v59  ;;  %17001 = vmatpush3.bf16.msra.mxu0 %v16998_v44  ;;  %v17046_v44 = vpack.c.bf16 %v13022_v48, %v13020_v10  ;;  %v9366_v59 = vld [vmem:[#allocation4 + $0x5e] sm:$0xff]  ;;  %v17132_v10 = vpack.c.bf16 %v13073_v9, %v13071_v7  ;;  %v9589_v48 = vld [vmem:[%s22529_s9 + $0x20] sm:$0xff] }
 0x5e3   : > { %17003 = vmatprep.subr.bf16.mxu0 %v17002_v14  ;;  %v9611_v9 = vld [vmem:[%s22529_s9 + $0xd0] sm:$0xff] }
 0x5e5   : > { %16096 = vmatmul.mubr.f32.gmra.mrb[60].mxu0 %v9208_v19  ;;  %v17050_v19 = vpack.c.bf16 %v13026_v3, %v13024_v5  ;;  %v9596_v5 = vld [vmem:[%s22529_s9 + $0x58] sm:$0xff]  ;;  %v13075_v3 = vld [vmem:[%s22529_s9 + $0x340] sm:$0xff] }
 0x5e6   : > { %16098 = vmatprep.mubr.f32.mxu0 %v9209_v17  ;;  %17005 = vmatpush3.bf16.msra.mxu0 %v17002_v14  ;;  %v9364_v14 = vld [vmem:[#allocation4 + $0x4e] sm:$0xff]  ;;  %v17052_v17 = vpack.c.bf16 %v13025_v21, %v13023_v20  ;;  %v9595_v20 = vld [vmem:[%s22529_s9 + $0x50] sm:$0xff]  ;;  %v13080_v21 = vld [vmem:[%s22529_s9 + $0x368] sm:$0xff] }
 0x5e7   : > { %17007 = vmatprep.subr.bf16.mxu0 %v17006_v18 }
 0x5e9   : > { %16099 = vmatmul.mubr.f32.gmra.mrb[62].mxu0 %v8152_v60  ;;  %v17018_v60 = vpack.c.bf16 %v12997_v29, %v12996_v27 }
 0x5ea   : > { %16101 = vmatprep.mubr.f32.mxu0 %v9211_v32  ;;  %17009 = vmatpush3.bf16.msra.mxu0 %v17006_v18  ;;  %v17048_v18 = vpack.c.bf16 %v13021_v13, %v13019_v12  ;;  %v13078_v12 = vld [vmem:[%s22529_s9 + $0x358] sm:$0xff]  ;;  %v9594_v13 = vld [vmem:[%s22529_s9 + $0x48] sm:$0xff] }
 0x5eb   : > { %17011 = vmatprep.subr.bf16.mxu0 %v17010_v24 }
 0x5ed   : > { %16102 = vmatmul.mubr.f32.gmra.mrb[64].mxu0 %v9212_v16  ;;  %v13061_v16 = vld [vmem:[%s22529_s9 + $0x2d0] sm:$0xff] }
 0x5ee   : > { %16104 = vmatprep.mubr.f32.mxu0 %v9213_v30  ;;  %17013 = vmatpush3.bf16.msra.mxu0 %v17010_v24  ;;  %v13060_v24 = vld [vmem:[%s22529_s9 + $0x2c8] sm:$0xff]  ;;  %v13027_v30 = vld [vmem:[%s22529_s9 + $0x1c0] sm:$0xff] }
 0x5ef   : > { %17015 = vmatprep.subr.bf16.mxu0 %v17014_v26  ;;  %v17118_v32 = vpack.c.bf16 %v13062_v25, %v13060_v24  ;;  %v13082_v24 = vld [vmem:[%s22529_s9 + $0x378] sm:$0xff]  ;;  %v9598_v25 = vld [vmem:[%s22529_s9 + $0x68] sm:$0xff] }
 0x5f1   : > { %16105 = vmatmul.mubr.f32.gmra.mrb[66].mxu0 %v9214_v55  ;;  %v13029_v55 = vld [vmem:[%s22529_s9 + $0x1d0] sm:$0xff]  ;;  %17119 = vmatprep.subr.bf16.mxu1 %v17118_v32  ;;  %v17138_v32 = vpack.c.bf16 %v13082_v24, %v13080_v21 }
 0x5f2   : > { %17017 = vmatpush3.bf16.msra.mxu0 %v17014_v26  ;;  %16139 = vmatprep.mubr.f32.mxu0 %v9357_v33  ;;  %v13030_v26 = vld [vmem:[%s22529_s9 + $0x1d8] sm:$0xff]  ;;  %v13032_v33 = vld [vmem:[%s22529_s9 + $0x1e8] sm:$0xff] }
 0x5f3   : > { %17019 = vmatprep.subr.bf16.mxu0 %v17018_v60  ;;  %v17054_v27 = vpack.c.bf16 %v13030_v26, %v13028_v28  ;;  %v17058_v39 = vpack.c.bf16 %v13034_v37, %v13032_v33  ;;  %v9600_v28 = vld [vmem:[%s22529_s9 + $0x78] sm:$0xff]  ;;  %v9602_v33 = vld [vmem:[%s22529_s9 + $0x88] sm:$0xff]  ;;  %v13083_v37 = vld [vmem:[%s22529_s9 + $0x380] sm:$0xff] }
 0x5f4   : > { %v17074_v26 = vpack.c.bf16 %v9600_v28, %v9598_v25 }
 0x5f6   : > { %17021 = vmatpush3.bf16.msra.mxu0 %v17018_v60  ;;  %v17056_v60 = vpack.c.bf16 %v13029_v55, %v13027_v30  ;;  %v9599_v30 = vld [vmem:[%s22529_s9 + $0x70] sm:$0xff]  ;;  %v13084_v55 = vld [vmem:[%s22529_s9 + $0x388] sm:$0xff] }
 0x5f7   : > { %17023 = vmatprep.subr.bf16.mxu0 %v17022_v34 }
 0x5fa   : > { %17025 = vmatpush3.bf16.msra.mxu0 %v17022_v34  ;;  %v17122_v34 = vpack.c.bf16 %v13066_v1, %v13064_v31 }
 0x5fb   : > { %17027 = vmatprep.subr.bf16.mxu0 %v17026_v38 }
 0x5fe   : > { %17029 = vmatpush3.bf16.msra.mxu0 %v17026_v38  ;;  %v13065_v38 = vld [vmem:[%s22529_s9 + $0x2f0] sm:$0xff] }
 0x5ff   : > { %17031 = vmatprep.subr.bf16.mxu0 %v17030_v41  ;;  %v17124_v45 = vpack.c.bf16 %v13065_v38, %v13063_v42  ;;  %v13031_v41 = vld [vmem:[%s22529_s9 + $0x1e0] sm:$0xff]  ;;  %v13085_v38 = vld [vmem:[%s22529_s9 + $0x390] sm:$0xff] }
 0x600   : > { %v17060_v43 = vpack.c.bf16 %v13033_v49, %v13031_v41  ;;  %v17144_v41 = vpack.c.bf16 %v13085_v38, %v13083_v37  ;;  %v13088_v49 = vld [vmem:[%s22529_s9 + $0x3a8] sm:$0xff] }
 0x601   : > { %16140 = vmatmul.mubr.f32.vlgmr.msra.gmra.mrb[58].mxu0 %v9358_v54  ;;  %v13067_v54 = vld [vmem:[%s22529_s9 + $0x300] sm:$0xff] }
 0x602   : > { %16142 = vmatprep.mubr.f32.mxu0 %v9359_v57  ;;  %17033 = vmatpush1.bf16.msra.mxu0 %v17032_v50  ;;  %v9586_v50 = vld [vmem:[%s22529_s9 + $0x8] sm:$0xff]  ;;  %v9617_v57 = vld [vmem:[#allocation5 + $0x1] sm:$0xff] }
 0x603   : > { %17035 = vmatprep.subr.bf16.mxu0 %v17034_v51  ;;  %v17126_v51 = vpack.c.bf16 %v13070_v47, %v13068_v36  ;;  %v17062_v46 = vpack.c.bf16 %v9588_v52, %v9586_v50  ;;  %v9606_v50 = vld [vmem:[%s22529_s9 + $0xa8] sm:$0xff]  ;;  %v13087_v52 = vld [vmem:[%s22529_s9 + $0x3a0] sm:$0xff] }
 0x605   : > { %16143 = vmatmul.mubr.f32.gmra.mrb[60].mxu0 %v9360_v0  ;;  %v20752_v0 = vld [vmem:[#allocation4] sm:$0xff] }
 0x606   : > { %16145 = vmatprep.mubr.f32.mxu0 %v9361_v23  ;;  %17037 = vmatpush1.bf16.msra.mxu0 %v17036_v58  ;;  %v9585_v58 = vld [vmem:[%s22529_s9] sm:$0xff]  ;;  %v9590_v23 = vld [vmem:[%s22529_s9 + $0x28] sm:$0xff] }
 0x607   : > { %17039 = vmatprep.subr.bf16.mxu0 %v17038_v61  ;;  %v17128_v61 = vpack.c.bf16 %v13069_v4, %v13067_v54  ;;  %v17064_v56 = vpack.c.bf16 %v9587_v63, %v9585_v58  ;;  %v13089_v54 = vld [vmem:[%s22529_s9 + $0x3b0] sm:$0xff]  ;;  %v13094_v58 = vld [vmem:[%s22529_s9 + $0x3d8] sm:$0xff] }
 0x608   : > { %v9607_v4 = vld [vmem:[%s22529_s9 + $0xb0] sm:$0xff]  ;;  %v17148_v63 = vpack.c.bf16 %v13089_v54, %v13087_v52 }
 0x609   : > { %16146 = vmatmul.mubr.f32.gmra.mrb[62].mxu0 %v9362_v8 }
 0x60a   : > { %16148 = vmatprep.mubr.f32.mxu0 %v9363_v11  ;;  %17041 = vmatpush1.bf16.msra.mxu0 %v17040_v62  ;;  %v17130_v62 = vpack.c.bf16 %v13074_v6, %v13072_v2  ;;  %v9591_v11 = vld [vmem:[%s22529_s9 + $0x30] sm:$0xff] }
 0x60b   : > { %17043 = vmatprep.subr.bf16.mxu0 %v17042_v35  ;;  %v9592_v35 = vld [vmem:[%s22529_s9 + $0x38] sm:$0xff] }
 0x60c   : > { %v17066_v8 = vpack.c.bf16 %v9592_v35, %v9590_v23  ;;  %v13091_v23 = vld [vmem:[%s22529_s9 + $0x3c0] sm:$0xff] }
 0x60d   : > { %16149 = vmatmul.mubr.f32.gmra.mrb[64].mxu0 %v9364_v14  ;;  %v9609_v35 = vld [vmem:[%s22529_s9 + $0xc0] sm:$0xff] }
 0x60e   : > { %16151 = vmatprep.mubr.f32.mxu0 %v9365_v15  ;;  %17045 = vmatpush1.bf16.msra.mxu0 %v17044_v40  ;;  %v17068_v40 = vpack.c.bf16 %v9591_v11, %v9589_v48  ;;  %v13077_v15 = vld [vmem:[%s22529_s9 + $0x350] sm:$0xff]  ;;  %v9614_v48 = vld [vmem:[%s22529_s9 + $0xe8] sm:$0xff]  ;;  %v9616_v11 = vld [vmem:[%s22529_s9 + $0xf8] sm:$0xff] }
 0x60f   : > { %17047 = vmatprep.subr.bf16.mxu0 %v17046_v44  ;;  %v13076_v44 = vld [vmem:[%s22529_s9 + $0x348] sm:$0xff] }
 0x610   : > { %v17134_v14 = vpack.c.bf16 %v13078_v12, %v13076_v44  ;;  %v17088_v44 = vpack.c.bf16 %v9611_v9, %v9609_v35 }
 0x611   : > { %16152 = vmatmul.mubr.f32.gmra.mrb[66].mxu0 %v9366_v59  ;;  %v17070_v59 = vpack.c.bf16 %v9596_v5, %v9594_v13  ;;  %v13095_v13 = vld [vmem:[%s22529_s9 + $0x3e0] sm:$0xff] }
 0x612   : > { %17049 = vmatpush1.bf16.msra.mxu0 %v17048_v18  ;;  %9718 = vmatprep.mubr.f32.mxu0 %v20190_v22  ;;  %v13059_v22 = vld [vmem:[%s22529_s9 + $0x2c0] sm:$0xff]  ;;  %v17136_v18 = vpack.c.bf16 %v13077_v15, %v13075_v3  ;;  %v17090_v3 = vpack.c.bf16 %v9616_v11, %v9614_v48  ;;  %v9615_v15 = vld [vmem:[%s22529_s9 + $0xf0] sm:$0xff] }
 0x613   : > { %17051 = vmatprep.subr.bf16.mxu0 %v17050_v19  ;;  %v17120_v29 = vpack.c.bf16 %v13061_v16, %v13059_v22  ;;  %v9593_v19 = vld [vmem:[%s22529_s9 + $0x40] sm:$0xff]  ;;  %v13081_v16 = vld [vmem:[%s22529_s9 + $0x370] sm:$0xff] }
 0x614   : > { %v13079_v22 = vld [vmem:[%s22529_s9 + $0x360] sm:$0xff] }
 0x615   : > { %17121 = vmatpush1.bf16.msra.mxu1 %v17120_v29  ;;  %v17140_v29 = vpack.c.bf16 %v13081_v16, %v13079_v22  ;;  %v9613_v5 = vld [vmem:[%s22529_s9 + $0xe0] sm:$0xff] }
 0x616   : > { %17053 = vmatpush1.bf16.msra.mxu0 %v17052_v17  ;;  %17123 = vmatprep.subr.bf16.mxu1 %v17122_v34  ;;  %v17072_v17 = vpack.c.bf16 %v9595_v20, %v9593_v19  ;;  %v9604_v34 = vld [vmem:[%s22529_s9 + $0x98] sm:$0xff]  ;;  %v17092_v20 = vpack.c.bf16 %v9615_v15, %v9613_v5 }
 0x617   : > { %17055 = vmatprep.subr.bf16.mxu0 %v17054_v27  ;;  %v9597_v27 = vld [vmem:[%s22529_s9 + $0x60] sm:$0xff]  ;;  %v17078_v42 = vpack.c.bf16 %v9604_v34, %v9602_v33 }
 0x618   : > { %v17076_v31 = vpack.c.bf16 %v9599_v30, %v9597_v27  ;;  %v9966_v15 = vld [vmem:[#allocation5 + $0x3] sm:$0xff] }
 0x619   : > { %17125 = vmatpush1.bf16.msra.mxu1 %v17124_v45  ;;  %v9603_v45 = vld [vmem:[%s22529_s9 + $0x90] sm:$0xff] }
 0x61a   : > { %17057 = vmatpush1.bf16.msra.mxu0 %v17056_v60  ;;  %17127 = vmatprep.subr.bf16.mxu1 %v17126_v51  ;;  %v13086_v60 = vld [vmem:[%s22529_s9 + $0x398] sm:$0xff] }
 0x61b   : > { %17059 = vmatprep.subr.bf16.mxu0 %v17058_v39  ;;  %v17142_v1 = vpack.c.bf16 %v13086_v60, %v13084_v55  ;;  %v9601_v39 = vld [vmem:[%s22529_s9 + $0x80] sm:$0xff]  ;;  %v9608_v51 = vld [vmem:[%s22529_s9 + $0xb8] sm:$0xff] }
 0x61c   : > { %9934 = vmatmul.mubr.f32.vlgmr.msra.gmra.mrb[24].mxu1 %v9832_v53  ;;  %v17080_v36 = vpack.c.bf16 %v9603_v45, %v9601_v39  ;;  %v17082_v53 = vpack.c.bf16 %v9608_v51, %v9606_v50 }
 0x61d   : > { %17129 = vmatpush1.bf16.msra.mxu1 %v17128_v61  ;;  %9939 = vmatprep.mubr.f32.mxu1 %v20752_v0  ;;  %v9610_v61 = vld [vmem:[%s22529_s9 + $0xc8] sm:$0xff] }
 0x61e   : > { %17061 = vmatpush1.bf16.msra.mxu0 %v17060_v43  ;;  %17131 = vmatprep.subr.bf16.mxu1 %v17130_v62  ;;  %v13090_v43 = vld [vmem:[%s22529_s9 + $0x3b8] sm:$0xff]  ;;  %v13093_v62 = vld [vmem:[%s22529_s9 + $0x3d0] sm:$0xff] }
 0x61f   : > { %17063 = vmatprep.subr.bf16.mxu0 %v17062_v46  ;;  %v17146_v47 = vpack.c.bf16 %v13090_v43, %v13088_v49  ;;  %v9605_v46 = vld [vmem:[%s22529_s9 + $0xa0] sm:$0xff] }
 0x620   : > { %v17084_v2 = vpack.c.bf16 %v9607_v4, %v9605_v46 }
 0x621   : > { %9719 = vmatmul.mubr.f32.vlgmr.msra.gmra.mrb[68].mxu0 %v9617_v57  ;;  %17133 = vmatpush1.bf16.msra.mxu1 %v17132_v10  ;;  %v13092_v57 = vld [vmem:[%s22529_s9 + $0x3c8] sm:$0xff]  ;;  %v13098_v10 = vld [vmem:[%s22529_s9 + $0x3f8] sm:$0xff] }
 0x622   : > { %9724 = vmatprep.mubr.f32.mxu0 %v20752_v0  ;;  %17065 = vmatpush1.bf16.msra.mxu0 %v17064_v56  ;;  %v9612_v56 = vld [vmem:[%s22529_s9 + $0xd8] sm:$0xff]  ;;  %v17150_v6 = vpack.c.bf16 %v13094_v58, %v13092_v57 }
 0x623   : > { %17067 = vmatprep.subr.bf16.mxu0 %v17066_v8  ;;  %17135 = vmatprep.subr.bf16.mxu1 %v17134_v14  ;;  %v17086_v7 = vpack.c.bf16 %v9612_v56, %v9610_v61  ;;  %v13096_v8 = vld [vmem:[%s22529_s9 + $0x3e8] sm:$0xff]  ;;  %v13097_v14 = vld [vmem:[%s22529_s9 + $0x3f0] sm:$0xff] }
 0x624   : > { %v17154_v12 = vpack.c.bf16 %v13098_v10, %v13096_v8  ;;  %v17156_v19 = vpack.c.bf16 %v13097_v14, %v13095_v13  ;;  %v13104_v13 = vld [vmem:[%s22529_s9 + $0x428] sm:$0xff] }
 0x625   : > { %17137 = vmatpush1.bf16.msra.mxu1 %v17136_v18  ;;  %v13102_v18 = vld [vmem:[%s22529_s9 + $0x418] sm:$0xff] }
 0x626   : > { %17069 = vmatpush1.bf16.msra.mxu0 %v17068_v40  ;;  %17139 = vmatprep.subr.bf16.mxu1 %v17138_v32  ;;  %v17152_v40 = vpack.c.bf16 %v13093_v62, %v13091_v23 }
 0x627   : > { %17071 = vmatprep.subr.bf16.mxu0 %v17070_v59  ;;  %v13100_v59 = vld [vmem:[%s22529_s9 + $0x408] sm:$0xff] }
 0x628   : > { %v17158_v21 = vpack.c.bf16 %v13102_v18, %v13100_v59 }
 0x629   : > { %17141 = vmatpush1.bf16.msra.mxu1 %v17140_v29 }
 0x62a   : > { %17073 = vmatpush1.bf16.msra.mxu0 %v17072_v17  ;;  %17143 = vmatprep.subr.bf16.mxu1 %v17142_v1  ;;  %v13002_v1 = vld [vmem:[%s22528_s8] ss:$0 sm:$0xff] }
 0x62b   : > { %17075 = vmatprep.subr.bf16.mxu0 %v17074_v26 }
 0x62d   : > { %17145 = vmatpush1.bf16.msra.mxu1 %v17144_v41 }
 0x62e   : > { %17077 = vmatpush1.bf16.msra.mxu0 %v17076_v31  ;;  %17147 = vmatprep.subr.bf16.mxu1 %v17146_v47 }
 0x62f   : > { %17079 = vmatprep.subr.bf16.mxu0 %v17078_v42 }
 0x631   : > { %17149 = vmatpush1.bf16.msra.mxu1 %v17148_v63 }
 0x632   : > { %17081 = vmatpush1.bf16.msra.mxu0 %v17080_v36  ;;  %17151 = vmatprep.subr.bf16.mxu1 %v17150_v6 }
 0x633   : > { %17083 = vmatprep.subr.bf16.mxu0 %v17082_v53 }
 0x635   : > { %17153 = vmatpush1.bf16.msra.mxu1 %v17152_v40 }
 0x636   : > { %17085 = vmatpush1.bf16.msra.mxu0 %v17084_v2  ;;  %17155 = vmatprep.subr.bf16.mxu1 %v17154_v12  ;;  %v13101_v12 = vld [vmem:[%s22529_s9 + $0x410] sm:$0xff] }
 0x637   : > { %17087 = vmatprep.subr.bf16.mxu0 %v17086_v7 }
 0x639   : > { %17157 = vmatpush1.bf16.msra.mxu1 %v17156_v19  ;;  %v13103_v19 = vld [vmem:[%s22529_s9 + $0x420] sm:$0xff] }
 0x63a   : > { %17089 = vmatpush1.bf16.msra.mxu0 %v17088_v44  ;;  %17159 = vmatprep.subr.bf16.mxu1 %v17158_v21  ;;  %v13099_v44 = vld [vmem:[%s22529_s9 + $0x400] sm:$0xff]  ;;  %v13108_v21 = vld [vmem:[%s22529_s9 + $0x448] sm:$0xff] }
 0x63b   : > { %17091 = vmatprep.subr.bf16.mxu0 %v17090_v3  ;;  %v13106_v3 = vld [vmem:[%s22529_s9 + $0x438] sm:$0xff]  ;;  %v17160_v59 = vpack.c.bf16 %v13101_v12, %v13099_v44 }
 0x63c   : > { %v17162_v18 = vpack.c.bf16 %v13106_v3, %v13104_v13  ;;  %v13138_v44 = vld [vmem:[%s22529_s9 + $0x538] sm:$0xff]  ;;  %v13137_v3 = vld [vmem:[%s22529_s9 + $0x530] sm:$0xff] }
 0x63d   : > { %v10100_v12 = vld [vmem:[#allocation5 + $0x7] sm:$0xff] }
 0x63e   : > { %17093 = vmatpush1.bf16.msra.mxu0 %v17092_v20  ;;  %v13105_v20 = vld [vmem:[%s22529_s9 + $0x430] sm:$0xff] }
 0x6d4   : > { %v16141_v17 = vpop.f32.mrb[58].mxu0 }
 0x6d5   : > { %9510 = vst [vmem:[#allocation8 + $0x8] sm:$0xff] %v16141_v17  ;;  %v9450_v24 = vpop.f32.mrb[59].mxu0  ;;  %v13110_v17 = vld [vmem:[%s22529_s9 + $0x458] sm:$0xff] }
 0x6d6   : > { %9509 = vst [vmem:[#allocation8] sm:$0xff] %v9450_v24  ;;  %v17164_v24 = vpack.c.bf16 %v13105_v20, %v13103_v19  ;;  %v13139_v20 = vld [vmem:[%s22529_s9 + $0x540] sm:$0xff] }
 0x6d8   : > { %v16144_v25 = vpop.f32.mrb[60].mxu0 }
 0x6d9   : > { %9512 = vst [vmem:[#allocation8 + $0x18] sm:$0xff] %v16144_v25  ;;  %v9460_v28 = vpop.f32.mrb[61].mxu0  ;;  %v17166_v25 = vpack.c.bf16 %v13110_v17, %v13108_v21  ;;  %v13141_v21 = vld [vmem:[%s22529_s9 + $0x550] sm:$0xff] }
 0x6da   : > { %9511 = vst [vmem:[#allocation8 + $0x10] sm:$0xff] %v9460_v28  ;;  %v13107_v28 = vld [vmem:[%s22529_s9 + $0x440] sm:$0xff] }
 0x6dc   : > { %v16147_v32 = vpop.f32.mrb[62].mxu0 }
 0x6dd   : > { %9514 = vst [vmem:[#allocation8 + $0x28] sm:$0xff] %v16147_v32  ;;  %v9470_v26 = vpop.f32.mrb[63].mxu0  ;;  %v9520_v22 = vld [vmem:[#allocation8] ss:$2 sm:$0xf] }
 0x6de   : > { %v9522_v16 = vld [vmem:[#allocation8 + $0x1] ss:$2 sm:$0xf]  ;;  %9513 = vst [vmem:[#allocation8 + $0x20] sm:$0xff] %v9470_v26 }
 0x6df   : > { %v9523_v55 = vmax.f32 %v9520_v22, %v9522_v16  ;;  %v13109_v32 = vld [vmem:[%s22529_s9 + $0x450] sm:$0xff]  ;;  %v13112_v22 = vld [vmem:[%s22529_s9 + $0x468] sm:$0xff]  ;;  %v13114_v16 = vld [vmem:[%s22529_s9 + $0x478] sm:$0xff] }
 0x6e0   : > { %v16150_v27 = vpop.f32.mrb[64].mxu0 }
 0x6e1   : > { %v9525_v29 = vld [vmem:[#allocation8 + $0xa] ss:$2 sm:$0xf]  ;;  %v9527_v30 = vld [vmem:[#allocation8 + $0xb] ss:$2 sm:$0xf] }
 0x6e2   : > { %9516 = vst [vmem:[#allocation8 + $0x38] sm:$0xff] %v16150_v27  ;;  %v9528_v60 = vmax.f32 %v9525_v29, %v9527_v30  ;;  %v9480_v31 = vpop.f32.mrb[65].mxu0  ;;  %v9540_v33 = vld [vmem:[#allocation8 + $0x14] ss:$2 sm:$0xf]  ;;  %v17168_v27 = vpack.c.bf16 %v13109_v32, %v13107_v28  ;;  %v17170_v29 = vpack.c.bf16 %v13114_v16, %v13112_v22  ;;  %v17200_v28 = vpack.c.bf16 %v13141_v21, %v13139_v20  ;;  %v13145_v22 = vld [vmem:[%s22529_s9 + $0x570] sm:$0xff] }
 0x6e3   : > { %v9542_v34 = vld [vmem:[#allocation8 + $0x15] ss:$2 sm:$0xf]  ;;  %9515 = vst [vmem:[#allocation8 + $0x30] sm:$0xff] %v9480_v31  ;;  %v13177_v20 = vld [vmem:[%s22529_s9 + $0x670] sm:$0xff] }
 0x6e4   : > { %v9529_v37 = vmax.f32 %v9523_v55, %v9528_v60  ;;  %v16153_v42 = vpop.f32.mrb[66].mxu0  ;;  %v9543_v41 = vmax.f32 %v9540_v33, %v9542_v34  ;;  %v9554_v47 = vld [vmem:[#allocation8 + $0x28] ss:$2 sm:$0xf]  ;;  %v13111_v30 = vld [vmem:[%s22529_s9 + $0x460] sm:$0xff]  ;;  %v13113_v55 = vld [vmem:[%s22529_s9 + $0x470] sm:$0xff] }
 0x6e5   : > { %v9545_v38 = vld [vmem:[#allocation8 + $0x1e] ss:$2 sm:$0xf]  ;;  %v9547_v39 = vld [vmem:[#allocation8 + $0x1f] ss:$2 sm:$0xf]  ;;  %v17172_v34 = vpack.c.bf16 %v13113_v55, %v13111_v30 }
 0x6e6   : > { %9518 = vst [vmem:[#allocation8 + $0x48] sm:$0xff] %v16153_v42  ;;  %v9536_v45 = vadd.f32 %v13002_v1, %v9529_v37  ;;  %v9548_v49 = vmax.f32 %v9545_v38, %v9547_v39  ;;  %v9490_v43 = vpop.f32.mrb[67].mxu0  ;;  %v9556_v50 = vld [vmem:[#allocation8 + $0x29] ss:$2 sm:$0xf]  ;;  %v13116_v60 = vld [vmem:[%s22529_s9 + $0x488] sm:$0xff] }
 0x6e7   : > { %9517 = vst [vmem:[#allocation8 + $0x40] sm:$0xff] %v9490_v43  ;;  %v9557_v46 = vmax.f32 %v9554_v47, %v9556_v50  ;;  %v13118_v33 = vld [vmem:[%s22529_s9 + $0x498] sm:$0xff]  ;;  %v13115_v42 = vld [vmem:[%s22529_s9 + $0x480] sm:$0xff]  ;;  %v13117_v38 = vld [vmem:[%s22529_s9 + $0x490] sm:$0xff] }
 0x6e8   : > { %v9537_v36 = vmax.f32 %v9536_v45, 0.0  ;;  %v9549_v51 = vmax.f32 %v9543_v41, %v9548_v49  ;;  %v17174_v37 = vpack.c.bf16 %v13118_v33, %v13116_v60  ;;  %v13120_v39 = vld [vmem:[%s22529_s9 + $0x4a8] sm:$0xff]  ;;  %v13122_v49 = vld [vmem:[%s22529_s9 + $0x4b8] sm:$0xff]  ;;  %v17176_v43 = vpack.c.bf16 %v13117_v38, %v13115_v42  ;;  %v13119_v47 = vld [vmem:[%s22529_s9 + $0x4a0] sm:$0xff] }
 0x6e9   : > { %v13121_v50 = vld [vmem:[%s22529_s9 + $0x4b0] sm:$0xff]  ;;  %v13147_v60 = vld [vmem:[%s22529_s9 + $0x580] sm:$0xff] }
 0x6ea   : > { %9538 = vst [vmem:[#allocation5 + $0x10] sm:$0xf] %v9537_v36  ;;  %v9559_v52 = vld [vmem:[#allocation8 + $0x32] ss:$2 sm:$0xf]  ;;  %v9550_v54 = vadd.f32 %v13002_v1, %v9549_v51  ;;  %v17178_v36 = vpack.c.bf16 %v13122_v49, %v13120_v39  ;;  %v13158_v49 = vld [vmem:[%s22529_s9 + $0x5d8] sm:$0xff] }
 0x6eb   : > { %v9561_v53 = vld [vmem:[#allocation8 + $0x33] ss:$2 sm:$0xf] }
 0x6ec   : > { %v9562_v4 = vmax.f32 %v9559_v52, %v9561_v53  ;;  %v9551_v57 = vmax.f32 %v9550_v54, 0.0  ;;  %v13124_v51 = vld [vmem:[%s22529_s9 + $0x4c8] sm:$0xff]  ;;  %v13126_v52 = vld [vmem:[%s22529_s9 + $0x4d8] sm:$0xff]  ;;  %v17180_v53 = vpack.c.bf16 %v13121_v50, %v13119_v47  ;;  %v13151_v39 = vld [vmem:[%s22529_s9 + $0x5a0] sm:$0xff] }
 0x6ed   : > { %v17182_v54 = vpack.c.bf16 %v13126_v52, %v13124_v51  ;;  %v13155_v47 = vld [vmem:[%s22529_s9 + $0x5c0] sm:$0xff]  ;;  %v13157_v50 = vld [vmem:[%s22529_s9 + $0x5d0] sm:$0xff]  ;;  %v13160_v51 = vld [vmem:[%s22529_s9 + $0x5e8] sm:$0xff] }
 0x6ee   : > { %v9563_v58 = vmax.f32 %v9557_v46, %v9562_v4  ;;  %v9568_v61 = vld [vmem:[#allocation8 + $0x3c] ss:$2 sm:$0xf]  ;;  %v9570_v63 = vld [vmem:[#allocation8 + $0x3d] ss:$2 sm:$0xf] }
 0x6ef   : > { %9552 = vst [vmem:[#allocation5 + $0x17] sm:$0xf] %v9551_v57  ;;  %v9571_v56 = vmax.f32 %v9568_v61, %v9570_v63  ;;  %v9573_v2 = vld [vmem:[#allocation8 + $0x46] ss:$2 sm:$0xf]  ;;  %v13123_v46 = vld [vmem:[%s22529_s9 + $0x4c0] sm:$0xff] }
 0x6f0   : > { %v9575_v6 = vld [vmem:[#allocation8 + $0x47] ss:$2 sm:$0xf]  ;;  %v9564_v23 = vadd.f32 %v13002_v1, %v9563_v58  ;;  %v13128_v57 = vld [vmem:[%s22529_s9 + $0x4e8] sm:$0xff] }
 0x6f1   : > { %v9576_v62 = vmax.f32 %v9573_v2, %v9575_v6  ;;  %v20933_v35 = vld [vmem:[#allocation5 + $0x9] sm:$0xff]  ;;  %v13125_v4 = vld [vmem:[%s22529_s9 + $0x4d0] sm:$0xff]  ;;  %v13130_v58 = vld [vmem:[%s22529_s9 + $0x4f8] sm:$0xff] }
 0x6f2   : > { %v20935_v7 = vld [vmem:[#allocation5 + $0xa] sm:$0xff]  ;;  %9725 = vmatmul.mubr.f32.gmra.mrb[70].mxu0 %v20933_v35  ;;  %v9565_v9 = vmax.f32 %v9564_v23, 0.0  ;;  %v17184_v61 = vpack.c.bf16 %v13125_v4, %v13123_v46  ;;  %v17186_v63 = vpack.c.bf16 %v13130_v58, %v13128_v57  ;;  %v13129_v2 = vld [vmem:[%s22529_s9 + $0x4f0] sm:$0xff]  ;;  %v13134_v23 = vld [vmem:[%s22529_s9 + $0x518] sm:$0xff] }
 0x6f3   : > { %9940 = vmatmul.mubr.f32.gmra.mrb[26].mxu1 %v20935_v7  ;;  %v9577_v8 = vmax.f32 %v9571_v56, %v9576_v62  ;;  %9730 = vmatprep.mubr.f32.mxu0 %v20752_v0  ;;  %v9967_v26 = vld [vmem:[#allocation5 + $0xb] sm:$0xff]  ;;  %v13162_v52 = vld [vmem:[%s22529_s9 + $0x5f8] sm:$0xff]  ;;  %v13161_v4 = vld [vmem:[%s22529_s9 + $0x5f0] sm:$0xff] }
 0x6f4   : > { %9945 = vmatprep.mubr.f32.mxu1 %v20752_v0  ;;  %9566 = vst [vmem:[#allocation5 + $0x1e] sm:$0xf] %v9565_v9  ;;  %v13127_v56 = vld [vmem:[%s22529_s9 + $0x4e0] sm:$0xff]  ;;  %v13132_v6 = vld [vmem:[%s22529_s9 + $0x508] sm:$0xff]  ;;  %v13166_v58 = vld [vmem:[%s22529_s9 + $0x618] sm:$0xff] }
 0x6f5   : > { %v9578_v10 = vadd.f32 %v13002_v1, %v9577_v8  ;;  %v17188_v62 = vpack.c.bf16 %v13129_v2, %v13127_v56  ;;  %v17190_v9 = vpack.c.bf16 %v13134_v23, %v13132_v6  ;;  %v13131_v8 = vld [vmem:[%s22529_s9 + $0x500] sm:$0xff]  ;;  %v13164_v57 = vld [vmem:[%s22529_s9 + $0x608] sm:$0xff]  ;;  %v13165_v2 = vld [vmem:[%s22529_s9 + $0x610] sm:$0xff] }
 0x6f6   : > { %v20941_v48 = vld [vmem:[#allocation5 + $0x11] sm:$0xff]  ;;  %v9620_v14 = vld [vmem:[#allocation5 + $0x19] sm:$0xf]  ;;  %v13159_v46 = vld [vmem:[%s22529_s9 + $0x5e0] sm:$0xff] }
 0x6f7   : > { %v20943_v11 = vld [vmem:[#allocation5 + $0x12] sm:$0xff]  ;;  %9731 = vmatmul.mubr.f32.gmra.mrb[72].mxu0 %v20941_v48  ;;  %v9579_v40 = vmax.f32 %v9578_v10, 0.0  ;;  %v9835_v5 = vld [vmem:[#allocation5 + $0x1a] sm:$0xf]  ;;  %v13163_v56 = vld [vmem:[%s22529_s9 + $0x600] sm:$0xff] }
 0x6f8   : > { %9946 = vmatmul.mubr.f32.gmra.mrb[28].mxu1 %v20943_v11  ;;  %9736 = vmatprep.mubr.f32.mxu0 %v20752_v0  ;;  %v21002_v31 = vld [vmem:[#allocation5 + $0x10] sm:$0xff]  ;;  %v9584_v45 = vld [vmem:[#allocation5 + $0x18] sm:$0xf]  ;;  %v13170_v23 = vld [vmem:[%s22529_s9 + $0x638] sm:$0xff] }
 0x6f9   : > { %9951 = vmatprep.mubr.f32.mxu1 %v20752_v0  ;;  %9580 = vst [vmem:[#allocation5 + $0x25] sm:$0xf] %v9579_v40  ;;  %v9968_v1 = vld [vmem:[#allocation5 + $0x13] sm:$0xff] }
 0x6fa   : > { %v13133_v10 = vld [vmem:[%s22529_s9 + $0x510] sm:$0xff]  ;;  %v13136_v40 = vld [vmem:[%s22529_s9 + $0x528] sm:$0xff] }
 0x6fb   : > { %9737 = vmatmul.mubr.f32.gmra.mrb[74].mxu0 %v9620_v14  ;;  %v9969_v41 = vld [vmem:[#allocation5 + $0x1b] sm:$0xf]  ;;  %v17192_v13 = vpack.c.bf16 %v13133_v10, %v13131_v8  ;;  %v17194_v14 = vpack.c.bf16 %v13138_v44, %v13136_v40  ;;  %v21090_v17 = vld [vmem:[#allocation5 + $0xf] sm:$0xff]  ;;  %v10103_v33 = vld [vmem:[#allocation5 + $0x1f] sm:$0xf] }
 0x6fc   : > { %9952 = vmatmul.mubr.f32.gmra.mrb[30].mxu1 %v9835_v5  ;;  %9807 = vmatprep.mubr.f32.mxu0 %v20752_v0  ;;  %v13135_v5 = vld [vmem:[%s22529_s9 + $0x520] sm:$0xff]  ;;  %v21106_v16 = vld [vmem:[#allocation5 + $0x17] sm:$0xff]  ;;  %v13174_v44 = vld [vmem:[%s22529_s9 + $0x658] sm:$0xff] }
 0x6fd   : > { %10067 = vmatprep.mubr.f32.mxu1 %v20752_v0  ;;  %v13168_v6 = vld [vmem:[%s22529_s9 + $0x628] sm:$0xff]  ;;  %v13167_v8 = vld [vmem:[%s22529_s9 + $0x620] sm:$0xff]  ;;  %v13169_v10 = vld [vmem:[%s22529_s9 + $0x630] sm:$0xff] }
 0x6fe   : > { %v13172_v40 = vld [vmem:[%s22529_s9 + $0x648] sm:$0xff]  ;;  %v21211_v21 = vld [vmem:[#allocation5 + $0x18] sm:$0xff] }
 0x6ff   : > { %9808 = vmatmul.mubr.f32.vlgmr.msra.gmra.mrb[68].mxu0 %v20752_v0 }
 0x700   : > { %10068 = vmatmul.mubr.f32.vlgmr.msra.gmra.mrb[24].mxu1 %v9966_v15  ;;  %9813 = vmatprep.mubr.f32.mxu0 %v20752_v0  ;;  %v13140_v15 = vld [vmem:[%s22529_s9 + $0x548] sm:$0xff] }
 0x701   : > { %17161 = vmatpush1.bf16.msra.mxu1 %v17160_v59  ;;  %10073 = vmatprep.mubr.f32.mxu1 %v20752_v0  ;;  %v13142_v59 = vld [vmem:[%s22529_s9 + $0x558] sm:$0xff] }
 0x702   : > { %17163 = vmatprep.subr.bf16.mxu1 %v17162_v18  ;;  %v17196_v18 = vpack.c.bf16 %v13137_v3, %v13135_v5  ;;  %v17198_v19 = vpack.c.bf16 %v13142_v59, %v13140_v15  ;;  %v13173_v5 = vld [vmem:[%s22529_s9 + $0x650] sm:$0xff]  ;;  %v13176_v3 = vld [vmem:[%s22529_s9 + $0x668] sm:$0xff]  ;;  %v13178_v15 = vld [vmem:[%s22529_s9 + $0x678] sm:$0xff] }
 0x703   : > { %9814 = vmatmul.mubr.f32.gmra.mrb[70].mxu0 %v20752_v0 }
 0x704   : > { %10074 = vmatmul.mubr.f32.gmra.mrb[26].mxu1 %v9967_v26  ;;  %9819 = vmatprep.mubr.f32.mxu0 %v20752_v0  ;;  %v13143_v26 = vld [vmem:[%s22529_s9 + $0x560] sm:$0xff] }
 0x705   : > { %17165 = vmatpush1.bf16.msra.mxu1 %v17164_v24  ;;  %10079 = vmatprep.mubr.f32.mxu1 %v20752_v0  ;;  %v13144_v24 = vld [vmem:[%s22529_s9 + $0x568] sm:$0xff]  ;;  %v17204_v30 = vpack.c.bf16 %v13145_v22, %v13143_v26  ;;  %v13181_v26 = vld [vmem:[%s22529_s9 + $0x690] sm:$0xff]  ;;  %v10237_v22 = vld [vmem:[#allocation5 + $0x20] sm:$0xf] }
 0x706   : > { %17167 = vmatprep.subr.bf16.mxu1 %v17166_v25  ;;  %v13146_v25 = vld [vmem:[%s22529_s9 + $0x578] sm:$0xff] }
 0x707   : > { %9820 = vmatmul.mubr.f32.gmra.mrb[72].mxu0 %v21002_v31  ;;  %v17202_v32 = vpack.c.bf16 %v13146_v25, %v13144_v24  ;;  %v13182_v24 = vld [vmem:[%s22529_s9 + $0x698] sm:$0xff] }
 0x708   : > { %10080 = vmatmul.mubr.f32.gmra.mrb[28].mxu1 %v9968_v1  ;;  %9825 = vmatprep.mubr.f32.mxu0 %v20752_v0  ;;  %v13149_v1 = vld [vmem:[%s22529_s9 + $0x590] sm:$0xff] }
 0x709   : > { %17169 = vmatpush1.bf16.msra.mxu1 %v17168_v27  ;;  %10085 = vmatprep.mubr.f32.mxu1 %v20752_v0  ;;  %v13148_v27 = vld [vmem:[%s22529_s9 + $0x588] sm:$0xff]  ;;  %v17208_v42 = vpack.c.bf16 %v13149_v1, %v13147_v60  ;;  %v13183_v60 = vld [vmem:[%s22529_s9 + $0x6a0] sm:$0xff]  ;;  %v13185_v1 = vld [vmem:[%s22529_s9 + $0x6b0] sm:$0xff] }
 0x70a   : > { %17171 = vmatprep.subr.bf16.mxu1 %v17170_v29  ;;  %v13150_v29 = vld [vmem:[%s22529_s9 + $0x598] sm:$0xff] }
 0x70b   : > { %9826 = vmatmul.mubr.f32.gmra.mrb[74].mxu0 %v9584_v45  ;;  %v17206_v55 = vpack.c.bf16 %v13150_v29, %v13148_v27  ;;  %v13153_v45 = vld [vmem:[%s22529_s9 + $0x5b0] sm:$0xff]  ;;  %v13184_v27 = vld [vmem:[%s22529_s9 + $0x6a8] sm:$0xff]  ;;  %v13186_v29 = vld [vmem:[%s22529_s9 + $0x6b8] sm:$0xff] }
 0x70c   : > { %10086 = vmatmul.mubr.f32.gmra.mrb[30].mxu1 %v9969_v41  ;;  %v13156_v41 = vld [vmem:[%s22529_s9 + $0x5c8] sm:$0xff] }
 0x70d   : > { %17173 = vmatpush1.bf16.msra.mxu1 %v17172_v34  ;;  %10201 = vmatprep.mubr.f32.mxu1 %v20752_v0  ;;  %v13152_v34 = vld [vmem:[%s22529_s9 + $0x5a8] sm:$0xff] }
 0x70e   : > { %17175 = vmatprep.subr.bf16.mxu1 %v17174_v37  ;;  %v13154_v37 = vld [vmem:[%s22529_s9 + $0x5b8] sm:$0xff] }
 0x70f   : > { %v17210_v38 = vpack.c.bf16 %v13154_v37, %v13152_v34  ;;  %v13190_v34 = vld [vmem:[%s22529_s9 + $0x6d8] sm:$0xff]  ;;  %v17244_v37 = vpack.c.bf16 %v13185_v1, %v13183_v60 }
 0x710   : > { %v13226_v60 = vld [vmem:[%s22529_s9 + $0x7f8] sm:$0xff] }
 0x711   : > { %17177 = vmatpush1.bf16.msra.mxu1 %v17176_v43  ;;  %v17212_v43 = vpack.c.bf16 %v13153_v45, %v13151_v39  ;;  %v13189_v39 = vld [vmem:[%s22529_s9 + $0x6d0] sm:$0xff]  ;;  %v13192_v45 = vld [vmem:[%s22529_s9 + $0x6e8] sm:$0xff] }
 0x712   : > { %17179 = vmatprep.subr.bf16.mxu1 %v17178_v36  ;;  %v17214_v36 = vpack.c.bf16 %v13158_v49, %v13156_v41  ;;  %v13194_v41 = vld [vmem:[%s22529_s9 + $0x6f8] sm:$0xff] }
 0x715   : > { %17181 = vmatpush1.bf16.msra.mxu1 %v17180_v53  ;;  %v17216_v53 = vpack.c.bf16 %v13157_v50, %v13155_v47  ;;  %v13193_v47 = vld [vmem:[%s22529_s9 + $0x6f0] sm:$0xff]  ;;  %v13196_v50 = vld [vmem:[%s22529_s9 + $0x708] sm:$0xff] }
 0x716   : > { %17183 = vmatprep.subr.bf16.mxu1 %v17182_v54  ;;  %v17218_v54 = vpack.c.bf16 %v13162_v52, %v13160_v51  ;;  %v13198_v51 = vld [vmem:[%s22529_s9 + $0x718] sm:$0xff] }
 0x719   : > { %17185 = vmatpush1.bf16.msra.mxu1 %v17184_v61  ;;  %v17220_v61 = vpack.c.bf16 %v13161_v4, %v13159_v46  ;;  %v13197_v46 = vld [vmem:[%s22529_s9 + $0x710] sm:$0xff]  ;;  %v13200_v4 = vld [vmem:[%s22529_s9 + $0x728] sm:$0xff] }
 0x71a   : > { %17187 = vmatprep.subr.bf16.mxu1 %v17186_v63  ;;  %v17222_v63 = vpack.c.bf16 %v13166_v58, %v13164_v57  ;;  %v13202_v57 = vld [vmem:[%s22529_s9 + $0x738] sm:$0xff] }
 0x71d   : > { %17189 = vmatpush1.bf16.msra.mxu1 %v17188_v62  ;;  %v17224_v62 = vpack.c.bf16 %v13165_v2, %v13163_v56  ;;  %v13201_v56 = vld [vmem:[%s22529_s9 + $0x730] sm:$0xff]  ;;  %v13204_v2 = vld [vmem:[%s22529_s9 + $0x748] sm:$0xff] }
 0x71e   : > { %17191 = vmatprep.subr.bf16.mxu1 %v17190_v9  ;;  %v17226_v9 = vpack.c.bf16 %v13170_v23, %v13168_v6  ;;  %v13206_v6 = vld [vmem:[%s22529_s9 + $0x758] sm:$0xff] }
 0x720   : > { %10202 = vmatmul.mubr.f32.vlgmr.msra.gmra.mrb[24].mxu1 %v10100_v12  ;;  %v17228_v12 = vpack.c.bf16 %v13169_v10, %v13167_v8  ;;  %v13205_v8 = vld [vmem:[%s22529_s9 + $0x750] sm:$0xff]  ;;  %v13208_v10 = vld [vmem:[%s22529_s9 + $0x768] sm:$0xff] }
 0x721   : > { %17193 = vmatpush1.bf16.msra.mxu1 %v17192_v13  ;;  %10207 = vmatprep.mubr.f32.mxu1 %v20752_v0  ;;  %v17230_v13 = vpack.c.bf16 %v13174_v44, %v13172_v40 }
 0x722   : > { %17195 = vmatprep.subr.bf16.mxu1 %v17194_v14  ;;  %v13171_v14 = vld [vmem:[%s22529_s9 + $0x640] sm:$0xff] }
 0x723   : > { %v17232_v59 = vpack.c.bf16 %v13173_v5, %v13171_v14  ;;  %v21316_v14 = vld [vmem:[#allocation5 + $0x19] sm:$0xff] }
 0x724   : > { %10208 = vmatmul.mubr.f32.gmra.mrb[26].mxu1 %v21090_v17  ;;  %v13214_v5 = vld [vmem:[%s22529_s9 + $0x798] sm:$0xff] }
 0x725   : > { %17197 = vmatpush1.bf16.msra.mxu1 %v17196_v18  ;;  %10213 = vmatprep.mubr.f32.mxu1 %v20752_v0  ;;  %v17234_v18 = vpack.c.bf16 %v13178_v15, %v13176_v3 }
 0x726   : > { %17199 = vmatprep.subr.bf16.mxu1 %v17198_v19  ;;  %v13175_v19 = vld [vmem:[%s22529_s9 + $0x660] sm:$0xff] }
 0x727   : > { %v17236_v25 = vpack.c.bf16 %v13177_v20, %v13175_v19  ;;  %v10371_v19 = vld [vmem:[#allocation5 + $0x21] sm:$0xf]  ;;  %v13216_v20 = vld [vmem:[%s22529_s9 + $0x7a8] sm:$0xff] }
 0x728   : > { %10214 = vmatmul.mubr.f32.gmra.mrb[28].mxu1 %v21106_v16 }
 0x729   : > { %17201 = vmatpush1.bf16.msra.mxu1 %v17200_v28  ;;  %10219 = vmatprep.mubr.f32.mxu1 %v20752_v0 }
 0x72a   : > { %17203 = vmatprep.subr.bf16.mxu1 %v17202_v32  ;;  %v13179_v32 = vld [vmem:[%s22529_s9 + $0x680] sm:$0xff] }
 0x72c   : > { %10220 = vmatmul.mubr.f32.gmra.mrb[30].mxu1 %v10103_v33  ;;  %v13188_v33 = vld [vmem:[%s22529_s9 + $0x6c8] sm:$0xff] }
 0x72d   : > { %17205 = vmatpush1.bf16.msra.mxu1 %v17204_v30  ;;  %10335 = vmatprep.mubr.f32.mxu1 %v20752_v0  ;;  %v17240_v30 = vpack.c.bf16 %v13181_v26, %v13179_v32  ;;  %v13217_v32 = vld [vmem:[%s22529_s9 + $0x7b0] sm:$0xff]  ;;  %v13220_v26 = vld [vmem:[%s22529_s9 + $0x7c8] sm:$0xff] }
 0x72e   : > { %17207 = vmatprep.subr.bf16.mxu1 %v17206_v55  ;;  %v17242_v55 = vpack.c.bf16 %v13186_v29, %v13184_v27  ;;  %v13219_v29 = vld [vmem:[%s22529_s9 + $0x7c0] sm:$0xff] }
 0x731   : > { %17209 = vmatpush1.bf16.msra.mxu1 %v17208_v42  ;;  %v17246_v42 = vpack.c.bf16 %v13190_v34, %v13188_v33  ;;  %v13223_v34 = vld [vmem:[%s22529_s9 + $0x7e0] sm:$0xff] }
 0x732   : > { %17211 = vmatprep.subr.bf16.mxu1 %v17210_v38  ;;  %v13187_v38 = vld [vmem:[%s22529_s9 + $0x6c0] sm:$0xff] }
 0x733   : > { %v17248_v49 = vpack.c.bf16 %v13189_v39, %v13187_v38  ;;  %v13230_v38 = vld [vmem:[%s22529_s9 + $0x818] sm:$0xff] }
 0x735   : > { %17213 = vmatpush1.bf16.msra.mxu1 %v17212_v43  ;;  %v17250_v43 = vpack.c.bf16 %v13194_v41, %v13192_v45  ;;  %v13227_v41 = vld [vmem:[%s22529_s9 + $0x800] sm:$0xff] }
 0x736   : > { %17215 = vmatprep.subr.bf16.mxu1 %v17214_v36  ;;  %v13191_v36 = vld [vmem:[%s22529_s9 + $0x6e0] sm:$0xff] }
 0x737   : > { %v17252_v52 = vpack.c.bf16 %v13193_v47, %v13191_v36  ;;  %v13234_v36 = vld [vmem:[%s22529_s9 + $0x838] sm:$0xff] }
 0x739   : > { %17217 = vmatpush1.bf16.msra.mxu1 %v17216_v53  ;;  %v17254_v53 = vpack.c.bf16 %v13198_v51, %v13196_v50  ;;  %v13231_v51 = vld [vmem:[%s22529_s9 + $0x820] sm:$0xff] }
 0x73a   : > { %17219 = vmatprep.subr.bf16.mxu1 %v17218_v54  ;;  %v13195_v54 = vld [vmem:[%s22529_s9 + $0x700] sm:$0xff] }
 0x73b   : > { %v17256_v58 = vpack.c.bf16 %v13197_v46, %v13195_v54  ;;  %v13238_v54 = vld [vmem:[%s22529_s9 + $0x858] sm:$0xff]  ;;  %v21400_v46 = vld [vmem:[#allocation4] sm:$0xff] }
 0x73d   : > { %17221 = vmatpush1.bf16.msra.mxu1 %v17220_v61  ;;  %v17258_v61 = vpack.c.bf16 %v13202_v57, %v13200_v4 }
 0x73e   : > { %17223 = vmatprep.subr.bf16.mxu1 %v17222_v63  ;;  %v13199_v63 = vld [vmem:[%s22529_s9 + $0x720] sm:$0xff] }
 0x73f   : > { %v17260_v23 = vpack.c.bf16 %v13201_v56, %v13199_v63  ;;  %v13242_v63 = vld [vmem:[%s22529_s9 + $0x878] sm:$0xff] }
 0x740   : > { %10336 = vmatmul.mubr.f32.vlgmr.msra.gmra.mrb[24].mxu1 %v20752_v0 }
 0x741   : > { %17225 = vmatpush1.bf16.msra.mxu1 %v17224_v62  ;;  %10341 = vmatprep.mubr.f32.mxu1 %v20752_v0  ;;  %v17262_v62 = vpack.c.bf16 %v13206_v6, %v13204_v2  ;;  %v13239_v6 = vld [vmem:[%s22529_s9 + $0x860] sm:$0xff] }
 0x742   : > { %17227 = vmatprep.subr.bf16.mxu1 %v17226_v9  ;;  %v13203_v9 = vld [vmem:[%s22529_s9 + $0x740] sm:$0xff] }
 0x743   : > { %v17264_v40 = vpack.c.bf16 %v13205_v8, %v13203_v9  ;;  %v13244_v9 = vld [vmem:[%s22529_s9 + $0x888] sm:$0xff] }
 0x744   : > { %10342 = vmatmul.mubr.f32.gmra.mrb[26].mxu1 %v21002_v31  ;;  %v13180_v31 = vld [vmem:[%s22529_s9 + $0x688] sm:$0xff] }
 0x745   : > { %17229 = vmatpush1.bf16.msra.mxu1 %v17228_v12  ;;  %10347 = vmatprep.mubr.f32.mxu1 %v20752_v0  ;;  %v17238_v28 = vpack.c.bf16 %v13182_v24, %v13180_v31  ;;  %v13207_v12 = vld [vmem:[%s22529_s9 + $0x760] sm:$0xff]  ;;  %v13218_v31 = vld [vmem:[%s22529_s9 + $0x7b8] sm:$0xff] }
 0x746   : > { %17231 = vmatprep.subr.bf16.mxu1 %v17230_v13  ;;  %v13209_v13 = vld [vmem:[%s22529_s9 + $0x770] sm:$0xff] }
 0x747   : > { %v17268_v3 = vpack.c.bf16 %v13209_v13, %v13207_v12  ;;  %v13248_v12 = vld [vmem:[%s22529_s9 + $0x8a8] sm:$0xff]  ;;  %v13250_v13 = vld [vmem:[%s22529_s9 + $0x8b8] sm:$0xff] }
 0x748   : > { %10348 = vmatmul.mubr.f32.gmra.mrb[28].mxu1 %v21211_v21 }
 0x749   : > { %17233 = vmatpush1.bf16.msra.mxu1 %v17232_v59  ;;  %10353 = vmatprep.mubr.f32.mxu1 %v20752_v0  ;;  %v13211_v59 = vld [vmem:[%s22529_s9 + $0x780] sm:$0xff] }
 0x74a   : > { %17235 = vmatprep.subr.bf16.mxu1 %v17234_v18  ;;  %v13213_v18 = vld [vmem:[%s22529_s9 + $0x790] sm:$0xff] }
 0x74b   : > { %v17272_v24 = vpack.c.bf16 %v13213_v18, %v13211_v59  ;;  %v13252_v59 = vld [vmem:[%s22529_s9 + $0x8c8] sm:$0xff]  ;;  %v13254_v18 = vld [vmem:[%s22529_s9 + $0x8d8] sm:$0xff] }
 0x74c   : > { %10354 = vmatmul.mubr.f32.gmra.mrb[30].mxu1 %v10237_v22  ;;  %v13222_v22 = vld [vmem:[%s22529_s9 + $0x7d8] sm:$0xff] }
 0x74d   : > { %17237 = vmatpush1.bf16.msra.mxu1 %v17236_v25  ;;  %10469 = vmatprep.mubr.f32.mxu1 %v20752_v0  ;;  %v17274_v25 = vpack.c.bf16 %v13218_v31, %v13216_v20  ;;  %v17278_v27 = vpack.c.bf16 %v13222_v22, %v13220_v26  ;;  %v17310_v20 = vpack.c.bf16 %v13254_v18, %v13252_v59  ;;  %v13251_v31 = vld [vmem:[%s22529_s9 + $0x8c0] sm:$0xff]  ;;  %v13290_v59 = vld [vmem:[%s22529_s9 + $0x9f8] sm:$0xff] }
 0x74e   : > { %17239 = vmatprep.subr.bf16.mxu1 %v17238_v28  ;;  %v13215_v28 = vld [vmem:[%s22529_s9 + $0x7a0] sm:$0xff] }
 0x74f   : > { %v13255_v22 = vld [vmem:[%s22529_s9 + $0x8e0] sm:$0xff] }
 0x751   : > { %17241 = vmatpush1.bf16.msra.mxu1 %v17240_v30  ;;  %v13221_v30 = vld [vmem:[%s22529_s9 + $0x7d0] sm:$0xff] }
 0x752   : > { %17243 = vmatprep.subr.bf16.mxu1 %v17242_v55  ;;  %v13224_v55 = vld [vmem:[%s22529_s9 + $0x7e8] sm:$0xff]  ;;  %v17280_v1 = vpack.c.bf16 %v13221_v30, %v13219_v29  ;;  %v13262_v29 = vld [vmem:[%s22529_s9 + $0x918] sm:$0xff] }
 0x753   : > { %v17282_v33 = vpack.c.bf16 %v13226_v60, %v13224_v55  ;;  %v13259_v60 = vld [vmem:[%s22529_s9 + $0x900] sm:$0xff] }
 0x755   : > { %17245 = vmatpush1.bf16.msra.mxu1 %v17244_v37  ;;  %v13225_v37 = vld [vmem:[%s22529_s9 + $0x7f0] sm:$0xff] }
 0x756   : > { %17247 = vmatprep.subr.bf16.mxu1 %v17246_v42  ;;  %v13228_v42 = vld [vmem:[%s22529_s9 + $0x808] sm:$0xff]  ;;  %v17284_v39 = vpack.c.bf16 %v13225_v37, %v13223_v34  ;;  %v13266_v34 = vld [vmem:[%s22529_s9 + $0x938] sm:$0xff] }
 0x757   : > { %v17286_v45 = vpack.c.bf16 %v13230_v38, %v13228_v42  ;;  %v13263_v38 = vld [vmem:[%s22529_s9 + $0x920] sm:$0xff] }
 0x759   : > { %17249 = vmatpush1.bf16.msra.mxu1 %v17248_v49  ;;  %v13229_v49 = vld [vmem:[%s22529_s9 + $0x810] sm:$0xff] }
 0x75a   : > { %17251 = vmatprep.subr.bf16.mxu1 %v17250_v43  ;;  %v13232_v43 = vld [vmem:[%s22529_s9 + $0x828] sm:$0xff]  ;;  %v17288_v47 = vpack.c.bf16 %v13229_v49, %v13227_v41  ;;  %v13270_v49 = vld [vmem:[%s22529_s9 + $0x958] sm:$0xff] }
 0x75b   : > { %v17290_v50 = vpack.c.bf16 %v13234_v36, %v13232_v43  ;;  %v13268_v41 = vld [vmem:[%s22529_s9 + $0x948] sm:$0xff] }
 0x75c   : > { %v17326_v36 = vpack.c.bf16 %v13270_v49, %v13268_v41  ;;  %v13303_v49 = vld [vmem:[%s22529_s9 + $0xa60] sm:$0xff] }
 0x75d   : > { %17253 = vmatpush1.bf16.msra.mxu1 %v17252_v52  ;;  %v13233_v52 = vld [vmem:[%s22529_s9 + $0x830] sm:$0xff] }
 0x75e   : > { %17255 = vmatprep.subr.bf16.mxu1 %v17254_v53  ;;  %v13236_v53 = vld [vmem:[%s22529_s9 + $0x848] sm:$0xff]  ;;  %v17292_v4 = vpack.c.bf16 %v13233_v52, %v13231_v51 }
 0x75f   : > { %v17294_v57 = vpack.c.bf16 %v13238_v54, %v13236_v53  ;;  %v21510_v51 = vld [vmem:[#allocation5 + $0x16] sm:$0xff]  ;;  %v13274_v53 = vld [vmem:[%s22529_s9 + $0x978] sm:$0xff] }
 0x760   : > { %10470 = vmatmul.mubr.f32.vlgmr.msra.gmra.mrb[24].mxu1 %v20933_v35  ;;  %v13210_v35 = vld [vmem:[%s22529_s9 + $0x778] sm:$0xff]  ;;  %v13272_v52 = vld [vmem:[%s22529_s9 + $0x968] sm:$0xff] }
 0x761   : > { %17257 = vmatpush1.bf16.msra.mxu1 %v17256_v58  ;;  %10475 = vmatprep.mubr.f32.mxu1 %v20752_v0  ;;  %v17266_v44 = vpack.c.bf16 %v13210_v35, %v13208_v10  ;;  %v13235_v58 = vld [vmem:[%s22529_s9 + $0x840] sm:$0xff] }
 0x762   : > { %17259 = vmatprep.subr.bf16.mxu1 %v17258_v61  ;;  %v13237_v61 = vld [vmem:[%s22529_s9 + $0x850] sm:$0xff]  ;;  %v13243_v35 = vld [vmem:[%s22529_s9 + $0x880] sm:$0xff] }
 0x763   : > { %v17296_v56 = vpack.c.bf16 %v13237_v61, %v13235_v58  ;;  %v13273_v58 = vld [vmem:[%s22529_s9 + $0x970] sm:$0xff] }
 0x764   : > { %10476 = vmatmul.mubr.f32.gmra.mrb[26].mxu1 %v20941_v48  ;;  %v13212_v48 = vld [vmem:[%s22529_s9 + $0x788] sm:$0xff]  ;;  %v21526_v61 = vld [vmem:[#allocation5 + $0x1e] sm:$0xff] }
 0x765   : > { %17261 = vmatpush1.bf16.msra.mxu1 %v17260_v23  ;;  %10481 = vmatprep.mubr.f32.mxu1 %v20752_v0  ;;  %v17270_v15 = vpack.c.bf16 %v13214_v5, %v13212_v48  ;;  %v13241_v23 = vld [vmem:[%s22529_s9 + $0x870] sm:$0xff]  ;;  %v17306_v5 = vpack.c.bf16 %v13250_v13, %v13248_v12  ;;  %v13286_v12 = vld [vmem:[%s22529_s9 + $0x9d8] sm:$0xff] }
 0x766   : > { %17263 = vmatprep.subr.bf16.mxu1 %v17262_v62  ;;  %v10504_v62 = vld [vmem:[#allocation5 + $0x1a] sm:$0xff]  ;;  %v17300_v8 = vpack.c.bf16 %v13241_v23, %v13239_v6  ;;  %v13275_v6 = vld [vmem:[%s22529_s9 + $0x980] sm:$0xff] }
 0x767   : > { %v13277_v23 = vld [vmem:[%s22529_s9 + $0x990] sm:$0xff] }
 0x768   : > { %10482 = vmatmul.mubr.f32.gmra.mrb[28].mxu1 %v21316_v14 }
 0x769   : > { %17265 = vmatpush1.bf16.msra.mxu1 %v17264_v40  ;;  %10487 = vmatprep.mubr.f32.mxu1 %v20752_v0  ;;  %v13245_v40 = vld [vmem:[%s22529_s9 + $0x890] sm:$0xff] }
 0x76a   : > { %17267 = vmatprep.subr.bf16.mxu1 %v17266_v44  ;;  %v10505_v44 = vld [vmem:[#allocation5 + $0x22] sm:$0xf]  ;;  %v17304_v48 = vpack.c.bf16 %v13245_v40, %v13243_v35  ;;  %v13279_v35 = vld [vmem:[%s22529_s9 + $0x9a0] sm:$0xff]  ;;  %v13281_v40 = vld [vmem:[%s22529_s9 + $0x9b0] sm:$0xff] }
 0x76b   : > { %v17340_v13 = vpack.c.bf16 %v13281_v40, %v13279_v35  ;;  %v13320_v35 = vld [vmem:[%s22529_s9 + $0xae8] sm:$0xff]  ;;  %v13322_v40 = vld [vmem:[%s22529_s9 + $0xaf8] sm:$0xff] }
 0x76c   : > { %10488 = vmatmul.mubr.f32.gmra.mrb[30].mxu1 %v10371_v19 }
 0x76d   : > { %17269 = vmatpush1.bf16.msra.mxu1 %v17268_v3  ;;  %10603 = vmatprep.mubr.f32.mxu1 %v20752_v0  ;;  %v17276_v0 = vpack.c.bf16 %v13217_v32, %v13215_v28  ;;  %v13247_v3 = vld [vmem:[%s22529_s9 + $0x8a0] sm:$0xff]  ;;  %v13258_v28 = vld [vmem:[%s22529_s9 + $0x8f8] sm:$0xff] }
 0x76e   : > { %17271 = vmatprep.subr.bf16.mxu1 %v17270_v15  ;;  %v13249_v15 = vld [vmem:[%s22529_s9 + $0x8b0] sm:$0xff] }
 0x76f   : > { %v17308_v19 = vpack.c.bf16 %v13249_v15, %v13247_v3  ;;  %v13285_v3 = vld [vmem:[%s22529_s9 + $0x9d0] sm:$0xff]  ;;  %v13288_v15 = vld [vmem:[%s22529_s9 + $0x9e8] sm:$0xff] }
 0x771   : > { %17273 = vmatpush1.bf16.msra.mxu1 %v17272_v24  ;;  %v13253_v24 = vld [vmem:[%s22529_s9 + $0x8d0] sm:$0xff] }
 0x772   : > { %17275 = vmatprep.subr.bf16.mxu1 %v17274_v25  ;;  %v13256_v25 = vld [vmem:[%s22529_s9 + $0x8e8] sm:$0xff]  ;;  %v17312_v32 = vpack.c.bf16 %v13253_v24, %v13251_v31  ;;  %v13289_v31 = vld [vmem:[%s22529_s9 + $0x9f0] sm:$0xff] }
 0x773   : > { %v17314_v26 = vpack.c.bf16 %v13258_v28, %v13256_v25  ;;  %v13292_v24 = vld [vmem:[%s22529_s9 + $0xa08] sm:$0xff]  ;;  %v13294_v25 = vld [vmem:[%s22529_s9 + $0xa18] sm:$0xff] }
 0x775   : > { %17277 = vmatpush1.bf16.msra.mxu1 %v17276_v0  ;;  %v13257_v0 = vld [vmem:[%s22529_s9 + $0x8f0] sm:$0xff] }
 0x776   : > { %17279 = vmatprep.subr.bf16.mxu1 %v17278_v27  ;;  %v13260_v27 = vld [vmem:[%s22529_s9 + $0x908] sm:$0xff]  ;;  %v17316_v30 = vpack.c.bf16 %v13257_v0, %v13255_v22  ;;  %v13293_v22 = vld [vmem:[%s22529_s9 + $0xa10] sm:$0xff] }
 0x777   : > { %v17318_v55 = vpack.c.bf16 %v13262_v29, %v13260_v27  ;;  %v13296_v0 = vld [vmem:[%s22529_s9 + $0xa28] sm:$0xff]  ;;  %v13298_v27 = vld [vmem:[%s22529_s9 + $0xa38] sm:$0xff] }
 0x779   : > { %17281 = vmatpush1.bf16.msra.mxu1 %v17280_v1  ;;  %v13261_v1 = vld [vmem:[%s22529_s9 + $0x910] sm:$0xff] }
 0x77a   : > { %17283 = vmatprep.subr.bf16.mxu1 %v17282_v33  ;;  %v13264_v33 = vld [vmem:[%s22529_s9 + $0x928] sm:$0xff]  ;;  %v17320_v37 = vpack.c.bf16 %v13261_v1, %v13259_v60  ;;  %v13297_v60 = vld [vmem:[%s22529_s9 + $0xa30] sm:$0xff] }
 0x77b   : > { %v17322_v42 = vpack.c.bf16 %v13266_v34, %v13264_v33  ;;  %v13300_v1 = vld [vmem:[%s22529_s9 + $0xa48] sm:$0xff]  ;;  %v13302_v33 = vld [vmem:[%s22529_s9 + $0xa58] sm:$0xff] }
 0x77d   : > { %17285 = vmatpush1.bf16.msra.mxu1 %v17284_v39  ;;  %v13265_v39 = vld [vmem:[%s22529_s9 + $0x930] sm:$0xff] }
 0x77e   : > { %17287 = vmatprep.subr.bf16.mxu1 %v17286_v45  ;;  %v10636_v45 = vld [vmem:[#allocation5 + $0xe] sm:$0xff]  ;;  %v17324_v43 = vpack.c.bf16 %v13265_v39, %v13263_v38  ;;  %v13301_v38 = vld [vmem:[%s22529_s9 + $0xa50] sm:$0xff] }
 0x77f   : > { %v13304_v39 = vld [vmem:[%s22529_s9 + $0xa68] sm:$0xff] }
 0x780   : > { %10604 = vmatmul.mubr.f32.vlgmr.msra.gmra.mrb[24].mxu1 %v20935_v7  ;;  %v13240_v7 = vld [vmem:[%s22529_s9 + $0x868] sm:$0xff] }
 0x781   : > { %17289 = vmatpush1.bf16.msra.mxu1 %v17288_v47  ;;  %10609 = vmatprep.mubr.f32.mxu1 %v21400_v46  ;;  %v17298_v2 = vpack.c.bf16 %v13242_v63, %v13240_v7  ;;  %v13267_v47 = vld [vmem:[%s22529_s9 + $0x940] sm:$0xff]  ;;  %v13276_v7 = vld [vmem:[%s22529_s9 + $0x988] sm:$0xff]  ;;  %v13278_v63 = vld [vmem:[%s22529_s9 + $0x998] sm:$0xff] }
 0x782   : > { %17291 = vmatprep.subr.bf16.mxu1 %v17290_v50  ;;  %v13269_v50 = vld [vmem:[%s22529_s9 + $0x950] sm:$0xff] }
 0x783   : > { %v17328_v54 = vpack.c.bf16 %v13269_v50, %v13267_v47  ;;  %v13310_v47 = vld [vmem:[%s22529_s9 + $0xa98] sm:$0xff] }
 0x784   : > { %10610 = vmatmul.mubr.f32.gmra.mrb[26].mxu1 %v20943_v11  ;;  %v13246_v11 = vld [vmem:[%s22529_s9 + $0x898] sm:$0xff] }
 0x785   : > { %17293 = vmatpush1.bf16.msra.mxu1 %v17292_v4  ;;  %10615 = vmatprep.mubr.f32.mxu1 %v21400_v46  ;;  %v17302_v10 = vpack.c.bf16 %v13246_v11, %v13244_v9  ;;  %v17330_v4 = vpack.c.bf16 %v13274_v53, %v13272_v52  ;;  %v13280_v9 = vld [vmem:[%s22529_s9 + $0x9a8] sm:$0xff]  ;;  %v13282_v11 = vld [vmem:[%s22529_s9 + $0x9b8] sm:$0xff]  ;;  %v13307_v53 = vld [vmem:[%s22529_s9 + $0xa80] sm:$0xff] }
 0x786   : > { %17295 = vmatprep.subr.bf16.mxu1 %v17294_v57  ;;  %v13271_v57 = vld [vmem:[%s22529_s9 + $0x960] sm:$0xff] }
 0x788   : > { %10616 = vmatmul.mubr.f32.gmra.mrb[28].mxu1 %v10504_v62  ;;  %v10639_v62 = vld [vmem:[#allocation5 + $0x26] sm:$0xf] }
 0x789   : > { %17297 = vmatpush1.bf16.msra.mxu1 %v17296_v56  ;;  %10621 = vmatprep.mubr.f32.mxu1 %v21400_v46  ;;  %v17332_v56 = vpack.c.bf16 %v13273_v58, %v13271_v57  ;;  %v13312_v57 = vld [vmem:[%s22529_s9 + $0xaa8] sm:$0xff]  ;;  %v13314_v58 = vld [vmem:[%s22529_s9 + $0xab8] sm:$0xff] }
 0x78a   : > { %17299 = vmatprep.subr.bf16.mxu1 %v17298_v2  ;;  %v17334_v2 = vpack.c.bf16 %v13278_v63, %v13276_v7  ;;  %v17370_v63 = vpack.c.bf16 %v13314_v58, %v13312_v57  ;;  %v13344_v57 = vld [vmem:[%s22529_s9 + $0xba8] sm:$0xff]  ;;  %v13346_v58 = vld [vmem:[%s22529_s9 + $0xbb8] sm:$0xff] }
 0x78c   : > { %10622 = vmatmul.mubr.f32.gmra.mrb[30].mxu1 %v10505_v44  ;;  %v13284_v44 = vld [vmem:[%s22529_s9 + $0x9c8] sm:$0xff] }
 0x78d   : > { %17301 = vmatpush1.bf16.msra.mxu1 %v17300_v8  ;;  %10737 = vmatprep.mubr.f32.mxu1 %v21400_v46  ;;  %v17336_v8 = vpack.c.bf16 %v13277_v23, %v13275_v6  ;;  %v13316_v6 = vld [vmem:[%s22529_s9 + $0xac8] sm:$0xff]  ;;  %v13318_v23 = vld [vmem:[%s22529_s9 + $0xad8] sm:$0xff] }
 0x78e   : > { %17303 = vmatprep.subr.bf16.mxu1 %v17302_v10  ;;  %v17338_v10 = vpack.c.bf16 %v13282_v11, %v13280_v9  ;;  %v17374_v9 = vpack.c.bf16 %v13318_v23, %v13316_v6  ;;  %v13315_v11 = vld [vmem:[%s22529_s9 + $0xac0] sm:$0xff]  ;;  %v13348_v6 = vld [vmem:[%s22529_s9 + $0xbc8] sm:$0xff]  ;;  %v13350_v23 = vld [vmem:[%s22529_s9 + $0xbd8] sm:$0xff] }
 0x791   : > { %17305 = vmatpush1.bf16.msra.mxu1 %v17304_v48  ;;  %v17342_v48 = vpack.c.bf16 %v13286_v12, %v13284_v44 }
 0x792   : > { %17307 = vmatprep.subr.bf16.mxu1 %v17306_v5  ;;  %v13283_v5 = vld [vmem:[%s22529_s9 + $0x9c0] sm:$0xff] }
 0x793   : > { %v17344_v18 = vpack.c.bf16 %v13285_v3, %v13283_v5  ;;  %v13321_v5 = vld [vmem:[%s22529_s9 + $0xaf0] sm:$0xff] }
 0x795   : > { %17309 = vmatpush1.bf16.msra.mxu1 %v17308_v19  ;;  %v17346_v19 = vpack.c.bf16 %v13290_v59, %v13288_v15  ;;  %v13324_v15 = vld [vmem:[%s22529_s9 + $0xb08] sm:$0xff]  ;;  %v13326_v59 = vld [vmem:[%s22529_s9 + $0xb18] sm:$0xff] }
 0x796   : > { %17311 = vmatprep.subr.bf16.mxu1 %v17310_v20  ;;  %v13287_v20 = vld [vmem:[%s22529_s9 + $0x9e0] sm:$0xff] }
 0x797   : > { %v17348_v28 = vpack.c.bf16 %v13289_v31, %v13287_v20  ;;  %v17382_v20 = vpack.c.bf16 %v13326_v59, %v13324_v15  ;;  %v13323_v31 = vld [vmem:[%s22529_s9 + $0xb00] sm:$0xff]  ;;  %v13356_v15 = vld [vmem:[%s22529_s9 + $0xc08] sm:$0xff]  ;;  %v13358_v59 = vld [vmem:[%s22529_s9 + $0xc18] sm:$0xff] }
 0x799   : > { %17313 = vmatpush1.bf16.msra.mxu1 %v17312_v32  ;;  %v17350_v32 = vpack.c.bf16 %v13294_v25, %v13292_v24  ;;  %v13325_v24 = vld [vmem:[%s22529_s9 + $0xb10] sm:$0xff] }
 0x79a   : > { %17315 = vmatprep.subr.bf16.mxu1 %v17314_v26  ;;  %v13291_v26 = vld [vmem:[%s22529_s9 + $0xa00] sm:$0xff] }
 0x79b   : > { %v17352_v29 = vpack.c.bf16 %v13293_v22, %v13291_v26  ;;  %v17384_v22 = vpack.c.bf16 %v13325_v24, %v13323_v31  ;;  %v13355_v31 = vld [vmem:[%s22529_s9 + $0xc00] sm:$0xff]  ;;  %v13357_v24 = vld [vmem:[%s22529_s9 + $0xc10] sm:$0xff] }
 0x79d   : > { %17317 = vmatpush1.bf16.msra.mxu1 %v17316_v30  ;;  %v17354_v30 = vpack.c.bf16 %v13298_v27, %v13296_v0  ;;  %v13327_v27 = vld [vmem:[%s22529_s9 + $0xb20] sm:$0xff] }
 0x79e   : > { %17319 = vmatprep.subr.bf16.mxu1 %v17318_v55  ;;  %v13295_v55 = vld [vmem:[%s22529_s9 + $0xa20] sm:$0xff] }
 0x79f   : > { %v17356_v34 = vpack.c.bf16 %v13297_v60, %v13295_v55  ;;  %v10904_v55 = vld [vmem:[#allocation5 + $0x10] sm:$0xff] }
 0x7a0   : > { %10738 = vmatmul.mubr.f32.vlgmr.msra.gmra.mrb[24].mxu1 %v10636_v45  ;;  %v13332_v60 = vld [vmem:[%s22529_s9 + $0xb48] sm:$0xff] }
 0x7a1   : > { %17321 = vmatpush1.bf16.msra.mxu1 %v17320_v37  ;;  %10743 = vmatprep.mubr.f32.mxu1 %v21400_v46  ;;  %v17358_v37 = vpack.c.bf16 %v13302_v33, %v13300_v1  ;;  %v13334_v1 = vld [vmem:[%s22529_s9 + $0xb58] sm:$0xff] }
 0x7a2   : > { %17323 = vmatprep.subr.bf16.mxu1 %v17322_v42  ;;  %v13299_v42 = vld [vmem:[%s22529_s9 + $0xa40] sm:$0xff] }
 0x7a3   : > { %v17360_v45 = vpack.c.bf16 %v13301_v38, %v13299_v42  ;;  %v13331_v42 = vld [vmem:[%s22529_s9 + $0xb40] sm:$0xff]  ;;  %v13333_v38 = vld [vmem:[%s22529_s9 + $0xb50] sm:$0xff] }
 0x7a4   : > { %10744 = vmatmul.mubr.f32.gmra.mrb[26].mxu1 %v21510_v51 }
 0x7a5   : > { %17325 = vmatpush1.bf16.msra.mxu1 %v17324_v43  ;;  %10749 = vmatprep.mubr.f32.mxu1 %v21400_v46  ;;  %v13305_v43 = vld [vmem:[%s22529_s9 + $0xa70] sm:$0xff] }
 0x7a6   : > { %17327 = vmatprep.subr.bf16.mxu1 %v17326_v36  ;;  %v21631_v36 = vld [vmem:[#allocation5 + $0x1f] sm:$0xff]  ;;  %v17364_v50 = vpack.c.bf16 %v13305_v43, %v13303_v49  ;;  %v13335_v49 = vld [vmem:[%s22529_s9 + $0xb60] sm:$0xff] }
 0x7a7   : > { %v13337_v43 = vld [vmem:[%s22529_s9 + $0xb70] sm:$0xff] }
 0x7a8   : > { %10750 = vmatmul.mubr.f32.gmra.mrb[28].mxu1 %v21526_v61 }
 0x7a9   : > { %17329 = vmatpush1.bf16.msra.mxu1 %v17328_v54  ;;  %10755 = vmatprep.mubr.f32.mxu1 %v21400_v46  ;;  %v13309_v54 = vld [vmem:[%s22529_s9 + $0xa90] sm:$0xff] }
 0x7aa   : > { %17331 = vmatprep.subr.bf16.mxu1 %v17330_v4  ;;  %v10773_v4 = vld [vmem:[#allocation5 + $0x27] sm:$0xf]  ;;  %v17368_v7 = vpack.c.bf16 %v13309_v54, %v13307_v53  ;;  %v13341_v54 = vld [vmem:[%s22529_s9 + $0xb90] sm:$0xff] }
 0x7ab   : > { %v13339_v53 = vld [vmem:[%s22529_s9 + $0xb80] sm:$0xff] }
 0x7ac   : > { %10756 = vmatmul.mubr.f32.gmra.mrb[30].mxu1 %v10639_v62 }
 0x7ad   : > { %17333 = vmatpush1.bf16.msra.mxu1 %v17332_v56  ;;  %10871 = vmatprep.mubr.f32.mxu1 %v21400_v46  ;;  %v13311_v56 = vld [vmem:[%s22529_s9 + $0xaa0] sm:$0xff] }
 0x7ae   : > { %17335 = vmatprep.subr.bf16.mxu1 %v17334_v2  ;;  %v13313_v2 = vld [vmem:[%s22529_s9 + $0xab0] sm:$0xff] }
 0x7af   : > { %v17372_v62 = vpack.c.bf16 %v13313_v2, %v13311_v56  ;;  %v13343_v56 = vld [vmem:[%s22529_s9 + $0xba0] sm:$0xff]  ;;  %v13345_v2 = vld [vmem:[%s22529_s9 + $0xbb0] sm:$0xff] }
 0x7b1   : > { %17337 = vmatpush1.bf16.msra.mxu1 %v17336_v8  ;;  %v13317_v8 = vld [vmem:[%s22529_s9 + $0xad0] sm:$0xff] }
 0x7b2   : > { %17339 = vmatprep.subr.bf16.mxu1 %v17338_v10  ;;  %v17376_v12 = vpack.c.bf16 %v13317_v8, %v13315_v11  ;;  %v13347_v11 = vld [vmem:[%s22529_s9 + $0xbc0] sm:$0xff]  ;;  %v13349_v8 = vld [vmem:[%s22529_s9 + $0xbd0] sm:$0xff] }
 0x7b5   : > { %17341 = vmatpush1.bf16.msra.mxu1 %v17340_v13  ;;  %v17378_v13 = vpack.c.bf16 %v13322_v40, %v13320_v35  ;;  %v13352_v35 = vld [vmem:[%s22529_s9 + $0xbe8] sm:$0xff]  ;;  %v13354_v40 = vld [vmem:[%s22529_s9 + $0xbf8] sm:$0xff] }
 0x7b6   : > { %17343 = vmatprep.subr.bf16.mxu1 %v17342_v48  ;;  %v13319_v48 = vld [vmem:[%s22529_s9 + $0xae0] sm:$0xff] }
 0x7b9   : > { %17345 = vmatpush1.bf16.msra.mxu1 %v17344_v18 }
 0x7ba   : > { %17347 = vmatprep.subr.bf16.mxu1 %v17346_v19  ;;  %v17380_v19 = vpack.c.bf16 %v13321_v5, %v13319_v48  ;;  %v13351_v48 = vld [vmem:[%s22529_s9 + $0xbe0] sm:$0xff]  ;;  %v13353_v5 = vld [vmem:[%s22529_s9 + $0xbf0] sm:$0xff] }
 0x7bd   : > { %17349 = vmatpush1.bf16.msra.mxu1 %v17348_v28  ;;  %v13328_v28 = vld [vmem:[%s22529_s9 + $0xb28] sm:$0xff] }
 0x7be   : > { %17351 = vmatprep.subr.bf16.mxu1 %v17350_v32  ;;  %v13330_v32 = vld [vmem:[%s22529_s9 + $0xb38] sm:$0xff] }
 0x7bf   : > { %v17386_v0 = vpack.c.bf16 %v13330_v32, %v13328_v28  ;;  %v13360_v28 = vld [vmem:[%s22529_s9 + $0xc28] sm:$0xff]  ;;  %v13362_v32 = vld [vmem:[%s22529_s9 + $0xc38] sm:$0xff] }
 0x7c0   : > { %10872 = vmatmul.mubr.f32.vlgmr.msra.gmra.mrb[24].mxu1 %v21090_v17  ;;  %v13306_v17 = vld [vmem:[%s22529_s9 + $0xa78] sm:$0xff] }
 0x7c1   : > { %17353 = vmatpush1.bf16.msra.mxu1 %v17352_v29  ;;  %10877 = vmatprep.mubr.f32.mxu1 %v21400_v46  ;;  %v17362_v41 = vpack.c.bf16 %v13306_v17, %v13304_v39  ;;  %v13329_v29 = vld [vmem:[%s22529_s9 + $0xb30] sm:$0xff]  ;;  %v13336_v39 = vld [vmem:[%s22529_s9 + $0xb68] sm:$0xff]  ;;  %v13338_v17 = vld [vmem:[%s22529_s9 + $0xb78] sm:$0xff] }
 0x7c2   : > { %17355 = vmatprep.subr.bf16.mxu1 %v17354_v30 }
 0x7c4   : > { %10878 = vmatmul.mubr.f32.gmra.mrb[26].mxu1 %v21106_v16  ;;  %v13308_v16 = vld [vmem:[%s22529_s9 + $0xa88] sm:$0xff] }
 0x7c5   : > { %17357 = vmatpush1.bf16.msra.mxu1 %v17356_v34  ;;  %10883 = vmatprep.mubr.f32.mxu1 %v21400_v46  ;;  %v17366_v52 = vpack.c.bf16 %v13310_v47, %v13308_v16  ;;  %v17388_v34 = vpack.c.bf16 %v13329_v29, %v13327_v27  ;;  %v21751_v16 = vld [vmem:[#allocation5 + $0x20] sm:$0xff]  ;;  %v13359_v27 = vld [vmem:[%s22529_s9 + $0xc20] sm:$0xff]  ;;  %v13361_v29 = vld [vmem:[%s22529_s9 + $0xc30] sm:$0xff] }
 0x7c6   : > { %17359 = vmatprep.subr.bf16.mxu1 %v17358_v37  ;;  %v17390_v37 = vpack.c.bf16 %v13334_v1, %v13332_v60  ;;  %v13342_v47 = vld [vmem:[%s22529_s9 + $0xb98] sm:$0xff]  ;;  %v13364_v60 = vld [vmem:[%s22529_s9 + $0xc48] sm:$0xff] }
 0x7c7   : > { %v13366_v1 = vld [vmem:[%s22529_s9 + $0xc58] sm:$0xff] }
 0x7c8   : > { %10884 = vmatmul.mubr.f32.gmra.mrb[28].mxu1 %v21631_v36 }
 0x7c9   : > { %17361 = vmatpush1.bf16.msra.mxu1 %v17360_v45  ;;  %10889 = vmatprep.mubr.f32.mxu1 %v21400_v46  ;;  %v17392_v45 = vpack.c.bf16 %v13333_v38, %v13331_v42  ;;  %v13363_v42 = vld [vmem:[%s22529_s9 + $0xc40] sm:$0xff]  ;;  %v13365_v38 = vld [vmem:[%s22529_s9 + $0xc50] sm:$0xff] }
 0x7ca   : > { %17363 = vmatprep.subr.bf16.mxu1 %v17362_v41  ;;  %v17394_v41 = vpack.c.bf16 %v13338_v17, %v13336_v39  ;;  %v13368_v39 = vld [vmem:[%s22529_s9 + $0xc68] sm:$0xff]  ;;  %v13370_v17 = vld [vmem:[%s22529_s9 + $0xc78] sm:$0xff] }
 0x7cc   : > { %10890 = vmatmul.mubr.f32.gmra.mrb[30].mxu1 %v10773_v4  ;;  %v10907_v4 = vld [vmem:[#allocation5 + $0x28] sm:$0xf] }
 0x7cd   : > { %17365 = vmatpush1.bf16.msra.mxu1 %v17364_v50  ;;  %11005 = vmatprep.mubr.f32.mxu1 %v21400_v46  ;;  %v17396_v50 = vpack.c.bf16 %v13337_v43, %v13335_v49  ;;  %v13367_v49 = vld [vmem:[%s22529_s9 + $0xc60] sm:$0xff]  ;;  %v13369_v43 = vld [vmem:[%s22529_s9 + $0xc70] sm:$0xff] }
 0x7ce   : > { %17367 = vmatprep.subr.bf16.mxu1 %v17366_v52 }
 0x7d1   : > { %17369 = vmatpush1.bf16.msra.mxu1 %v17368_v7  ;;  %v17400_v7 = vpack.c.bf16 %v13341_v54, %v13339_v53  ;;  %v13371_v54 = vld [vmem:[%s22529_s9 + $0xc80] sm:$0xff] }
 0x7d2   : > { %17371 = vmatprep.subr.bf16.mxu1 %v17370_v63  ;;  %v21672_v10 = vpop.f32.mrb[68].mxu0  ;;  %v17402_v63 = vpack.c.bf16 %v13346_v58, %v13344_v57  ;;  %v13376_v57 = vld [vmem:[%s22529_s9 + $0xca8] sm:$0xff]  ;;  %v13378_v58 = vld [vmem:[%s22529_s9 + $0xcb8] sm:$0xff] }
 0x7d3   : > { %v21680_v44 = vpop.f32.mrb[69].mxu0 }
 0x7d5   : > { %17373 = vmatpush1.bf16.msra.mxu1 %v17372_v62  ;;  %v17404_v62 = vpack.c.bf16 %v13345_v2, %v13343_v56  ;;  %v11827_v56 = vld [vmem:[%s22531_s11 + $0x18] sm:$0xff]  ;;  %v11824_v2 = vld [vmem:[%s22531_s11] sm:$0xff] }
 0x7d6   : > { %17375 = vmatprep.subr.bf16.mxu1 %v17374_v9  ;;  %v21688_v3 = vpop.f32.mrb[70].mxu0  ;;  %v17406_v9 = vpack.c.bf16 %v13350_v23, %v13348_v6 }
 0x7d7   : > { %v21696_v18 = vpop.f32.mrb[71].mxu0 }
 0x7d9   : > { %17377 = vmatpush1.bf16.msra.mxu1 %v17376_v12  ;;  %v17408_v12 = vpack.c.bf16 %v13349_v8, %v13347_v11  ;;  %v11831_v11 = vld [vmem:[%s22531_s11 + $0x38] sm:$0xff]  ;;  %v17434_v8 = vpack.c.bf16 %v13378_v58, %v13376_v57 }
 0x7da   : > { %17379 = vmatprep.subr.bf16.mxu1 %v17378_v13  ;;  %v21704_v25 = vpop.f32.mrb[72].mxu0  ;;  %v17410_v13 = vpack.c.bf16 %v13354_v40, %v13352_v35  ;;  %v13377_v35 = vld [vmem:[%s22529_s9 + $0xcb0] sm:$0xff]  ;;  %v13402_v57 = vld [vmem:[%s22529_s9 + $0xd78] sm:$0xff] }
 0x7db   : > { %v21712_v26 = vpop.f32.mrb[73].mxu0 }
 0x7dd   : > { %17381 = vmatpush1.bf16.msra.mxu1 %v17380_v19  ;;  %v17412_v19 = vpack.c.bf16 %v13353_v5, %v13351_v48  ;;  %v11830_v48 = vld [vmem:[%s22531_s11 + $0x30] sm:$0xff]  ;;  %v13380_v5 = vld [vmem:[%s22529_s9 + $0xcc8] sm:$0xff] }
 0x7de   : > { %17383 = vmatprep.subr.bf16.mxu1 %v17382_v20  ;;  %v21720_v30 = vpop.f32.mrb[74].mxu0  ;;  %v17414_v20 = vpack.c.bf16 %v13358_v59, %v13356_v15  ;;  %v13382_v15 = vld [vmem:[%s22529_s9 + $0xcd8] sm:$0xff] }
 0x7df   : > { %v21728_v33 = vpop.f32.mrb[75].mxu0 }
 0x7e0   : > { %11006 = vmatmul.mubr.f32.vlgmr.msra.gmra.mrb[24].mxu1 %v10904_v55  ;;  %v11038_v55 = vld [vmem:[#allocation5 + $0x11] sm:$0xff] }
 0x7e1   : > { %17385 = vmatpush1.bf16.msra.mxu1 %v17384_v22  ;;  %11011 = vmatprep.mubr.f32.mxu1 %v21400_v46  ;;  %v17416_v22 = vpack.c.bf16 %v13357_v24, %v13355_v31  ;;  %v13379_v31 = vld [vmem:[%s22529_s9 + $0xcc0] sm:$0xff]  ;;  %v13381_v24 = vld [vmem:[%s22529_s9 + $0xcd0] sm:$0xff] }
 0x7e2   : > { %17387 = vmatprep.subr.bf16.mxu1 %v17386_v0  ;;  %v17418_v0 = vpack.c.bf16 %v13362_v32, %v13360_v28  ;;  %v13384_v28 = vld [vmem:[%s22529_s9 + $0xce8] sm:$0xff]  ;;  %v13386_v32 = vld [vmem:[%s22529_s9 + $0xcf8] sm:$0xff] }
 0x7e4   : > { %11012 = vmatmul.mubr.f32.gmra.mrb[26].mxu1 %v21211_v21  ;;  %v13340_v21 = vld [vmem:[%s22529_s9 + $0xb88] sm:$0xff] }
 0x7e5   : > { %17389 = vmatpush1.bf16.msra.mxu1 %v17388_v34  ;;  %11017 = vmatprep.mubr.f32.mxu1 %v21400_v46  ;;  %v17398_v52 = vpack.c.bf16 %v13342_v47, %v13340_v21  ;;  %v17420_v34 = vpack.c.bf16 %v13361_v29, %v13359_v27  ;;  %v11040_v21 = vld [vmem:[#allocation5 + $0x21] sm:$0xff]  ;;  %v13372_v47 = vld [vmem:[%s22529_s9 + $0xc88] sm:$0xff]  ;;  %v13385_v29 = vld [vmem:[%s22529_s9 + $0xcf0] sm:$0xff] }
 0x7e6   : > { %17391 = vmatprep.subr.bf16.mxu1 %v17390_v37  ;;  %v17422_v37 = vpack.c.bf16 %v13366_v1, %v13364_v60  ;;  %v13383_v27 = vld [vmem:[%s22529_s9 + $0xce0] sm:$0xff]  ;;  %v13390_v60 = vld [vmem:[%s22529_s9 + $0xd18] sm:$0xff] }
 0x7e7   : > { %v17444_v1 = vpack.c.bf16 %v13385_v29, %v13383_v27  ;;  %v13415_v29 = vld [vmem:[%s22529_s9 + $0xde0] sm:$0xff] }
 0x7e8   : > { %11018 = vmatmul.mubr.f32.gmra.mrb[28].mxu1 %v21751_v16 }
 0x7e9   : > { %17393 = vmatpush1.bf16.msra.mxu1 %v17392_v45  ;;  %11023 = vmatprep.mubr.f32.mxu1 %v21400_v46  ;;  %v17424_v45 = vpack.c.bf16 %v13365_v38, %v13363_v42  ;;  %v13389_v42 = vld [vmem:[%s22529_s9 + $0xd10] sm:$0xff]  ;;  %v13392_v38 = vld [vmem:[%s22529_s9 + $0xd28] sm:$0xff] }
 0x7ea   : > { %17395 = vmatprep.subr.bf16.mxu1 %v17394_v41  ;;  %v17426_v41 = vpack.c.bf16 %v13370_v17, %v13368_v39  ;;  %v13394_v39 = vld [vmem:[%s22529_s9 + $0xd38] sm:$0xff] }
 0x7ec   : > { %11024 = vmatmul.mubr.f32.gmra.mrb[30].mxu1 %v10907_v4  ;;  %v13373_v4 = vld [vmem:[%s22529_s9 + $0xc90] sm:$0xff] }
 0x7ed   : > { %17397 = vmatpush1.bf16.msra.mxu1 %v17396_v50  ;;  %11139 = vmatprep.mubr.f32.mxu1 %v21400_v46  ;;  %v17428_v50 = vpack.c.bf16 %v13369_v43, %v13367_v49  ;;  %v17432_v6 = vpack.c.bf16 %v13373_v4, %v13371_v54  ;;  %v13393_v49 = vld [vmem:[%s22529_s9 + $0xd30] sm:$0xff]  ;;  %v13400_v4 = vld [vmem:[%s22529_s9 + $0xd68] sm:$0xff] }
 0x7ee   : > { %17399 = vmatprep.subr.bf16.mxu1 %v17398_v52  ;;  %v11041_v52 = vld [vmem:[#allocation5 + $0x29] sm:$0xf]  ;;  %v11172_v43 = vld [vmem:[#allocation5 + $0x15] sm:$0xff]  ;;  %v11173_v54 = vld [vmem:[#allocation5 + $0x1d] sm:$0xff] }
 0x7f1   : > { %17401 = vmatpush1.bf16.msra.mxu1 %v17400_v7  ;;  %v13375_v7 = vld [vmem:[%s22529_s9 + $0xca0] sm:$0xff] }
 0x7f2   : > { %17403 = vmatprep.subr.bf16.mxu1 %v17402_v63  ;;  %v11825_v63 = vld [vmem:[%s22531_s11 + $0x8] sm:$0xff] }
 0x7f3   : > { %v17542_v23 = vpack.c.bf16 %v11827_v56, %v11825_v63  ;;  %v13399_v63 = vld [vmem:[%s22529_s9 + $0xd60] sm:$0xff]  ;;  %v13401_v56 = vld [vmem:[%s22529_s9 + $0xd70] sm:$0xff] }
 0x7f5   : > { %17405 = vmatpush1.bf16.msra.mxu1 %v17404_v62  ;;  %v11826_v62 = vld [vmem:[%s22531_s11 + $0x10] sm:$0xff]  ;;  %17543 = vmatprep.subr.bf16.mxu0 %v17542_v23  ;;  %v13406_v23 = vld [vmem:[%s22529_s9 + $0xd98] sm:$0xff] }
 0x7f6   : > { %17407 = vmatprep.subr.bf16.mxu1 %v17406_v9  ;;  %v11829_v9 = vld [vmem:[%s22531_s11 + $0x28] sm:$0xff]  ;;  %v17544_v40 = vpack.c.bf16 %v11826_v62, %v11824_v2  ;;  %v11174_v2 = vld [vmem:[#allocation5 + $0x25] sm:$0xff]  ;;  %v17460_v62 = vpack.c.bf16 %v13401_v56, %v13399_v63 }
 0x7f7   : > { %v11308_v63 = vld [vmem:[#allocation5 + $0x26] sm:$0xff]  ;;  %v13436_v56 = vld [vmem:[%s22529_s9 + $0xe88] sm:$0xff] }
 0x7f8   : > { %17545 = vmatpush1.bf16.msra.mxu0 %v17544_v40  ;;  %v13408_v40 = vld [vmem:[%s22529_s9 + $0xda8] sm:$0xff] }
 0x7f9   : > { %17409 = vmatpush1.bf16.msra.mxu1 %v17408_v12  ;;  %v17546_v12 = vpack.c.bf16 %v11831_v11, %v11829_v9  ;;  %v11175_v9 = vld [vmem:[#allocation5 + $0x2d] sm:$0xf] }
 0x7fa   : > { %17411 = vmatprep.subr.bf16.mxu1 %v17410_v13  ;;  %v11828_v13 = vld [vmem:[%s22531_s11 + $0x20] sm:$0xff] }
 0x7fb   : > { %v17548_v59 = vpack.c.bf16 %v11830_v48, %v11828_v13  ;;  %17547 = vmatprep.subr.bf16.mxu0 %v17546_v12  ;;  %v13410_v12 = vld [vmem:[%s22529_s9 + $0xdb8] sm:$0xff] }
 0x7fc   : > { %v17466_v48 = vpack.c.bf16 %v13410_v12, %v13408_v40  ;;  %v13439_v12 = vld [vmem:[%s22529_s9 + $0xea0] sm:$0xff] }
 0x7fd   : > { %17413 = vmatpush1.bf16.msra.mxu1 %v17412_v19  ;;  %v17436_v19 = vpack.c.bf16 %v13377_v35, %v13375_v7  ;;  %17549 = vmatpush1.bf16.msra.mxu0 %v17548_v59  ;;  %v17458_v7 = vpack.c.bf16 %v13402_v57, %v13400_v4  ;;  %v13405_v35 = vld [vmem:[%s22529_s9 + $0xd90] sm:$0xff]  ;;  %v13412_v59 = vld [vmem:[%s22529_s9 + $0xdc8] sm:$0xff] }
 0x7fe   : > { %17415 = vmatprep.subr.bf16.mxu1 %v17414_v20  ;;  %v17438_v20 = vpack.c.bf16 %v13382_v15, %v13380_v5  ;;  %v13407_v5 = vld [vmem:[%s22529_s9 + $0xda0] sm:$0xff]  ;;  %v13409_v15 = vld [vmem:[%s22529_s9 + $0xdb0] sm:$0xff] }
 0x800   : > { %11140 = vmatmul.mubr.f32.vlgmr.msra.gmra.mrb[24].mxu1 %v11038_v55  ;;  %v13388_v55 = vld [vmem:[%s22529_s9 + $0xd08] sm:$0xff] }
 0x801   : > { %17417 = vmatpush1.bf16.msra.mxu1 %v17416_v22  ;;  %11145 = vmatprep.mubr.f32.mxu1 %v21400_v46  ;;  %v17440_v22 = vpack.c.bf16 %v13381_v24, %v13379_v31  ;;  %v13411_v24 = vld [vmem:[%s22529_s9 + $0xdc0] sm:$0xff] }
 0x802   : > { %17419 = vmatprep.subr.bf16.mxu1 %v17418_v0  ;;  %v17442_v0 = vpack.c.bf16 %v13386_v32, %v13384_v28  ;;  %v13413_v28 = vld [vmem:[%s22529_s9 + $0xdd0] sm:$0xff]  ;;  %v13416_v32 = vld [vmem:[%s22529_s9 + $0xde8] sm:$0xff] }
 0x804   : > { %11146 = vmatmul.mubr.f32.gmra.mrb[26].mxu1 %v21316_v14  ;;  %v13374_v14 = vld [vmem:[%s22529_s9 + $0xc98] sm:$0xff] }
 0x805   : > { %17421 = vmatpush1.bf16.msra.mxu1 %v17420_v34  ;;  %11151 = vmatprep.mubr.f32.mxu1 %v21400_v46  ;;  %v17430_v53 = vpack.c.bf16 %v13374_v14, %v13372_v47  ;;  %v17446_v34 = vpack.c.bf16 %v13390_v60, %v13388_v55  ;;  %v13398_v47 = vld [vmem:[%s22529_s9 + $0xd58] sm:$0xff]  ;;  %v13417_v55 = vld [vmem:[%s22529_s9 + $0xdf0] sm:$0xff]  ;;  %v13420_v60 = vld [vmem:[%s22529_s9 + $0xe08] sm:$0xff] }
 0x806   : > { %17423 = vmatprep.subr.bf16.mxu1 %v17422_v37  ;;  %v13387_v37 = vld [vmem:[%s22529_s9 + $0xd00] sm:$0xff] }
 0x807   : > { %v17448_v17 = vpack.c.bf16 %v13389_v42, %v13387_v37  ;;  %v13419_v42 = vld [vmem:[%s22529_s9 + $0xe00] sm:$0xff] }
 0x808   : > { %11152 = vmatmul.mubr.f32.gmra.mrb[28].mxu1 %v11040_v21  ;;  %v13396_v21 = vld [vmem:[%s22529_s9 + $0xd48] sm:$0xff] }
 0x809   : > { %17425 = vmatpush1.bf16.msra.mxu1 %v17424_v45  ;;  %11157 = vmatprep.mubr.f32.mxu1 %v21400_v46  ;;  %v17450_v45 = vpack.c.bf16 %v13394_v39, %v13392_v38  ;;  %v13421_v38 = vld [vmem:[%s22529_s9 + $0xe10] sm:$0xff]  ;;  %v13424_v39 = vld [vmem:[%s22529_s9 + $0xe28] sm:$0xff] }
 0x80a   : > { %17427 = vmatprep.subr.bf16.mxu1 %v17426_v41  ;;  %v13391_v41 = vld [vmem:[%s22529_s9 + $0xd20] sm:$0xff] }
 0x80b   : > { %v17452_v14 = vpack.c.bf16 %v13393_v49, %v13391_v41  ;;  %v13423_v49 = vld [vmem:[%s22529_s9 + $0xe20] sm:$0xff] }
 0x80c   : > { %11158 = vmatmul.mubr.f32.gmra.mrb[30].mxu1 %v11041_v52  ;;  %v13395_v52 = vld [vmem:[%s22529_s9 + $0xd40] sm:$0xff] }
 0x80d   : > { %17429 = vmatpush1.bf16.msra.mxu1 %v17428_v50  ;;  %11273 = vmatprep.mubr.f32.mxu1 %v21400_v46  ;;  %v17454_v50 = vpack.c.bf16 %v13398_v47, %v13396_v21  ;;  %v13428_v21 = vld [vmem:[%s22529_s9 + $0xe48] sm:$0xff]  ;;  %v13430_v47 = vld [vmem:[%s22529_s9 + $0xe58] sm:$0xff] }
 0x80e   : > { %17431 = vmatprep.subr.bf16.mxu1 %v17430_v53  ;;  %v13397_v53 = vld [vmem:[%s22529_s9 + $0xd50] sm:$0xff] }
 0x80f   : > { %v17456_v58 = vpack.c.bf16 %v13397_v53, %v13395_v52  ;;  %v13427_v52 = vld [vmem:[%s22529_s9 + $0xe40] sm:$0xff]  ;;  %v13429_v53 = vld [vmem:[%s22529_s9 + $0xe50] sm:$0xff] }
 0x810   : > { %v17488_v4 = vpack.c.bf16 %v13429_v53, %v13427_v52  ;;  %v13464_v52 = vld [vmem:[%s22529_s9 + $0xf68] sm:$0xff]  ;;  %v13466_v53 = vld [vmem:[%s22529_s9 + $0xf78] sm:$0xff] }
 0x811   : > { %17433 = vmatpush1.bf16.msra.mxu1 %v17432_v6  ;;  %v13404_v6 = vld [vmem:[%s22529_s9 + $0xd88] sm:$0xff] }
 0x812   : > { %17435 = vmatprep.subr.bf16.mxu1 %v17434_v8  ;;  %v17462_v11 = vpack.c.bf16 %v13406_v23, %v13404_v6  ;;  %v13403_v8 = vld [vmem:[%s22529_s9 + $0xd80] sm:$0xff] }
 0x813   : > { %v17464_v13 = vpack.c.bf16 %v13405_v35, %v13403_v8  ;;  %v11309_v6 = vld [vmem:[#allocation5 + $0x2e] sm:$0xf]  ;;  %v13442_v8 = vld [vmem:[%s22529_s9 + $0xeb8] sm:$0xff] }
 0x815   : > { %17437 = vmatpush1.bf16.msra.mxu1 %v17436_v19  ;;  %v13414_v19 = vld [vmem:[%s22529_s9 + $0xdd8] sm:$0xff] }
 0x816   : > { %17439 = vmatprep.subr.bf16.mxu1 %v17438_v20  ;;  %v17468_v20 = vpack.c.bf16 %v13409_v15, %v13407_v5  ;;  %v17470_v31 = vpack.c.bf16 %v13414_v19, %v13412_v59  ;;  %v13446_v5 = vld [vmem:[%s22529_s9 + $0xed8] sm:$0xff]  ;;  %v13443_v59 = vld [vmem:[%s22529_s9 + $0xec0] sm:$0xff]  ;;  %v13445_v19 = vld [vmem:[%s22529_s9 + $0xed0] sm:$0xff] }
 0x819   : > { %17441 = vmatpush1.bf16.msra.mxu1 %v17440_v22  ;;  %v13418_v22 = vld [vmem:[%s22529_s9 + $0xdf8] sm:$0xff] }
 0x81a   : > { %17443 = vmatprep.subr.bf16.mxu1 %v17442_v0  ;;  %v17472_v0 = vpack.c.bf16 %v13413_v28, %v13411_v24  ;;  %v17474_v27 = vpack.c.bf16 %v13418_v22, %v13416_v32  ;;  %v17504_v24 = vpack.c.bf16 %v13445_v19, %v13443_v59  ;;  %v13447_v32 = vld [vmem:[%s22529_s9 + $0xee0] sm:$0xff]  ;;  %v13449_v22 = vld [vmem:[%s22529_s9 + $0xef0] sm:$0xff]  ;;  %v13482_v59 = vld [vmem:[%s22529_s9 + $0xff8] sm:$0xff] }
 0x81d   : > { %17445 = vmatpush1.bf16.msra.mxu1 %v17444_v1  ;;  %v13422_v1 = vld [vmem:[%s22529_s9 + $0xe18] sm:$0xff] }
 0x81e   : > { %17447 = vmatprep.subr.bf16.mxu1 %v17446_v34  ;;  %v17476_v34 = vpack.c.bf16 %v13417_v55, %v13415_v29  ;;  %v17478_v37 = vpack.c.bf16 %v13422_v1, %v13420_v60  ;;  %v17508_v29 = vpack.c.bf16 %v13449_v22, %v13447_v32  ;;  %v13451_v60 = vld [vmem:[%s22529_s9 + $0xf00] sm:$0xff]  ;;  %v13453_v1 = vld [vmem:[%s22529_s9 + $0xf10] sm:$0xff] }
 0x81f   : > { %v11574_v32 = vld [vmem:[#allocation5 + $0x18] sm:$0xff]  ;;  %v11576_v22 = vld [vmem:[#allocation5 + $0x28] sm:$0xff] }
 0x820   : > { %11274 = vmatmul.mubr.f32.vlgmr.msra.gmra.mrb[24].mxu1 %v11172_v43  ;;  %v13425_v43 = vld [vmem:[%s22529_s9 + $0xe30] sm:$0xff] }
 0x821   : > { %17449 = vmatpush1.bf16.msra.mxu1 %v17448_v17  ;;  %11279 = vmatprep.mubr.f32.mxu1 %v21400_v46  ;;  %v13426_v17 = vld [vmem:[%s22529_s9 + $0xe38] sm:$0xff] }
 0x822   : > { %17451 = vmatprep.subr.bf16.mxu1 %v17450_v45  ;;  %v17480_v45 = vpack.c.bf16 %v13421_v38, %v13419_v42  ;;  %v17482_v41 = vpack.c.bf16 %v13426_v17, %v13424_v39  ;;  %v17512_v42 = vpack.c.bf16 %v13453_v1, %v13451_v60  ;;  %v13455_v39 = vld [vmem:[%s22529_s9 + $0xf20] sm:$0xff]  ;;  %v13457_v17 = vld [vmem:[%s22529_s9 + $0xf30] sm:$0xff] }
 0x823   : > { %v11834_v60 = vld [vmem:[%s22531_s11 + $0x50] sm:$0xff] }
 0x824   : > { %11280 = vmatmul.mubr.f32.gmra.mrb[26].mxu1 %v11173_v54  ;;  %v13432_v54 = vld [vmem:[%s22529_s9 + $0xe68] sm:$0xff] }
 0x825   : > { %17453 = vmatpush1.bf16.msra.mxu1 %v17452_v14  ;;  %11285 = vmatprep.mubr.f32.mxu1 %v21400_v46  ;;  %v17484_v14 = vpack.c.bf16 %v13425_v43, %v13423_v49  ;;  %v13462_v49 = vld [vmem:[%s22529_s9 + $0xf58] sm:$0xff]  ;;  %v22161_v43 = vld [vmem:[#allocation4] sm:$0xff] }
 0x826   : > { %17455 = vmatprep.subr.bf16.mxu1 %v17454_v50  ;;  %v17486_v50 = vpack.c.bf16 %v13430_v47, %v13428_v21  ;;  %v17516_v21 = vpack.c.bf16 %v13457_v17, %v13455_v39  ;;  %v11838_v39 = vld [vmem:[%s22531_s11 + $0x70] sm:$0xff] }
 0x828   : > { %11286 = vmatmul.mubr.f32.gmra.mrb[28].mxu1 %v11174_v2 }
 0x829   : > { %17457 = vmatpush1.bf16.msra.mxu1 %v17456_v58  ;;  %11291 = vmatprep.mubr.f32.mxu1 %v21400_v46  ;;  %v13431_v58 = vld [vmem:[%s22529_s9 + $0xe60] sm:$0xff] }
 0x82a   : > { %17459 = vmatprep.subr.bf16.mxu1 %v17458_v7  ;;  %v13433_v7 = vld [vmem:[%s22529_s9 + $0xe70] sm:$0xff] }
 0x82b   : > { %v17492_v2 = vpack.c.bf16 %v13433_v7, %v13431_v58  ;;  %v11442_v58 = vld [vmem:[#allocation5 + $0x27] sm:$0xff]  ;;  %v13468_v7 = vld [vmem:[%s22529_s9 + $0xf88] sm:$0xff] }
 0x82c   : > { %11292 = vmatmul.mubr.f32.gmra.mrb[30].mxu1 %v11175_v9  ;;  %v13437_v9 = vld [vmem:[%s22529_s9 + $0xe90] sm:$0xff] }
 0x82d   : > { %17461 = vmatpush1.bf16.msra.mxu1 %v17460_v62  ;;  %11407 = vmatprep.mubr.f32.mxu1 %v21400_v46  ;;  %v13435_v62 = vld [vmem:[%s22529_s9 + $0xe80] sm:$0xff] }
 0x82e   : > { %17463 = vmatprep.subr.bf16.mxu1 %v17462_v11  ;;  %v13440_v11 = vld [vmem:[%s22529_s9 + $0xea8] sm:$0xff]  ;;  %v17496_v35 = vpack.c.bf16 %v13437_v9, %v13435_v62  ;;  %v13474_v62 = vld [vmem:[%s22529_s9 + $0xfb8] sm:$0xff] }
 0x82f   : > { %v17498_v40 = vpack.c.bf16 %v13442_v8, %v13440_v11  ;;  %v13471_v8 = vld [vmem:[%s22529_s9 + $0xfa0] sm:$0xff] }
 0x831   : > { %17465 = vmatpush1.bf16.msra.mxu1 %v17464_v13  ;;  %v13441_v13 = vld [vmem:[%s22529_s9 + $0xeb0] sm:$0xff] }
 0x832   : > { %17467 = vmatprep.subr.bf16.mxu1 %v17466_v48  ;;  %v13444_v48 = vld [vmem:[%s22529_s9 + $0xec8] sm:$0xff] }
 0x833   : > { %v17502_v15 = vpack.c.bf16 %v13446_v5, %v13444_v48  ;;  %v13475_v5 = vld [vmem:[%s22529_s9 + $0xfc0] sm:$0xff] }
 0x835   : > { %17469 = vmatpush1.bf16.msra.mxu1 %v17468_v20  ;;  %v13448_v20 = vld [vmem:[%s22529_s9 + $0xee8] sm:$0xff] }
 0x836   : > { %17471 = vmatprep.subr.bf16.mxu1 %v17470_v31  ;;  %v13450_v31 = vld [vmem:[%s22529_s9 + $0xef8] sm:$0xff] }
 0x837   : > { %v17506_v28 = vpack.c.bf16 %v13450_v31, %v13448_v20  ;;  %v13479_v31 = vld [vmem:[%s22529_s9 + $0xfe0] sm:$0xff] }
 0x839   : > { %17473 = vmatpush1.bf16.msra.mxu1 %v17472_v0  ;;  %v13452_v0 = vld [vmem:[%s22529_s9 + $0xf08] sm:$0xff] }
 0x83a   : > { %17475 = vmatprep.subr.bf16.mxu1 %v17474_v27  ;;  %v13454_v27 = vld [vmem:[%s22529_s9 + $0xf18] sm:$0xff] }
 0x83b   : > { %v17510_v55 = vpack.c.bf16 %v13454_v27, %v13452_v0  ;;  %v11577_v0 = vld [vmem:[#allocation5 + $0x30] sm:$0xf] }
 0x83c   : > { %v11833_v27 = vld [vmem:[%s22531_s11 + $0x48] sm:$0xff] }
 0x83d   : > { %17477 = vmatpush1.bf16.msra.mxu1 %v17476_v34  ;;  %v13456_v34 = vld [vmem:[%s22529_s9 + $0xf28] sm:$0xff] }
 0x83e   : > { %17479 = vmatprep.subr.bf16.mxu1 %v17478_v37  ;;  %v13458_v37 = vld [vmem:[%s22529_s9 + $0xf38] sm:$0xff] }
 0x83f   : > { %v17514_v38 = vpack.c.bf16 %v13458_v37, %v13456_v34  ;;  %v11837_v34 = vld [vmem:[%s22531_s11 + $0x68] sm:$0xff]  ;;  %v11839_v37 = vld [vmem:[%s22531_s11 + $0x78] sm:$0xff] }
 0x840   : > { %11408 = vmatmul.mubr.f32.vlgmr.msra.gmra.mrb[24].mxu1 %v21510_v51  ;;  %v13434_v51 = vld [vmem:[%s22529_s9 + $0xe78] sm:$0xff] }
 0x841   : > { %17481 = vmatpush1.bf16.msra.mxu1 %v17480_v45  ;;  %11413 = vmatprep.mubr.f32.mxu1 %v21400_v46  ;;  %v17490_v57 = vpack.c.bf16 %v13434_v51, %v13432_v54  ;;  %v11440_v45 = vld [vmem:[#allocation5 + $0x17] sm:$0xff]  ;;  %v17522_v51 = vpack.c.bf16 %v13466_v53, %v13464_v52  ;;  %v11844_v53 = vld [vmem:[%s22531_s11 + $0xa0] sm:$0xff] }
 0x842   : > { %17483 = vmatprep.subr.bf16.mxu1 %v17482_v41  ;;  %v13460_v41 = vld [vmem:[%s22529_s9 + $0xf48] sm:$0xff] }
 0x843   : > { %v17518_v47 = vpack.c.bf16 %v13462_v49, %v13460_v41  ;;  %v11843_v41 = vld [vmem:[%s22531_s11 + $0x98] sm:$0xff]  ;;  %v11840_v49 = vld [vmem:[%s22531_s11 + $0x80] sm:$0xff] }
 0x844   : > { %11414 = vmatmul.mubr.f32.gmra.mrb[26].mxu1 %v21526_v61  ;;  %v13438_v61 = vld [vmem:[%s22529_s9 + $0xe98] sm:$0xff] }
 0x845   : > { %17485 = vmatpush1.bf16.msra.mxu1 %v17484_v14  ;;  %11419 = vmatprep.mubr.f32.mxu1 %v21400_v46  ;;  %v17494_v23 = vpack.c.bf16 %v13438_v61, %v13436_v56  ;;  %v13459_v14 = vld [vmem:[%s22529_s9 + $0xf40] sm:$0xff] }
 0x846   : > { %17487 = vmatprep.subr.bf16.mxu1 %v17486_v50  ;;  %v13461_v50 = vld [vmem:[%s22529_s9 + $0xf50] sm:$0xff]  ;;  %v11443_v56 = vld [vmem:[#allocation5 + $0x2f] sm:$0xf] }
 0x847   : > { %v17520_v54 = vpack.c.bf16 %v13461_v50, %v13459_v14  ;;  %v11845_v14 = vld [vmem:[%s22531_s11 + $0xa8] sm:$0xff]  ;;  %v11847_v50 = vld [vmem:[%s22531_s11 + $0xb8] sm:$0xff] }
 0x848   : > { %11420 = vmatmul.mubr.f32.gmra.mrb[28].mxu1 %v11308_v63  ;;  %v17562_v52 = vpack.c.bf16 %v11847_v50, %v11845_v14 }
 0x849   : > { %17489 = vmatpush1.bf16.msra.mxu1 %v17488_v4  ;;  %11425 = vmatprep.mubr.f32.mxu1 %v21400_v46  ;;  %v13463_v4 = vld [vmem:[%s22529_s9 + $0xf60] sm:$0xff] }
 0x84a   : > { %17491 = vmatprep.subr.bf16.mxu1 %v17490_v57  ;;  %v13465_v57 = vld [vmem:[%s22529_s9 + $0xf70] sm:$0xff] }
 0x84b   : > { %v17524_v63 = vpack.c.bf16 %v13465_v57, %v13463_v4  ;;  %v11851_v57 = vld [vmem:[%s22531_s11 + $0xd8] sm:$0xff] }
 0x84c   : > { %11426 = vmatmul.mubr.f32.gmra.mrb[30].mxu1 %v11309_v6  ;;  %v13469_v6 = vld [vmem:[%s22529_s9 + $0xf90] sm:$0xff] }
 0x84d   : > { %17493 = vmatpush1.bf16.msra.mxu1 %v17492_v2  ;;  %11541 = vmatprep.mubr.f32.mxu1 %v21400_v46  ;;  %v17500_v46 = vpack.c.bf16 %v13441_v13, %v13439_v12  ;;  %v13467_v2 = vld [vmem:[%s22529_s9 + $0xf80] sm:$0xff]  ;;  %v13478_v12 = vld [vmem:[%s22529_s9 + $0xfd8] sm:$0xff] }
 0x84e   : > { %17495 = vmatprep.subr.bf16.mxu1 %v17494_v23  ;;  %v13472_v23 = vld [vmem:[%s22529_s9 + $0xfa8] sm:$0xff]  ;;  %v17528_v9 = vpack.c.bf16 %v13469_v6, %v13467_v2  ;;  %v11852_v6 = vld [vmem:[%s22531_s11 + $0xe0] sm:$0xff] }
 0x84f   : > { %v17530_v11 = vpack.c.bf16 %v13474_v62, %v13472_v23  ;;  %v11854_v23 = vld [vmem:[%s22531_s11 + $0xf0] sm:$0xff]  ;;  %v11857_v62 = vld [vmem:[%s22531_s11 + $0x108] sm:$0xff] }
 0x851   : > { %17497 = vmatpush1.bf16.msra.mxu1 %v17496_v35  ;;  %v13473_v35 = vld [vmem:[%s22529_s9 + $0xfb0] sm:$0xff] }
 0x852   : > { %17499 = vmatprep.subr.bf16.mxu1 %v17498_v40  ;;  %v13476_v40 = vld [vmem:[%s22529_s9 + $0xfc8] sm:$0xff]  ;;  %v17532_v13 = vpack.c.bf16 %v13473_v35, %v13471_v8  ;;  %v11856_v35 = vld [vmem:[%s22531_s11 + $0x100] sm:$0xff] }
 0x853   : > { %v17534_v48 = vpack.c.bf16 %v13478_v12, %v13476_v40  ;;  %v11858_v40 = vld [vmem:[%s22531_s11 + $0x110] sm:$0xff]  ;;  %v11861_v12 = vld [vmem:[%s22531_s11 + $0x128] sm:$0xff] }
 0x855   : > { %17501 = vmatpush1.bf16.msra.mxu1 %v17500_v46  ;;  %v13477_v46 = vld [vmem:[%s22529_s9 + $0xfd0] sm:$0xff] }
 0x856   : > { %17503 = vmatprep.subr.bf16.mxu1 %v17502_v15  ;;  %v13480_v15 = vld [vmem:[%s22529_s9 + $0xfe8] sm:$0xff]  ;;  %v17536_v19 = vpack.c.bf16 %v13477_v46, %v13475_v5  ;;  %v11860_v46 = vld [vmem:[%s22531_s11 + $0x120] sm:$0xff] }
 0x857   : > { %v17538_v20 = vpack.c.bf16 %v13482_v59, %v13480_v15  ;;  %v11862_v15 = vld [vmem:[%s22531_s11 + $0x130] sm:$0xff]  ;;  %v11964_v59 = vld [vmem:[%s22533_s13 + $0x8] sm:$0xff] }
 0x859   : > { %17505 = vmatpush1.bf16.msra.mxu1 %v17504_v24  ;;  %v13481_v24 = vld [vmem:[%s22529_s9 + $0xff0] sm:$0xff] }
 0x85a   : > { %17507 = vmatprep.subr.bf16.mxu1 %v17506_v28  ;;  %v17540_v28 = vpack.c.bf16 %v13481_v24, %v13479_v31  ;;  %v11722_v24 = vlaneseq }
 0x85d   : > { %17509 = vmatpush1.bf16.msra.mxu1 %v17508_v29  ;;  %v11835_v29 = vld [vmem:[%s22531_s11 + $0x58] sm:$0xff] }
 0x85e   : > { %17511 = vmatprep.subr.bf16.mxu1 %v17510_v55  ;;  %v17550_v55 = vpack.c.bf16 %v11835_v29, %v11833_v27 }
 0x860   : > { %11542 = vmatmul.mubr.f32.vlgmr.msra.gmra.mrb[24].mxu1 %v11440_v45  ;;  %17551 = vmatprep.subr.bf16.mxu0 %v17550_v55  ;;  %v11841_v45 = vld [vmem:[%s22531_s11 + $0x88] sm:$0xff] }
 0x861   : > { %17513 = vmatpush1.bf16.msra.mxu1 %v17512_v42  ;;  %11547 = vmatprep.mubr.f32.mxu1 %v22161_v43  ;;  %v11836_v42 = vld [vmem:[%s22531_s11 + $0x60] sm:$0xff] }
 0x862   : > { %17515 = vmatprep.subr.bf16.mxu1 %v17514_v38  ;;  %v17554_v38 = vpack.c.bf16 %v11839_v37, %v11837_v34  ;;  %v17556_v17 = vpack.c.bf16 %v11838_v39, %v11836_v42 }
 0x864   : > { %11548 = vmatmul.mubr.f32.gmra.mrb[26].mxu1 %v21631_v36  ;;  %v13470_v36 = vld [vmem:[%s22529_s9 + $0xf98] sm:$0xff] }
 0x865   : > { %17517 = vmatpush1.bf16.msra.mxu1 %v17516_v21  ;;  %11553 = vmatprep.mubr.f32.mxu1 %v22161_v43  ;;  %v17526_v61 = vpack.c.bf16 %v13470_v36, %v13468_v7  ;;  %v11842_v21 = vld [vmem:[%s22531_s11 + $0x90] sm:$0xff] }
 0x866   : > { %17519 = vmatprep.subr.bf16.mxu1 %v17518_v47  ;;  %v17560_v47 = vpack.c.bf16 %v11842_v21, %v11840_v49  ;;  %v11850_v7 = vld [vmem:[%s22531_s11 + $0xd0] sm:$0xff] }
 0x868   : > { %11554 = vmatmul.mubr.f32.gmra.mrb[28].mxu1 %v11442_v58  ;;  %v11848_v58 = vld [vmem:[%s22531_s11 + $0xc0] sm:$0xff] }
 0x869   : > { %17521 = vmatpush1.bf16.msra.mxu1 %v17520_v54  ;;  %11559 = vmatprep.mubr.f32.mxu1 %v22161_v43  ;;  %v11846_v54 = vld [vmem:[%s22531_s11 + $0xb0] sm:$0xff] }
 0x86a   : > { %17523 = vmatprep.subr.bf16.mxu1 %v17522_v51  ;;  %v11849_v51 = vld [vmem:[%s22531_s11 + $0xc8] sm:$0xff]  ;;  %v17564_v4 = vpack.c.bf16 %v11846_v54, %v11844_v53 }
 0x86b   : > { %v17566_v36 = vpack.c.bf16 %v11851_v57, %v11849_v51 }
 0x86c   : > { %11560 = vmatmul.mubr.f32.gmra.mrb[30].mxu1 %v11443_v56  ;;  %v11855_v56 = vld [vmem:[%s22531_s11 + $0xf8] sm:$0xff] }
 0x86d   : > { %17525 = vmatpush1.bf16.msra.mxu1 %v17524_v63  ;;  %11675 = vmatprep.mubr.f32.mxu1 %v22161_v43  ;;  %v11853_v63 = vld [vmem:[%s22531_s11 + $0xe8] sm:$0xff] }
 0x86e   : > { %17527 = vmatprep.subr.bf16.mxu1 %v17526_v61  ;;  %v17568_v61 = vpack.c.bf16 %v11850_v7, %v11848_v58  ;;  %v17570_v2 = vpack.c.bf16 %v11855_v56, %v11853_v63 }
 0x871   : > { %17529 = vmatpush1.bf16.msra.mxu1 %v17528_v9  ;;  %v11859_v9 = vld [vmem:[%s22531_s11 + $0x118] sm:$0xff] }
 0x872   : > { %17531 = vmatprep.subr.bf16.mxu1 %v17530_v11  ;;  %v17572_v11 = vpack.c.bf16 %v11854_v23, %v11852_v6  ;;  %v17574_v8 = vpack.c.bf16 %v11859_v9, %v11857_v62 }
 0x875   : > { %17533 = vmatpush1.bf16.msra.mxu1 %v17532_v13  ;;  %v11863_v13 = vld [vmem:[%s22531_s11 + $0x138] sm:$0xff] }
 0x876   : > { %17535 = vmatprep.subr.bf16.mxu1 %v17534_v48  ;;  %v17576_v48 = vpack.c.bf16 %v11858_v40, %v11856_v35  ;;  %v17578_v5 = vpack.c.bf16 %v11863_v13, %v11861_v12 }
 0x879   : > { %17537 = vmatpush1.bf16.msra.mxu1 %v17536_v19  ;;  %v11966_v19 = vld [vmem:[%s22533_s13 + $0x18] sm:$0xff] }
 0x87a   : > { %17539 = vmatprep.subr.bf16.mxu1 %v17538_v20  ;;  %v17580_v20 = vpack.c.bf16 %v11862_v15, %v11860_v46  ;;  %v17582_v31 = vpack.c.bf16 %v11966_v19, %v11964_v59 }
 0x87d   : > { %17541 = vmatpush1.bf16.msra.mxu1 %v17540_v28  ;;  %v11723_v28 = vshrl.u32 %v11722_v24, 7 }
 0x87f   : > { %v22342_v29 = vsub.s32 0, %v11723_v28 }
 0x880   : > { %11676 = vmatmul.mubr.f32.vlgmr.msra.gmra.mrb[24].mxu1 %v11574_v32 }
 0x881   : > { %11681 = vmatprep.mubr.f32.mxu1 %v22161_v43 }
 0x884   : > { %11682 = vmatmul.mubr.f32.gmra.mrb[26].mxu1 %v21751_v16  ;;  %v11832_v16 = vld [vmem:[%s22531_s11 + $0x40] sm:$0xff] }
 0x885   : > { %11687 = vmatprep.mubr.f32.mxu1 %v22161_v43  ;;  %v17552_v1 = vpack.c.bf16 %v11834_v60, %v11832_v16  ;;  %v11718_v16 = vld [vmem:[%s22530_s10] sm:$0x3]  ;;  %v22348_v60 = vsub.s32 1, %v11723_v28 }
 0x886   : > { %v22353_v37 = vrot.slane %v11718_v16, %v22342_v29 }
 0x887   : > { %17553 = vmatpush1.bf16.msra.mxu0 %v17552_v1  ;;  %v22357_v42 = vrot.slane %v11718_v16, %v22348_v60 }
 0x888   : > { %11688 = vmatmul.mubr.f32.gmra.mrb[28].mxu1 %v11576_v22  ;;  %17555 = vmatprep.subr.bf16.mxu0 %v17554_v38 }
 0x889   : > { %11693 = vmatprep.mubr.f32.mxu1 %v22161_v43  ;;  %v17558_v43 = vpack.c.bf16 %v11843_v41, %v11841_v45 }
 0x88b   : > { %17557 = vmatpush1.bf16.msra.mxu0 %v17556_v17 }
 0x88c   : > { %11694 = vmatmul.mubr.f32.gmra.mrb[30].mxu1 %v11577_v0  ;;  %17559 = vmatprep.subr.bf16.mxu0 %v17558_v43 }
 0x88f   : > { %17561 = vmatpush1.bf16.msra.mxu0 %v17560_v47 }
 0x890   : > { %17563 = vmatprep.subr.bf16.mxu0 %v17562_v52 }
 0x893   : > { %17565 = vmatpush1.bf16.msra.mxu0 %v17564_v4 }
 0x894   : > { %17567 = vmatprep.subr.bf16.mxu0 %v17566_v36 }
 0x897   : > { %17569 = vmatpush1.bf16.msra.mxu0 %v17568_v61 }
 0x898   : > { %17571 = vmatprep.subr.bf16.mxu0 %v17570_v2 }
 0x89b   : > { %17573 = vmatpush1.bf16.msra.mxu0 %v17572_v11 }
 0x89c   : > { %17575 = vmatprep.subr.bf16.mxu0 %v17574_v8 }
 0x89f   : > { %17577 = vmatpush1.bf16.msra.mxu0 %v17576_v48 }
 0x8a0   : > { %17579 = vmatprep.subr.bf16.mxu0 %v17578_v5 }
 0x8a3   : > { %17581 = vmatpush1.bf16.msra.mxu0 %v17580_v20 }
 0x8a4   : > { %17583 = vmatprep.subr.bf16.mxu0 %v17582_v31 }
 0x953   : > { %v11677_v32 = vpop.f32.mrb[24].mxu1 }
 0x954   : > { %v17622_v22 = vadd.f32 %v11677_v32, %v21672_v10  ;;  %v11679_v0 = vpop.f32.mrb[25].mxu1 }
 0x955   : > { %v17623_v27 = vadd.f32 %v11679_v0, %v21680_v44 }
 0x956   : > { %11708 = vst [vmem:[#allocation9] sm:$0xff] %v17622_v22 }
 0x957   : > { %11710 = vst.msk [vmem:[#allocation9 + $0x8] sm:$0xff] %vm11709_vm2, %v17623_v27  ;;  %v11683_v55 = vpop.f32.mrb[26].mxu1 }
 0x958   : > { %v17624_v1 = vadd.f32 %v11683_v55, %v21688_v3  ;;  %v11685_v34 = vpop.f32.mrb[27].mxu1 }
 0x959   : > { %v17625_v10 = vadd.f32 %v11685_v34, %v21696_v18 }
 0x95a   : > { %11711 = vst [vmem:[#allocation9 + $0x10] sm:$0xff] %v17624_v1 }
 0x95b   : > { %11712 = vst.msk [vmem:[#allocation9 + $0x18] sm:$0xff] %vm11709_vm2, %v17625_v10  ;;  %v11689_v44 = vpop.f32.mrb[28].mxu1 }
 0x95c   : > { %v17626_v38 = vadd.f32 %v11689_v44, %v21704_v25  ;;  %v11691_v39 = vpop.f32.mrb[29].mxu1 }
 0x95d   : > { %v11719_v17 = vld [vmem:[#allocation9] sm:$0xf]  ;;  %v11738_v45 = vld [vmem:[#allocation9] sm:$0x80]  ;;  %v17627_v3 = vadd.f32 %v11691_v39, %v21712_v26  ;;  %v11965_v39 = vld [vmem:[%s22533_s13 + $0x10] sm:$0xff] }
 0x95e   : > { %v11732_v41 = vadd.f32 %v22353_v37, %v11719_v17  ;;  %v11742_v18 = vadd.f32 %v11738_v45, %v22353_v37  ;;  %v11739_v49 = vld [vmem:[#allocation9 + $0x8] sm:$0x80]  ;;  %11713 = vst [vmem:[#allocation9 + $0x20] sm:$0xff] %v17626_v38  ;;  %v11720_v43 = vld [vmem:[#allocation9 + $0x8] sm:$0xf] }
 0x95f   : > { %11714 = vst.msk [vmem:[#allocation9 + $0x28] sm:$0xff] %vm11709_vm2, %v17627_v3  ;;  %v11695_v21 = vpop.f32.mrb[30].mxu1  ;;  %v11733_v47 = vadd.f32 %v22357_v42, %v11720_v43  ;;  %v11743_v14 = vadd.f32 %v11739_v49, %v22357_v42  ;;  %v11970_v3 = vld [vmem:[%s22533_s13 + $0x38] sm:$0xff] }
 0x960   : > { %v11734_v25 = vmax.f32 %v11732_v41, 0.0  ;;  %v11746_v50 = vmax.f32 %v11742_v18, 0.0  ;;  %v17628_v52 = vadd.f32 %v11695_v21, %v21720_v30  ;;  %v11697_v53 = vpop.f32.mrb[31].mxu1 }
 0x961   : > { %v11740_v26 = vld [vmem:[#allocation9 + $0x10] sm:$0x7]  ;;  %v17629_v54 = vadd.f32 %v11697_v53, %v21728_v33  ;;  %v11735_v51 = vmax.f32 %v11733_v47, 0.0  ;;  %v11766_v4 = vld [vmem:[#allocation9 + $0x10] sm:$0xc0]  ;;  %v11747_v57 = vmax.f32 %v11743_v14, 0.0 }
 0x962   : > { %11736 = vst [vmem:[#allocation6] sm:$0xf] %v11734_v25  ;;  %v11744_v58 = vadd.f32 %v11740_v26, %v22353_v37  ;;  %v11741_v7 = vld [vmem:[#allocation9 + $0x18] sm:$0x7]  ;;  %11715 = vst [vmem:[#allocation9 + $0x30] sm:$0xf] %v17628_v52  ;;  %v11770_v63 = vadd.f32 %v11766_v4, %v22353_v37 }
 0x963   : > { %v11767_v36 = vld [vmem:[#allocation9 + $0x18] sm:$0xc0]  ;;  %11717 = vst.msk [vmem:[#allocation9 + $0x38] sm:$0xf] %vm11716_vm3, %v17629_v54  ;;  %11737 = vst.msk [vmem:[#allocation6 + $0x8] sm:$0xf] %vm11716_vm3, %v11735_v51  ;;  %v11745_v56 = vadd.f32 %v11741_v7, %v22357_v42 }
 0x964   : > { %v11771_v30 = vadd.f32 %v11767_v36, %v22357_v42  ;;  %v11755_v33 = vrot.slane %v11746_v50, 3  ;;  %v11748_v61 = vmax.f32 %v11744_v58, 0.0  ;;  %v11758_v62 = vrot.slane %v11747_v57, 3  ;;  %v11967_v25 = vld [vmem:[%s22533_s13 + $0x20] sm:$0xff]  ;;  %v11969_v50 = vld [vmem:[%s22533_s13 + $0x30] sm:$0xff]  ;;  %v11972_v53 = vld [vmem:[%s22533_s13 + $0x48] sm:$0xff] }
 0x965   : > { %v11793_v2 = vld [vmem:[#allocation9 + $0x20] sm:$0xe0]  ;;  %v11768_v6 = vld [vmem:[#allocation9 + $0x20] sm:$0x3]  ;;  %v11749_v23 = vmax.f32 %v11745_v56, 0.0  ;;  %v11774_v12 = vmax.f32 %v11770_v63, 0.0  ;;  %v17588_v54 = vpack.c.bf16 %v11969_v50, %v11967_v25 }
 0x966   : > { %v11756_v9 = vrot.slane %v11748_v61, 3  ;;  %v11797_v11 = vadd.f32 %v11793_v2, %v22353_v37  ;;  %v11794_v8 = vld [vmem:[#allocation9 + $0x28] sm:$0xe0]  ;;  %v11769_v35 = vld [vmem:[#allocation9 + $0x28] sm:$0x3]  ;;  %v11772_v40 = vadd.f32 %v11768_v6, %v22353_v37  ;;  %v11775_v48 = vmax.f32 %v11771_v30, 0.0 }
 0x967   : > { %v11773_v13 = vadd.f32 %v11769_v35, %v22357_v42  ;;  %v11759_v5 = vrot.slane %v11749_v23, 3  ;;  %v11798_v46 = vadd.f32 %v11794_v8, %v22357_v42  ;;  %v11783_v32 = vrot.slane %v11774_v12, 6  ;;  %v11974_v26 = vld [vmem:[%s22533_s13 + $0x58] sm:$0xff]  ;;  %v11971_v4 = vld [vmem:[%s22533_s13 + $0x40] sm:$0xff]  ;;  %v11973_v57 = vld [vmem:[%s22533_s13 + $0x50] sm:$0xff] }
 0x968   : > { %v11776_v15 = vmax.f32 %v11772_v40, 0.0  ;;  %v11757_v59 = vsel %vm11754_vm4, %v11755_v33, %v11756_v9  ;;  %v11801_v24 = vmax.f32 %v11797_v11, 0.0  ;;  %v11786_v27 = vrot.slane %v11775_v48, 6  ;;  %v11976_v58 = vld [vmem:[%s22533_s13 + $0x68] sm:$0xff]  ;;  %v11978_v7 = vld [vmem:[%s22533_s13 + $0x78] sm:$0xff]  ;;  %v11975_v56 = vld [vmem:[%s22533_s13 + $0x60] sm:$0xff] }
 0x969   : > { %v11795_v19 = vld [vmem:[#allocation9 + $0x30] sm:$0x1]  ;;  %v11777_v20 = vmax.f32 %v11773_v13, 0.0  ;;  %v11760_v31 = vsel %vm11754_vm4, %v11758_v62, %v11759_v5  ;;  %11763 = vst [vmem:[#allocation6] sm:$0xf0] %v11757_v59  ;;  %v11802_v1 = vmax.f32 %v11798_v46, 0.0  ;;  %v17590_v51 = vpack.c.bf16 %v11974_v26, %v11972_v53 }
 0x96a   : > { %v11799_v28 = vadd.f32 %v11795_v19, %v22353_v37  ;;  %v11784_v22 = vrot.slane %v11776_v15, 6  ;;  %v11796_v0 = vld [vmem:[#allocation9 + $0x38] sm:$0x1]  ;;  %11765 = vst.msk [vmem:[#allocation6 + $0x8] sm:$0xf0] %vm11764_vm5, %v11760_v31  ;;  %v11963_v37 = vld [vmem:[%s22533_s13] sm:$0xff]  ;;  %v17592_v36 = vpack.c.bf16 %v11973_v57, %v11971_v4  ;;  %v17594_v30 = vpack.c.bf16 %v11978_v7, %v11976_v58 }
 0x96b   : > { %v11787_v16 = vrot.slane %v11777_v20, 6  ;;  %v11800_v55 = vadd.f32 %v11796_v0, %v22357_v42  ;;  %v11810_v17 = vrot.slane %v11801_v24, 1  ;;  %v11968_v42 = vld [vmem:[%s22533_s13 + $0x28] sm:$0xff]  ;;  %v11813_v18 = vrot.slane %v11802_v1, 1  ;;  %v11977_v33 = vld [vmem:[%s22533_s13 + $0x70] sm:$0xff]  ;;  %v11982_v6 = vld [vmem:[%s22533_s13 + $0x98] sm:$0xff] }
 0x96c   : > { %v11803_v34 = vmax.f32 %v11799_v28, 0.0  ;;  %v11785_v10 = vsel %vm11782_vm6, %v11783_v32, %v11784_v22  ;;  %v17584_v43 = vpack.c.bf16 %v11965_v39, %v11963_v37  ;;  %v17586_v14 = vpack.c.bf16 %v11970_v3, %v11968_v42  ;;  %v11980_v2 = vld [vmem:[%s22533_s13 + $0x88] sm:$0xff]  ;;  %v11979_v9 = vld [vmem:[%s22533_s13 + $0x80] sm:$0xff]  ;;  %v11981_v11 = vld [vmem:[%s22533_s13 + $0x90] sm:$0xff] }
 0x96d   : > { %v11788_v44 = vsel %vm11782_vm6, %v11786_v27, %v11787_v16  ;;  %11791 = vst [vmem:[#allocation6 + $0x10] sm:$0xf] %v11785_v10  ;;  %v11804_v38 = vmax.f32 %v11800_v55, 0.0  ;;  %v17596_v23 = vpack.c.bf16 %v11977_v33, %v11975_v56  ;;  %v17598_v62 = vpack.c.bf16 %v11982_v6, %v11980_v2  ;;  %v11984_v8 = vld [vmem:[%s22533_s13 + $0xa8] sm:$0xff]  ;;  %v11986_v35 = vld [vmem:[%s22533_s13 + $0xb8] sm:$0xff]  ;;  %v11983_v13 = vld [vmem:[%s22533_s13 + $0xa0] sm:$0xff] }
 0x96e   : > { %v11811_v45 = vrot.slane %v11803_v34, 1  ;;  %11792 = vst.msk [vmem:[#allocation6 + $0x18] sm:$0xf] %vm11716_vm3, %v11788_v44  ;;  %v17600_v40 = vpack.c.bf16 %v11981_v11, %v11979_v9  ;;  %v17602_v12 = vpack.c.bf16 %v11986_v35, %v11984_v8  ;;  %v11985_v48 = vld [vmem:[%s22533_s13 + $0xb0] sm:$0xff]  ;;  %v11988_v5 = vld [vmem:[%s22533_s13 + $0xc8] sm:$0xff]  ;;  %v11990_v46 = vld [vmem:[%s22533_s13 + $0xd8] sm:$0xff] }
 0x96f   : > { %v11814_v41 = vrot.slane %v11804_v38, 1  ;;  %v17604_v15 = vpack.c.bf16 %v11985_v48, %v11983_v13  ;;  %v17606_v59 = vpack.c.bf16 %v11990_v46, %v11988_v5  ;;  %v11987_v19 = vld [vmem:[%s22533_s13 + $0xc0] sm:$0xff]  ;;  %v11989_v20 = vld [vmem:[%s22533_s13 + $0xd0] sm:$0xff]  ;;  %v11992_v31 = vld [vmem:[%s22533_s13 + $0xe8] sm:$0xff] }
 0x970   : > { %v11812_v49 = vsel %vm11809_vm7, %v11810_v17, %v11811_v45  ;;  %v11820_v52 = vld [vmem:[#allocation6] sm:$0xff]  ;;  %v11994_v24 = vld [vmem:[%s22533_s13 + $0xf8] sm:$0xff]  ;;  %v17608_v28 = vpack.c.bf16 %v11989_v20, %v11987_v19  ;;  %v11991_v22 = vld [vmem:[%s22533_s13 + $0xe0] sm:$0xff] }
 0x971   : > { %v11821_v21 = vld [vmem:[#allocation6 + $0x8] sm:$0xff]  ;;  %v11815_v47 = vsel %vm11809_vm7, %v11813_v18, %v11814_v41  ;;  %11818 = vst [vmem:[#allocation6 + $0x10] sm:$0xf0] %v11812_v49  ;;  %v17610_v32 = vpack.c.bf16 %v11994_v24, %v11992_v31  ;;  %v11993_v0 = vld [vmem:[%s22533_s13 + $0xf0] sm:$0xff]  ;;  %v11996_v27 = vld [vmem:[%s22533_s13 + $0x108] sm:$0xff] }
 0x972   : > { %13483 = vmatprep.mubr.msk.f32.mxu0 %vm11709_vm2, %v11821_v21  ;;  %11819 = vst.msk [vmem:[#allocation6 + $0x18] sm:$0xf0] %vm11764_vm5, %v11815_v47  ;;  %v11998_v16 = vld [vmem:[%s22533_s13 + $0x118] sm:$0xff]  ;;  %v17612_v55 = vpack.c.bf16 %v11993_v0, %v11991_v22  ;;  %v11995_v34 = vld [vmem:[%s22533_s13 + $0x100] sm:$0xff]  ;;  %v11997_v10 = vld [vmem:[%s22533_s13 + $0x110] sm:$0xff] }
 0x973   : > { %11947 = vmatmul.mubr.f32.vlgmr.msra.gmra.mrb[76].mxu0 %v11820_v52  ;;  %v17614_v1 = vpack.c.bf16 %v11998_v16, %v11996_v27  ;;  %v17616_v44 = vpack.c.bf16 %v11997_v10, %v11995_v34  ;;  %v12000_v38 = vld [vmem:[%s22533_s13 + $0x128] sm:$0xff]  ;;  %v12002_v37 = vld [vmem:[%s22533_s13 + $0x138] sm:$0xff]  ;;  %v11999_v39 = vld [vmem:[%s22533_s13 + $0x120] sm:$0xff] }
 0x974   : > { %17585 = vmatpush1.bf16.msra.mxu0 %v17584_v43  ;;  %v17618_v17 = vpack.c.bf16 %v12002_v37, %v12000_v38  ;;  %v12001_v45 = vld [vmem:[%s22533_s13 + $0x130] sm:$0xff]  ;;  %v11864_v3 = vld [vmem:[%s22532_s12] sm:$0x3] }
 0x975   : > { %17587 = vmatprep.subr.bf16.mxu0 %v17586_v14  ;;  %v17620_v42 = vpack.c.bf16 %v12001_v45, %v11999_v39  ;;  %v11869_v41 = vrot.slane %v11864_v3, %v22342_v29  ;;  %v11873_v18 = vrot.slane %v11864_v3, %v22348_v60  ;;  %v12003_v4 = vld [vmem:[%s22534_s14] sm:$0x3] }
 0x976   : > { %v12008_v57 = vrot.slane %v12003_v4, %v22342_v29  ;;  %v12012_v58 = vrot.slane %v12003_v4, %v22348_v60 }
 0x978   : > { %17589 = vmatpush1.bf16.msra.mxu0 %v17588_v54  ;;  %v11822_v61 = vld [vmem:[#allocation6 + $0x10] sm:$0xff] }
 0x979   : > { %v11823_v63 = vld [vmem:[#allocation6 + $0x18] sm:$0xff]  ;;  %17591 = vmatprep.subr.bf16.mxu0 %v17590_v51 }
 0x97a   : > { %13484 = vmatprep.mubr.msk.f32.mxu0 %vm11709_vm2, %v11823_v63 }
 0x97b   : > { %11953 = vmatmul.mubr.f32.gmra.mrb[78].mxu0 %v11822_v61 }
 0x97c   : > { %17593 = vmatpush1.bf16.msra.mxu0 %v17592_v36 }
 0x97d   : > { %17595 = vmatprep.subr.bf16.mxu0 %v17594_v30 }
 0x980   : > { %17597 = vmatpush1.bf16.msra.mxu0 %v17596_v23 }
 0x981   : > { %17599 = vmatprep.subr.bf16.mxu0 %v17598_v62 }
 0x984   : > { %17601 = vmatpush1.bf16.msra.mxu0 %v17600_v40 }
 0x985   : > { %17603 = vmatprep.subr.bf16.mxu0 %v17602_v12 }
 0x988   : > { %17605 = vmatpush1.bf16.msra.mxu0 %v17604_v15 }
 0x989   : > { %17607 = vmatprep.subr.bf16.mxu0 %v17606_v59 }
 0x98c   : > { %17609 = vmatpush1.bf16.msra.mxu0 %v17608_v28 }
 0x98d   : > { %17611 = vmatprep.subr.bf16.mxu0 %v17610_v32 }
 0x990   : > { %17613 = vmatpush1.bf16.msra.mxu0 %v17612_v55 }
 0x991   : > { %17615 = vmatprep.subr.bf16.mxu0 %v17614_v1 }
 0x994   : > { %17617 = vmatpush1.bf16.msra.mxu0 %v17616_v44 }
 0x995   : > { %17619 = vmatprep.subr.bf16.mxu0 %v17618_v17 }
 0x998   : > { %17621 = vmatpush1.bf16.msra.mxu0 %v17620_v42 }
 0xa46   : > { %v11948_v49 = vpop.f32.mrb[76].mxu0 }
 0xa47   : > { %v11949_v43 = vadd.f32 %v11948_v49, %v11869_v41  ;;  %v11950_v21 = vpop.f32.mrb[77].mxu0 }
 0xa48   : > { %v11951_v47 = vadd.f32 %v11950_v21, %v11873_v18 }
 0xa49   : > { %v11959_v25 = vmax.f32 %v11949_v43, 0.0 }
 0xa4a   : > { %v11960_v14 = vmax.f32 %v11951_v47, 0.0 }
 0xa4c   : > { %13485 = vmatprep.mubr.msk.f32.mxu0 %vm11709_vm2, %v11960_v14 }
 0xa4d   : > { %12086 = vmatmul.mubr.f32.vlgmr.msra.gmra.mrb[80].mxu0 %v11959_v25 }
 0xa4e   : > { %v11954_v50 = vpop.f32.mrb[78].mxu0 }
 0xa4f   : > { %v11955_v52 = vadd.f32 %v11954_v50, %v11869_v41  ;;  %v11956_v53 = vpop.f32.mrb[79].mxu0 }
 0xa50   : > { %v11957_v26 = vadd.f32 %v11956_v53, %v11873_v18 }
 0xa51   : > { %v11961_v51 = vmax.f32 %v11955_v52, 0.0 }
 0xa52   : > { %v11962_v54 = vmax.f32 %v11957_v26, 0.0 }
 0xa54   : > { %13486 = vmatprep.mubr.msk.f32.mxu0 %vm11709_vm2, %v11962_v54 }
 0xa55   : > { %12092 = vmatmul.mubr.f32.gmra.mrb[82].mxu0 %v11961_v51 }
 0xb20   : > { %v12087_v7 = vpop.f32.mrb[80].mxu0 }
 0xb21   : > { %v12088_v36 = vadd.f32 %v12087_v7, %v12008_v57  ;;  %v12089_v63 = vpop.f32.mrb[81].mxu0 }
 0xb22   : > { %v12090_v30 = vadd.f32 %v12089_v63, %v12012_v58 }
 0xb23   : > { %12098 = vst [vmem:[%s494_s25] sm:$0xff] %v12088_v36 }
 0xb24   : > { %12099 = vst [vmem:[%s494_s25 + $0x8] sm:$0xff] %v12090_v30 }
 0xb28   : > { %v12093_v56 = vpop.f32.mrb[82].mxu0 }
 0xb29   : > { %v12094_v33 = vadd.f32 %v12093_v56, %v12008_v57  ;;  %v12095_v61 = vpop.f32.mrb[83].mxu0 }
 0xb2a   : > { %v12096_v2 = vadd.f32 %v12095_v61, %v12012_v58 }
 0xb2b   : > { %12100 = vst [vmem:[%s494_s25 + $0x10] sm:$0xff] %v12094_v33 }
 0xb2c   : > { %12101 = vst [vmem:[%s494_s25 + $0x18] sm:$0xff] %v12096_v2 }
 0xb2d PF: > { %s25_s18 = sadd.s32 1, %s18211_s18  }
 0xb2e   : > { %p22_p4 = scmp.ge.s32.totalorder %s25_s18, 4  }
 0xb30   :  { %24 = sbr.rel (!%p22_p4) target bundleno = 1 (0x1), region = 195 }

</bundles_post_ra>
